<compile_context>
chip_gen: v7x
topology: tpu7x:2x2x1
jax: 0.10.0
libtpu: 0.0.40
codegen_flags: <defaults>
</compile_context>

<pallas_src>
import math

import jax
import jax.numpy as jnp
from jax.experimental import pallas as pl
from jax.experimental.pallas import tpu as pltpu

# Feed the heavy 64->512 conv to the MXU in bf16 (f32 accumulation): native on
# v6e/v7x MXU, numerics stay within ~1e-3 of the f32 module.  Set False for
# bit-faithful f32 everywhere.
USE_BF16_MXU = True

COUT_TILE = 128               # Cout tile width for the 64->512 conv: keeps the
                              # accumulator at (H*W, 128) instead of (H*W, 512)

FEATURE_DEFS = [(3, 32), (32, 64), (64, 512)]    # (Cin, Cout) of the 3x3 convs


# ---------------------------------------------------------------------------
# In-kernel helpers
# ---------------------------------------------------------------------------
def _fill_im2col(x_ref, xpad_scr, im2col_scr):
    """Zero-pad the (H, W, Cin) tile in VMEM and build the (H*W, 9*Cin) im2col
    patch matrix so the 3x3 conv becomes a single matmul with K = 9*Cin."""
    _, H, W, Cin = x_ref.shape
    xpad_scr[...] = jnp.zeros_like(xpad_scr)              # halo = zero padding
    xpad_scr[1:H + 1, 1:W + 1, :] = x_ref[0]
    for dy in range(3):
        for dx in range(3):
            t = dy * 3 + dx
            tap = xpad_scr[dy:dy + H, dx:dx + W, :]        # (H, W, Cin)
            im2col_scr[:, t * Cin:(t + 1) * Cin] = (
                tap.reshape(H * W, Cin).astype(im2col_scr.dtype))


# ---------------------------------------------------------------------------
# Pallas kernels
# ---------------------------------------------------------------------------
def _conv3x3_relu_kernel(x_ref, w_ref, b_ref, conv_ref, relu_ref,
                         xpad_scr, im2col_scr):
    """3x3 conv (stride 1, pad 1) + bias, fused ReLU.
    Emits both the pre-ReLU (feat[2i]) and post-ReLU (feat[2i+1]) tensors."""
    _, H, W, _ = x_ref.shape
    Cout = conv_ref.shape[-1]
    _fill_im2col(x_ref, xpad_scr, im2col_scr)
    acc = jnp.dot(im2col_scr[...], w_ref[...],
                  preferred_element_type=jnp.float32) + b_ref[...]
    conv = acc.reshape(1, H, W, Cout)
    conv_ref[...] = conv.astype(conv_ref.dtype)
    relu_ref[...] = jnp.maximum(conv, 0.0).astype(relu_ref.dtype)


def _conv3x3_relu_classifier_kernel(x_ref, w2_ref, b2_ref, wc_ref, bc_ref,
                                    feat_ref, sal_ref,
                                    xpad_scr, im2col_scr, sal_acc):
    """Fused tail: conv3x3(64->512) with Cout tiled over grid axis 1, ReLU ("5"),
    1x1 classifier (512->1) and sigmoid.  The 512-channel activation stays in
    VMEM; the saliency partials accumulate lane-dense in a (1, H*W) scratch."""
    _, H, W, _ = x_ref.shape
    ct = feat_ref.shape[-1]                                # Cout tile (128)
    c = pl.program_id(1)

    @pl.when(c == 0)                                       # once per image
    def _():
        _fill_im2col(x_ref, xpad_scr, im2col_scr)
        sal_acc[...] = jnp.zeros_like(sal_acc)

    acc = jnp.dot(im2col_scr[...], w2_ref[...],
                  preferred_element_type=jnp.float32) + b2_ref[...]
    feat_ref[...] = acc.reshape(1, H, W, ct).astype(feat_ref.dtype)

    r = jnp.maximum(acc, 0.0)                              # ReLU "5", VMEM only
    # partial 1x1 classifier: (1, ct) x (H*W, ct)^T -> (1, H*W), lane-dense
    sal_acc[...] += jax.lax.dot_general(
        wc_ref[...], r, (((1,), (1,)), ((), ())),
        preferred_element_type=jnp.float32)

    @pl.when(c == pl.num_programs(1) - 1)
    def _():
        s = sal_acc[...] + bc_ref[...]
        sal_ref[...] = jax.nn.sigmoid(s).reshape(1, 1, H * W).astype(sal_ref.dtype)


# ---------------------------------------------------------------------------
# Wrappers (pallas_call plumbing)
# ---------------------------------------------------------------------------
def conv3x3_relu(x_nhwc, w, b):
    """x: (N,H,W,Cin), w: (9*Cin,Cout), b: (1,Cout) -> (conv, relu)."""
    N, H, W, Cin = x_nhwc.shape
    Cout = w.shape[-1]
    return pl.pallas_call(
        _conv3x3_relu_kernel,
        out_shape=(jax.ShapeDtypeStruct((N, H, W, Cout), jnp.float32),
                   jax.ShapeDtypeStruct((N, H, W, Cout), jnp.float32)),
        grid=(N,),
        in_specs=[
            pl.BlockSpec((1, H, W, Cin), lambda n: (n, 0, 0, 0)),
            pl.BlockSpec((9 * Cin, Cout), lambda n: (0, 0)),
            pl.BlockSpec((1, Cout), lambda n: (0, 0)),
        ],
        out_specs=(
            pl.BlockSpec((1, H, W, Cout), lambda n: (n, 0, 0, 0)),
            pl.BlockSpec((1, H, W, Cout), lambda n: (n, 0, 0, 0)),
        ),
        scratch_shapes=[
            pltpu.VMEM((H + 2, W + 2, Cin), jnp.float32),
            pltpu.VMEM((H * W, 9 * Cin), jnp.float32),
        ],
        compiler_params=pltpu.CompilerParams(dimension_semantics=("parallel",)),
    )(x_nhwc, w, b)


# TODO(synk): for large H,W (e.g. 224x224) add an H-row grid axis with a 1-row
# halo (manual DMA / Element-indexed blocks) so blocks fit v7x's 64 MiB VMEM
# and both v7x TensorCores stay busy when N == 1.
def conv3x3_relu_classifier(x_nhwc, w2, b2, wc, bc):
    """Fused conv3x3(Cin->512)+ReLU+1x1(512->1)+sigmoid.
    Returns (feat4 (N,H,W,512) pre-ReLU, sal (N,1,H*W))."""
    N, H, W, Cin = x_nhwc.shape
    Cout = w2.shape[-1]
    n_ct = Cout // COUT_TILE
    return pl.pallas_call(
        _conv3x3_relu_classifier_kernel,
        out_shape=(jax.ShapeDtypeStruct((N, H, W, Cout), jnp.float32),
                   jax.ShapeDtypeStruct((N, 1, H * W), jnp.float32)),
        grid=(N, n_ct),
        in_specs=[
            pl.BlockSpec((1, H, W, Cin), lambda n, c: (n, 0, 0, 0)),
            pl.BlockSpec((9 * Cin, COUT_TILE), lambda n, c: (0, c)),
            pl.BlockSpec((1, COUT_TILE), lambda n, c: (0, c)),
            pl.BlockSpec((1, COUT_TILE), lambda n, c: (0, c)),
            pl.BlockSpec((1, 1), lambda n, c: (0, 0)),
        ],
        out_specs=(
            pl.BlockSpec((1, H, W, COUT_TILE), lambda n, c: (n, 0, 0, c)),
            pl.BlockSpec((1, 1, H * W), lambda n, c: (n, 0, 0)),
        ),
        scratch_shapes=[
            pltpu.VMEM((H + 2, W + 2, Cin), jnp.float32),
            pltpu.VMEM((H * W, 9 * Cin), w2.dtype),
            pltpu.VMEM((1, H * W), jnp.float32),
        ],
        compiler_params=pltpu.CompilerParams(
            dimension_semantics=("parallel", "arbitrary")),
    )(x_nhwc, w2, b2, wc, bc)


# ---------------------------------------------------------------------------
# Parameter init (mirrors Encoder._initialize_weights)
# ---------------------------------------------------------------------------
def init_params(key):
    """Conv weight ~ N(0, sqrt(2/(kH*kW*Cout))), biases zero.
    3x3 weights are stored im2col-packed as (9*Cin, Cout), (ky,kx,ci) in K."""
    params = {}
    keys = jax.random.split(key, len(FEATURE_DEFS) + 1)
    for i, (cin, cout) in enumerate(FEATURE_DEFS):
        std = math.sqrt(2.0 / (3 * 3 * cout))
        w_pt = jax.random.normal(keys[i], (cout, cin, 3, 3), jnp.float32) * std
        w = jnp.transpose(w_pt, (2, 3, 1, 0)).reshape(9 * cin, cout)
        if i == len(FEATURE_DEFS) - 1 and USE_BF16_MXU:
            w = w.astype(jnp.bfloat16)
        params[f"w{i}"] = w
        params[f"b{i}"] = jnp.zeros((1, cout), jnp.float32)
    # classifier Conv2d(512, 1, kernel_size=1): n = 1*1*1 -> std = sqrt(2)
    std = math.sqrt(2.0 / (1 * 1 * 1))
    wc_pt = jax.random.normal(keys[-1], (1, 512, 1, 1), jnp.float32) * std
    params["wc"] = wc_pt.reshape(1, 512)
    params["bc"] = jnp.zeros((1, 1), jnp.float32)
    return params


# ---------------------------------------------------------------------------
# Encoder.forward
# ---------------------------------------------------------------------------
@jax.jit
def encoder_forward(x_nchw, params):
    """Encoder.forward(x, layers=range(5)) -> [feat (5 NCHW tensors), sigmoid(sal)]."""
    N, _, H, W = x_nchw.shape
    x = jnp.transpose(x_nchw, (0, 2, 3, 1))                        # NCHW -> NHWC
    c0, r0 = conv3x3_relu(x, params["w0"], params["b0"])           # "0", "1"
    c1, r1 = conv3x3_relu(r0, params["w1"], params["b1"])          # "2", "3"
    c2, sal = conv3x3_relu_classifier(r1, params["w2"], params["b2"],
                                      params["wc"], params["bc"])  # "4","5",cls
    feat = [jnp.transpose(f, (0, 3, 1, 2)) for f in (c0, r0, c1, r1, c2)]
    return feat, sal.reshape(N, 1, H, W)


# ---------------------------------------------------------------------------
# Pure-JAX reference (XLA convs) for numerical validation
# ---------------------------------------------------------------------------
def _ref_forward(x_nchw, params):
    x = jnp.transpose(x_nchw, (0, 2, 3, 1)).astype(jnp.float32)

    def conv3(h, w_flat, b, cin, cout):
        w = w_flat.astype(jnp.float32).reshape(3, 3, cin, cout)
        y = jax.lax.conv_general_dilated(
            h, w, window_strides=(1, 1), padding="SAME",
            dimension_numbers=("NHWC", "HWIO", "NHWC"))
        return y + b.reshape(1, 1, 1, cout)

    c0 = conv3(x, params["w0"], params["b0"], 3, 32);    r0 = jnp.maximum(c0, 0.0)
    c1 = conv3(r0, params["w1"], params["b1"], 32, 64);  r1 = jnp.maximum(c1, 0.0)
    c2 = conv3(r1, params["w2"], params["b2"], 64, 512); r2 = jnp.maximum(c2, 0.0)
    logit = jnp.einsum("nhwc,c->nhw", r2, params["wc"][0].astype(jnp.float32))
    sal = jax.nn.sigmoid(logit + params["bc"][0, 0])[:, None]
    feat = [jnp.transpose(f, (0, 3, 1, 2)) for f in (c0, r0, c1, r1, c2)]
    return feat, sal


def _close(a, b, atol, rtol):
    return bool(jnp.all(jnp.abs(a - b) <= atol + rtol * jnp.abs(b)))


if __name__ == "__main__":
    key = jax.random.PRNGKey(0)
    pkey, xkey = jax.random.split(key)
    params = init_params(pkey)
    x = jax.random.normal(xkey, (2, 3, 16, 16), jnp.float32)       # NCHW input

    feat, sal = encoder_forward(x, params)
    for f in feat:
        jax.block_until_ready(f)
    jax.block_until_ready(sal)

    # shape / range checks
    assert len(feat) == 5
    assert feat[0].shape == (2, 32, 16, 16) and feat[1].shape == (2, 32, 16, 16)
    assert feat[2].shape == (2, 64, 16, 16) and feat[3].shape == (2, 64, 16, 16)
    assert feat[4].shape == (2, 512, 16, 16)
    assert sal.shape == (2, 1, 16, 16)
    assert bool(jnp.all((sal >= 0.0) & (sal <= 1.0)))

    # numerical check against the pure-JAX reference
    feat_xla, sal_xla = _ref_forward(x, params)
    for i in range(4):                                            # f32 path
        assert _close(feat[i], feat_xla[i], 1e-3, 1e-3), f"feat[{i}] mismatch"
    assert _close(feat[4], feat_xla[4], 2e-2, 2e-2), "feat[4] mismatch"   # bf16 MXU
    assert _close(sal, sal_xla, 5e-2, 5e-2), "sal mismatch"
    print("KERNEL_OK")
</pallas_src>

<mosaic_0001>
module attributes {stable_mosaic.version = 11 : i64} {
  func.func @_conv3x3_relu_kernel(%arg0: i32, %arg1: memref<1x16x16x3xf32, #tpu.memory_space<vmem>>, %arg2: memref<27x32xf32, #tpu.memory_space<vmem>>, %arg3: memref<1x32xf32, #tpu.memory_space<vmem>>, %arg4: memref<1x16x16x32xf32, #tpu.memory_space<vmem>>, %arg5: memref<1x16x16x32xf32, #tpu.memory_space<vmem>>, %arg6: memref<18x18x3xf32, #tpu.memory_space<vmem>>, %arg7: memref<256x27xf32, #tpu.memory_space<vmem>>) attributes {dimension_semantics = [#tpu.dimension_semantics<parallel>], iteration_bounds = array<i64: 2>, scalar_prefetch = 0 : i64, scratch_operands = 2 : i64, tpu.core_type = #tpu.core_type<tc>, window_params = [{transform_indices = @transform_0, window_bounds = array<i64: 1, 16, 16, 3>}, {pipeline_mode = #tpu.pipeline_mode<synchronous>, transform_indices = @transform_1, window_bounds = array<i64: 27, 32>}, {pipeline_mode = #tpu.pipeline_mode<synchronous>, transform_indices = @transform_2, window_bounds = array<i64: 1, 32>}, {transform_indices = @transform_3, window_bounds = array<i64: 1, 16, 16, 32>}, {transform_indices = @transform_4, window_bounds = array<i64: 1, 16, 16, 32>}]} {
    %cst = arith.constant 0.000000e+00 : f32
    %0 = vector.broadcast %cst : f32 to vector<18x18x3xf32>
    %c0 = arith.constant 0 : index
    %c0_0 = arith.constant 0 : index
    %c0_1 = arith.constant 0 : index
    %1 = vector.load %arg6[%c0, %c0_0, %c0_1] : memref<18x18x3xf32, #tpu.memory_space<vmem>>, vector<18x18x3xf32>
    tpu.vector_store %arg6[%c0, %c0_0, %c0_1], %0 {strides = array<i32>} : memref<18x18x3xf32, #tpu.memory_space<vmem>>, vector<18x18x3xf32>,
    %c0_2 = arith.constant 0 : index
    %c0_3 = arith.constant 0 : index
    %c0_4 = arith.constant 0 : index
    %c0_5 = arith.constant 0 : index
    %2 = vector.load %arg1[%c0_2, %c0_3, %c0_4, %c0_5] : memref<1x16x16x3xf32, #tpu.memory_space<vmem>>, vector<1x16x16x3xf32>
    %3 = vector.shape_cast %2 : vector<1x16x16x3xf32> to vector<16x16x3xf32>
    %c1 = arith.constant 1 : index
    %c1_6 = arith.constant 1 : index
    %c0_7 = arith.constant 0 : index
    %4 = vector.load %arg6[%c1, %c1_6, %c0_7] : memref<18x18x3xf32, #tpu.memory_space<vmem>>, vector<16x16x3xf32>
    tpu.vector_store %arg6[%c1, %c1_6, %c0_7], %3 {strides = array<i32>} : memref<18x18x3xf32, #tpu.memory_space<vmem>>, vector<16x16x3xf32>,
    %c0_8 = arith.constant 0 : index
    %c0_9 = arith.constant 0 : index
    %c0_10 = arith.constant 0 : index
    %5 = vector.load %arg6[%c0_8, %c0_9, %c0_10] : memref<18x18x3xf32, #tpu.memory_space<vmem>>, vector<16x16x3xf32>
    %6 = vector.shape_cast %5 : vector<16x16x3xf32> to vector<256x3xf32>
    %c0_11 = arith.constant 0 : index
    %c0_12 = arith.constant 0 : index
    %7 = vector.load %arg7[%c0_11, %c0_12] : memref<256x27xf32, #tpu.memory_space<vmem>>, vector<256x3xf32>
    tpu.vector_store %arg7[%c0_11, %c0_12], %6 {strides = array<i32>} : memref<256x27xf32, #tpu.memory_space<vmem>>, vector<256x3xf32>,
    %c0_13 = arith.constant 0 : index
    %c1_14 = arith.constant 1 : index
    %c0_15 = arith.constant 0 : index
    %8 = vector.load %arg6[%c0_13, %c1_14, %c0_15] : memref<18x18x3xf32, #tpu.memory_space<vmem>>, vector<16x16x3xf32>
    %9 = vector.shape_cast %8 : vector<16x16x3xf32> to vector<256x3xf32>
    %c0_16 = arith.constant 0 : index
    %c3 = arith.constant 3 : index
    %10 = vector.load %arg7[%c0_16, %c3] : memref<256x27xf32, #tpu.memory_space<vmem>>, vector<256x3xf32>
    tpu.vector_store %arg7[%c0_16, %c3], %9 {strides = array<i32>} : memref<256x27xf32, #tpu.memory_space<vmem>>, vector<256x3xf32>,
    %c0_17 = arith.constant 0 : index
    %c2 = arith.constant 2 : index
    %c0_18 = arith.constant 0 : index
    %11 = vector.load %arg6[%c0_17, %c2, %c0_18] : memref<18x18x3xf32, #tpu.memory_space<vmem>>, vector<16x16x3xf32>
    %12 = vector.shape_cast %11 : vector<16x16x3xf32> to vector<256x3xf32>
    %c0_19 = arith.constant 0 : index
    %c6 = arith.constant 6 : index
    %13 = vector.load %arg7[%c0_19, %c6] : memref<256x27xf32, #tpu.memory_space<vmem>>, vector<256x3xf32>
    tpu.vector_store %arg7[%c0_19, %c6], %12 {strides = array<i32>} : memref<256x27xf32, #tpu.memory_space<vmem>>, vector<256x3xf32>,
    %c1_20 = arith.constant 1 : index
    %c0_21 = arith.constant 0 : index
    %c0_22 = arith.constant 0 : index
    %14 = vector.load %arg6[%c1_20, %c0_21, %c0_22] : memref<18x18x3xf32, #tpu.memory_space<vmem>>, vector<16x16x3xf32>
    %15 = vector.shape_cast %14 : vector<16x16x3xf32> to vector<256x3xf32>
    %c0_23 = arith.constant 0 : index
    %c9 = arith.constant 9 : index
    %16 = vector.load %arg7[%c0_23, %c9] : memref<256x27xf32, #tpu.memory_space<vmem>>, vector<256x3xf32>
    tpu.vector_store %arg7[%c0_23, %c9], %15 {strides = array<i32>} : memref<256x27xf32, #tpu.memory_space<vmem>>, vector<256x3xf32>,
    %c1_24 = arith.constant 1 : index
    %c1_25 = arith.constant 1 : index
    %c0_26 = arith.constant 0 : index
    %17 = vector.load %arg6[%c1_24, %c1_25, %c0_26] : memref<18x18x3xf32, #tpu.memory_space<vmem>>, vector<16x16x3xf32>
    %18 = vector.shape_cast %17 : vector<16x16x3xf32> to vector<256x3xf32>
    %c0_27 = arith.constant 0 : index
    %c12 = arith.constant 12 : index
    %19 = vector.load %arg7[%c0_27, %c12] : memref<256x27xf32, #tpu.memory_space<vmem>>, vector<256x3xf32>
    tpu.vector_store %arg7[%c0_27, %c12], %18 {strides = array<i32>} : memref<256x27xf32, #tpu.memory_space<vmem>>, vector<256x3xf32>,
    %c1_28 = arith.constant 1 : index
    %c2_29 = arith.constant 2 : index
    %c0_30 = arith.constant 0 : index
    %20 = vector.load %arg6[%c1_28, %c2_29, %c0_30] : memref<18x18x3xf32, #tpu.memory_space<vmem>>, vector<16x16x3xf32>
    %21 = vector.shape_cast %20 : vector<16x16x3xf32> to vector<256x3xf32>
    %c0_31 = arith.constant 0 : index
    %c15 = arith.constant 15 : index
    %22 = vector.load %arg7[%c0_31, %c15] : memref<256x27xf32, #tpu.memory_space<vmem>>, vector<256x3xf32>
    tpu.vector_store %arg7[%c0_31, %c15], %21 {strides = array<i32>} : memref<256x27xf32, #tpu.memory_space<vmem>>, vector<256x3xf32>,
    %c2_32 = arith.constant 2 : index
    %c0_33 = arith.constant 0 : index
    %c0_34 = arith.constant 0 : index
    %23 = vector.load %arg6[%c2_32, %c0_33, %c0_34] : memref<18x18x3xf32, #tpu.memory_space<vmem>>, vector<16x16x3xf32>
    %24 = vector.shape_cast %23 : vector<16x16x3xf32> to vector<256x3xf32>
    %c0_35 = arith.constant 0 : index
    %c18 = arith.constant 18 : index
    %25 = vector.load %arg7[%c0_35, %c18] : memref<256x27xf32, #tpu.memory_space<vmem>>, vector<256x3xf32>
    tpu.vector_store %arg7[%c0_35, %c18], %24 {strides = array<i32>} : memref<256x27xf32, #tpu.memory_space<vmem>>, vector<256x3xf32>,
    %c2_36 = arith.constant 2 : index
    %c1_37 = arith.constant 1 : index
    %c0_38 = arith.constant 0 : index
    %26 = vector.load %arg6[%c2_36, %c1_37, %c0_38] : memref<18x18x3xf32, #tpu.memory_space<vmem>>, vector<16x16x3xf32>
    %27 = vector.shape_cast %26 : vector<16x16x3xf32> to vector<256x3xf32>
    %c0_39 = arith.constant 0 : index
    %c21 = arith.constant 21 : index
    %28 = vector.load %arg7[%c0_39, %c21] : memref<256x27xf32, #tpu.memory_space<vmem>>, vector<256x3xf32>
    tpu.vector_store %arg7[%c0_39, %c21], %27 {strides = array<i32>} : memref<256x27xf32, #tpu.memory_space<vmem>>, vector<256x3xf32>,
    %c2_40 = arith.constant 2 : index
    %c2_41 = arith.constant 2 : index
    %c0_42 = arith.constant 0 : index
    %29 = vector.load %arg6[%c2_40, %c2_41, %c0_42] : memref<18x18x3xf32, #tpu.memory_space<vmem>>, vector<16x16x3xf32>
    %30 = vector.shape_cast %29 : vector<16x16x3xf32> to vector<256x3xf32>
    %c0_43 = arith.constant 0 : index
    %c24 = arith.constant 24 : index
    %31 = vector.load %arg7[%c0_43, %c24] : memref<256x27xf32, #tpu.memory_space<vmem>>, vector<256x3xf32>
    tpu.vector_store %arg7[%c0_43, %c24], %30 {strides = array<i32>} : memref<256x27xf32, #tpu.memory_space<vmem>>, vector<256x3xf32>,
    %c0_44 = arith.constant 0 : index
    %c0_45 = arith.constant 0 : index
    %32 = vector.load %arg7[%c0_44, %c0_45] : memref<256x27xf32, #tpu.memory_space<vmem>>, vector<256x27xf32>
    %c0_46 = arith.constant 0 : index
    %c0_47 = arith.constant 0 : index
    %33 = vector.load %arg2[%c0_46, %c0_47] : memref<27x32xf32, #tpu.memory_space<vmem>>, vector<27x32xf32>
    %cst_48 = arith.constant dense<0.000000e+00> : vector<256x32xf32>
    %34 = tpu.matmul %32, %33, %cst_48 {dimension_numbers = #tpu.dot_dimension_numbers<[1], [0], [0], [1], [0, 0, 1, 1], [], []>} : vector<256x27xf32>, vector<27x32xf32>, vector<256x32xf32> -> vector<256x32xf32>
    %c0_49 = arith.constant 0 : index
    %c0_50 = arith.constant 0 : index
    %35 = vector.load %arg3[%c0_49, %c0_50] : memref<1x32xf32, #tpu.memory_space<vmem>>, vector<1x32xf32>
    %36 = vector.broadcast %35 : vector<1x32xf32> to vector<256x32xf32>
    %37 = arith.addf %34, %36 : vector<256x32xf32>
    %38 = vector.shape_cast %37 : vector<256x32xf32> to vector<1x16x16x32xf32>
    %c0_51 = arith.constant 0 : index
    %c0_52 = arith.constant 0 : index
    %c0_53 = arith.constant 0 : index
    %c0_54 = arith.constant 0 : index
    %39 = vector.load %arg4[%c0_51, %c0_52, %c0_53, %c0_54] : memref<1x16x16x32xf32, #tpu.memory_space<vmem>>, vector<1x16x16x32xf32>
    tpu.vector_store %arg4[%c0_51, %c0_52, %c0_53, %c0_54], %38 {strides = array<i32>} : memref<1x16x16x32xf32, #tpu.memory_space<vmem>>, vector<1x16x16x32xf32>,
    %cst_55 = arith.constant 0.000000e+00 : f32
    %40 = vector.broadcast %cst_55 : f32 to vector<1x16x16x32xf32>
    %41 = arith.maximumf %38, %40 : vector<1x16x16x32xf32>
    %c0_56 = arith.constant 0 : index
    %c0_57 = arith.constant 0 : index
    %c0_58 = arith.constant 0 : index
    %c0_59 = arith.constant 0 : index
    %42 = vector.load %arg5[%c0_56, %c0_57, %c0_58, %c0_59] : memref<1x16x16x32xf32, #tpu.memory_space<vmem>>, vector<1x16x16x32xf32>
    tpu.vector_store %arg5[%c0_56, %c0_57, %c0_58, %c0_59], %41 {strides = array<i32>} : memref<1x16x16x32xf32, #tpu.memory_space<vmem>>, vector<1x16x16x32xf32>,
    return
  }
  func.func @transform_0(%arg0: i32) -> (i32, i32, i32, i32) {
    %c0_i32 = arith.constant 0 : i32
    %c0_i32_0 = arith.constant 0 : i32
    %c0_i32_1 = arith.constant 0 : i32
    %c0_i32_2 = arith.constant 0 : i32
    return %arg0, %c0_i32, %c0_i32_0, %c0_i32_1 : i32, i32, i32, i32
  }
  func.func @transform_1(%arg0: i32) -> (i32, i32) {
    %c0_i32 = arith.constant 0 : i32
    %c0_i32_0 = arith.constant 0 : i32
    %c0_i32_1 = arith.constant 0 : i32
    return %c0_i32, %c0_i32_0 : i32, i32
  }
  func.func @transform_2(%arg0: i32) -> (i32, i32) {
    %c0_i32 = arith.constant 0 : i32
    %c0_i32_0 = arith.constant 0 : i32
    %c0_i32_1 = arith.constant 0 : i32
    return %c0_i32, %c0_i32_0 : i32, i32
  }
  func.func @transform_3(%arg0: i32) -> (i32, i32, i32, i32) {
    %c0_i32 = arith.constant 0 : i32
    %c0_i32_0 = arith.constant 0 : i32
    %c0_i32_1 = arith.constant 0 : i32
    %c0_i32_2 = arith.constant 0 : i32
    return %arg0, %c0_i32, %c0_i32_0, %c0_i32_1 : i32, i32, i32, i32
  }
  func.func @transform_4(%arg0: i32) -> (i32, i32, i32, i32) {
    %c0_i32 = arith.constant 0 : i32
    %c0_i32_0 = arith.constant 0 : i32
    %c0_i32_1 = arith.constant 0 : i32
    %c0_i32_2 = arith.constant 0 : i32
    return %arg0, %c0_i32, %c0_i32_0, %c0_i32_1 : i32, i32, i32, i32
  }
}

module attributes {stable_mosaic.version = 11 : i64} {
  func.func @_conv3x3_relu_kernel(%arg0: i32, %arg1: memref<1x16x16x32xf32, #tpu.memory_space<vmem>>, %arg2: memref<288x64xf32, #tpu.memory_space<vmem>>, %arg3: memref<1x64xf32, #tpu.memory_space<vmem>>, %arg4: memref<1x16x16x64xf32, #tpu.memory_space<vmem>>, %arg5: memref<1x16x16x64xf32, #tpu.memory_space<vmem>>, %arg6: memref<18x18x32xf32, #tpu.memory_space<vmem>>, %arg7: memref<256x288xf32, #tpu.memory_space<vmem>>) attributes {dimension_semantics = [#tpu.dimension_semantics<parallel>], iteration_bounds = array<i64: 2>, scalar_prefetch = 0 : i64, scratch_operands = 2 : i64, tpu.core_type = #tpu.core_type<tc>, window_params = [{transform_indices = @transform_0, window_bounds = array<i64: 1, 16, 16, 32>}, {pipeline_mode = #tpu.pipeline_mode<synchronous>, transform_indices = @transform_1, window_bounds = array<i64: 288, 64>}, {pipeline_mode = #tpu.pipeline_mode<synchronous>, transform_indices = @transform_2, window_bounds = array<i64: 1, 64>}, {transform_indices = @transform_3, window_bounds = array<i64: 1, 16, 16, 64>}, {transform_indices = @transform_4, window_bounds = array<i64: 1, 16, 16, 64>}]} {
    %cst = arith.constant 0.000000e+00 : f32
    %0 = vector.broadcast %cst : f32 to vector<18x18x32xf32>
    %c0 = arith.constant 0 : index
    %c0_0 = arith.constant 0 : index
    %c0_1 = arith.constant 0 : index
    %1 = vector.load %arg6[%c0, %c0_0, %c0_1] : memref<18x18x32xf32, #tpu.memory_space<vmem>>, vector<18x18x32xf32>
    tpu.vector_store %arg6[%c0, %c0_0, %c0_1], %0 {strides = array<i32>} : memref<18x18x32xf32, #tpu.memory_space<vmem>>, vector<18x18x32xf32>,
    %c0_2 = arith.constant 0 : index
    %c0_3 = arith.constant 0 : index
    %c0_4 = arith.constant 0 : index
    %c0_5 = arith.constant 0 : index
    %2 = vector.load %arg1[%c0_2, %c0_3, %c0_4, %c0_5] : memref<1x16x16x32xf32, #tpu.memory_space<vmem>>, vector<1x16x16x32xf32>
    %3 = vector.shape_cast %2 : vector<1x16x16x32xf32> to vector<16x16x32xf32>
    %c1 = arith.constant 1 : index
    %c1_6 = arith.constant 1 : index
    %c0_7 = arith.constant 0 : index
    %4 = vector.load %arg6[%c1, %c1_6, %c0_7] : memref<18x18x32xf32, #tpu.memory_space<vmem>>, vector<16x16x32xf32>
    tpu.vector_store %arg6[%c1, %c1_6, %c0_7], %3 {strides = array<i32>} : memref<18x18x32xf32, #tpu.memory_space<vmem>>, vector<16x16x32xf32>,
    %c0_8 = arith.constant 0 : index
    %c0_9 = arith.constant 0 : index
    %c0_10 = arith.constant 0 : index
    %5 = vector.load %arg6[%c0_8, %c0_9, %c0_10] : memref<18x18x32xf32, #tpu.memory_space<vmem>>, vector<16x16x32xf32>
    %6 = vector.shape_cast %5 : vector<16x16x32xf32> to vector<256x32xf32>
    %c0_11 = arith.constant 0 : index
    %c0_12 = arith.constant 0 : index
    %7 = vector.load %arg7[%c0_11, %c0_12] : memref<256x288xf32, #tpu.memory_space<vmem>>, vector<256x32xf32>
    tpu.vector_store %arg7[%c0_11, %c0_12], %6 {strides = array<i32>} : memref<256x288xf32, #tpu.memory_space<vmem>>, vector<256x32xf32>,
    %c0_13 = arith.constant 0 : index
    %c1_14 = arith.constant 1 : index
    %c0_15 = arith.constant 0 : index
    %8 = vector.load %arg6[%c0_13, %c1_14, %c0_15] : memref<18x18x32xf32, #tpu.memory_space<vmem>>, vector<16x16x32xf32>
    %9 = vector.shape_cast %8 : vector<16x16x32xf32> to vector<256x32xf32>
    %c0_16 = arith.constant 0 : index
    %c32 = arith.constant 32 : index
    %10 = vector.load %arg7[%c0_16, %c32] : memref<256x288xf32, #tpu.memory_space<vmem>>, vector<256x32xf32>
    tpu.vector_store %arg7[%c0_16, %c32], %9 {strides = array<i32>} : memref<256x288xf32, #tpu.memory_space<vmem>>, vector<256x32xf32>,
    %c0_17 = arith.constant 0 : index
    %c2 = arith.constant 2 : index
    %c0_18 = arith.constant 0 : index
    %11 = vector.load %arg6[%c0_17, %c2, %c0_18] : memref<18x18x32xf32, #tpu.memory_space<vmem>>, vector<16x16x32xf32>
    %12 = vector.shape_cast %11 : vector<16x16x32xf32> to vector<256x32xf32>
    %c0_19 = arith.constant 0 : index
    %c64 = arith.constant 64 : index
    %13 = vector.load %arg7[%c0_19, %c64] : memref<256x288xf32, #tpu.memory_space<vmem>>, vector<256x32xf32>
    tpu.vector_store %arg7[%c0_19, %c64], %12 {strides = array<i32>} : memref<256x288xf32, #tpu.memory_space<vmem>>, vector<256x32xf32>,
    %c1_20 = arith.constant 1 : index
    %c0_21 = arith.constant 0 : index
    %c0_22 = arith.constant 0 : index
    %14 = vector.load %arg6[%c1_20, %c0_21, %c0_22] : memref<18x18x32xf32, #tpu.memory_space<vmem>>, vector<16x16x32xf32>
    %15 = vector.shape_cast %14 : vector<16x16x32xf32> to vector<256x32xf32>
    %c0_23 = arith.constant 0 : index
    %c96 = arith.constant 96 : index
    %16 = vector.load %arg7[%c0_23, %c96] : memref<256x288xf32, #tpu.memory_space<vmem>>, vector<256x32xf32>
    tpu.vector_store %arg7[%c0_23, %c96], %15 {strides = array<i32>} : memref<256x288xf32, #tpu.memory_space<vmem>>, vector<256x32xf32>,
    %c1_24 = arith.constant 1 : index
    %c1_25 = arith.constant 1 : index
    %c0_26 = arith.constant 0 : index
    %17 = vector.load %arg6[%c1_24, %c1_25, %c0_26] : memref<18x18x32xf32, #tpu.memory_space<vmem>>, vector<16x16x32xf32>
    %18 = vector.shape_cast %17 : vector<16x16x32xf32> to vector<256x32xf32>
    %c0_27 = arith.constant 0 : index
    %c128 = arith.constant 128 : index
    %19 = vector.load %arg7[%c0_27, %c128] : memref<256x288xf32, #tpu.memory_space<vmem>>, vector<256x32xf32>
    tpu.vector_store %arg7[%c0_27, %c128], %18 {strides = array<i32>} : memref<256x288xf32, #tpu.memory_space<vmem>>, vector<256x32xf32>,
    %c1_28 = arith.constant 1 : index
    %c2_29 = arith.constant 2 : index
    %c0_30 = arith.constant 0 : index
    %20 = vector.load %arg6[%c1_28, %c2_29, %c0_30] : memref<18x18x32xf32, #tpu.memory_space<vmem>>, vector<16x16x32xf32>
    %21 = vector.shape_cast %20 : vector<16x16x32xf32> to vector<256x32xf32>
    %c0_31 = arith.constant 0 : index
    %c160 = arith.constant 160 : index
    %22 = vector.load %arg7[%c0_31, %c160] : memref<256x288xf32, #tpu.memory_space<vmem>>, vector<256x32xf32>
    tpu.vector_store %arg7[%c0_31, %c160], %21 {strides = array<i32>} : memref<256x288xf32, #tpu.memory_space<vmem>>, vector<256x32xf32>,
    %c2_32 = arith.constant 2 : index
    %c0_33 = arith.constant 0 : index
    %c0_34 = arith.constant 0 : index
    %23 = vector.load %arg6[%c2_32, %c0_33, %c0_34] : memref<18x18x32xf32, #tpu.memory_space<vmem>>, vector<16x16x32xf32>
    %24 = vector.shape_cast %23 : vector<16x16x32xf32> to vector<256x32xf32>
    %c0_35 = arith.constant 0 : index
    %c192 = arith.constant 192 : index
    %25 = vector.load %arg7[%c0_35, %c192] : memref<256x288xf32, #tpu.memory_space<vmem>>, vector<256x32xf32>
    tpu.vector_store %arg7[%c0_35, %c192], %24 {strides = array<i32>} : memref<256x288xf32, #tpu.memory_space<vmem>>, vector<256x32xf32>,
    %c2_36 = arith.constant 2 : index
    %c1_37 = arith.constant 1 : index
    %c0_38 = arith.constant 0 : index
    %26 = vector.load %arg6[%c2_36, %c1_37, %c0_38] : memref<18x18x32xf32, #tpu.memory_space<vmem>>, vector<16x16x32xf32>
    %27 = vector.shape_cast %26 : vector<16x16x32xf32> to vector<256x32xf32>
    %c0_39 = arith.constant 0 : index
    %c224 = arith.constant 224 : index
    %28 = vector.load %arg7[%c0_39, %c224] : memref<256x288xf32, #tpu.memory_space<vmem>>, vector<256x32xf32>
    tpu.vector_store %arg7[%c0_39, %c224], %27 {strides = array<i32>} : memref<256x288xf32, #tpu.memory_space<vmem>>, vector<256x32xf32>,
    %c2_40 = arith.constant 2 : index
    %c2_41 = arith.constant 2 : index
    %c0_42 = arith.constant 0 : index
    %29 = vector.load %arg6[%c2_40, %c2_41, %c0_42] : memref<18x18x32xf32, #tpu.memory_space<vmem>>, vector<16x16x32xf32>
    %30 = vector.shape_cast %29 : vector<16x16x32xf32> to vector<256x32xf32>
    %c0_43 = arith.constant 0 : index
    %c256 = arith.constant 256 : index
    %31 = vector.load %arg7[%c0_43, %c256] : memref<256x288xf32, #tpu.memory_space<vmem>>, vector<256x32xf32>
    tpu.vector_store %arg7[%c0_43, %c256], %30 {strides = array<i32>} : memref<256x288xf32, #tpu.memory_space<vmem>>, vector<256x32xf32>,
    %c0_44 = arith.constant 0 : index
    %c0_45 = arith.constant 0 : index
    %32 = vector.load %arg7[%c0_44, %c0_45] : memref<256x288xf32, #tpu.memory_space<vmem>>, vector<256x288xf32>
    %c0_46 = arith.constant 0 : index
    %c0_47 = arith.constant 0 : index
    %33 = vector.load %arg2[%c0_46, %c0_47] : memref<288x64xf32, #tpu.memory_space<vmem>>, vector<288x64xf32>
    %cst_48 = arith.constant dense<0.000000e+00> : vector<256x64xf32>
    %34 = tpu.matmul %32, %33, %cst_48 {dimension_numbers = #tpu.dot_dimension_numbers<[1], [0], [0], [1], [0, 0, 1, 1], [], []>} : vector<256x288xf32>, vector<288x64xf32>, vector<256x64xf32> -> vector<256x64xf32>
    %c0_49 = arith.constant 0 : index
    %c0_50 = arith.constant 0 : index
    %35 = vector.load %arg3[%c0_49, %c0_50] : memref<1x64xf32, #tpu.memory_space<vmem>>, vector<1x64xf32>
    %36 = vector.broadcast %35 : vector<1x64xf32> to vector<256x64xf32>
    %37 = arith.addf %34, %36 : vector<256x64xf32>
    %38 = vector.shape_cast %37 : vector<256x64xf32> to vector<1x16x16x64xf32>
    %c0_51 = arith.constant 0 : index
    %c0_52 = arith.constant 0 : index
    %c0_53 = arith.constant 0 : index
    %c0_54 = arith.constant 0 : index
    %39 = vector.load %arg4[%c0_51, %c0_52, %c0_53, %c0_54] : memref<1x16x16x64xf32, #tpu.memory_space<vmem>>, vector<1x16x16x64xf32>
    tpu.vector_store %arg4[%c0_51, %c0_52, %c0_53, %c0_54], %38 {strides = array<i32>} : memref<1x16x16x64xf32, #tpu.memory_space<vmem>>, vector<1x16x16x64xf32>,
    %cst_55 = arith.constant 0.000000e+00 : f32
    %40 = vector.broadcast %cst_55 : f32 to vector<1x16x16x64xf32>
    %41 = arith.maximumf %38, %40 : vector<1x16x16x64xf32>
    %c0_56 = arith.constant 0 : index
    %c0_57 = arith.constant 0 : index
    %c0_58 = arith.constant 0 : index
    %c0_59 = arith.constant 0 : index
    %42 = vector.load %arg5[%c0_56, %c0_57, %c0_58, %c0_59] : memref<1x16x16x64xf32, #tpu.memory_space<vmem>>, vector<1x16x16x64xf32>
    tpu.vector_store %arg5[%c0_56, %c0_57, %c0_58, %c0_59], %41 {strides = array<i32>} : memref<1x16x16x64xf32, #tpu.memory_space<vmem>>, vector<1x16x16x64xf32>,
    return
  }
  func.func @transform_0(%arg0: i32) -> (i32, i32, i32, i32) {
    %c0_i32 = arith.constant 0 : i32
    %c0_i32_0 = arith.constant 0 : i32
    %c0_i32_1 = arith.constant 0 : i32
    %c0_i32_2 = arith.constant 0 : i32
    return %arg0, %c0_i32, %c0_i32_0, %c0_i32_1 : i32, i32, i32, i32
  }
  func.func @transform_1(%arg0: i32) -> (i32, i32) {
    %c0_i32 = arith.constant 0 : i32
    %c0_i32_0 = arith.constant 0 : i32
    %c0_i32_1 = arith.constant 0 : i32
    return %c0_i32, %c0_i32_0 : i32, i32
  }
  func.func @transform_2(%arg0: i32) -> (i32, i32) {
    %c0_i32 = arith.constant 0 : i32
    %c0_i32_0 = arith.constant 0 : i32
    %c0_i32_1 = arith.constant 0 : i32
    return %c0_i32, %c0_i32_0 : i32, i32
  }
  func.func @transform_3(%arg0: i32) -> (i32, i32, i32, i32) {
    %c0_i32 = arith.constant 0 : i32
    %c0_i32_0 = arith.constant 0 : i32
    %c0_i32_1 = arith.constant 0 : i32
    %c0_i32_2 = arith.constant 0 : i32
    return %arg0, %c0_i32, %c0_i32_0, %c0_i32_1 : i32, i32, i32, i32
  }
  func.func @transform_4(%arg0: i32) -> (i32, i32, i32, i32) {
    %c0_i32 = arith.constant 0 : i32
    %c0_i32_0 = arith.constant 0 : i32
    %c0_i32_1 = arith.constant 0 : i32
    %c0_i32_2 = arith.constant 0 : i32
    return %arg0, %c0_i32, %c0_i32_0, %c0_i32_1 : i32, i32, i32, i32
  }
}

module attributes {stable_mosaic.version = 11 : i64} {
  func.func @_conv3x3_relu_classifier_kernel(%arg0: i32, %arg1: i32, %arg2: memref<1x16x16x64xf32, #tpu.memory_space<vmem>>, %arg3: memref<576x128xbf16, #tpu.memory_space<vmem>>, %arg4: memref<1x128xf32, #tpu.memory_space<vmem>>, %arg5: memref<1x128xf32, #tpu.memory_space<vmem>>, %arg6: memref<1x1xf32, #tpu.memory_space<vmem>>, %arg7: memref<1x16x16x128xf32, #tpu.memory_space<vmem>>, %arg8: memref<1x1x256xf32, #tpu.memory_space<vmem>>, %arg9: memref<18x18x64xf32, #tpu.memory_space<vmem>>, %arg10: memref<256x576xbf16, #tpu.memory_space<vmem>>, %arg11: memref<1x256xf32, #tpu.memory_space<vmem>>) attributes {dimension_semantics = [#tpu.dimension_semantics<parallel>, #tpu.dimension_semantics<arbitrary>], iteration_bounds = array<i64: 2, 4>, scalar_prefetch = 0 : i64, scratch_operands = 3 : i64, tpu.core_type = #tpu.core_type<tc>, window_params = [{transform_indices = @transform_0, window_bounds = array<i64: 1, 16, 16, 64>}, {transform_indices = @transform_1, window_bounds = array<i64: 576, 128>}, {transform_indices = @transform_2, window_bounds = array<i64: 1, 128>}, {transform_indices = @transform_3, window_bounds = array<i64: 1, 128>}, {pipeline_mode = #tpu.pipeline_mode<synchronous>, transform_indices = @transform_4, window_bounds = array<i64: 1, 1>}, {transform_indices = @transform_5, window_bounds = array<i64: 1, 16, 16, 128>}, {transform_indices = @transform_6, window_bounds = array<i64: 1, 1, 256>}]} {
    %c0_i32 = arith.constant 0 : i32
    %0 = arith.cmpi eq, %arg1, %c0_i32 : i32
    %1 = arith.extui %0 : i1 to i32
    %c0_i32_0 = arith.constant 0 : i32
    %2 = arith.cmpi ne, %1, %c0_i32_0 : i32
    scf.if %2 {
      %cst_19 = arith.constant 0.000000e+00 : f32
      %21 = vector.broadcast %cst_19 : f32 to vector<18x18x64xf32>
      %c0_20 = arith.constant 0 : index
      %c0_21 = arith.constant 0 : index
      %c0_22 = arith.constant 0 : index
      %22 = vector.load %arg9[%c0_20, %c0_21, %c0_22] : memref<18x18x64xf32, #tpu.memory_space<vmem>>, vector<18x18x64xf32>
      tpu.vector_store %arg9[%c0_20, %c0_21, %c0_22], %21 {strides = array<i32>} : memref<18x18x64xf32, #tpu.memory_space<vmem>>, vector<18x18x64xf32>,
      %c0_23 = arith.constant 0 : index
      %c0_24 = arith.constant 0 : index
      %c0_25 = arith.constant 0 : index
      %c0_26 = arith.constant 0 : index
      %23 = vector.load %arg2[%c0_23, %c0_24, %c0_25, %c0_26] : memref<1x16x16x64xf32, #tpu.memory_space<vmem>>, vector<1x16x16x64xf32>
      %24 = vector.shape_cast %23 : vector<1x16x16x64xf32> to vector<16x16x64xf32>
      %c1 = arith.constant 1 : index
      %c1_27 = arith.constant 1 : index
      %c0_28 = arith.constant 0 : index
      %25 = vector.load %arg9[%c1, %c1_27, %c0_28] : memref<18x18x64xf32, #tpu.memory_space<vmem>>, vector<16x16x64xf32>
      tpu.vector_store %arg9[%c1, %c1_27, %c0_28], %24 {strides = array<i32>} : memref<18x18x64xf32, #tpu.memory_space<vmem>>, vector<16x16x64xf32>,
      %c0_29 = arith.constant 0 : index
      %c0_30 = arith.constant 0 : index
      %c0_31 = arith.constant 0 : index
      %26 = vector.load %arg9[%c0_29, %c0_30, %c0_31] : memref<18x18x64xf32, #tpu.memory_space<vmem>>, vector<16x16x64xf32>
      %27 = vector.shape_cast %26 : vector<16x16x64xf32> to vector<256x64xf32>
      %28 = arith.truncf %27 : vector<256x64xf32> to vector<256x64xbf16>
      %c0_32 = arith.constant 0 : index
      %c0_33 = arith.constant 0 : index
      %29 = vector.load %arg10[%c0_32, %c0_33] : memref<256x576xbf16, #tpu.memory_space<vmem>>, vector<256x64xbf16>
      tpu.vector_store %arg10[%c0_32, %c0_33], %28 {strides = array<i32>} : memref<256x576xbf16, #tpu.memory_space<vmem>>, vector<256x64xbf16>,
      %c0_34 = arith.constant 0 : index
      %c1_35 = arith.constant 1 : index
      %c0_36 = arith.constant 0 : index
      %30 = vector.load %arg9[%c0_34, %c1_35, %c0_36] : memref<18x18x64xf32, #tpu.memory_space<vmem>>, vector<16x16x64xf32>
      %31 = vector.shape_cast %30 : vector<16x16x64xf32> to vector<256x64xf32>
      %32 = arith.truncf %31 : vector<256x64xf32> to vector<256x64xbf16>
      %c0_37 = arith.constant 0 : index
      %c64 = arith.constant 64 : index
      %33 = vector.load %arg10[%c0_37, %c64] : memref<256x576xbf16, #tpu.memory_space<vmem>>, vector<256x64xbf16>
      tpu.vector_store %arg10[%c0_37, %c64], %32 {strides = array<i32>} : memref<256x576xbf16, #tpu.memory_space<vmem>>, vector<256x64xbf16>,
      %c0_38 = arith.constant 0 : index
      %c2 = arith.constant 2 : index
      %c0_39 = arith.constant 0 : index
      %34 = vector.load %arg9[%c0_38, %c2, %c0_39] : memref<18x18x64xf32, #tpu.memory_space<vmem>>, vector<16x16x64xf32>
      %35 = vector.shape_cast %34 : vector<16x16x64xf32> to vector<256x64xf32>
      %36 = arith.truncf %35 : vector<256x64xf32> to vector<256x64xbf16>
      %c0_40 = arith.constant 0 : index
      %c128 = arith.constant 128 : index
      %37 = vector.load %arg10[%c0_40, %c128] : memref<256x576xbf16, #tpu.memory_space<vmem>>, vector<256x64xbf16>
      tpu.vector_store %arg10[%c0_40, %c128], %36 {strides = array<i32>} : memref<256x576xbf16, #tpu.memory_space<vmem>>, vector<256x64xbf16>,
      %c1_41 = arith.constant 1 : index
      %c0_42 = arith.constant 0 : index
      %c0_43 = arith.constant 0 : index
      %38 = vector.load %arg9[%c1_41, %c0_42, %c0_43] : memref<18x18x64xf32, #tpu.memory_space<vmem>>, vector<16x16x64xf32>
      %39 = vector.shape_cast %38 : vector<16x16x64xf32> to vector<256x64xf32>
      %40 = arith.truncf %39 : vector<256x64xf32> to vector<256x64xbf16>
      %c0_44 = arith.constant 0 : index
      %c192 = arith.constant 192 : index
      %41 = vector.load %arg10[%c0_44, %c192] : memref<256x576xbf16, #tpu.memory_space<vmem>>, vector<256x64xbf16>
      tpu.vector_store %arg10[%c0_44, %c192], %40 {strides = array<i32>} : memref<256x576xbf16, #tpu.memory_space<vmem>>, vector<256x64xbf16>,
      %c1_45 = arith.constant 1 : index
      %c1_46 = arith.constant 1 : index
      %c0_47 = arith.constant 0 : index
      %42 = vector.load %arg9[%c1_45, %c1_46, %c0_47] : memref<18x18x64xf32, #tpu.memory_space<vmem>>, vector<16x16x64xf32>
      %43 = vector.shape_cast %42 : vector<16x16x64xf32> to vector<256x64xf32>
      %44 = arith.truncf %43 : vector<256x64xf32> to vector<256x64xbf16>
      %c0_48 = arith.constant 0 : index
      %c256 = arith.constant 256 : index
      %45 = vector.load %arg10[%c0_48, %c256] : memref<256x576xbf16, #tpu.memory_space<vmem>>, vector<256x64xbf16>
      tpu.vector_store %arg10[%c0_48, %c256], %44 {strides = array<i32>} : memref<256x576xbf16, #tpu.memory_space<vmem>>, vector<256x64xbf16>,
      %c1_49 = arith.constant 1 : index
      %c2_50 = arith.constant 2 : index
      %c0_51 = arith.constant 0 : index
      %46 = vector.load %arg9[%c1_49, %c2_50, %c0_51] : memref<18x18x64xf32, #tpu.memory_space<vmem>>, vector<16x16x64xf32>
      %47 = vector.shape_cast %46 : vector<16x16x64xf32> to vector<256x64xf32>
      %48 = arith.truncf %47 : vector<256x64xf32> to vector<256x64xbf16>
      %c0_52 = arith.constant 0 : index
      %c320 = arith.constant 320 : index
      %49 = vector.load %arg10[%c0_52, %c320] : memref<256x576xbf16, #tpu.memory_space<vmem>>, vector<256x64xbf16>
      tpu.vector_store %arg10[%c0_52, %c320], %48 {strides = array<i32>} : memref<256x576xbf16, #tpu.memory_space<vmem>>, vector<256x64xbf16>,
      %c2_53 = arith.constant 2 : index
      %c0_54 = arith.constant 0 : index
      %c0_55 = arith.constant 0 : index
      %50 = vector.load %arg9[%c2_53, %c0_54, %c0_55] : memref<18x18x64xf32, #tpu.memory_space<vmem>>, vector<16x16x64xf32>
      %51 = vector.shape_cast %50 : vector<16x16x64xf32> to vector<256x64xf32>
      %52 = arith.truncf %51 : vector<256x64xf32> to vector<256x64xbf16>
      %c0_56 = arith.constant 0 : index
      %c384 = arith.constant 384 : index
      %53 = vector.load %arg10[%c0_56, %c384] : memref<256x576xbf16, #tpu.memory_space<vmem>>, vector<256x64xbf16>
      tpu.vector_store %arg10[%c0_56, %c384], %52 {strides = array<i32>} : memref<256x576xbf16, #tpu.memory_space<vmem>>, vector<256x64xbf16>,
      %c2_57 = arith.constant 2 : index
      %c1_58 = arith.constant 1 : index
      %c0_59 = arith.constant 0 : index
      %54 = vector.load %arg9[%c2_57, %c1_58, %c0_59] : memref<18x18x64xf32, #tpu.memory_space<vmem>>, vector<16x16x64xf32>
      %55 = vector.shape_cast %54 : vector<16x16x64xf32> to vector<256x64xf32>
      %56 = arith.truncf %55 : vector<256x64xf32> to vector<256x64xbf16>
      %c0_60 = arith.constant 0 : index
      %c448 = arith.constant 448 : index
      %57 = vector.load %arg10[%c0_60, %c448] : memref<256x576xbf16, #tpu.memory_space<vmem>>, vector<256x64xbf16>
      tpu.vector_store %arg10[%c0_60, %c448], %56 {strides = array<i32>} : memref<256x576xbf16, #tpu.memory_space<vmem>>, vector<256x64xbf16>,
      %c2_61 = arith.constant 2 : index
      %c2_62 = arith.constant 2 : index
      %c0_63 = arith.constant 0 : index
      %58 = vector.load %arg9[%c2_61, %c2_62, %c0_63] : memref<18x18x64xf32, #tpu.memory_space<vmem>>, vector<16x16x64xf32>
      %59 = vector.shape_cast %58 : vector<16x16x64xf32> to vector<256x64xf32>
      %60 = arith.truncf %59 : vector<256x64xf32> to vector<256x64xbf16>
      %c0_64 = arith.constant 0 : index
      %c512 = arith.constant 512 : index
      %61 = vector.load %arg10[%c0_64, %c512] : memref<256x576xbf16, #tpu.memory_space<vmem>>, vector<256x64xbf16>
      tpu.vector_store %arg10[%c0_64, %c512], %60 {strides = array<i32>} : memref<256x576xbf16, #tpu.memory_space<vmem>>, vector<256x64xbf16>,
      %cst_65 = arith.constant 0.000000e+00 : f32
      %62 = vector.broadcast %cst_65 : f32 to vector<1x256xf32>
      %c0_66 = arith.constant 0 : index
      %c0_67 = arith.constant 0 : index
      %63 = vector.load %arg11[%c0_66, %c0_67] : memref<1x256xf32, #tpu.memory_space<vmem>>, vector<1x256xf32>
      tpu.vector_store %arg11[%c0_66, %c0_67], %62 {strides = array<i32>} : memref<1x256xf32, #tpu.memory_space<vmem>>, vector<1x256xf32>,
    } else {
    }
    %c0 = arith.constant 0 : index
    %c0_1 = arith.constant 0 : index
    %3 = vector.load %arg10[%c0, %c0_1] : memref<256x576xbf16, #tpu.memory_space<vmem>>, vector<256x576xbf16>
    %c0_2 = arith.constant 0 : index
    %c0_3 = arith.constant 0 : index
    %4 = vector.load %arg3[%c0_2, %c0_3] : memref<576x128xbf16, #tpu.memory_space<vmem>>, vector<576x128xbf16>
    %cst = arith.constant dense<0.000000e+00> : vector<256x128xf32>
    %5 = tpu.matmul %3, %4, %cst {dimension_numbers = #tpu.dot_dimension_numbers<[1], [0], [0], [1], [0, 0, 1, 1], [], []>} : vector<256x576xbf16>, vector<576x128xbf16>, vector<256x128xf32> -> vector<256x128xf32>
    %c0_4 = arith.constant 0 : index
    %c0_5 = arith.constant 0 : index
    %6 = vector.load %arg4[%c0_4, %c0_5] : memref<1x128xf32, #tpu.memory_space<vmem>>, vector<1x128xf32>
    %7 = vector.broadcast %6 : vector<1x128xf32> to vector<256x128xf32>
    %8 = arith.addf %5, %7 : vector<256x128xf32>
    %9 = vector.shape_cast %8 : vector<256x128xf32> to vector<1x16x16x128xf32>
    %c0_6 = arith.constant 0 : index
    %c0_7 = arith.constant 0 : index
    %c0_8 = arith.constant 0 : index
    %c0_9 = arith.constant 0 : index
    %10 = vector.load %arg7[%c0_6, %c0_7, %c0_8, %c0_9] : memref<1x16x16x128xf32, #tpu.memory_space<vmem>>, vector<1x16x16x128xf32>
    tpu.vector_store %arg7[%c0_6, %c0_7, %c0_8, %c0_9], %9 {strides = array<i32>} : memref<1x16x16x128xf32, #tpu.memory_space<vmem>>, vector<1x16x16x128xf32>,
    %cst_10 = arith.constant 0.000000e+00 : f32
    %11 = vector.broadcast %cst_10 : f32 to vector<256x128xf32>
    %12 = arith.maximumf %8, %11 : vector<256x128xf32>
    %c0_11 = arith.constant 0 : index
    %c0_12 = arith.constant 0 : index
    %13 = vector.load %arg11[%c0_11, %c0_12] : memref<1x256xf32, #tpu.memory_space<vmem>>, vector<1x256xf32>
    %c0_13 = arith.constant 0 : index
    %c0_14 = arith.constant 0 : index
    %14 = vector.load %arg5[%c0_13, %c0_14] : memref<1x128xf32, #tpu.memory_space<vmem>>, vector<1x128xf32>
    %cst_15 = arith.constant dense<0.000000e+00> : vector<1x256xf32>
    %15 = tpu.matmul %14, %12, %cst_15 {dimension_numbers = #tpu.dot_dimension_numbers<[1], [1], [0], [0], [0, 0, 1, 0], [], []>} : vector<1x128xf32>, vector<256x128xf32>, vector<1x256xf32> -> vector<1x256xf32>
    %16 = arith.addf %13, %15 : vector<1x256xf32>
    %c0_16 = arith.constant 0 : index
    %c0_17 = arith.constant 0 : index
    %17 = vector.load %arg11[%c0_16, %c0_17] : memref<1x256xf32, #tpu.memory_space<vmem>>, vector<1x256xf32>
    tpu.vector_store %arg11[%c0_16, %c0_17], %16 {strides = array<i32>} : memref<1x256xf32, #tpu.memory_space<vmem>>, vector<1x256xf32>,
    %c3_i32 = arith.constant 3 : i32
    %18 = arith.cmpi eq, %arg1, %c3_i32 : i32
    %19 = arith.extui %18 : i1 to i32
    %c0_i32_18 = arith.constant 0 : i32
    %20 = arith.cmpi ne, %19, %c0_i32_18 : i32
    scf.if %20 {
      %c0_19 = arith.constant 0 : index
      %c0_20 = arith.constant 0 : index
      %21 = vector.load %arg11[%c0_19, %c0_20] : memref<1x256xf32, #tpu.memory_space<vmem>>, vector<1x256xf32>
      %c0_21 = arith.constant 0 : index
      %c0_22 = arith.constant 0 : index
      %22 = vector.load %arg6[%c0_21, %c0_22] : memref<1x1xf32, #tpu.memory_space<vmem>>, vector<1x1xf32>
      %23 = vector.broadcast %22 : vector<1x1xf32> to vector<1x256xf32>
      %24 = arith.addf %21, %23 : vector<1x256xf32>
      %25 = arith.negf %24 : vector<1x256xf32>
      %26 = math.exp %25 : vector<1x256xf32>
      %cst_23 = arith.constant 1.000000e+00 : f32
      %27 = vector.broadcast %cst_23 : f32 to vector<1x256xf32>
      %28 = arith.addf %27, %26 : vector<1x256xf32>
      %29 = arith.divf %27, %28 : vector<1x256xf32>
      %30 = vector.shape_cast %29 : vector<1x256xf32> to vector<1x1x256xf32>
      %c0_24 = arith.constant 0 : index
      %c0_25 = arith.constant 0 : index
      %c0_26 = arith.constant 0 : index
      %31 = vector.load %arg8[%c0_24, %c0_25, %c0_26] : memref<1x1x256xf32, #tpu.memory_space<vmem>>, vector<1x1x256xf32>
      tpu.vector_store %arg8[%c0_24, %c0_25, %c0_26], %30 {strides = array<i32>} : memref<1x1x256xf32, #tpu.memory_space<vmem>>, vector<1x1x256xf32>,
    } else {
    }
    return
  }
  func.func @transform_0(%arg0: i32, %arg1: i32) -> (i32, i32, i32, i32) {
    %c0_i32 = arith.constant 0 : i32
    %c0_i32_0 = arith.constant 0 : i32
    %c0_i32_1 = arith.constant 0 : i32
    %c0_i32_2 = arith.constant 0 : i32
    return %arg0, %c0_i32, %c0_i32_0, %c0_i32_1 : i32, i32, i32, i32
  }
  func.func @transform_1(%arg0: i32, %arg1: i32) -> (i32, i32) {
    %c0_i32 = arith.constant 0 : i32
    %c0_i32_0 = arith.constant 0 : i32
    return %c0_i32, %arg1 : i32, i32
  }
  func.func @transform_2(%arg0: i32, %arg1: i32) -> (i32, i32) {
    %c0_i32 = arith.constant 0 : i32
    %c0_i32_0 = arith.constant 0 : i32
    return %c0_i32, %arg1 : i32, i32
  }
  func.func @transform_3(%arg0: i32, %arg1: i32) -> (i32, i32) {
    %c0_i32 = arith.constant 0 : i32
    %c0_i32_0 = arith.constant 0 : i32
    return %c0_i32, %arg1 : i32, i32
  }
  func.func @transform_4(%arg0: i32, %arg1: i32) -> (i32, i32) {
    %c0_i32 = arith.constant 0 : i32
    %c0_i32_0 = arith.constant 0 : i32
    %c0_i32_1 = arith.constant 0 : i32
    return %c0_i32, %c0_i32_0 : i32, i32
  }
  func.func @transform_5(%arg0: i32, %arg1: i32) -> (i32, i32, i32, i32) {
    %c0_i32 = arith.constant 0 : i32
    %c0_i32_0 = arith.constant 0 : i32
    %c0_i32_1 = arith.constant 0 : i32
    return %arg0, %c0_i32, %c0_i32_0, %arg1 : i32, i32, i32, i32
  }
  func.func @transform_6(%arg0: i32, %arg1: i32) -> (i32, i32, i32) {
    %c0_i32 = arith.constant 0 : i32
    %c0_i32_0 = arith.constant 0 : i32
    %c0_i32_1 = arith.constant 0 : i32
    return %arg0, %c0_i32, %c0_i32_0 : i32, i32, i32
  }
}

</mosaic_0001>

<bundles_post_ra>
// kernel: encoder_forward.3
= control target key start
LH: loop header
LB: loop body
LE: loop exit
PB: predicated region body
PF: predicated region fallthrough
CT: control target
= control target key end

     0   :  { %10 = vsyncpa [#allocation5], 0  ;;  %s4178_s0 = inlined_call_operand.vmem [shape: f32[2,16,16,3], index: 0, kind: input, shape index: {}]   ;;  %s4179_s1 = inlined_call_operand.vmem [shape: f32[27,32], index: 1, kind: input, shape index: {}]   ;;  %s4180_s2 = inlined_call_operand.hbm [shape: f32[1,32], index: 2, kind: input, shape index: {}]   ;;  %s4181_s3 = inlined_call_operand.hbm [shape: f32[2,16,16,32], index: 3, kind: output, shape index: {0}]   ;;  %s4182_s4 = inlined_call_operand.vmem [shape: f32[2,16,16,32], index: 4, kind: output, shape index: {1}]  }
   0x1   :  { %11 = vsyncpa [#allocation6], 0 }
   0x2   :  { %13 = vsyncpa [#allocation6 + $0x1], 0  ;;  %s2895_s15 = smov 0   ;;  %s2897_s16 = smov 0  }
   0x3   :  { %s2899_s17 = smov 0   ;;  %s2901_s18 = smov 0  }
   0x4 LB: > { %s2916_s19 = sadd.s32 4294967295, %s2854_s18   ;;  %s2539_s20 = sadd.s32 4294967294, %s2854_s18   ;;  %s2854_s18 = sphi %s2901_s18, %s4198_s18   ;;  %s2850_s17 = sphi %s2899_s17, %s4197_s17   ;;  %s2846_s16 = sphi %s2897_s16, %s4196_s16   ;;  %s2842_s15 = sphi %s2895_s15, %s4195_s15  }
   0x5   : > { %s2920_s21 = sadd.s32 1, %s2854_s18   ;;  %s94_s22 = sadd.s32 1, %s2850_s17 }
   0x6   : > { %s91_s23 = ssub.s32 %s2854_s18, %s2920_s21  ;;  %p104_p0 = scmp.ne.s32.totalorder %s2850_s17, %s2846_s16 }
   0x7   : > { %p92_p1 = scmp.eq.s32.totalorder %s91_s23, 0  ;;  %p105_p2 = scmp.eq.s32.totalorder %s2916_s19, 1 }
   0x8   : > { %p110_p3 = scmp.ne.s32.totalorder %s2846_s16, %s2842_s15  ;;  %p111_p4 = scmp.eq.s32.totalorder %s2539_s20, 1 }
   0x9   : > { %s2931_s24 = scalar_select %p92_p1, %s2850_s17, %s94_s22  }
   0xa   : > { %p2933_p5 = por %p105_p2, %p104_p0  ;;  %p2937_p6 = por %p111_p4, %p110_p3 }
   0xb   : > { %p2540_p7 = scmp.ge.s32.totalorder %s2854_s18, 1  ;;  %p144_p8 = scmp.lt.s32.totalorder %s2854_s18, 3 }
   0xc   : > { %s4186_s25 = scalar_select %p2933_p5, 1, 0 }
   0xd   : > { %s4187_s26 = scalar_select %p2937_p6, 1, 0 }
   0xe   : > { %p4183_p9 = scmp.eq.s32.totalorder %s2916_s19, 0  ;;  %p2944_p10 = pnand %p2540_p7, %p144_p8 }
   0xf   : > { %s2856_s28 = smov [#allocation4]   ;;  %s2760_s7 = scalar_lea.hbm %s4180_s2, 16 }
  0x10   : > { %s4188_s27 = scalar_select %p2944_p10, 1, 0 }
  0x11   : > { %s160_s29 = sshll.u32 %s2856_s28, 4  ;;  %p2704_p11 = pneg %p2944_p10  ;;  %s161_s29 = int_to_ptr.vmem [resolvable:$true] %s160_s29 }
  0x12   : > { %p2761_p13 = scmp.ne.s32.totalorder %s4180_s2, %s2760_s7  ;;  %p2767_p3 = scmp.lt.u32.totalorder %s2760_s7, %s4180_s2 }
  0x13   : > { %p2952_p12 = pnand %p4183_p9, %p2704_p11 }
  0x15   : > { %p2762_p0 = pneg %p2952_p12 }
  0x17   : > { %p2763_p1 = pnand %p2762_p0, %p2761_p13 }
  0x19   : > { %p2764_p2 = pneg %p2763_p1 }
  0x1b   : > { %p2769_p4 = pnand %p2767_p3, %p2764_p2 }
  0x1d   : > { %2772 = shalt.err (!%p2769_p4)
}
  0x1e   : > { %s2773_s12 = scalar_lea.vmem %s161_s29, 16  ;;  %s2780_s13 = scalar_lea.vmem %s161_s29, 32 }
  0x1f   : > { %p2774_p7 = scmp.ne.s32.totalorder %s161_s29, %s2773_s12  ;;  %p2781_p9 = scmp.lt.s32.totalorder %s161_s29, %s161_s29 }
  0x20   : > { %p2782_p6 = scmp.lt.s32.totalorder %s2780_s13, %s2773_s12 }
  0x21   : > { %p2776_p8 = pnand %p2774_p7, %p2762_p0 }
  0x22   : > { %p2783_p5 = por %p2782_p6, %p2781_p9 }
  0x23   : > { %p2777_p11 = pneg %p2776_p8 }
  0x25   : > { %p2784_p10 = pnand %p2783_p5, %p2777_p11 }
  0x27   : > { %2787 = shalt.err (!%p2784_p10)
}
  0x28   : > { %2707 = dma.hbm_to_vmem [thread:$0]  (!%p2952_p12), %s4180_s2, 16, %s161_s29, [#allocation5]  }
  0x29   : > { %p4190_p13 = scmp.ne.s32.totalorder %s4188_s27, 0 }
  0x2a   : > { %p4191_p1 = scmp.eq.s32.totalorder (!%p4190_p13), %s2916_s19, 0 }
  0x2b   : > { %181 = sbr.rel (%p4190_p13) target bundleno = 947 (0x3b3), region = 32 }
  0x32   : > { %2833 = dma.done.wait (%p4191_p1), [#allocation5], 16   ;;  %p4192_p0 = pmov %p4191_p1 }
  0x33   : > { %vm222_vm0 = vcmask 23552   ;;  %p212_p6 = scmp.lt.s32.totalorder %s2916_s19, 1  ;;  %v2857_v0 = vmov 0.0   ;;  %vm225_vm1 = vcmask 17408   ;;  %s2858_s30 = smov 3   ;;  %vm567_vm2 = vcmask 48152  }
  0x34   : > { %2835 = vsyncadd (%p4192_p0), [#allocation5], 4294967280  ;;  %223 = vst.msk [vmem:[#allocation2] sm:$0xff] %vm222_vm0, %v2857_v0  ;;  %s2859_s5 = smov 6   ;;  %s2860_s6 = smov 9   ;;  %vm760_vm3 = vcmask 72752  }
  0x35   : > { %224 = vst.msk [vmem:[#allocation2 + $0x8] sm:$0xff] %vm222_vm0, %v2857_v0  ;;  %227 = vst.msk [vmem:[#allocation2 + $0x18] sm:$0xff] %vm222_vm0, %v2857_v0  ;;  %s3018_s22 = scalar_select %p212_p6, %s2916_s19, 1  ;;  %vm2092_vm4 = vcmask 1042432   ;;  %vm2866_vm5 = vmmov 1   ;;  %vm953_vm7 = vcmask 97352  }
  0x36   : > { %228 = vst.msk [vmem:[#allocation2 + $0x20] sm:$0xff] %vm222_vm0, %v2857_v0  ;;  %230 = vst.msk [vmem:[#allocation2 + $0x30] sm:$0xff] %vm222_vm0, %v2857_v0  ;;  %s2861_s7 = smov 12   ;;  %s2862_s8 = smov 15   ;;  %vm1146_vm8 = vcmask 121952   ;;  %vm1339_vm9 = vcmask 146552  }
  0x37   : > { %231 = vst.msk [vmem:[#allocation2 + $0x38] sm:$0xff] %vm222_vm0, %v2857_v0  ;;  %233 = vst.msk [vmem:[#allocation2 + $0x48] sm:$0xff] %vm222_vm0, %v2857_v0  ;;  %s2589_s23 = sshll.u32 %s3018_s22, 8  ;;  %s2863_s9 = smov 18   ;;  %vm1533_vm10 = vcmask 171152   ;;  %vm1726_vm11 = vcmask 195752  }
  0x38   : > { %234 = vst.msk [vmem:[#allocation2 + $0x50] sm:$0xff] %vm222_vm0, %v2857_v0  ;;  %236 = vst.msk [vmem:[#allocation2 + $0x60] sm:$0xff] %vm222_vm0, %v2857_v0  ;;  %s3044_s29 = scalar_lea.vmem %s4178_s0, %s2589_s23  ;;  %s2864_s10 = smov 21   ;;  %vm1919_vm12 = vcmask 220352   ;;  %vm1995_vm13 = vcmask 220160   ;;  %vm2321_vm14 = vcmask 261120  }
  0x39   : > { %237 = vst.msk [vmem:[#allocation2 + $0x68] sm:$0xff] %vm222_vm0, %v2857_v0  ;;  %239 = vst.msk [vmem:[#allocation2 + $0x78] sm:$0xff] %vm222_vm0, %v2857_v0  ;;  %v278_v1 = vld [vmem:[%s3044_s29] sm:$0xff]  ;;  %v279_v2 = vld [vmem:[%s3044_s29 + $0x8] sm:$0xff]  ;;  %s2865_s11 = smov 24   ;;  %s2591_s22 = sshll.u32 %s2916_s19, 12 }
  0x3a   : > { %240 = vst.msk [vmem:[#allocation2 + $0x80] sm:$0xff] %vm222_vm0, %v2857_v0  ;;  %242 = vst.msk [vmem:[#allocation2 + $0x90] sm:$0xff] %vm222_vm0, %v2857_v0  ;;  %v280_v3 = vld [vmem:[%s3044_s29 + $0x10] sm:$0xff]  ;;  %v281_v5 = vld [vmem:[%s3044_s29 + $0x18] sm:$0xff]  ;;  %s4122_s13 = scalar_lea.hbm %s4181_s3, %s2591_s22  ;;  %p4193_p9 = scmp.ne.s32.totalorder %s4186_s25, 0 }
  0x3b   : > { %243 = vst.msk [vmem:[#allocation2 + $0x98] sm:$0xff] %vm222_vm0, %v2857_v0  ;;  %245 = vst.msk [vmem:[#allocation2 + $0xa8] sm:$0xff] %vm222_vm0, %v2857_v0  ;;  %v282_v6 = vld [vmem:[%s3044_s29 + $0x20] sm:$0xff]  ;;  %v283_v8 = vld [vmem:[%s3044_s29 + $0x28] sm:$0xff]  ;;  %s2867_s20 = smov [#allocation7]  }
  0x3c   : > { %246 = vst.msk [vmem:[#allocation2 + $0xb0] sm:$0xff] %vm222_vm0, %v2857_v0  ;;  %248 = vst.msk [vmem:[#allocation2 + $0xc0] sm:$0xff] %vm222_vm0, %v2857_v0  ;;  %v407_v4 = vld [vmem:[#allocation2 + $0x1] sm:$0xff]  ;;  %v284_v9 = vld [vmem:[%s3044_s29 + $0x30] sm:$0xff]  ;;  %s2792_s27 = sshll.u32 %s2867_s20, 4  ;;  %s2793_s27 = int_to_ptr.vmem [resolvable:$false] %s2792_s27 }
  0x3d   : > { %249 = vst.msk [vmem:[#allocation2 + $0xc8] sm:$0xff] %vm222_vm0, %v2857_v0  ;;  %251 = vst.msk [vmem:[#allocation2 + $0xd8] sm:$0xff] %vm222_vm0, %v2857_v0  ;;  %471 = vrot.lane.b32.xlu0 %v407_v4, %s2858_s30  ;;  %v285_v10 = vld [vmem:[%s3044_s29 + $0x38] sm:$0xff]  ;;  %v286_v11 = vld [vmem:[%s3044_s29 + $0x40] sm:$0xff]  ;;  %s2794_s28 = scalar_lea.vmem %s2793_s27, 8192 }
  0x3e   : > { %252 = vst.msk [vmem:[#allocation2 + $0xe0] sm:$0xff] %vm222_vm0, %v2857_v0  ;;  %254 = vst.msk [vmem:[#allocation2 + $0xf0] sm:$0xff] %vm222_vm0, %v2857_v0  ;;  %v287_v12 = vld [vmem:[%s3044_s29 + $0x48] sm:$0xff]  ;;  %v288_v13 = vld [vmem:[%s3044_s29 + $0x50] sm:$0xff] }
  0x3f   : > { %255 = vst.msk [vmem:[#allocation2 + $0xf8] sm:$0xff] %vm222_vm0, %v2857_v0  ;;  %257 = vst.msk [vmem:[#allocation2 + $0x108] sm:$0xff] %vm222_vm0, %v2857_v0  ;;  %v289_v14 = vld [vmem:[%s3044_s29 + $0x58] sm:$0xff]  ;;  %v290_v15 = vld [vmem:[%s3044_s29 + $0x60] sm:$0xff] }
  0x40   : > { %258 = vst.msk [vmem:[#allocation2 + $0x110] sm:$0xff] %vm222_vm0, %v2857_v0  ;;  %260 = vst.msk [vmem:[#allocation2 + $0x120] sm:$0xff] %vm222_vm0, %v2857_v0  ;;  %v291_v16 = vld [vmem:[%s3044_s29 + $0x68] sm:$0xff]  ;;  %v292_v17 = vld [vmem:[%s3044_s29 + $0x70] sm:$0xff] }
  0x41   : > { %261 = vst.msk [vmem:[#allocation2 + $0x128] sm:$0xff] %vm222_vm0, %v2857_v0  ;;  %263 = vst.msk [vmem:[#allocation2 + $0x138] sm:$0xff] %vm222_vm0, %v2857_v0  ;;  %v293_v18 = vld [vmem:[%s3044_s29 + $0x78] sm:$0xff]  ;;  %v294_v19 = vld [vmem:[%s3044_s29 + $0x80] sm:$0xff] }
  0x42   : > { %264 = vst.msk [vmem:[#allocation2 + $0x140] sm:$0xff] %vm222_vm0, %v2857_v0  ;;  %266 = vst.msk [vmem:[#allocation2 + $0x150] sm:$0xff] %vm222_vm0, %v2857_v0  ;;  %v295_v20 = vld [vmem:[%s3044_s29 + $0x88] sm:$0xff]  ;;  %v296_v21 = vld [vmem:[%s3044_s29 + $0x90] sm:$0xff] }
  0x43   : > { %267 = vst.msk [vmem:[#allocation2 + $0x158] sm:$0xff] %vm222_vm0, %v2857_v0  ;;  %269 = vst.msk [vmem:[#allocation2 + $0x168] sm:$0xff] %vm222_vm0, %v2857_v0  ;;  %v297_v22 = vld [vmem:[%s3044_s29 + $0x98] sm:$0xff]  ;;  %v298_v23 = vld [vmem:[%s3044_s29 + $0xa0] sm:$0xff] }
  0x44   : > { %270 = vst.msk [vmem:[#allocation2 + $0x170] sm:$0xff] %vm222_vm0, %v2857_v0  ;;  %272 = vst.msk [vmem:[#allocation2 + $0x180] sm:$0xff] %vm222_vm0, %v2857_v0  ;;  %v299_v24 = vld [vmem:[%s3044_s29 + $0xa8] sm:$0xff]  ;;  %v300_v27 = vld [vmem:[%s3044_s29 + $0xb0] sm:$0xff] }
  0x45   : > { %273 = vst.msk [vmem:[#allocation2 + $0x188] sm:$0xff] %vm222_vm0, %v2857_v0  ;;  %275 = vst.msk [vmem:[#allocation2 + $0x198] sm:$0xff] %vm222_vm0, %v2857_v0  ;;  %v301_v29 = vld [vmem:[%s3044_s29 + $0xb8] sm:$0xff]  ;;  %v302_v33 = vld [vmem:[%s3044_s29 + $0xc0] sm:$0xff] }
  0x46   : > { %276 = vst.msk [vmem:[#allocation2 + $0x1a0] sm:$0xff] %vm222_vm0, %v2857_v0  ;;  %311 = vst.msk [vmem:[#allocation2 + $0x19] sm:$0xff] %vm222_vm0, %v278_v1  ;;  %v303_v34 = vld [vmem:[%s3044_s29 + $0xc8] sm:$0xff]  ;;  %v304_v35 = vld [vmem:[%s3044_s29 + $0xd0] sm:$0xff] }
  0x47   : > { %226 = vst.msk [vmem:[#allocation2 + $0x10] sm:$0x3] %vm225_vm1, %v2857_v0  ;;  %229 = vst.msk [vmem:[#allocation2 + $0x28] sm:$0x3] %vm225_vm1, %v2857_v0  ;;  %v305_v36 = vld [vmem:[%s3044_s29 + $0xd8] sm:$0xff]  ;;  %v306_v37 = vld [vmem:[%s3044_s29 + $0xe0] sm:$0xff] }
  0x48   : > { %232 = vst.msk [vmem:[#allocation2 + $0x40] sm:$0x3] %vm225_vm1, %v2857_v0  ;;  %235 = vst.msk [vmem:[#allocation2 + $0x58] sm:$0x3] %vm225_vm1, %v2857_v0  ;;  %v307_v39 = vld [vmem:[%s3044_s29 + $0xe8] sm:$0xff]  ;;  %v343_v45 = vld [vmem:[#allocation2] sm:$0xff] }
  0x49   : > { %238 = vst.msk [vmem:[#allocation2 + $0x70] sm:$0x3] %vm225_vm1, %v2857_v0  ;;  %241 = vst.msk [vmem:[#allocation2 + $0x88] sm:$0x3] %vm225_vm1, %v2857_v0  ;;  %v344_v48 = vld [vmem:[#allocation2 + $0x8] sm:$0xff] }
  0x4a   : > { %244 = vst.msk [vmem:[#allocation2 + $0xa0] sm:$0x3] %vm225_vm1, %v2857_v0  ;;  %247 = vst.msk [vmem:[#allocation2 + $0xb8] sm:$0x3] %vm225_vm1, %v2857_v0 }
  0x4b   : > { %250 = vst.msk [vmem:[#allocation2 + $0xd0] sm:$0x3] %vm225_vm1, %v2857_v0  ;;  %253 = vst.msk [vmem:[#allocation2 + $0xe8] sm:$0x3] %vm225_vm1, %v2857_v0 }
  0x4c   : > { %256 = vst.msk [vmem:[#allocation2 + $0x100] sm:$0x3] %vm225_vm1, %v2857_v0  ;;  %259 = vst.msk [vmem:[#allocation2 + $0x118] sm:$0x3] %vm225_vm1, %v2857_v0 }
  0x4d   : > { %262 = vst.msk [vmem:[#allocation2 + $0x130] sm:$0x3] %vm225_vm1, %v2857_v0  ;;  %265 = vst.msk [vmem:[#allocation2 + $0x148] sm:$0x3] %vm225_vm1, %v2857_v0  ;;  %v3089_v25 = vld [vmem:[#allocation2 + $0x19] sm:$0xff] }
  0x4e   : > { %268 = vst.msk [vmem:[#allocation2 + $0x160] sm:$0x3] %vm225_vm1, %v2857_v0  ;;  %271 = vst.msk [vmem:[#allocation2 + $0x178] sm:$0x3] %vm225_vm1, %v2857_v0  ;;  %v408_v7 = vld [vmem:[#allocation2 + $0x9] sm:$0xff]  ;;  %475 = vrot.lane.b32.xlu1 %v3089_v25, %s2858_s30  ;;  %v3131_v46 = vld [vmem:[#allocation2 + $0x18] sm:$0xff] }
  0x4f   : > { %274 = vst.msk [vmem:[#allocation2 + $0x190] sm:$0x3] %vm225_vm1, %v2857_v0  ;;  %277 = vst.msk [vmem:[#allocation2 + $0x1a8] sm:$0x3] %vm225_vm1, %v2857_v0  ;;  %473 = vrot.lane.b32.xlu0 %v408_v7, %s2858_s30 }
  0x50   : > { %312 = vst.msk [vmem:[#allocation2 + $0x21] sm:$0xff] %vm222_vm0, %v279_v2  ;;  %313 = vst.msk [vmem:[#allocation2 + $0x31] sm:$0xff] %vm222_vm0, %v280_v3 }
  0x51   : > { %314 = vst.msk [vmem:[#allocation2 + $0x39] sm:$0xff] %vm222_vm0, %v281_v5  ;;  %315 = vst.msk [vmem:[#allocation2 + $0x49] sm:$0xff] %vm222_vm0, %v282_v6 }
  0x52   : > { %316 = vst.msk [vmem:[#allocation2 + $0x51] sm:$0xff] %vm222_vm0, %v283_v8  ;;  %317 = vst.msk [vmem:[#allocation2 + $0x61] sm:$0xff] %vm222_vm0, %v284_v9 }
  0x53   : > { %318 = vst.msk [vmem:[#allocation2 + $0x69] sm:$0xff] %vm222_vm0, %v285_v10  ;;  %319 = vst.msk [vmem:[#allocation2 + $0x79] sm:$0xff] %vm222_vm0, %v286_v11 }
  0x54   : > { %320 = vst.msk [vmem:[#allocation2 + $0x81] sm:$0xff] %vm222_vm0, %v287_v12  ;;  %321 = vst.msk [vmem:[#allocation2 + $0x91] sm:$0xff] %vm222_vm0, %v288_v13 }
  0x55   : > { %322 = vst.msk [vmem:[#allocation2 + $0x99] sm:$0xff] %vm222_vm0, %v289_v14  ;;  %323 = vst.msk [vmem:[#allocation2 + $0xa9] sm:$0xff] %vm222_vm0, %v290_v15 }
  0x56   : > { %324 = vst.msk [vmem:[#allocation2 + $0xb1] sm:$0xff] %vm222_vm0, %v291_v16  ;;  %325 = vst.msk [vmem:[#allocation2 + $0xc1] sm:$0xff] %vm222_vm0, %v292_v17 }
  0x57   : > { %326 = vst.msk [vmem:[#allocation2 + $0xc9] sm:$0xff] %vm222_vm0, %v293_v18  ;;  %327 = vst.msk [vmem:[#allocation2 + $0xd9] sm:$0xff] %vm222_vm0, %v294_v19  ;;  %v3091_v26 = vld [vmem:[#allocation2 + $0x31] sm:$0xff]  ;;  %v3099_v28 = vld [vmem:[#allocation2 + $0x21] sm:$0xff] }
  0x58   : > { %328 = vst.msk [vmem:[#allocation2 + $0xe1] sm:$0xff] %vm222_vm0, %v295_v20  ;;  %329 = vst.msk [vmem:[#allocation2 + $0xf1] sm:$0xff] %vm222_vm0, %v296_v21  ;;  %479 = vrot.lane.b32.xlu0 %v3091_v26, %s2858_s30  ;;  %v413_v30 = vld [vmem:[#allocation2 + $0x49] sm:$0xff]  ;;  %477 = vrot.lane.b32.xlu1 %v3099_v28, %s2858_s30  ;;  %v3108_v31 = vld [vmem:[#allocation2 + $0x39] sm:$0xff] }
  0x59   : > { %330 = vst.msk [vmem:[#allocation2 + $0xf9] sm:$0xff] %vm222_vm0, %v297_v22  ;;  %331 = vst.msk [vmem:[#allocation2 + $0x109] sm:$0xff] %vm222_vm0, %v298_v23  ;;  %v415_v32 = vld [vmem:[#allocation2 + $0x61] sm:$0xff]  ;;  %v414_v38 = vld [vmem:[#allocation2 + $0x51] sm:$0xff] }
  0x5a   : > { %332 = vst.msk [vmem:[#allocation2 + $0x111] sm:$0xff] %vm222_vm0, %v299_v24  ;;  %333 = vst.msk [vmem:[#allocation2 + $0x121] sm:$0xff] %vm222_vm0, %v300_v27  ;;  %v417_v40 = vld [vmem:[#allocation2 + $0x79] sm:$0xff]  ;;  %v416_v41 = vld [vmem:[#allocation2 + $0x69] sm:$0xff] }
  0x5b   : > { %334 = vst.msk [vmem:[#allocation2 + $0x129] sm:$0xff] %vm222_vm0, %v301_v29  ;;  %335 = vst.msk [vmem:[#allocation2 + $0x139] sm:$0xff] %vm222_vm0, %v302_v33  ;;  %v419_v42 = vld [vmem:[#allocation2 + $0x91] sm:$0xff]  ;;  %v418_v43 = vld [vmem:[#allocation2 + $0x81] sm:$0xff] }
  0x5c   : > { %483 = vrot.lane.b32.xlu0 %v413_v30, %s2858_s30  ;;  %481 = vrot.lane.b32.xlu1 %v3108_v31, %s2858_s30  ;;  %336 = vst.msk [vmem:[#allocation2 + $0x141] sm:$0xff] %vm222_vm0, %v303_v34  ;;  %337 = vst.msk [vmem:[#allocation2 + $0x151] sm:$0xff] %vm222_vm0, %v304_v35  ;;  %v421_v44 = vld [vmem:[#allocation2 + $0xa9] sm:$0xff]  ;;  %v420_v47 = vld [vmem:[#allocation2 + $0x99] sm:$0xff] }
  0x5d   : > { %338 = vst.msk [vmem:[#allocation2 + $0x159] sm:$0xff] %vm222_vm0, %v305_v36  ;;  %339 = vst.msk [vmem:[#allocation2 + $0x169] sm:$0xff] %vm222_vm0, %v306_v37  ;;  %v423_v49 = vld [vmem:[#allocation2 + $0xc1] sm:$0xff]  ;;  %v422_v51 = vld [vmem:[#allocation2 + $0xb1] sm:$0xff] }
  0x5e   : > { %340 = vst.msk [vmem:[#allocation2 + $0x171] sm:$0xff] %vm222_vm0, %v307_v39  ;;  %375 = vst.msk [vmem:[#allocation3] sm:$0xff] %vm222_vm0, %v343_v45  ;;  %v3138_v50 = vld [vmem:[#allocation2 + $0x20] sm:$0xff]  ;;  %v3142_v52 = vld [vmem:[#allocation2 + $0x30] sm:$0xff] }
  0x5f   : > { %377 = vst.msk [vmem:[#allocation3 + $0x10] sm:$0xff] %vm222_vm0, %v3131_v46  ;;  %376 = vst.msk [vmem:[#allocation3 + $0x8] sm:$0xff] %vm222_vm0, %v344_v48  ;;  %v3144_v53 = vld [vmem:[#allocation2 + $0x38] sm:$0xff]  ;;  %v3153_v55 = vld [vmem:[#allocation2 + $0x48] sm:$0xff] }
  0x60   : > { %487 = vrot.lane.b32.xlu0 %v415_v32, %s2858_s30  ;;  %485 = vrot.lane.b32.xlu1 %v414_v38, %s2858_s30  ;;  %378 = vst.msk [vmem:[#allocation3 + $0x18] sm:$0xff] %vm222_vm0, %v3138_v50  ;;  %v3147_v54 = vld [vmem:[#allocation2 + $0xd9] sm:$0xff]  ;;  %379 = vst.msk [vmem:[#allocation3 + $0x20] sm:$0xff] %vm222_vm0, %v3142_v52  ;;  %v3155_v56 = vld [vmem:[#allocation2 + $0x50] sm:$0xff] }
  0x61   : > { %380 = vst.msk [vmem:[#allocation3 + $0x28] sm:$0xff] %vm222_vm0, %v3144_v53  ;;  %381 = vst.msk [vmem:[#allocation3 + $0x30] sm:$0xff] %vm222_vm0, %v3153_v55  ;;  %v3162_v57 = vld [vmem:[#allocation2 + $0x60] sm:$0xff]  ;;  %v3164_v58 = vld [vmem:[#allocation2 + $0x68] sm:$0xff] }
  0x62   : > { %382 = vst.msk [vmem:[#allocation3 + $0x38] sm:$0xff] %vm222_vm0, %v3155_v56  ;;  %v3166_v59 = vld [vmem:[#allocation2 + $0x78] sm:$0xff]  ;;  %383 = vst.msk [vmem:[#allocation3 + $0x40] sm:$0xff] %vm222_vm0, %v3162_v57  ;;  %v3174_v60 = vld [vmem:[#allocation2 + $0x80] sm:$0xff] }
  0x63   : > { %384 = vst.msk [vmem:[#allocation3 + $0x48] sm:$0xff] %vm222_vm0, %v3164_v58  ;;  %385 = vst.msk [vmem:[#allocation3 + $0x50] sm:$0xff] %vm222_vm0, %v3166_v59  ;;  %v3176_v61 = vld [vmem:[#allocation2 + $0x90] sm:$0xff]  ;;  %v3178_v62 = vld [vmem:[#allocation2 + $0x98] sm:$0xff] }
  0x64   : > { %491 = vrot.lane.b32.xlu0 %v417_v40, %s2858_s30  ;;  %489 = vrot.lane.b32.xlu1 %v416_v41, %s2858_s30  ;;  %v424_v63 = vld [vmem:[#allocation2 + $0xc9] sm:$0xff]  ;;  %386 = vst.msk [vmem:[#allocation3 + $0x58] sm:$0xff] %vm222_vm0, %v3174_v60  ;;  %387 = vst.msk [vmem:[#allocation3 + $0x60] sm:$0xff] %vm222_vm0, %v3176_v61  ;;  %v3190_v2 = vld [vmem:[#allocation2 + $0xc0] sm:$0xff] }
  0x65   : > { %388 = vst.msk [vmem:[#allocation3 + $0x68] sm:$0xff] %vm222_vm0, %v3178_v62  ;;  %v3186_v0 = vld [vmem:[#allocation2 + $0xa8] sm:$0xff]  ;;  %v3188_v1 = vld [vmem:[#allocation2 + $0xb0] sm:$0xff]  ;;  %391 = vst.msk [vmem:[#allocation3 + $0x80] sm:$0xff] %vm222_vm0, %v3190_v2 }
  0x66   : > { %389 = vst.msk [vmem:[#allocation3 + $0x70] sm:$0xff] %vm222_vm0, %v3186_v0  ;;  %390 = vst.msk [vmem:[#allocation3 + $0x78] sm:$0xff] %vm222_vm0, %v3188_v1  ;;  %v3199_v3 = vld [vmem:[#allocation2 + $0xc8] sm:$0xff]  ;;  %v3201_v4 = vld [vmem:[#allocation2 + $0xd8] sm:$0xff] }
  0x67   : > { %v3203_v5 = vld [vmem:[#allocation2 + $0xe0] sm:$0xff]  ;;  %392 = vst.msk [vmem:[#allocation3 + $0x88] sm:$0xff] %vm222_vm0, %v3199_v3  ;;  %393 = vst.msk [vmem:[#allocation3 + $0x90] sm:$0xff] %vm222_vm0, %v3201_v4  ;;  %v3213_v6 = vld [vmem:[#allocation2 + $0xf0] sm:$0xff] }
  0x68   : > { %495 = vrot.lane.b32.xlu0 %v419_v42, %s2858_s30  ;;  %493 = vrot.lane.b32.xlu1 %v418_v43, %s2858_s30  ;;  %394 = vst.msk [vmem:[#allocation3 + $0x98] sm:$0xff] %vm222_vm0, %v3203_v5  ;;  %v3215_v7 = vld [vmem:[#allocation2 + $0xf8] sm:$0xff]  ;;  %v3217_v8 = vld [vmem:[#allocation2 + $0x108] sm:$0xff]  ;;  %395 = vst.msk [vmem:[#allocation3 + $0xa0] sm:$0xff] %vm222_vm0, %v3213_v6 }
  0x69   : > { %v3219_v9 = vld [vmem:[#allocation2 + $0xf1] sm:$0xff]  ;;  %396 = vst.msk [vmem:[#allocation3 + $0xa8] sm:$0xff] %vm222_vm0, %v3215_v7  ;;  %397 = vst.msk [vmem:[#allocation3 + $0xb0] sm:$0xff] %vm222_vm0, %v3217_v8  ;;  %v3232_v11 = vld [vmem:[#allocation2 + $0x120] sm:$0xff] }
  0x6a   : > { %v3227_v10 = vld [vmem:[#allocation2 + $0x110] sm:$0xff]  ;;  %v3234_v12 = vld [vmem:[#allocation2 + $0x128] sm:$0xff]  ;;  %399 = vst.msk [vmem:[#allocation3 + $0xc0] sm:$0xff] %vm222_vm0, %v3232_v11  ;;  %v3248_v15 = vld [vmem:[#allocation2 + $0x138] sm:$0xff] }
  0x6b   : > { %398 = vst.msk [vmem:[#allocation3 + $0xb8] sm:$0xff] %vm222_vm0, %v3227_v10  ;;  %v3236_v13 = vld [vmem:[#allocation2 + $0xe1] sm:$0xff]  ;;  %400 = vst.msk [vmem:[#allocation3 + $0xc8] sm:$0xff] %vm222_vm0, %v3234_v12  ;;  %v3244_v14 = vld [vmem:[#allocation2 + $0x109] sm:$0xff] }
  0x6c   : > { %499 = vrot.lane.b32.xlu0 %v421_v44, %s2858_s30  ;;  %497 = vrot.lane.b32.xlu1 %v420_v47, %s2858_s30  ;;  %v3250_v16 = vld [vmem:[#allocation2 + $0x140] sm:$0xff]  ;;  %401 = vst.msk [vmem:[#allocation3 + $0xd0] sm:$0xff] %vm222_vm0, %v3248_v15  ;;  %v3262_v19 = vld [vmem:[#allocation2 + $0x150] sm:$0xff]  ;;  %v3264_v20 = vld [vmem:[#allocation2 + $0x158] sm:$0xff] }
  0x6d   : > { %v3252_v17 = vld [vmem:[#allocation2 + $0xf9] sm:$0xff]  ;;  %402 = vst.msk [vmem:[#allocation3 + $0xd8] sm:$0xff] %vm222_vm0, %v3250_v16  ;;  %v431_v18 = vld [vmem:[#allocation2 + $0x121] sm:$0xff]  ;;  %v3266_v21 = vld [vmem:[#allocation2 + $0x111] sm:$0xff] }
  0x6e   : > { %403 = vst.msk [vmem:[#allocation3 + $0xe0] sm:$0xff] %vm222_vm0, %v3262_v19  ;;  %404 = vst.msk [vmem:[#allocation3 + $0xe8] sm:$0xff] %vm222_vm0, %v3264_v20  ;;  %v433_v22 = vld [vmem:[#allocation2 + $0x139] sm:$0xff]  ;;  %v3275_v23 = vld [vmem:[#allocation2 + $0x168] sm:$0xff] }
  0x6f   : > { %v3277_v24 = vld [vmem:[#allocation2 + $0x170] sm:$0xff]  ;;  %405 = vst.msk [vmem:[#allocation3 + $0xf0] sm:$0xff] %vm222_vm0, %v3275_v23  ;;  %v434_v30 = vld [vmem:[#allocation2 + $0x141] sm:$0xff]  ;;  %v309_v34 = vld [vmem:[%s3044_s29 + $0xf8] sm:$0xff] }
  0x70   : > { %503 = vrot.lane.b32.xlu0 %v423_v49, %s2858_s30  ;;  %501 = vrot.lane.b32.xlu1 %v422_v51, %s2858_s30  ;;  %v432_v27 = vld [vmem:[#allocation2 + $0x129] sm:$0xff]  ;;  %406 = vst.msk [vmem:[#allocation3 + $0xf8] sm:$0xff] %vm222_vm0, %v3277_v24  ;;  %v435_v29 = vld [vmem:[#allocation2 + $0x151] sm:$0xff]  ;;  %342 = vst.msk [vmem:[#allocation2 + $0x189] sm:$0xff] %vm222_vm0, %v309_v34 }
  0x71   : > { %v437_v32 = vld [vmem:[#allocation2 + $0x169] sm:$0xff]  ;;  %v436_v35 = vld [vmem:[#allocation2 + $0x159] sm:$0xff]  ;;  %v438_v37 = vld [vmem:[#allocation2 + $0x171] sm:$0xff] }
  0x72   : > { %v308_v33 = vld [vmem:[%s3044_s29 + $0xf0] sm:$0xff]  ;;  %v600_v36 = vld [vmem:[#allocation2 + $0x2] sm:$0xff]  ;;  %v3294_v38 = vld [vmem:[#allocation2 + $0x1a] sm:$0xff] }
  0x73   : > { %341 = vst.msk [vmem:[#allocation2 + $0x181] sm:$0xff] %vm222_vm0, %v308_v33  ;;  %v601_v39 = vld [vmem:[#allocation2 + $0xa] sm:$0xff]  ;;  %v3299_v40 = vld [vmem:[#allocation2 + $0x32] sm:$0xff]  ;;  %v3302_v41 = vld [vmem:[#allocation2 + $0x22] sm:$0xff] }
  0x74   : > { %507 = vrot.lane.b32.xlu0 %v3147_v54, %s2858_s30  ;;  %505 = vrot.lane.b32.xlu1 %v424_v63, %s2858_s30  ;;  %v3306_v42 = vld [vmem:[#allocation2 + $0x4a] sm:$0xff]  ;;  %v3310_v43 = vld [vmem:[#allocation2 + $0x3a] sm:$0xff]  ;;  %v3314_v44 = vld [vmem:[#allocation2 + $0x62] sm:$0xff] }
  0x75   : > { %v3318_v45 = vld [vmem:[#allocation2 + $0x52] sm:$0xff]  ;;  %v610_v47 = vld [vmem:[#allocation2 + $0x7a] sm:$0xff]  ;;  %v609_v48 = vld [vmem:[#allocation2 + $0x6a] sm:$0xff] }
  0x76   : > { %v612_v49 = vld [vmem:[#allocation2 + $0x92] sm:$0xff]  ;;  %v611_v51 = vld [vmem:[#allocation2 + $0x82] sm:$0xff]  ;;  %v614_v63 = vld [vmem:[#allocation2 + $0xaa] sm:$0xff] }
  0x77   : > { %v3339_v33 = vld [vmem:[#allocation2 + $0xe2] sm:$0xff]  ;;  %v3343_v34 = vld [vmem:[#allocation2 + $0x10a] sm:$0xff]  ;;  %vm2689_vm6 = vmpackc.low %vm2092_vm4, %vm2866_vm5 }
  0x78   : > { %511 = vrot.lane.b32.xlu0 %v3219_v9, %s2858_s30  ;;  %509 = vrot.lane.b32.xlu1 %v3236_v13, %s2858_s30 }
  0x7c   : > { %515 = vrot.lane.b32.xlu0 %v3244_v14, %s2858_s30  ;;  %513 = vrot.lane.b32.xlu1 %v3252_v17, %s2858_s30 }
  0x80   : > { %519 = vrot.lane.b32.xlu0 %v431_v18, %s2858_s30  ;;  %517 = vrot.lane.b32.xlu1 %v3266_v21, %s2858_s30  ;;  %v613_v18 = vld [vmem:[#allocation2 + $0x9a] sm:$0xff] }
  0x84   : > { %523 = vrot.lane.b32.xlu0 %v433_v22, %s2858_s30  ;;  %521 = vrot.lane.b32.xlu1 %v432_v27, %s2858_s30  ;;  %v616_v22 = vld [vmem:[#allocation2 + $0xc2] sm:$0xff]  ;;  %v615_v27 = vld [vmem:[#allocation2 + $0xb2] sm:$0xff] }
  0x88   : > { %527 = vrot.lane.b32.xlu0 %v435_v29, %s2858_s30  ;;  %525 = vrot.lane.b32.xlu1 %v434_v30, %s2858_s30  ;;  %v3331_v29 = vld [vmem:[#allocation2 + $0xda] sm:$0xff]  ;;  %v617_v30 = vld [vmem:[#allocation2 + $0xca] sm:$0xff] }
  0x8c   : > { %531 = vrot.lane.b32.xlu0 %v437_v32, %s2858_s30  ;;  %529 = vrot.lane.b32.xlu1 %v436_v35, %s2858_s30  ;;  %v3336_v32 = vld [vmem:[#allocation2 + $0xf2] sm:$0xff]  ;;  %v3347_v35 = vld [vmem:[#allocation2 + $0xfa] sm:$0xff] }
  0x90   : > { %664 = vrot.lane.b32.xlu0 %v600_v36, %s2859_s5  ;;  %533 = vrot.lane.b32.xlu1 %v438_v37, %s2858_s30  ;;  %v3351_v36 = vld [vmem:[#allocation2 + $0x122] sm:$0xff]  ;;  %v3355_v37 = vld [vmem:[#allocation2 + $0x112] sm:$0xff] }
  0x94   : > { %668 = vrot.lane.b32.xlu0 %v3294_v38, %s2859_s5  ;;  %666 = vrot.lane.b32.xlu1 %v601_v39, %s2859_s5  ;;  %v626_v39 = vld [vmem:[#allocation2 + $0x13a] sm:$0xff] }
  0x98   : > { %672 = vrot.lane.b32.xlu0 %v3299_v40, %s2859_s5  ;;  %670 = vrot.lane.b32.xlu1 %v3302_v41, %s2859_s5 }
  0x9c   : > { %676 = vrot.lane.b32.xlu0 %v3306_v42, %s2859_s5  ;;  %674 = vrot.lane.b32.xlu1 %v3310_v43, %s2859_s5 }
  0xa0   : > { %680 = vrot.lane.b32.xlu0 %v3314_v44, %s2859_s5  ;;  %678 = vrot.lane.b32.xlu1 %v3318_v45, %s2859_s5 }
  0xa4   : > { %684 = vrot.lane.b32.xlu0 %v610_v47, %s2859_s5  ;;  %682 = vrot.lane.b32.xlu1 %v609_v48, %s2859_s5  ;;  %v3362_v48 = vld [vmem:[#allocation2 + $0x12a] sm:$0xff] }
  0xa8   : > { %688 = vrot.lane.b32.xlu0 %v612_v49, %s2859_s5  ;;  %686 = vrot.lane.b32.xlu1 %v611_v51, %s2859_s5  ;;  %v628_v49 = vld [vmem:[#allocation2 + $0x152] sm:$0xff] }
  0xac   : > { %692 = vrot.lane.b32.xlu0 %v614_v63, %s2859_s5  ;;  %690 = vrot.lane.b32.xlu1 %v613_v18, %s2859_s5  ;;  %v627_v63 = vld [vmem:[#allocation2 + $0x142] sm:$0xff] }
  0xaf   : > { %v472_v47 = vpop.permute.xlu0 %471 }
  0xb0   : > { %696 = vrot.lane.b32.xlu0 %v616_v22, %s2859_s5  ;;  %694 = vrot.lane.b32.xlu1 %v615_v27, %s2859_s5  ;;  %568 = vst.msk [vmem:[#allocation3] sm:$0xff] %vm567_vm2, %v472_v47  ;;  %v630_v22 = vld [vmem:[#allocation2 + $0x16a] sm:$0xff] }
  0xb4   : > { %700 = vrot.lane.b32.xlu0 %v3331_v29, %s2859_s5  ;;  %698 = vrot.lane.b32.xlu1 %v617_v30, %s2859_s5  ;;  %v629_v30 = vld [vmem:[#allocation2 + $0x15a] sm:$0xff] }
  0xb8   : > { %704 = vrot.lane.b32.xlu0 %v3336_v32, %s2859_s5  ;;  %702 = vrot.lane.b32.xlu1 %v3339_v33, %s2859_s5 }
  0xbc   : > { %708 = vrot.lane.b32.xlu0 %v3343_v34, %s2859_s5  ;;  %706 = vrot.lane.b32.xlu1 %v3347_v35, %s2859_s5 }
  0xc0   : > { %712 = vrot.lane.b32.xlu0 %v3351_v36, %s2859_s5  ;;  %710 = vrot.lane.b32.xlu1 %v3355_v37, %s2859_s5  ;;  %v476_v18 = vpop.permute.xlu1 %475 }
  0xc1   : > { %v474_v51 = vpop.permute.xlu0 %473  ;;  %570 = vst.msk [vmem:[#allocation3 + $0x10] sm:$0xff] %vm567_vm2, %v476_v18 }
  0xc2   : > { %569 = vst.msk [vmem:[#allocation3 + $0x8] sm:$0xff] %vm567_vm2, %v474_v51 }
  0xc4   : > { %716 = vrot.lane.b32.xlu0 %v626_v39, %s2859_s5  ;;  %714 = vrot.lane.b32.xlu1 %v3362_v48, %s2859_s5 }
  0xc8   : > { %720 = vrot.lane.b32.xlu0 %v628_v49, %s2859_s5  ;;  %718 = vrot.lane.b32.xlu1 %v627_v63, %s2859_s5  ;;  %v631_v49 = vld [vmem:[#allocation2 + $0x172] sm:$0xff] }
  0xca   : > { %v480_v27 = vpop.permute.xlu0 %479  ;;  %v478_v39 = vpop.permute.xlu1 %477 }
  0xcb   : > { %572 = vst.msk [vmem:[#allocation3 + $0x20] sm:$0xff] %vm567_vm2, %v480_v27  ;;  %571 = vst.msk [vmem:[#allocation3 + $0x18] sm:$0xff] %vm567_vm2, %v478_v39 }
  0xcc   : > { %724 = vrot.lane.b32.xlu0 %v630_v22, %s2859_s5  ;;  %722 = vrot.lane.b32.xlu1 %v629_v30, %s2859_s5 }
  0xce   : > { %v484_v47 = vpop.permute.xlu0 %483  ;;  %v482_v51 = vpop.permute.xlu1 %481 }
  0xcf   : > { %574 = vst.msk [vmem:[#allocation3 + $0x30] sm:$0xff] %vm567_vm2, %v484_v47  ;;  %573 = vst.msk [vmem:[#allocation3 + $0x28] sm:$0xff] %vm567_vm2, %v482_v51 }
  0xd0   : > { %857 = vrot.lane.b32.xlu0 %v3131_v46, %s2860_s6  ;;  %726 = vrot.lane.b32.xlu1 %v631_v49, %s2859_s5  ;;  %s202_s5 = sand.u32 1, %s2846_s16  }
  0xd1   : > { %s4135_s19 = scalar_lea.sflag [#allocation6], %s202_s5 }
  0xd2   : > { %v488_v63 = vpop.permute.xlu0 %487  ;;  %v486_v18 = vpop.permute.xlu1 %485 }
  0xd3   : > { %576 = vst.msk [vmem:[#allocation3 + $0x40] sm:$0xff] %vm567_vm2, %v488_v63  ;;  %575 = vst.msk [vmem:[#allocation3 + $0x38] sm:$0xff] %vm567_vm2, %v486_v18 }
  0xd4   : > { %861 = vrot.lane.b32.xlu0 %v3142_v52, %s2860_s6  ;;  %859 = vrot.lane.b32.xlu1 %v3138_v50, %s2860_s6 }
  0xd6   : > { %v492_v22 = vpop.permute.xlu0 %491  ;;  %v490_v46 = vpop.permute.xlu1 %489 }
  0xd7   : > { %578 = vst.msk [vmem:[#allocation3 + $0x50] sm:$0xff] %vm567_vm2, %v492_v22  ;;  %577 = vst.msk [vmem:[#allocation3 + $0x48] sm:$0xff] %vm567_vm2, %v490_v46 }
  0xd8   : > { %865 = vrot.lane.b32.xlu0 %v3153_v55, %s2860_s6  ;;  %863 = vrot.lane.b32.xlu1 %v3144_v53, %s2860_s6 }
  0xda   : > { %v496_v27 = vpop.permute.xlu0 %495  ;;  %v494_v30 = vpop.permute.xlu1 %493 }
  0xdb   : > { %580 = vst.msk [vmem:[#allocation3 + $0x60] sm:$0xff] %vm567_vm2, %v496_v27  ;;  %579 = vst.msk [vmem:[#allocation3 + $0x58] sm:$0xff] %vm567_vm2, %v494_v30 }
  0xdc   : > { %869 = vrot.lane.b32.xlu0 %v3162_v57, %s2860_s6  ;;  %867 = vrot.lane.b32.xlu1 %v3155_v56, %s2860_s6 }
  0xde   : > { %v500_v50 = vpop.permute.xlu0 %499  ;;  %v498_v39 = vpop.permute.xlu1 %497 }
  0xdf   : > { %582 = vst.msk [vmem:[#allocation3 + $0x70] sm:$0xff] %vm567_vm2, %v500_v50  ;;  %581 = vst.msk [vmem:[#allocation3 + $0x68] sm:$0xff] %vm567_vm2, %v498_v39 }
  0xe0   : > { %873 = vrot.lane.b32.xlu0 %v3166_v59, %s2860_s6  ;;  %871 = vrot.lane.b32.xlu1 %v3164_v58, %s2860_s6 }
  0xe2   : > { %v504_v47 = vpop.permute.xlu0 %503  ;;  %v502_v49 = vpop.permute.xlu1 %501 }
  0xe3   : > { %584 = vst.msk [vmem:[#allocation3 + $0x80] sm:$0xff] %vm567_vm2, %v504_v47  ;;  %583 = vst.msk [vmem:[#allocation3 + $0x78] sm:$0xff] %vm567_vm2, %v502_v49  ;;  %v823_v49 = vld [vmem:[#allocation2 + $0x180] sm:$0xff] }
  0xe4   : > { %877 = vrot.lane.b32.xlu0 %v3176_v61, %s2860_s6  ;;  %875 = vrot.lane.b32.xlu1 %v3174_v60, %s2860_s6 }
  0xe6   : > { %v508_v51 = vpop.permute.xlu0 %507  ;;  %v506_v63 = vpop.permute.xlu1 %505 }
  0xe7   : > { %586 = vst.msk [vmem:[#allocation3 + $0x90] sm:$0xff] %vm567_vm2, %v508_v51  ;;  %585 = vst.msk [vmem:[#allocation3 + $0x88] sm:$0xff] %vm567_vm2, %v506_v63 }
  0xe8   : > { %881 = vrot.lane.b32.xlu0 %v3186_v0, %s2860_s6  ;;  %879 = vrot.lane.b32.xlu1 %v3178_v62, %s2860_s6 }
  0xea   : > { %v512_v18 = vpop.permute.xlu0 %511  ;;  %v510_v61 = vpop.permute.xlu1 %509 }
  0xeb   : > { %588 = vst.msk [vmem:[#allocation3 + $0xa0] sm:$0xff] %vm567_vm2, %v512_v18  ;;  %587 = vst.msk [vmem:[#allocation3 + $0x98] sm:$0xff] %vm567_vm2, %v510_v61 }
  0xec   : > { %885 = vrot.lane.b32.xlu0 %v3190_v2, %s2860_s6  ;;  %883 = vrot.lane.b32.xlu1 %v3188_v1, %s2860_s6 }
  0xee   : > { %v516_v22 = vpop.permute.xlu0 %515  ;;  %v514_v0 = vpop.permute.xlu1 %513 }
  0xef   : > { %590 = vst.msk [vmem:[#allocation3 + $0xb0] sm:$0xff] %vm567_vm2, %v516_v22  ;;  %589 = vst.msk [vmem:[#allocation3 + $0xa8] sm:$0xff] %vm567_vm2, %v514_v0 }
  0xf0   : > { %889 = vrot.lane.b32.xlu0 %v3201_v4, %s2860_s6  ;;  %887 = vrot.lane.b32.xlu1 %v3199_v3, %s2860_s6 }
  0xf2   : > { %v520_v62 = vpop.permute.xlu0 %519  ;;  %v518_v2 = vpop.permute.xlu1 %517 }
  0xf3   : > { %592 = vst.msk [vmem:[#allocation3 + $0xc0] sm:$0xff] %vm567_vm2, %v520_v62  ;;  %591 = vst.msk [vmem:[#allocation3 + $0xb8] sm:$0xff] %vm567_vm2, %v518_v2 }
  0xf4   : > { %893 = vrot.lane.b32.xlu0 %v3213_v6, %s2860_s6  ;;  %891 = vrot.lane.b32.xlu1 %v3203_v5, %s2860_s6 }
  0xf6   : > { %v524_v1 = vpop.permute.xlu0 %523  ;;  %v522_v4 = vpop.permute.xlu1 %521 }
  0xf7   : > { %594 = vst.msk [vmem:[#allocation3 + $0xd0] sm:$0xff] %vm567_vm2, %v524_v1  ;;  %593 = vst.msk [vmem:[#allocation3 + $0xc8] sm:$0xff] %vm567_vm2, %v522_v4  ;;  %v1984_v4 = vld [vmem:[%s4179_s1] sm:$0xff] }
  0xf8   : > { %897 = vrot.lane.b32.xlu0 %v3217_v8, %s2860_s6  ;;  %895 = vrot.lane.b32.xlu1 %v3215_v7, %s2860_s6 }
  0xfa   : > { %v528_v3 = vpop.permute.xlu0 %527  ;;  %v526_v46 = vpop.permute.xlu1 %525 }
  0xfb   : > { %596 = vst.msk [vmem:[#allocation3 + $0xe0] sm:$0xff] %vm567_vm2, %v528_v3  ;;  %595 = vst.msk [vmem:[#allocation3 + $0xd8] sm:$0xff] %vm567_vm2, %v526_v46  ;;  %v1985_v3 = vld [vmem:[%s4179_s1 + $0x8] sm:$0xff] }
  0xfc   : > { %901 = vrot.lane.b32.xlu0 %v3232_v11, %s2860_s6  ;;  %899 = vrot.lane.b32.xlu1 %v3227_v10, %s2860_s6 }
  0xfe   : > { %v532_v5 = vpop.permute.xlu0 %531  ;;  %v530_v27 = vpop.permute.xlu1 %529 }
  0xff   : > { %598 = vst.msk [vmem:[#allocation3 + $0xf0] sm:$0xff] %vm567_vm2, %v532_v5  ;;  %597 = vst.msk [vmem:[#allocation3 + $0xe8] sm:$0xff] %vm567_vm2, %v530_v27  ;;  %v1986_v27 = vld [vmem:[%s4179_s1 + $0x10] sm:$0xff] }
 0x100   : > { %905 = vrot.lane.b32.xlu0 %v3248_v15, %s2860_s6  ;;  %903 = vrot.lane.b32.xlu1 %v3234_v12, %s2860_s6 }
 0x102   : > { %v665_v30 = vpop.permute.xlu0 %664  ;;  %v534_v50 = vpop.permute.xlu1 %533 }
 0x103   : > { %761 = vst.msk [vmem:[#allocation3] sm:$0xff] %vm760_vm3, %v665_v30  ;;  %v1987_v30 = vld [vmem:[%s4179_s1 + $0x18] sm:$0x7] }
 0x104   : > { %909 = vrot.lane.b32.xlu0 %v3262_v19, %s2860_s6  ;;  %599 = vst.msk [vmem:[#allocation3 + $0xf8] sm:$0xff] %vm567_vm2, %v534_v50  ;;  %907 = vrot.lane.b32.xlu1 %v3250_v16, %s2860_s6 }
 0x106   : > { %v669_v39 = vpop.permute.xlu0 %668  ;;  %v667_v47 = vpop.permute.xlu1 %666 }
 0x107   : > { %763 = vst.msk [vmem:[#allocation3 + $0x10] sm:$0xff] %vm760_vm3, %v669_v39  ;;  %762 = vst.msk [vmem:[#allocation3 + $0x8] sm:$0xff] %vm760_vm3, %v667_v47 }
 0x108   : > { %913 = vrot.lane.b32.xlu0 %v3275_v23, %s2860_s6  ;;  %911 = vrot.lane.b32.xlu1 %v3264_v20, %s2860_s6  ;;  %v824_v23 = vld [vmem:[#allocation2 + $0x188] sm:$0xff] }
 0x10a   : > { %v673_v51 = vpop.permute.xlu0 %672  ;;  %v671_v63 = vpop.permute.xlu1 %670 }
 0x10b   : > { %765 = vst.msk [vmem:[#allocation3 + $0x20] sm:$0xff] %vm760_vm3, %v673_v51  ;;  %764 = vst.msk [vmem:[#allocation3 + $0x18] sm:$0xff] %vm760_vm3, %v671_v63  ;;  %v1568_v63 = vld [vmem:[#allocation2 + $0x49] sm:$0xff] }
 0x10c   : > { %917 = vrot.lane.b32.xlu0 %v823_v49, %s2860_s6  ;;  %915 = vrot.lane.b32.xlu1 %v3277_v24, %s2860_s6 }
 0x10e   : > { %v677_v18 = vpop.permute.xlu0 %676  ;;  %v675_v61 = vpop.permute.xlu1 %674 }
 0x10f   : > { %767 = vst.msk [vmem:[#allocation3 + $0x30] sm:$0xff] %vm760_vm3, %v677_v18  ;;  %766 = vst.msk [vmem:[#allocation3 + $0x28] sm:$0xff] %vm760_vm3, %v675_v61 }
 0x110   : > { %1050 = vrot.lane.b32.xlu0 %v3089_v25, %s2861_s7  ;;  %919 = vrot.lane.b32.xlu1 %v824_v23, %s2860_s6  ;;  %v1569_v23 = vld [vmem:[#allocation2 + $0x51] sm:$0xff]  ;;  %s2545_s6 = sshll.u32 %s202_s5, 8 }
 0x112   : > { %v681_v22 = vpop.permute.xlu0 %680  ;;  %v679_v0 = vpop.permute.xlu1 %678 }
 0x113   : > { %769 = vst.msk [vmem:[#allocation3 + $0x40] sm:$0xff] %vm760_vm3, %v681_v22  ;;  %768 = vst.msk [vmem:[#allocation3 + $0x38] sm:$0xff] %vm760_vm3, %v679_v0 }
 0x114   : > { %1082 = vrot.lane.b32.xlu0 %v3147_v54, %s2861_s7  ;;  %1052 = vrot.lane.b32.xlu1 %v3099_v28, %s2861_s7 }
 0x116   : > { %v685_v24 = vpop.permute.xlu0 %684  ;;  %v683_v25 = vpop.permute.xlu1 %682 }
 0x117   : > { %771 = vst.msk [vmem:[#allocation3 + $0x50] sm:$0xff] %vm760_vm3, %v685_v24  ;;  %770 = vst.msk [vmem:[#allocation3 + $0x48] sm:$0xff] %vm760_vm3, %v683_v25 }
 0x118   : > { %1243 = vrot.lane.b32.xlu0 %v3294_v38, %s2862_s8  ;;  %1084 = vrot.lane.b32.xlu1 %v3236_v13, %s2861_s7 }
 0x11a   : > { %v689_v62 = vpop.permute.xlu0 %688  ;;  %v687_v54 = vpop.permute.xlu1 %686 }
 0x11b   : > { %773 = vst.msk [vmem:[#allocation3 + $0x60] sm:$0xff] %vm760_vm3, %v689_v62  ;;  %772 = vst.msk [vmem:[#allocation3 + $0x58] sm:$0xff] %vm760_vm3, %v687_v54 }
 0x11c   : > { %1245 = vrot.lane.b32.xlu0 %v3302_v41, %s2862_s8  ;;  %1275 = vrot.lane.b32.xlu1 %v3331_v29, %s2862_s8 }
 0x11e   : > { %v693_v28 = vpop.permute.xlu0 %692  ;;  %v691_v38 = vpop.permute.xlu1 %690 }
 0x11f   : > { %775 = vst.msk [vmem:[#allocation3 + $0x70] sm:$0xff] %vm760_vm3, %v693_v28  ;;  %774 = vst.msk [vmem:[#allocation3 + $0x68] sm:$0xff] %vm760_vm3, %v691_v38 }
 0x120   : > { %1437 = vrot.lane.b32.xlu0 %v3142_v52, %s2863_s9  ;;  %1277 = vrot.lane.b32.xlu1 %v3339_v33, %s2862_s8 }
 0x122   : > { %v697_v13 = vpop.permute.xlu0 %696  ;;  %v695_v41 = vpop.permute.xlu1 %694 }
 0x123   : > { %777 = vst.msk [vmem:[#allocation3 + $0x80] sm:$0xff] %vm760_vm3, %v697_v13  ;;  %776 = vst.msk [vmem:[#allocation3 + $0x78] sm:$0xff] %vm760_vm3, %v695_v41  ;;  %v1570_v13 = vld [vmem:[#allocation2 + $0x61] sm:$0xff] }
 0x124   : > { %1439 = vrot.lane.b32.xlu0 %v3144_v53, %s2863_s9  ;;  %1469 = vrot.lane.b32.xlu1 %v3213_v6, %s2863_s9 }
 0x126   : > { %v701_v29 = vpop.permute.xlu0 %700  ;;  %v699_v52 = vpop.permute.xlu1 %698 }
 0x127   : > { %779 = vst.msk [vmem:[#allocation3 + $0x90] sm:$0xff] %vm760_vm3, %v701_v29  ;;  %778 = vst.msk [vmem:[#allocation3 + $0x88] sm:$0xff] %vm760_vm3, %v699_v52  ;;  %v1571_v52 = vld [vmem:[#allocation2 + $0x69] sm:$0xff] }
 0x128   : > { %1630 = vrot.lane.b32.xlu0 %v3091_v26, %s2864_s10  ;;  %1471 = vrot.lane.b32.xlu1 %v3215_v7, %s2863_s9 }
 0x12a   : > { %v705_v33 = vpop.permute.xlu0 %704  ;;  %v703_v53 = vpop.permute.xlu1 %702 }
 0x12b   : > { %781 = vst.msk [vmem:[#allocation3 + $0xa0] sm:$0xff] %vm760_vm3, %v705_v33  ;;  %780 = vst.msk [vmem:[#allocation3 + $0x98] sm:$0xff] %vm760_vm3, %v703_v53  ;;  %v1587_v53 = vld [vmem:[#allocation2 + $0x129] sm:$0xff] }
 0x12c   : > { %1054 = vrot.lane.b32.xlu0 %v3091_v26, %s2861_s7  ;;  %1662 = vrot.lane.b32.xlu1 %v3219_v9, %s2864_s10 }
 0x12e   : > { %v709_v6 = vpop.permute.xlu0 %708  ;;  %v707_v2 = vpop.permute.xlu1 %706 }
 0x12f   : > { %783 = vst.msk [vmem:[#allocation3 + $0xb0] sm:$0xff] %vm760_vm3, %v709_v6  ;;  %782 = vst.msk [vmem:[#allocation3 + $0xa8] sm:$0xff] %vm760_vm3, %v707_v2 }
 0x130   : > { %1632 = vrot.lane.b32.xlu0 %v3108_v31, %s2864_s10  ;;  %1086 = vrot.lane.b32.xlu1 %v3219_v9, %s2861_s7  ;;  %v2684_v9 = vpack.c.bf16 %v1985_v3, %v1984_v4  ;;  %v1764_v4 = vld [vmem:[#allocation2 + $0x6a] sm:$0xff] }
 0x132   : > { %v713_v7 = vpop.permute.xlu0 %712  ;;  %v711_v26 = vpop.permute.xlu1 %710  ;;  %2685 = vmatprep.subr.bf16.mxu0 %v2684_v9  ;;  %2694 = vmatprep.subr.bf16.mxu1 %v2684_v9 }
 0x133   : > { %785 = vst.msk [vmem:[#allocation3 + $0xc0] sm:$0xff] %vm760_vm3, %v713_v7  ;;  %784 = vst.msk [vmem:[#allocation3 + $0xb8] sm:$0xff] %vm760_vm3, %v711_v26  ;;  %2687 = vmatpush3.bf16.msra.mxu0 %v2684_v9  ;;  %2696 = vmatpush3.bf16.msra.mxu1 %v2684_v9  ;;  %v1185_v26 = vld [vmem:[#allocation2 + $0x62] sm:$0xff] }
 0x134   : > { %1823 = vrot.lane.b32.xlu0 %v3299_v40, %s2865_s11  ;;  %1664 = vrot.lane.b32.xlu1 %v3252_v17, %s2864_s10 }
 0x136   : > { %v717_v1 = vpop.permute.xlu0 %716  ;;  %v715_v46 = vpop.permute.xlu1 %714 }
 0x137   : > { %787 = vst.msk [vmem:[#allocation3 + $0xd0] sm:$0xff] %vm760_vm3, %v717_v1  ;;  %786 = vst.msk [vmem:[#allocation3 + $0xc8] sm:$0xff] %vm760_vm3, %v715_v46 }
 0x138   : > { %1056 = vrot.lane.b32.xlu0 %v3108_v31, %s2861_s7  ;;  %1855 = vrot.lane.b32.xlu1 %v3336_v32, %s2865_s11  ;;  %v2688_v31 = vpack.c.bf16 %v1987_v30, %v1986_v27 }
 0x13a   : > { %v721_v5 = vpop.permute.xlu0 %720  ;;  %v719_v50 = vpop.permute.xlu1 %718  ;;  %2690 = vmatprep.subr.msk.bf16.mxu0 %vm2689_vm6, %v2688_v31  ;;  %2695 = vmatprep.subr.msk.bf16.mxu1 %vm2689_vm6, %v2688_v31 }
 0x13b   : > { %789 = vst.msk [vmem:[#allocation3 + $0xe0] sm:$0xff] %vm760_vm3, %v721_v5  ;;  %788 = vst.msk [vmem:[#allocation3 + $0xd8] sm:$0xff] %vm760_vm3, %v719_v50  ;;  %2693 = vmatpush3.bf16.msk.msra.mxu0 %vm2689_vm6, %v2688_v31  ;;  %2697 = vmatpush3.bf16.msk.msra.mxu1 %vm2689_vm6, %v2688_v31  ;;  %v1572_v50 = vld [vmem:[#allocation2 + $0x79] sm:$0xff] }
 0x13c   : > { %1247 = vrot.lane.b32.xlu0 %v3299_v40, %s2862_s8  ;;  %1088 = vrot.lane.b32.xlu1 %v3252_v17, %s2861_s7 }
 0x13e   : > { %v725_v39 = vpop.permute.xlu0 %724  ;;  %v723_v40 = vpop.permute.xlu1 %722 }
 0x13f   : > { %791 = vst.msk [vmem:[#allocation3 + $0xf0] sm:$0xff] %vm760_vm3, %v725_v39  ;;  %790 = vst.msk [vmem:[#allocation3 + $0xe8] sm:$0xff] %vm760_vm3, %v723_v40 }
 0x140   : > { %1825 = vrot.lane.b32.xlu0 %v3310_v43, %s2865_s11  ;;  %1279 = vrot.lane.b32.xlu1 %v3336_v32, %s2862_s8 }
 0x142   : > { %v858_v47 = vpop.permute.xlu0 %857  ;;  %v727_v49 = vpop.permute.xlu1 %726 }
 0x143   : > { %954 = vst.msk [vmem:[#allocation3] sm:$0xff] %vm953_vm7, %v858_v47  ;;  %v1573_v47 = vld [vmem:[#allocation2 + $0x81] sm:$0xff] }
 0x144   : > { %1249 = vrot.lane.b32.xlu0 %v3310_v43, %s2862_s8  ;;  %792 = vst.msk [vmem:[#allocation3 + $0xf8] sm:$0xff] %vm760_vm3, %v727_v49  ;;  %1857 = vrot.lane.b32.xlu1 %v3347_v35, %s2865_s11 }
 0x146   : > { %v862_v17 = vpop.permute.xlu0 %861  ;;  %v860_v51 = vpop.permute.xlu1 %859 }
 0x147   : > { %956 = vst.msk [vmem:[#allocation3 + $0x10] sm:$0xff] %vm953_vm7, %v862_v17  ;;  %955 = vst.msk [vmem:[#allocation3 + $0x8] sm:$0xff] %vm953_vm7, %v860_v51  ;;  %v1765_v17 = vld [vmem:[#allocation2 + $0x7a] sm:$0xff] }
 0x148   : > { %1441 = vrot.lane.b32.xlu0 %v3153_v55, %s2863_s9  ;;  %1281 = vrot.lane.b32.xlu1 %v3347_v35, %s2862_s8  ;;  %v1589_v51 = vld [vmem:[#allocation2 + $0x141] sm:$0xff] }
 0x14a   : > { %v866_v32 = vpop.permute.xlu0 %865  ;;  %v864_v43 = vpop.permute.xlu1 %863 }
 0x14b   : > { %958 = vst.msk [vmem:[#allocation3 + $0x20] sm:$0xff] %vm953_vm7, %v866_v32  ;;  %957 = vst.msk [vmem:[#allocation3 + $0x18] sm:$0xff] %vm953_vm7, %v864_v43 }
 0x14c   : > { %1443 = vrot.lane.b32.xlu0 %v3155_v56, %s2863_s9  ;;  %1473 = vrot.lane.b32.xlu1 %v3217_v8, %s2863_s9 }
 0x14e   : > { %v870_v18 = vpop.permute.xlu0 %869  ;;  %v868_v55 = vpop.permute.xlu1 %867 }
 0x14f   : > { %960 = vst.msk [vmem:[#allocation3 + $0x30] sm:$0xff] %vm953_vm7, %v870_v18  ;;  %959 = vst.msk [vmem:[#allocation3 + $0x28] sm:$0xff] %vm953_vm7, %v868_v55  ;;  %v1781_v18 = vld [vmem:[#allocation2 + $0x13a] sm:$0xff] }
 0x150   : > { %1634 = vrot.lane.b32.xlu0 %v1568_v63, %s2864_s10  ;;  %1475 = vrot.lane.b32.xlu1 %v3227_v10, %s2863_s9 }
 0x152   : > { %v874_v35 = vpop.permute.xlu0 %873  ;;  %v872_v56 = vpop.permute.xlu1 %871 }
 0x153   : > { %962 = vst.msk [vmem:[#allocation3 + $0x40] sm:$0xff] %vm953_vm7, %v874_v35  ;;  %961 = vst.msk [vmem:[#allocation3 + $0x38] sm:$0xff] %vm953_vm7, %v872_v56 }
 0x154   : > { %1058 = vrot.lane.b32.xlu0 %v1568_v63, %s2861_s7  ;;  %1666 = vrot.lane.b32.xlu1 %v3244_v14, %s2864_s10 }
 0x156   : > { %v878_v8 = vpop.permute.xlu0 %877  ;;  %v876_v61 = vpop.permute.xlu1 %875 }
 0x157   : > { %964 = vst.msk [vmem:[#allocation3 + $0x50] sm:$0xff] %vm953_vm7, %v878_v8  ;;  %963 = vst.msk [vmem:[#allocation3 + $0x48] sm:$0xff] %vm953_vm7, %v876_v61  ;;  %v1766_v8 = vld [vmem:[#allocation2 + $0x82] sm:$0xff] }
 0x158   : > { %1636 = vrot.lane.b32.xlu0 %v1569_v23, %s2864_s10  ;;  %1090 = vrot.lane.b32.xlu1 %v3244_v14, %s2861_s7 }
 0x15a   : > { %v882_v10 = vpop.permute.xlu0 %881  ;;  %v880_v22 = vpop.permute.xlu1 %879 }
 0x15b   : > { %966 = vst.msk [vmem:[#allocation3 + $0x60] sm:$0xff] %vm953_vm7, %v882_v10  ;;  %965 = vst.msk [vmem:[#allocation3 + $0x58] sm:$0xff] %vm953_vm7, %v880_v22 }
 0x15c   : > { %1827 = vrot.lane.b32.xlu0 %v3306_v42, %s2865_s11  ;;  %1668 = vrot.lane.b32.xlu1 %v3266_v21, %s2864_s10 }
 0x15e   : > { %v886_v0 = vpop.permute.xlu0 %885  ;;  %v884_v24 = vpop.permute.xlu1 %883 }
 0x15f   : > { %968 = vst.msk [vmem:[#allocation3 + $0x70] sm:$0xff] %vm953_vm7, %v886_v0  ;;  %967 = vst.msk [vmem:[#allocation3 + $0x68] sm:$0xff] %vm953_vm7, %v884_v24  ;;  %v1782_v24 = vld [vmem:[#allocation2 + $0x142] sm:$0xff] }
 0x160   : > { %1060 = vrot.lane.b32.xlu0 %v1569_v23, %s2861_s7  ;;  %1859 = vrot.lane.b32.xlu1 %v3343_v34, %s2865_s11 }
 0x162   : > { %v890_v14 = vpop.permute.xlu0 %889  ;;  %v888_v25 = vpop.permute.xlu1 %887 }
 0x163   : > { %970 = vst.msk [vmem:[#allocation3 + $0x80] sm:$0xff] %vm953_vm7, %v890_v14  ;;  %969 = vst.msk [vmem:[#allocation3 + $0x78] sm:$0xff] %vm953_vm7, %v888_v25  ;;  %v1381_v25 = vld [vmem:[#allocation2 + $0x90] sm:$0xff] }
 0x164   : > { %1251 = vrot.lane.b32.xlu0 %v3306_v42, %s2862_s8  ;;  %1092 = vrot.lane.b32.xlu1 %v3266_v21, %s2861_s7 }
 0x166   : > { %v894_v62 = vpop.permute.xlu0 %893  ;;  %v892_v54 = vpop.permute.xlu1 %891 }
 0x167   : > { %972 = vst.msk [vmem:[#allocation3 + $0x90] sm:$0xff] %vm953_vm7, %v894_v62  ;;  %971 = vst.msk [vmem:[#allocation3 + $0x88] sm:$0xff] %vm953_vm7, %v892_v54 }
 0x168   : > { %1829 = vrot.lane.b32.xlu0 %v3318_v45, %s2865_s11  ;;  %1283 = vrot.lane.b32.xlu1 %v3343_v34, %s2862_s8 }
 0x16a   : > { %v898_v28 = vpop.permute.xlu0 %897  ;;  %v896_v42 = vpop.permute.xlu1 %895 }
 0x16b   : > { %974 = vst.msk [vmem:[#allocation3 + $0xa0] sm:$0xff] %vm953_vm7, %v898_v28  ;;  %973 = vst.msk [vmem:[#allocation3 + $0x98] sm:$0xff] %vm953_vm7, %v896_v42  ;;  %v1382_v42 = vld [vmem:[#allocation2 + $0x98] sm:$0xff] }
 0x16c   : > { %1253 = vrot.lane.b32.xlu0 %v3318_v45, %s2862_s8  ;;  %1861 = vrot.lane.b32.xlu1 %v3355_v37, %s2865_s11 }
 0x16e   : > { %v902_v21 = vpop.permute.xlu0 %901  ;;  %v900_v38 = vpop.permute.xlu1 %899 }
 0x16f   : > { %976 = vst.msk [vmem:[#allocation3 + $0xb0] sm:$0xff] %vm953_vm7, %v902_v21  ;;  %975 = vst.msk [vmem:[#allocation3 + $0xa8] sm:$0xff] %vm953_vm7, %v900_v38 }
 0x170   : > { %1445 = vrot.lane.b32.xlu0 %v3162_v57, %s2863_s9  ;;  %1285 = vrot.lane.b32.xlu1 %v3355_v37, %s2862_s8 }
 0x172   : > { %v906_v34 = vpop.permute.xlu0 %905  ;;  %v904_v45 = vpop.permute.xlu1 %903 }
 0x173   : > { %978 = vst.msk [vmem:[#allocation3 + $0xc0] sm:$0xff] %vm953_vm7, %v906_v34  ;;  %977 = vst.msk [vmem:[#allocation3 + $0xb8] sm:$0xff] %vm953_vm7, %v904_v45  ;;  %v1574_v34 = vld [vmem:[#allocation2 + $0x91] sm:$0xff] }
 0x174   : > { %1447 = vrot.lane.b32.xlu0 %v3164_v58, %s2863_s9  ;;  %1477 = vrot.lane.b32.xlu1 %v3232_v11, %s2863_s9  ;;  %v1586_v58 = vld [vmem:[#allocation2 + $0x121] sm:$0xff] }
 0x176   : > { %v910_v41 = vpop.permute.xlu0 %909  ;;  %v908_v57 = vpop.permute.xlu1 %907 }
 0x177   : > { %980 = vst.msk [vmem:[#allocation3 + $0xd0] sm:$0xff] %vm953_vm7, %v910_v41  ;;  %979 = vst.msk [vmem:[#allocation3 + $0xc8] sm:$0xff] %vm953_vm7, %v908_v57  ;;  %v1590_v57 = vld [vmem:[#allocation2 + $0x151] sm:$0xff] }
 0x178   : > { %1638 = vrot.lane.b32.xlu0 %v1570_v13, %s2864_s10  ;;  %1479 = vrot.lane.b32.xlu1 %v3234_v12, %s2863_s9 }
 0x17a   : > { %v914_v37 = vpop.permute.xlu0 %913  ;;  %v912_v29 = vpop.permute.xlu1 %911 }
 0x17b   : > { %982 = vst.msk [vmem:[#allocation3 + $0xe0] sm:$0xff] %vm953_vm7, %v914_v37  ;;  %981 = vst.msk [vmem:[#allocation3 + $0xd8] sm:$0xff] %vm953_vm7, %v912_v29 }
 0x17c   : > { %1062 = vrot.lane.b32.xlu0 %v1570_v13, %s2861_s7  ;;  %1670 = vrot.lane.b32.xlu1 %v1586_v58, %s2864_s10 }
 0x17e   : > { %v918_v11 = vpop.permute.xlu0 %917  ;;  %v916_v33 = vpop.permute.xlu1 %915 }
 0x17f   : > { %984 = vst.msk [vmem:[#allocation3 + $0xf0] sm:$0xff] %vm953_vm7, %v918_v11  ;;  %983 = vst.msk [vmem:[#allocation3 + $0xe8] sm:$0xff] %vm953_vm7, %v916_v33  ;;  %v1591_v11 = vld [vmem:[#allocation2 + $0x159] sm:$0xff] }
 0x180   : > { %1640 = vrot.lane.b32.xlu0 %v1571_v52, %s2864_s10  ;;  %1094 = vrot.lane.b32.xlu1 %v1586_v58, %s2861_s7  ;;  %v1575_v58 = vld [vmem:[#allocation2 + $0x99] sm:$0xff] }
 0x182   : > { %v1051_v12 = vpop.permute.xlu0 %1050  ;;  %v920_v6 = vpop.permute.xlu1 %919 }
 0x183   : > { %1147 = vst.msk [vmem:[#allocation3] sm:$0xff] %vm1146_vm8, %v1051_v12 }
 0x184   : > { %1831 = vrot.lane.b32.xlu0 %v3314_v44, %s2865_s11  ;;  %985 = vst.msk [vmem:[#allocation3 + $0xf8] sm:$0xff] %vm953_vm7, %v920_v6  ;;  %1672 = vrot.lane.b32.xlu1 %v1587_v53, %s2864_s10  ;;  %v1783_v6 = vld [vmem:[#allocation2 + $0x152] sm:$0xff] }
 0x186   : > { %v1083_v2 = vpop.permute.xlu0 %1082  ;;  %v1053_v7 = vpop.permute.xlu1 %1052 }
 0x187   : > { %1163 = vst.msk [vmem:[#allocation3 + $0x80] sm:$0xff] %vm1146_vm8, %v1083_v2  ;;  %1148 = vst.msk [vmem:[#allocation3 + $0x8] sm:$0xff] %vm1146_vm8, %v1053_v7 }
 0x188   : > { %1064 = vrot.lane.b32.xlu0 %v1571_v52, %s2861_s7  ;;  %1863 = vrot.lane.b32.xlu1 %v3351_v36, %s2865_s11  ;;  %v1767_v52 = vld [vmem:[#allocation2 + $0x92] sm:$0xff] }
 0x18a   : > { %v1244_v1 = vpop.permute.xlu0 %1243  ;;  %v1085_v44 = vpop.permute.xlu1 %1084 }
 0x18b   : > { %1340 = vst.msk [vmem:[#allocation3] sm:$0xff] %vm1339_vm9, %v1244_v1 }
 0x18c   : > { %1255 = vrot.lane.b32.xlu0 %v1185_v26, %s2862_s8  ;;  %1164 = vst.msk [vmem:[#allocation3 + $0x88] sm:$0xff] %vm1146_vm8, %v1085_v44  ;;  %1096 = vrot.lane.b32.xlu1 %v1587_v53, %s2861_s7  ;;  %v1768_v44 = vld [vmem:[#allocation2 + $0x9a] sm:$0xff] }
 0x18e   : > { %v1246_v3 = vpop.permute.xlu0 %1245  ;;  %v1276_v9 = vpop.permute.xlu1 %1275 }
 0x18f   : > { %1341 = vst.msk [vmem:[#allocation3 + $0x8] sm:$0xff] %vm1339_vm9, %v1246_v3  ;;  %1356 = vst.msk [vmem:[#allocation3 + $0x80] sm:$0xff] %vm1339_vm9, %v1276_v9 }
 0x190   : > { %1833 = vrot.lane.b32.xlu0 %v1764_v4, %s2865_s11  ;;  %1287 = vrot.lane.b32.xlu1 %v3351_v36, %s2862_s8 }
 0x192   : > { %v1438_v46 = vpop.permute.xlu0 %1437  ;;  %v1278_v5 = vpop.permute.xlu1 %1277 }
 0x193   : > { %1534 = vst.msk [vmem:[#allocation3] sm:$0xff] %vm1533_vm10, %v1438_v46 }
 0x194   : > { %1257 = vrot.lane.b32.xlu0 %v1764_v4, %s2862_s8  ;;  %1357 = vst.msk [vmem:[#allocation3 + $0x88] sm:$0xff] %vm1339_vm9, %v1278_v5  ;;  %1865 = vrot.lane.b32.xlu1 %v3362_v48, %s2865_s11  ;;  %v1784_v5 = vld [vmem:[#allocation2 + $0x15a] sm:$0xff] }
 0x196   : > { %v1440_v27 = vpop.permute.xlu0 %1439  ;;  %v1470_v30 = vpop.permute.xlu1 %1469 }
 0x197   : > { %1535 = vst.msk [vmem:[#allocation3 + $0x8] sm:$0xff] %vm1533_vm10, %v1440_v27  ;;  %1550 = vst.msk [vmem:[#allocation3 + $0x80] sm:$0xff] %vm1533_vm10, %v1470_v30  ;;  %v1383_v30 = vld [vmem:[#allocation2 + $0xa8] sm:$0xff] }
 0x198   : > { %1449 = vrot.lane.b32.xlu0 %v3166_v59, %s2863_s9  ;;  %1289 = vrot.lane.b32.xlu1 %v3362_v48, %s2862_s8 }
 0x19a   : > { %v1631_v36 = vpop.permute.xlu0 %1630  ;;  %v1472_v31 = vpop.permute.xlu1 %1471 }
 0x19b   : > { %1727 = vst.msk [vmem:[#allocation3] sm:$0xff] %vm1726_vm11, %v1631_v36 }
 0x19c   : > { %1451 = vrot.lane.b32.xlu0 %v3174_v60, %s2863_s9  ;;  %1551 = vst.msk [vmem:[#allocation3 + $0x88] sm:$0xff] %vm1533_vm10, %v1472_v31  ;;  %1481 = vrot.lane.b32.xlu1 %v3248_v15, %s2863_s9  ;;  %v1588_v60 = vld [vmem:[#allocation2 + $0x139] sm:$0xff] }
 0x19e   : > { %v1055_v39 = vpop.permute.xlu0 %1054  ;;  %v1663_v59 = vpop.permute.xlu1 %1662 }
 0x19f   : > { %1149 = vst.msk [vmem:[#allocation3 + $0x10] sm:$0xff] %vm1146_vm8, %v1055_v39  ;;  %v1384_v39 = vld [vmem:[#allocation2 + $0xb0] sm:$0xff] }
 0x1a0   : > { %1642 = vrot.lane.b32.xlu0 %v1572_v50, %s2864_s10  ;;  %1743 = vst.msk [vmem:[#allocation3 + $0x80] sm:$0xff] %vm1726_vm11, %v1663_v59  ;;  %1483 = vrot.lane.b32.xlu1 %v3250_v16, %s2863_s9 }
 0x1a2   : > { %v1633_v48 = vpop.permute.xlu0 %1632  ;;  %v1087_v40 = vpop.permute.xlu1 %1086 }
 0x1a3   : > { %1728 = vst.msk [vmem:[#allocation3 + $0x8] sm:$0xff] %vm1726_vm11, %v1633_v48  ;;  %v1399_v48 = vld [vmem:[#allocation2 + $0x168] sm:$0xff] }
 0x1a4   : > { %1066 = vrot.lane.b32.xlu0 %v1572_v50, %s2861_s7  ;;  %1165 = vst.msk [vmem:[#allocation3 + $0x90] sm:$0xff] %vm1146_vm8, %v1087_v40  ;;  %1674 = vrot.lane.b32.xlu1 %v1588_v60, %s2864_s10  ;;  %v1576_v40 = vld [vmem:[#allocation2 + $0xa9] sm:$0xff] }
 0x1a6   : > { %v1824_v15 = vpop.permute.xlu0 %1823  ;;  %v1665_v49 = vpop.permute.xlu1 %1664 }
 0x1a7   : > { %1920 = vst.msk [vmem:[#allocation3] sm:$0xff] %vm1919_vm12, %v1824_v15  ;;  %v1400_v15 = vld [vmem:[#allocation2 + $0x170] sm:$0xff] }
 0x1a8   : > { %1644 = vrot.lane.b32.xlu0 %v1573_v47, %s2864_s10  ;;  %1744 = vst.msk [vmem:[#allocation3 + $0x88] sm:$0xff] %vm1726_vm11, %v1665_v49  ;;  %1098 = vrot.lane.b32.xlu1 %v1588_v60, %s2861_s7 }
 0x1aa   : > { %v1057_v16 = vpop.permute.xlu0 %1056  ;;  %v1856_v32 = vpop.permute.xlu1 %1855 }
 0x1ab   : > { %1150 = vst.msk [vmem:[#allocation3 + $0x18] sm:$0xff] %vm1146_vm8, %v1057_v16  ;;  %v1592_v16 = vld [vmem:[#allocation2 + $0x169] sm:$0xff] }
 0x1ac   : > { %1835 = vrot.lane.b32.xlu0 %v1765_v17, %s2865_s11  ;;  %1936 = vst.msk [vmem:[#allocation3 + $0x80] sm:$0xff] %vm1919_vm12, %v1856_v32  ;;  %1676 = vrot.lane.b32.xlu1 %v1589_v51, %s2864_s10  ;;  %v1577_v32 = vld [vmem:[#allocation2 + $0xb1] sm:$0xff] }
 0x1ae   : > { %v1248_v43 = vpop.permute.xlu0 %1247  ;;  %v1952_v63 = vld [vmem:[#allocation3] sm:$0xff]  ;;  %v1089_v55 = vpop.permute.xlu1 %1088 }
 0x1af   : > { %1342 = vst.msk [vmem:[#allocation3 + $0x10] sm:$0xff] %vm1339_vm9, %v1248_v43  ;;  %2636 = vmatprep.mubr.msk.f32.mxu0 %vm1995_vm13, %v1952_v63 }
 0x1b0   : > { %1068 = vrot.lane.b32.xlu0 %v1573_v47, %s2861_s7  ;;  %1166 = vst.msk [vmem:[#allocation3 + $0x98] sm:$0xff] %vm1146_vm8, %v1089_v55  ;;  %1867 = vrot.lane.b32.xlu1 %v1781_v18, %s2865_s11 }
 0x1b2   : > { %v1826_v35 = vpop.permute.xlu0 %1825  ;;  %v1280_v56 = vpop.permute.xlu1 %1279 }
 0x1b3   : > { %1921 = vst.msk [vmem:[#allocation3 + $0x8] sm:$0xff] %vm1919_vm12, %v1826_v35  ;;  %v1968_v23 = vld [vmem:[#allocation3 + $0x80] sm:$0xff] }
 0x1b4   : > { %1259 = vrot.lane.b32.xlu0 %v1765_v17, %s2862_s8  ;;  %1358 = vst.msk [vmem:[#allocation3 + $0x90] sm:$0xff] %vm1339_vm9, %v1280_v56  ;;  %2660 = vmatprep.mubr.msk.f32.mxu1 %vm1995_vm13, %v1968_v23  ;;  %v1593_v35 = vld [vmem:[#allocation2 + $0x171] sm:$0xff] }
 0x1b5   : > { %1100 = vrot.lane.b32.xlu1 %v1589_v51, %s2861_s7 }
 0x1b6   : > { %v1250_v61 = vpop.permute.xlu0 %1249  ;;  %v1858_v10 = vpop.permute.xlu1 %1857 }
 0x1b7   : > { %1343 = vst.msk [vmem:[#allocation3 + $0x18] sm:$0xff] %vm1339_vm9, %v1250_v61  ;;  %v1785_v61 = vld [vmem:[#allocation2 + $0x16a] sm:$0xff] }
 0x1b8   : > { %1837 = vrot.lane.b32.xlu0 %v1766_v8, %s2865_s11  ;;  %1937 = vst.msk [vmem:[#allocation3 + $0x88] sm:$0xff] %vm1919_vm12, %v1858_v10 }
 0x1b9   : > { %1291 = vrot.lane.b32.xlu1 %v1781_v18, %s2862_s8  ;;  %v1769_v18 = vld [vmem:[#allocation2 + $0xaa] sm:$0xff] }
 0x1ba   : > { %v1442_v22 = vpop.permute.xlu0 %1441  ;;  %v1953_v0 = vld [vmem:[#allocation3 + $0x8] sm:$0xff]  ;;  %v1282_v14 = vpop.permute.xlu1 %1281 }
 0x1bb   : > { %1536 = vst.msk [vmem:[#allocation3 + $0x10] sm:$0xff] %vm1533_vm10, %v1442_v22  ;;  %2637 = vmatmul.mubr.msk.f32.vlgmr.msra.gmra.mrb[0].mxu0 %vm1995_vm13, %v1953_v0 }
 0x1bc   : > { %1261 = vrot.lane.b32.xlu0 %v1766_v8, %s2862_s8  ;;  %1359 = vst.msk [vmem:[#allocation3 + $0x98] sm:$0xff] %vm1339_vm9, %v1282_v14  ;;  %v1770_v14 = vld [vmem:[#allocation2 + $0xb2] sm:$0xff] }
 0x1bd   : > { %1869 = vrot.lane.b32.xlu1 %v1782_v24, %s2865_s11 }
 0x1be   : > { %v1444_v62 = vpop.permute.xlu0 %1443  ;;  %v1474_v54 = vpop.permute.xlu1 %1473 }
 0x1bf   : > { %1537 = vst.msk [vmem:[#allocation3 + $0x18] sm:$0xff] %vm1533_vm10, %v1444_v62  ;;  %v1969_v28 = vld [vmem:[#allocation3 + $0x88] sm:$0xff]  ;;  %1552 = vst.msk [vmem:[#allocation3 + $0x90] sm:$0xff] %vm1533_vm10, %v1474_v54 }
 0x1c0   : > { %1453 = vrot.lane.b32.xlu0 %v1381_v25, %s2863_s9  ;;  %2661 = vmatmul.mubr.msk.f32.vlgmr.msra.gmra.mrb[0].mxu1 %vm1995_vm13, %v1969_v28 }
 0x1c1   : > { %1293 = vrot.lane.b32.xlu1 %v1782_v24, %s2862_s8 }
 0x1c2   : > { %v1635_v21 = vpop.permute.xlu0 %1634  ;;  %v1476_v38 = vpop.permute.xlu1 %1475 }
 0x1c3   : > { %1729 = vst.msk [vmem:[#allocation3 + $0x10] sm:$0xff] %vm1726_vm11, %v1635_v21 }
 0x1c4   : > { %1455 = vrot.lane.b32.xlu0 %v1382_v42, %s2863_s9  ;;  %1553 = vst.msk [vmem:[#allocation3 + $0x98] sm:$0xff] %vm1533_vm10, %v1476_v38  ;;  %v1786_v42 = vld [vmem:[#allocation2 + $0x172] sm:$0xff]  ;;  %v1385_v38 = vld [vmem:[#allocation2 + $0xc0] sm:$0xff] }
 0x1c5   : > { %1485 = vrot.lane.b32.xlu1 %v3262_v19, %s2863_s9 }
 0x1c6   : > { %v1059_v45 = vpop.permute.xlu0 %1058  ;;  %v1667_v13 = vpop.permute.xlu1 %1666 }
 0x1c7   : > { %1151 = vst.msk [vmem:[#allocation3 + $0x20] sm:$0xff] %vm1146_vm8, %v1059_v45 }
 0x1c8   : > { %1646 = vrot.lane.b32.xlu0 %v1574_v34, %s2864_s10  ;;  %1745 = vst.msk [vmem:[#allocation3 + $0x90] sm:$0xff] %vm1726_vm11, %v1667_v13 }
 0x1c9   : > { %1487 = vrot.lane.b32.xlu1 %v3264_v20, %s2863_s9 }
 0x1ca   : > { %v1637_v41 = vpop.permute.xlu0 %1636  ;;  %v1091_v37 = vpop.permute.xlu1 %1090 }
 0x1cb   : > { %1730 = vst.msk [vmem:[#allocation3 + $0x18] sm:$0xff] %vm1726_vm11, %v1637_v41  ;;  %v1386_v41 = vld [vmem:[#allocation2 + $0xc8] sm:$0xff] }
 0x1cc   : > { %1070 = vrot.lane.b32.xlu0 %v1574_v34, %s2861_s7  ;;  %1167 = vst.msk [vmem:[#allocation3 + $0xa0] sm:$0xff] %vm1146_vm8, %v1091_v37  ;;  %v1401_v37 = vld [vmem:[#allocation2 + $0x180] sm:$0xff] }
 0x1cd   : > { %1678 = vrot.lane.b32.xlu1 %v1590_v57, %s2864_s10 }
 0x1ce   : > { %v1828_v19 = vpop.permute.xlu0 %1827  ;;  %v1669_v29 = vpop.permute.xlu1 %1668 }
 0x1cf   : > { %1922 = vst.msk [vmem:[#allocation3 + $0x10] sm:$0xff] %vm1919_vm12, %v1828_v19  ;;  %v1578_v19 = vld [vmem:[#allocation2 + $0xc1] sm:$0xff] }
 0x1d0   : > { %1648 = vrot.lane.b32.xlu0 %v1575_v58, %s2864_s10  ;;  %1746 = vst.msk [vmem:[#allocation3 + $0x98] sm:$0xff] %vm1726_vm11, %v1669_v29 }
 0x1d1   : > { %1102 = vrot.lane.b32.xlu1 %v1590_v57, %s2861_s7 }
 0x1d2   : > { %v1061_v20 = vpop.permute.xlu0 %1060  ;;  %v1860_v33 = vpop.permute.xlu1 %1859 }
 0x1d3   : > { %1152 = vst.msk [vmem:[#allocation3 + $0x28] sm:$0xff] %vm1146_vm8, %v1061_v20 }
 0x1d4   : > { %1839 = vrot.lane.b32.xlu0 %v1767_v52, %s2865_s11  ;;  %1938 = vst.msk [vmem:[#allocation3 + $0x90] sm:$0xff] %vm1919_vm12, %v1860_v33  ;;  %v1594_v33 = vld [vmem:[#allocation2 + $0x181] sm:$0xff] }
 0x1d5   : > { %1680 = vrot.lane.b32.xlu1 %v1591_v11, %s2864_s10 }
 0x1d6   : > { %v1252_v12 = vpop.permute.xlu0 %1251  ;;  %v1954_v53 = vld [vmem:[#allocation3 + $0x10] sm:$0xff]  ;;  %v1093_v2 = vpop.permute.xlu1 %1092 }
 0x1d7   : > { %1344 = vst.msk [vmem:[#allocation3 + $0x20] sm:$0xff] %vm1339_vm9, %v1252_v12  ;;  %2639 = vmatprep.mubr.msk.f32.mxu0 %vm1995_vm13, %v1954_v53  ;;  %v1579_v53 = vld [vmem:[#allocation2 + $0xc9] sm:$0xff] }
 0x1d8   : > { %1072 = vrot.lane.b32.xlu0 %v1575_v58, %s2861_s7  ;;  %1168 = vst.msk [vmem:[#allocation3 + $0xa8] sm:$0xff] %vm1146_vm8, %v1093_v2 }
 0x1d9   : > { %1871 = vrot.lane.b32.xlu1 %v1783_v6, %s2865_s11 }
 0x1da   : > { %v1830_v7 = vpop.permute.xlu0 %1829  ;;  %v1284_v26 = vpop.permute.xlu1 %1283 }
 0x1db   : > { %1923 = vst.msk [vmem:[#allocation3 + $0x18] sm:$0xff] %vm1919_vm12, %v1830_v7  ;;  %v1970_v1 = vld [vmem:[#allocation3 + $0x90] sm:$0xff] }
 0x1dc   : > { %1263 = vrot.lane.b32.xlu0 %v1767_v52, %s2862_s8  ;;  %1360 = vst.msk [vmem:[#allocation3 + $0xa0] sm:$0xff] %vm1339_vm9, %v1284_v26  ;;  %2663 = vmatprep.mubr.msk.f32.mxu1 %vm1995_vm13, %v1970_v1  ;;  %v1402_v52 = vld [vmem:[#allocation2 + $0x188] sm:$0xff] }
 0x1dd   : > { %1104 = vrot.lane.b32.xlu1 %v1591_v11, %s2861_s7  ;;  %v1771_v7 = vld [vmem:[#allocation2 + $0xc2] sm:$0xff] }
 0x1de   : > { %v1254_v4 = vpop.permute.xlu0 %1253  ;;  %v1862_v3 = vpop.permute.xlu1 %1861  ;;  %v1595_v1 = vld [vmem:[#allocation2 + $0x189] sm:$0xff] }
 0x1df   : > { %1345 = vst.msk [vmem:[#allocation3 + $0x28] sm:$0xff] %vm1339_vm9, %v1254_v4 }
 0x1e0   : > { %1841 = vrot.lane.b32.xlu0 %v1768_v44, %s2865_s11  ;;  %1939 = vst.msk [vmem:[#allocation3 + $0x98] sm:$0xff] %vm1919_vm12, %v1862_v3 }
 0x1e1   : > { %1295 = vrot.lane.b32.xlu1 %v1783_v6, %s2862_s8 }
 0x1e2   : > { %v1446_v9 = vpop.permute.xlu0 %1445  ;;  %v1955_v46 = vld [vmem:[#allocation3 + $0x18] sm:$0xff]  ;;  %v1286_v27 = vpop.permute.xlu1 %1285 }
 0x1e3   : > { %1538 = vst.msk [vmem:[#allocation3 + $0x20] sm:$0xff] %vm1533_vm10, %v1446_v9  ;;  %2640 = vmatmul.mubr.msk.f32.gmra.mrb[2].mxu0 %vm1995_vm13, %v1955_v46  ;;  %v1787_v9 = vld [vmem:[#allocation2 + $0x182] sm:$0xff] }
 0x1e4   : > { %1265 = vrot.lane.b32.xlu0 %v1768_v44, %s2862_s8  ;;  %1361 = vst.msk [vmem:[#allocation3 + $0xa8] sm:$0xff] %vm1339_vm9, %v1286_v27 }
 0x1e5   : > { %1873 = vrot.lane.b32.xlu1 %v1784_v5, %s2865_s11 }
 0x1e6   : > { %v1448_v36 = vpop.permute.xlu0 %1447  ;;  %v1478_v31 = vpop.permute.xlu1 %1477 }
 0x1e7   : > { %1539 = vst.msk [vmem:[#allocation3 + $0x28] sm:$0xff] %vm1533_vm10, %v1448_v36  ;;  %v1971_v50 = vld [vmem:[#allocation3 + $0x98] sm:$0xff]  ;;  %1554 = vst.msk [vmem:[#allocation3 + $0xa0] sm:$0xff] %vm1533_vm10, %v1478_v31 }
 0x1e8   : > { %1457 = vrot.lane.b32.xlu0 %v1383_v30, %s2863_s9  ;;  %2664 = vmatmul.mubr.msk.f32.gmra.mrb[2].mxu1 %vm1995_vm13, %v1971_v50  ;;  %v1772_v36 = vld [vmem:[#allocation2 + $0xca] sm:$0xff] }
 0x1e9   : > { %1297 = vrot.lane.b32.xlu1 %v1784_v5, %s2862_s8 }
 0x1ea   : > { %v1639_v59 = vpop.permute.xlu0 %1638  ;;  %v1480_v60 = vpop.permute.xlu1 %1479 }
 0x1eb   : > { %1731 = vst.msk [vmem:[#allocation3 + $0x20] sm:$0xff] %vm1726_vm11, %v1639_v59 }
 0x1ec   : > { %1459 = vrot.lane.b32.xlu0 %v1384_v39, %s2863_s9  ;;  %1555 = vst.msk [vmem:[#allocation3 + $0xa8] sm:$0xff] %vm1533_vm10, %v1480_v60 }
 0x1ed   : > { %1489 = vrot.lane.b32.xlu1 %v1399_v48, %s2863_s9  ;;  %v1788_v48 = vld [vmem:[#allocation2 + $0x18a] sm:$0xff] }
 0x1ee   : > { %v1063_v47 = vpop.permute.xlu0 %1062  ;;  %v1671_v49 = vpop.permute.xlu1 %1670 }
 0x1ef   : > { %1153 = vst.msk [vmem:[#allocation3 + $0x30] sm:$0xff] %vm1146_vm8, %v1063_v47 }
 0x1f0   : > { %1650 = vrot.lane.b32.xlu0 %v1576_v40, %s2864_s10  ;;  %1747 = vst.msk [vmem:[#allocation3 + $0xa0] sm:$0xff] %vm1726_vm11, %v1671_v49 }
 0x1f1   : > { %1491 = vrot.lane.b32.xlu1 %v1400_v15, %s2863_s9 }
 0x1f2   : > { %v1641_v17 = vpop.permute.xlu0 %1640  ;;  %v1095_v51 = vpop.permute.xlu1 %1094 }
 0x1f3   : > { %1732 = vst.msk [vmem:[#allocation3 + $0x28] sm:$0xff] %vm1726_vm11, %v1641_v17  ;;  %v1388_v17 = vld [vmem:[#allocation2 + $0xe0] sm:$0xff] }
 0x1f4   : > { %1074 = vrot.lane.b32.xlu0 %v1576_v40, %s2861_s7  ;;  %1169 = vst.msk [vmem:[#allocation3 + $0xb0] sm:$0xff] %vm1146_vm8, %v1095_v51  ;;  %v1387_v40 = vld [vmem:[#allocation2 + $0xd8] sm:$0xff] }
 0x1f5   : > { %1682 = vrot.lane.b32.xlu1 %v1592_v16, %s2864_s10  ;;  %v1403_v51 = vld [vmem:[#allocation2 + $0x198] sm:$0xff] }
 0x1f6   : > { %v1832_v43 = vpop.permute.xlu0 %1831  ;;  %v1673_v63 = vpop.permute.xlu1 %1672 }
 0x1f7   : > { %1924 = vst.msk [vmem:[#allocation3 + $0x20] sm:$0xff] %vm1919_vm12, %v1832_v43  ;;  %v1580_v43 = vld [vmem:[#allocation2 + $0xd9] sm:$0xff] }
 0x1f8   : > { %1652 = vrot.lane.b32.xlu0 %v1577_v32, %s2864_s10  ;;  %1748 = vst.msk [vmem:[#allocation3 + $0xa8] sm:$0xff] %vm1726_vm11, %v1673_v63 }
 0x1f9   : > { %1106 = vrot.lane.b32.xlu1 %v1592_v16, %s2861_s7 }
 0x1fa   : > { %v1065_v55 = vpop.permute.xlu0 %1064  ;;  %v1864_v56 = vpop.permute.xlu1 %1863 }
 0x1fb   : > { %1154 = vst.msk [vmem:[#allocation3 + $0x38] sm:$0xff] %vm1146_vm8, %v1065_v55 }
 0x1fc   : > { %1843 = vrot.lane.b32.xlu0 %v1769_v18, %s2865_s11  ;;  %1940 = vst.msk [vmem:[#allocation3 + $0xa0] sm:$0xff] %vm1919_vm12, %v1864_v56 }
 0x1fd   : > { %1684 = vrot.lane.b32.xlu1 %v1593_v35, %s2864_s10 }
 0x1fe   : > { %v1256_v23 = vpop.permute.xlu0 %1255  ;;  %v1956_v8 = vld [vmem:[#allocation3 + $0x20] sm:$0xff]  ;;  %v1097_v10 = vpop.permute.xlu1 %1096 }
 0x1ff   : > { %1346 = vst.msk [vmem:[#allocation3 + $0x30] sm:$0xff] %vm1339_vm9, %v1256_v23  ;;  %2642 = vmatprep.mubr.msk.f32.mxu0 %vm1995_vm13, %v1956_v8  ;;  %v1596_v23 = vld [vmem:[#allocation2 + $0x199] sm:$0xff] }
 0x200   : > { %1076 = vrot.lane.b32.xlu0 %v1577_v32, %s2861_s7  ;;  %1170 = vst.msk [vmem:[#allocation3 + $0xb8] sm:$0xff] %vm1146_vm8, %v1097_v10 }
 0x201   : > { %1875 = vrot.lane.b32.xlu1 %v1785_v61, %s2865_s11 }
 0x202   : > { %v1834_v22 = vpop.permute.xlu0 %1833  ;;  %v1288_v0 = vpop.permute.xlu1 %1287 }
 0x203   : > { %1925 = vst.msk [vmem:[#allocation3 + $0x28] sm:$0xff] %vm1919_vm12, %v1834_v22  ;;  %v1972_v24 = vld [vmem:[#allocation3 + $0xa0] sm:$0xff]  ;;  %v1597_v22 = vld [vmem:[#allocation2 + $0x1a1] sm:$0xff] }
 0x204   : > { %1267 = vrot.lane.b32.xlu0 %v1769_v18, %s2862_s8  ;;  %1362 = vst.msk [vmem:[#allocation3 + $0xb0] sm:$0xff] %vm1339_vm9, %v1288_v0  ;;  %2666 = vmatprep.mubr.msk.f32.mxu1 %vm1995_vm13, %v1972_v24  ;;  %v1404_v18 = vld [vmem:[#allocation2 + $0x1a0] sm:$0xff] }
 0x205   : > { %1108 = vrot.lane.b32.xlu1 %v1593_v35, %s2861_s7  ;;  %v1581_v35 = vld [vmem:[#allocation2 + $0xe1] sm:$0xff] }
 0x206   : > { %v1258_v25 = vpop.permute.xlu0 %1257  ;;  %v1866_v62 = vpop.permute.xlu1 %1865  ;;  %v1774_v24 = vld [vmem:[#allocation2 + $0xe2] sm:$0xff] }
 0x207   : > { %1347 = vst.msk [vmem:[#allocation3 + $0x38] sm:$0xff] %vm1339_vm9, %v1258_v25  ;;  %v1789_v25 = vld [vmem:[#allocation2 + $0x19a] sm:$0xff] }
 0x208   : > { %1845 = vrot.lane.b32.xlu0 %v1770_v14, %s2865_s11  ;;  %1941 = vst.msk [vmem:[#allocation3 + $0xa8] sm:$0xff] %vm1919_vm12, %v1866_v62 }
 0x209   : > { %1299 = vrot.lane.b32.xlu1 %v1785_v61, %s2862_s8  ;;  %v1773_v61 = vld [vmem:[#allocation2 + $0xda] sm:$0xff] }
 0x20a   : > { %v1450_v54 = vpop.permute.xlu0 %1449  ;;  %v1957_v28 = vld [vmem:[#allocation3 + $0x28] sm:$0xff]  ;;  %v1290_v21 = vpop.permute.xlu1 %1289 }
 0x20b   : > { %1540 = vst.msk [vmem:[#allocation3 + $0x30] sm:$0xff] %vm1533_vm10, %v1450_v54  ;;  %2643 = vmatmul.mubr.msk.f32.gmra.mrb[4].mxu0 %vm1995_vm13, %v1957_v28 }
 0x20c   : > { %1269 = vrot.lane.b32.xlu0 %v1770_v14, %s2862_s8  ;;  %1363 = vst.msk [vmem:[#allocation3 + $0xb8] sm:$0xff] %vm1339_vm9, %v1290_v21 }
 0x20d   : > { %1877 = vrot.lane.b32.xlu1 %v1786_v42, %s2865_s11 }
 0x20e   : > { %v1452_v34 = vpop.permute.xlu0 %1451  ;;  %v1482_v45 = vpop.permute.xlu1 %1481 }
 0x20f   : > { %1541 = vst.msk [vmem:[#allocation3 + $0x38] sm:$0xff] %vm1533_vm10, %v1452_v34  ;;  %v1973_v13 = vld [vmem:[#allocation3 + $0xa8] sm:$0xff]  ;;  %1556 = vst.msk [vmem:[#allocation3 + $0xb0] sm:$0xff] %vm1533_vm10, %v1482_v45 }
 0x210   : > { %1461 = vrot.lane.b32.xlu0 %v1385_v38, %s2863_s9  ;;  %2667 = vmatmul.mubr.msk.f32.gmra.mrb[4].mxu1 %vm1995_vm13, %v1973_v13 }
 0x211   : > { %1301 = vrot.lane.b32.xlu1 %v1786_v42, %s2862_s8  ;;  %v1790_v42 = vld [vmem:[#allocation2 + $0x1a2] sm:$0xff] }
 0x212   : > { %v1643_v57 = vpop.permute.xlu0 %1642  ;;  %v1484_v58 = vpop.permute.xlu1 %1483 }
 0x213   : > { %1733 = vst.msk [vmem:[#allocation3 + $0x30] sm:$0xff] %vm1726_vm11, %v1643_v57 }
 0x214   : > { %1463 = vrot.lane.b32.xlu0 %v1386_v41, %s2863_s9  ;;  %1557 = vst.msk [vmem:[#allocation3 + $0xb8] sm:$0xff] %vm1533_vm10, %v1484_v58 }
 0x215   : > { %1493 = vrot.lane.b32.xlu1 %v1401_v37, %s2863_s9 }
 0x216   : > { %v1067_v29 = vpop.permute.xlu0 %1066  ;;  %v1675_v20 = vpop.permute.xlu1 %1674 }
 0x217   : > { %1155 = vst.msk [vmem:[#allocation3 + $0x40] sm:$0xff] %vm1146_vm8, %v1067_v29 }
 0x218   : > { %1654 = vrot.lane.b32.xlu0 %v1578_v19, %s2864_s10  ;;  %1749 = vst.msk [vmem:[#allocation3 + $0xb0] sm:$0xff] %vm1726_vm11, %v1675_v20 }
 0x219   : > { %1495 = vrot.lane.b32.xlu1 %v1402_v52, %s2863_s9 }
 0x21a   : > { %v1645_v11 = vpop.permute.xlu0 %1644  ;;  %v1099_v12 = vpop.permute.xlu1 %1098 }
 0x21b   : > { %1734 = vst.msk [vmem:[#allocation3 + $0x38] sm:$0xff] %vm1726_vm11, %v1645_v11 }
 0x21c   : > { %1078 = vrot.lane.b32.xlu0 %v1578_v19, %s2861_s7  ;;  %1171 = vst.msk [vmem:[#allocation3 + $0xc0] sm:$0xff] %vm1146_vm8, %v1099_v12 }
 0x21d   : > { %1686 = vrot.lane.b32.xlu1 %v1594_v33, %s2864_s10 }
 0x21e   : > { %v1836_v6 = vpop.permute.xlu0 %1835  ;;  %v1677_v2 = vpop.permute.xlu1 %1676 }
 0x21f   : > { %1926 = vst.msk [vmem:[#allocation3 + $0x30] sm:$0xff] %vm1919_vm12, %v1836_v6 }
 0x220   : > { %1656 = vrot.lane.b32.xlu0 %v1579_v53, %s2864_s10  ;;  %1750 = vst.msk [vmem:[#allocation3 + $0xb8] sm:$0xff] %vm1726_vm11, %v1677_v2 }
 0x221   : > { %1110 = vrot.lane.b32.xlu1 %v1594_v33, %s2861_s7 }
 0x222   : > { %v1069_v26 = vpop.permute.xlu0 %1068  ;;  %v1868_v44 = vpop.permute.xlu1 %1867 }
 0x223   : > { %1156 = vst.msk [vmem:[#allocation3 + $0x48] sm:$0xff] %vm1146_vm8, %v1069_v26 }
 0x224   : > { %1847 = vrot.lane.b32.xlu0 %v1771_v7, %s2865_s11  ;;  %1942 = vst.msk [vmem:[#allocation3 + $0xb0] sm:$0xff] %vm1919_vm12, %v1868_v44 }
 0x225   : > { %1688 = vrot.lane.b32.xlu1 %v1595_v1, %s2864_s10 }
 0x226   : > { %v1260_v4 = vpop.permute.xlu0 %1259  ;;  %v1958_v3 = vld [vmem:[#allocation3 + $0x30] sm:$0xff] }
 0x227   : > { %1348 = vst.msk [vmem:[#allocation3 + $0x40] sm:$0xff] %vm1339_vm9, %v1260_v4  ;;  %2645 = vmatprep.mubr.msk.f32.mxu0 %vm1995_vm13, %v1958_v3  ;;  %v1101_v46 = vpop.permute.xlu1 %1100 }
 0x228   : > { %1080 = vrot.lane.b32.xlu0 %v1579_v53, %s2861_s7  ;;  %1172 = vst.msk [vmem:[#allocation3 + $0xc8] sm:$0xff] %vm1146_vm8, %v1101_v46 }
 0x229   : > { %1879 = vrot.lane.b32.xlu1 %v1787_v9, %s2865_s11 }
 0x22a   : > { %v1838_v5 = vpop.permute.xlu0 %1837 }
 0x22b   : > { %1927 = vst.msk [vmem:[#allocation3 + $0x38] sm:$0xff] %vm1919_vm12, %v1838_v5  ;;  %v1292_v27 = vpop.permute.xlu1 %1291  ;;  %v1974_v30 = vld [vmem:[#allocation3 + $0xb0] sm:$0xff] }
 0x22c   : > { %1271 = vrot.lane.b32.xlu0 %v1771_v7, %s2862_s8  ;;  %1364 = vst.msk [vmem:[#allocation3 + $0xc0] sm:$0xff] %vm1339_vm9, %v1292_v27  ;;  %2669 = vmatprep.mubr.msk.f32.mxu1 %vm1995_vm13, %v1974_v30 }
 0x22d   : > { %1112 = vrot.lane.b32.xlu1 %v1595_v1, %s2861_s7 }
 0x22e   : > { %v1262_v31 = vpop.permute.xlu0 %1261 }
 0x22f   : > { %1349 = vst.msk [vmem:[#allocation3 + $0x48] sm:$0xff] %vm1339_vm9, %v1262_v31  ;;  %v1870_v50 = vpop.permute.xlu1 %1869 }
 0x230   : > { %1849 = vrot.lane.b32.xlu0 %v1772_v36, %s2865_s11  ;;  %1943 = vst.msk [vmem:[#allocation3 + $0xb8] sm:$0xff] %vm1919_vm12, %v1870_v50 }
 0x231   : > { %1303 = vrot.lane.b32.xlu1 %v1787_v9, %s2862_s8 }
 0x232   : > { %v1454_v39 = vpop.permute.xlu0 %1453  ;;  %v1959_v59 = vld [vmem:[#allocation3 + $0x38] sm:$0xff] }
 0x233   : > { %1542 = vst.msk [vmem:[#allocation3 + $0x40] sm:$0xff] %vm1533_vm10, %v1454_v39  ;;  %2646 = vmatmul.mubr.msk.f32.gmra.mrb[6].mxu0 %vm1995_vm13, %v1959_v59  ;;  %v1294_v60 = vpop.permute.xlu1 %1293 }
 0x234   : > { %1273 = vrot.lane.b32.xlu0 %v1772_v36, %s2862_s8  ;;  %1365 = vst.msk [vmem:[#allocation3 + $0xc8] sm:$0xff] %vm1339_vm9, %v1294_v60 }
 0x235   : > { %1881 = vrot.lane.b32.xlu1 %v1788_v48, %s2865_s11 }
 0x236   : > { %v1456_v47 = vpop.permute.xlu0 %1455 }
 0x237   : > { %1543 = vst.msk [vmem:[#allocation3 + $0x48] sm:$0xff] %vm1533_vm10, %v1456_v47  ;;  %v1486_v15 = vpop.permute.xlu1 %1485  ;;  %v1975_v49 = vld [vmem:[#allocation3 + $0xb8] sm:$0xff] }
 0x238   : > { %1465 = vrot.lane.b32.xlu0 %v1387_v40, %s2863_s9  ;;  %1558 = vst.msk [vmem:[#allocation3 + $0xc0] sm:$0xff] %vm1533_vm10, %v1486_v15  ;;  %2670 = vmatmul.mubr.msk.f32.gmra.mrb[6].mxu1 %vm1995_vm13, %v1975_v49  ;;  %v3919_v40 = vld [vmem:[#allocation4] ss:$0 sm:$0xff] }
 0x239   : > { %1305 = vrot.lane.b32.xlu1 %v1788_v48, %s2862_s8 }
 0x23a   : > { %v1647_v16 = vpop.permute.xlu0 %1646 }
 0x23b   : > { %1735 = vst.msk [vmem:[#allocation3 + $0x40] sm:$0xff] %vm1726_vm11, %v1647_v16  ;;  %v1488_v32 = vpop.permute.xlu1 %1487 }
 0x23c   : > { %1467 = vrot.lane.b32.xlu0 %v1388_v17, %s2863_s9  ;;  %1559 = vst.msk [vmem:[#allocation3 + $0xc8] sm:$0xff] %vm1533_vm10, %v1488_v32 }
 0x23d   : > { %1497 = vrot.lane.b32.xlu1 %v1403_v51, %s2863_s9 }
 0x23e   : > { %v1071_v63 = vpop.permute.xlu0 %1070 }
 0x23f   : > { %1157 = vst.msk [vmem:[#allocation3 + $0x50] sm:$0xff] %vm1146_vm8, %v1071_v63  ;;  %v1679_v55 = vpop.permute.xlu1 %1678 }
 0x240   : > { %1658 = vrot.lane.b32.xlu0 %v1580_v43, %s2864_s10  ;;  %1751 = vst.msk [vmem:[#allocation3 + $0xc0] sm:$0xff] %vm1726_vm11, %v1679_v55 }
 0x241   : > { %1499 = vrot.lane.b32.xlu1 %v1404_v18, %s2863_s9  ;;  %s3929_s9 = scalar_lea.vmem %s4182_s4, %s2589_s23 }
 0x242   : > { %v1649_v56 = vpop.permute.xlu0 %1648 }
 0x243   : > { %1736 = vst.msk [vmem:[#allocation3 + $0x48] sm:$0xff] %vm1726_vm11, %v1649_v56  ;;  %v1103_v8 = vpop.permute.xlu1 %1102 }
 0x244   : > { %1660 = vrot.lane.b32.xlu0 %v1581_v35, %s2864_s10  ;;  %1173 = vst.msk [vmem:[#allocation3 + $0xd0] sm:$0xff] %vm1146_vm8, %v1103_v8 }
 0x245   : > { %1690 = vrot.lane.b32.xlu1 %v1596_v23, %s2864_s10 }
 0x246   : > { %v1840_v10 = vpop.permute.xlu0 %1839 }
 0x247   : > { %1928 = vst.msk [vmem:[#allocation3 + $0x40] sm:$0xff] %vm1919_vm12, %v1840_v10  ;;  %v1681_v0 = vpop.permute.xlu1 %1680 }
 0x248   : > { %1851 = vrot.lane.b32.xlu0 %v1773_v61, %s2865_s11  ;;  %1752 = vst.msk [vmem:[#allocation3 + $0xc8] sm:$0xff] %vm1726_vm11, %v1681_v0 }
 0x249   : > { %1692 = vrot.lane.b32.xlu1 %v1597_v22, %s2864_s10  ;;  %s3932_s10 = scalar_lea.vmem [#allocation7], %s2545_s6 }
 0x24a   : > { %v1073_v14 = vpop.permute.xlu0 %1072  ;;  %s2437_s23 = sshll.u32 %s3932_s10, 4  ;;  %s4124_s23 = int_to_ptr.vmem [resolvable:$true] %s2437_s23 }
 0x24b   : > { %1158 = vst.msk [vmem:[#allocation3 + $0x58] sm:$0xff] %vm1146_vm8, %v1073_v14  ;;  %v1872_v62 = vpop.permute.xlu1 %1871  ;;  %s2788_s14 = scalar_lea.vmem %s4124_s23, 4096  ;;  %p2795_p2 = scmp.lt.s32.totalorder %s4124_s23, %s2793_s27 }
 0x24c   : > { %1853 = vrot.lane.b32.xlu0 %v1774_v24, %s2865_s11  ;;  %1944 = vst.msk [vmem:[#allocation3 + $0xc0] sm:$0xff] %vm1919_vm12, %v1872_v62  ;;  %p2789_p5 = scmp.ne.s32.totalorder %s4124_s23, %s2788_s14  ;;  %p2796_p3 = scmp.lt.s32.totalorder %s2794_s28, %s2788_s14 }
 0x24d   : > { %1883 = vrot.lane.b32.xlu1 %v1789_v25, %s2865_s11 }
 0x24e   : > { %v1264_v54 = vpop.permute.xlu0 %1263  ;;  %v1960_v28 = vld [vmem:[#allocation3 + $0x40] sm:$0xff]  ;;  %p2790_p10 = pnand %p2789_p5, %p4193_p9  ;;  %p2797_p4 = por %p2796_p3, %p2795_p2 }
 0x24f   : > { %1350 = vst.msk [vmem:[#allocation3 + $0x50] sm:$0xff] %vm1339_vm9, %v1264_v54  ;;  %2648 = vmatprep.mubr.msk.f32.mxu0 %vm1995_vm13, %v1960_v28  ;;  %v1105_v21 = vpop.permute.xlu1 %1104 }
 0x250   : > { %1174 = vst.msk [vmem:[#allocation3 + $0xd8] sm:$0xff] %vm1146_vm8, %v1105_v21  ;;  %p2791_p12 = pneg %p2790_p10 }
 0x251   : > { %1885 = vrot.lane.b32.xlu1 %v1790_v42, %s2865_s11 }
 0x252   : > { %v1842_v38 = vpop.permute.xlu0 %1841  ;;  %p2798_p7 = pnand %p2797_p4, %p2791_p12 }
 0x253   : > { %1929 = vst.msk [vmem:[#allocation3 + $0x48] sm:$0xff] %vm1919_vm12, %v1842_v38  ;;  %v1296_v34 = vpop.permute.xlu1 %1295  ;;  %v1976_v45 = vld [vmem:[#allocation3 + $0xc0] sm:$0xff] }
 0x254   : > { %1366 = vst.msk [vmem:[#allocation3 + $0xd0] sm:$0xff] %vm1339_vm9, %v1296_v34  ;;  %2672 = vmatprep.mubr.msk.f32.mxu1 %vm1995_vm13, %v1976_v45 }
 0x256   : > { %v1266_v13 = vpop.permute.xlu0 %1265 }
 0x257   : > { %1351 = vst.msk [vmem:[#allocation3 + $0x58] sm:$0xff] %vm1339_vm9, %v1266_v13  ;;  %v1874_v41 = vpop.permute.xlu1 %1873 }
 0x258   : > { %1945 = vst.msk [vmem:[#allocation3 + $0xc8] sm:$0xff] %vm1919_vm12, %v1874_v41 }
 0x25a   : > { %v1458_v57 = vpop.permute.xlu0 %1457  ;;  %v1961_v37 = vld [vmem:[#allocation3 + $0x48] sm:$0xff] }
 0x25b   : > { %1544 = vst.msk [vmem:[#allocation3 + $0x50] sm:$0xff] %vm1533_vm10, %v1458_v57  ;;  %2649 = vmatmul.mubr.msk.f32.gmra.mrb[8].mxu0 %vm1995_vm13, %v1961_v37  ;;  %v1298_v58 = vpop.permute.xlu1 %1297 }
 0x25c   : > { %1367 = vst.msk [vmem:[#allocation3 + $0xd8] sm:$0xff] %vm1339_vm9, %v1298_v58 }
 0x25e   : > { %v1460_v19 = vpop.permute.xlu0 %1459 }
 0x25f   : > { %1545 = vst.msk [vmem:[#allocation3 + $0x58] sm:$0xff] %vm1533_vm10, %v1460_v19  ;;  %v1490_v29 = vpop.permute.xlu1 %1489  ;;  %v1977_v52 = vld [vmem:[#allocation3 + $0xc8] sm:$0xff] }
 0x260   : > { %1560 = vst.msk [vmem:[#allocation3 + $0xd0] sm:$0xff] %vm1533_vm10, %v1490_v29  ;;  %2673 = vmatmul.mubr.msk.f32.gmra.mrb[8].mxu1 %vm1995_vm13, %v1977_v52 }
 0x262   : > { %v1651_v20 = vpop.permute.xlu0 %1650 }
 0x263   : > { %1737 = vst.msk [vmem:[#allocation3 + $0x50] sm:$0xff] %vm1726_vm11, %v1651_v20  ;;  %v1492_v11 = vpop.permute.xlu1 %1491 }
 0x264   : > { %1561 = vst.msk [vmem:[#allocation3 + $0xd8] sm:$0xff] %vm1533_vm10, %v1492_v11 }
 0x266   : > { %v1075_v33 = vpop.permute.xlu0 %1074 }
 0x267   : > { %1159 = vst.msk [vmem:[#allocation3 + $0x60] sm:$0xff] %vm1146_vm8, %v1075_v33  ;;  %v1683_v12 = vpop.permute.xlu1 %1682 }
 0x268   : > { %1753 = vst.msk [vmem:[#allocation3 + $0xd0] sm:$0xff] %vm1726_vm11, %v1683_v12 }
 0x26a   : > { %v1653_v53 = vpop.permute.xlu0 %1652 }
 0x26b   : > { %1738 = vst.msk [vmem:[#allocation3 + $0x58] sm:$0xff] %vm1726_vm11, %v1653_v53  ;;  %v1107_v6 = vpop.permute.xlu1 %1106 }
 0x26c   : > { %1175 = vst.msk [vmem:[#allocation3 + $0xe0] sm:$0xff] %vm1146_vm8, %v1107_v6 }
 0x26e   : > { %v1844_v2 = vpop.permute.xlu0 %1843 }
 0x26f   : > { %1930 = vst.msk [vmem:[#allocation3 + $0x50] sm:$0xff] %vm1919_vm12, %v1844_v2  ;;  %v1685_v7 = vpop.permute.xlu1 %1684 }
 0x270   : > { %1754 = vst.msk [vmem:[#allocation3 + $0xd8] sm:$0xff] %vm1726_vm11, %v1685_v7 }
 0x272   : > { %v1077_v26 = vpop.permute.xlu0 %1076 }
 0x273   : > { %1160 = vst.msk [vmem:[#allocation3 + $0x68] sm:$0xff] %vm1146_vm8, %v1077_v26  ;;  %v1876_v1 = vpop.permute.xlu1 %1875 }
 0x274   : > { %1946 = vst.msk [vmem:[#allocation3 + $0xd0] sm:$0xff] %vm1919_vm12, %v1876_v1 }
 0x276   : > { %v1268_v44 = vpop.permute.xlu0 %1267  ;;  %v1962_v4 = vld [vmem:[#allocation3 + $0x50] sm:$0xff] }
 0x277   : > { %1352 = vst.msk [vmem:[#allocation3 + $0x60] sm:$0xff] %vm1339_vm9, %v1268_v44  ;;  %2651 = vmatprep.mubr.msk.f32.mxu0 %vm1995_vm13, %v1962_v4  ;;  %v1109_v3 = vpop.permute.xlu1 %1108 }
 0x278   : > { %1176 = vst.msk [vmem:[#allocation3 + $0xe8] sm:$0xff] %vm1146_vm8, %v1109_v3 }
 0x27a   : > { %v1846_v9 = vpop.permute.xlu0 %1845 }
 0x27b   : > { %1931 = vst.msk [vmem:[#allocation3 + $0x58] sm:$0xff] %vm1919_vm12, %v1846_v9  ;;  %v1300_v46 = vpop.permute.xlu1 %1299  ;;  %v1978_v5 = vld [vmem:[#allocation3 + $0xd0] sm:$0xff] }
 0x27c   : > { %1368 = vst.msk [vmem:[#allocation3 + $0xe0] sm:$0xff] %vm1339_vm9, %v1300_v46  ;;  %2675 = vmatprep.mubr.msk.f32.mxu1 %vm1995_vm13, %v1978_v5 }
 0x27e   : > { %v1270_v27 = vpop.permute.xlu0 %1269 }
 0x27f   : > { %1353 = vst.msk [vmem:[#allocation3 + $0x68] sm:$0xff] %vm1339_vm9, %v1270_v27  ;;  %v1878_v30 = vpop.permute.xlu1 %1877 }
 0x280   : > { %1947 = vst.msk [vmem:[#allocation3 + $0xd8] sm:$0xff] %vm1919_vm12, %v1878_v30 }
 0x282   : > { %v1462_v36 = vpop.permute.xlu0 %1461  ;;  %v1963_v31 = vld [vmem:[#allocation3 + $0x58] sm:$0xff] }
 0x283   : > { %1546 = vst.msk [vmem:[#allocation3 + $0x60] sm:$0xff] %vm1533_vm10, %v1462_v36  ;;  %2652 = vmatmul.mubr.msk.f32.gmra.mrb[10].mxu0 %vm1995_vm13, %v1963_v31  ;;  %v1302_v50 = vpop.permute.xlu1 %1301 }
 0x284   : > { %1369 = vst.msk [vmem:[#allocation3 + $0xe8] sm:$0xff] %vm1339_vm9, %v1302_v50 }
 0x286   : > { %v1464_v39 = vpop.permute.xlu0 %1463 }
 0x287   : > { %1547 = vst.msk [vmem:[#allocation3 + $0x68] sm:$0xff] %vm1533_vm10, %v1464_v39  ;;  %v1494_v59 = vpop.permute.xlu1 %1493  ;;  %v1979_v48 = vld [vmem:[#allocation3 + $0xd8] sm:$0xff] }
 0x288   : > { %1562 = vst.msk [vmem:[#allocation3 + $0xe0] sm:$0xff] %vm1533_vm10, %v1494_v59  ;;  %2676 = vmatmul.mubr.msk.f32.gmra.mrb[10].mxu1 %vm1995_vm13, %v1979_v48 }
 0x28a   : > { %v1655_v60 = vpop.permute.xlu0 %1654 }
 0x28b   : > { %1739 = vst.msk [vmem:[#allocation3 + $0x60] sm:$0xff] %vm1726_vm11, %v1655_v60  ;;  %v1496_v47 = vpop.permute.xlu1 %1495 }
 0x28c   : > { %1563 = vst.msk [vmem:[#allocation3 + $0xe8] sm:$0xff] %vm1533_vm10, %v1496_v47 }
 0x28e   : > { %v1079_v15 = vpop.permute.xlu0 %1078  ;;  %v2638_v49 = vpop.f32.mrb[0].mxu0 }
 0x28f   : > { %1161 = vst.msk [vmem:[#allocation3 + $0x70] sm:$0xff] %vm1146_vm8, %v1079_v15  ;;  %v2168_v17 = vadd.f32 %v2638_v49, %v3919_v40  ;;  %v2162_v16 = vpop.f32.mrb[1].mxu0  ;;  %v1687_v32 = vpop.permute.xlu1 %1686 }
 0x290   : > { %v2163_v51 = vadd.f32 %v3919_v40, %v2162_v16  ;;  %1755 = vst.msk [vmem:[#allocation3 + $0xe0] sm:$0xff] %vm1726_vm11, %v1687_v32 }
 0x291   : > { %2323 = vst.msk [vmem:[%s3932_s10 + $0x8] sm:$0xff] %vm2321_vm14, %v2168_v17  ;;  %v2355_v43 = vmax.f32 %v2168_v17, 0.0 }
 0x292   : > { %2322 = vst.msk [vmem:[%s3932_s10] sm:$0xff] %vm2321_vm14, %v2163_v51  ;;  %v2354_v63 = vmax.f32 %v2163_v51, 0.0  ;;  %v1657_v18 = vpop.permute.xlu0 %1656 }
 0x293   : > { %2387 = vst.msk [vmem:[%s3929_s9 + $0x8] sm:$0xff] %vm2321_vm14, %v2355_v43  ;;  %v1111_v55 = vpop.permute.xlu1 %1110  ;;  %v2662_v35 = vpop.f32.mrb[0].mxu1 }
 0x294   : > { %1740 = vst.msk [vmem:[#allocation3 + $0x68] sm:$0xff] %vm1726_vm11, %v1657_v18  ;;  %v2248_v56 = vadd.f32 %v2662_v35, %v3919_v40  ;;  %v2242_v23 = vpop.f32.mrb[1].mxu1 }
 0x295   : > { %2386 = vst.msk [vmem:[%s3929_s9] sm:$0xff] %vm2321_vm14, %v2354_v63  ;;  %v2243_v61 = vadd.f32 %v3919_v40, %v2242_v23 }
 0x296   : > { %1177 = vst.msk [vmem:[#allocation3 + $0xf0] sm:$0xff] %vm1146_vm8, %v1111_v55  ;;  %v1848_v8 = vpop.permute.xlu0 %1847  ;;  %v2371_v10 = vmax.f32 %v2248_v56, 0.0 }
 0x297   : > { %1932 = vst.msk [vmem:[#allocation3 + $0x60] sm:$0xff] %vm1919_vm12, %v1848_v8  ;;  %v2370_v22 = vmax.f32 %v2243_v61, 0.0  ;;  %v1689_v0 = vpop.permute.xlu1 %1688 }
 0x298   : > { %2339 = vst.msk [vmem:[%s3932_s10 + $0x88] sm:$0xff] %vm2321_vm14, %v2248_v56  ;;  %2338 = vst.msk [vmem:[%s3932_s10 + $0x80] sm:$0xff] %vm2321_vm14, %v2243_v61 }
 0x299   : > { %2403 = vst.msk [vmem:[%s3929_s9 + $0x88] sm:$0xff] %vm2321_vm14, %v2371_v10  ;;  %2402 = vst.msk [vmem:[%s3929_s9 + $0x80] sm:$0xff] %vm2321_vm14, %v2370_v22 }
 0x29a   : > { %1756 = vst.msk [vmem:[#allocation3 + $0xe8] sm:$0xff] %vm1726_vm11, %v1689_v0  ;;  %v1081_v24 = vpop.permute.xlu0 %1080 }
 0x29b   : > { %1162 = vst.msk [vmem:[#allocation3 + $0x78] sm:$0xff] %vm1146_vm8, %v1081_v24  ;;  %v1880_v14 = vpop.permute.xlu1 %1879 }
 0x29c   : > { %1948 = vst.msk [vmem:[#allocation3 + $0xe0] sm:$0xff] %vm1919_vm12, %v1880_v14 }
 0x29e   : > { %v1272_v25 = vpop.permute.xlu0 %1271  ;;  %v1964_v62 = vld [vmem:[#allocation3 + $0x60] sm:$0xff] }
 0x29f   : > { %1354 = vst.msk [vmem:[#allocation3 + $0x70] sm:$0xff] %vm1339_vm9, %v1272_v25  ;;  %2654 = vmatprep.mubr.msk.f32.mxu0 %vm1995_vm13, %v1964_v62  ;;  %v1113_v54 = vpop.permute.xlu1 %1112 }
 0x2a0   : > { %1178 = vst.msk [vmem:[#allocation3 + $0xf8] sm:$0xff] %vm1146_vm8, %v1113_v54 }
 0x2a2   : > { %v1850_v28 = vpop.permute.xlu0 %1849 }
 0x2a3   : > { %1933 = vst.msk [vmem:[#allocation3 + $0x68] sm:$0xff] %vm1919_vm12, %v1850_v28  ;;  %v1304_v42 = vpop.permute.xlu1 %1303  ;;  %v1980_v21 = vld [vmem:[#allocation3 + $0xe0] sm:$0xff] }
 0x2a4   : > { %1370 = vst.msk [vmem:[#allocation3 + $0xf0] sm:$0xff] %vm1339_vm9, %v1304_v42  ;;  %2678 = vmatprep.mubr.msk.f32.mxu1 %vm1995_vm13, %v1980_v21 }
 0x2a6   : > { %v1274_v38 = vpop.permute.xlu0 %1273 }
 0x2a7   : > { %1355 = vst.msk [vmem:[#allocation3 + $0x78] sm:$0xff] %vm1339_vm9, %v1274_v38  ;;  %v1882_v34 = vpop.permute.xlu1 %1881 }
 0x2a8   : > { %1949 = vst.msk [vmem:[#allocation3 + $0xe8] sm:$0xff] %vm1919_vm12, %v1882_v34 }
 0x2aa   : > { %v1466_v45 = vpop.permute.xlu0 %1465  ;;  %v1965_v13 = vld [vmem:[#allocation3 + $0x68] sm:$0xff] }
 0x2ab   : > { %1548 = vst.msk [vmem:[#allocation3 + $0x70] sm:$0xff] %vm1533_vm10, %v1466_v45  ;;  %2655 = vmatmul.mubr.msk.f32.gmra.mrb[12].mxu0 %vm1995_vm13, %v1965_v13  ;;  %v1306_v41 = vpop.permute.xlu1 %1305 }
 0x2ac   : > { %1371 = vst.msk [vmem:[#allocation3 + $0xf8] sm:$0xff] %vm1339_vm9, %v1306_v41 }
 0x2ae   : > { %v1468_v57 = vpop.permute.xlu0 %1467 }
 0x2af   : > { %1549 = vst.msk [vmem:[#allocation3 + $0x78] sm:$0xff] %vm1533_vm10, %v1468_v57  ;;  %v1498_v37 = vpop.permute.xlu1 %1497  ;;  %v1981_v58 = vld [vmem:[#allocation3 + $0xe8] sm:$0xff] }
 0x2b0   : > { %1564 = vst.msk [vmem:[#allocation3 + $0xf0] sm:$0xff] %vm1533_vm10, %v1498_v37  ;;  %2679 = vmatmul.mubr.msk.f32.gmra.mrb[12].mxu1 %vm1995_vm13, %v1981_v58 }
 0x2b2   : > { %v1659_v19 = vpop.permute.xlu0 %1658 }
 0x2b3   : > { %1741 = vst.msk [vmem:[#allocation3 + $0x70] sm:$0xff] %vm1726_vm11, %v1659_v19  ;;  %v1500_v29 = vpop.permute.xlu1 %1499 }
 0x2b4   : > { %1565 = vst.msk [vmem:[#allocation3 + $0xf8] sm:$0xff] %vm1533_vm10, %v1500_v29 }
 0x2b6   : > { %v1661_v52 = vpop.permute.xlu0 %1660  ;;  %v2641_v20 = vpop.f32.mrb[2].mxu0 }
 0x2b7   : > { %1742 = vst.msk [vmem:[#allocation3 + $0x78] sm:$0xff] %vm1726_vm11, %v1661_v52  ;;  %v2178_v11 = vadd.f32 %v2641_v20, %v3919_v40  ;;  %v2172_v33 = vpop.f32.mrb[3].mxu0  ;;  %v1691_v53 = vpop.permute.xlu1 %1690 }
 0x2b8   : > { %v2173_v12 = vadd.f32 %v3919_v40, %v2172_v33  ;;  %1757 = vst.msk [vmem:[#allocation3 + $0xf0] sm:$0xff] %vm1726_vm11, %v1691_v53 }
 0x2b9   : > { %2325 = vst.msk [vmem:[%s3932_s10 + $0x18] sm:$0xff] %vm2321_vm14, %v2178_v11  ;;  %v2357_v6 = vmax.f32 %v2178_v11, 0.0 }
 0x2ba   : > { %2324 = vst.msk [vmem:[%s3932_s10 + $0x10] sm:$0xff] %vm2321_vm14, %v2173_v12  ;;  %v2356_v2 = vmax.f32 %v2173_v12, 0.0  ;;  %v1852_v7 = vpop.permute.xlu0 %1851 }
 0x2bb   : > { %2389 = vst.msk [vmem:[%s3929_s9 + $0x18] sm:$0xff] %vm2321_vm14, %v2357_v6  ;;  %v1693_v26 = vpop.permute.xlu1 %1692  ;;  %v2665_v1 = vpop.f32.mrb[2].mxu1 }
 0x2bc   : > { %1934 = vst.msk [vmem:[#allocation3 + $0x70] sm:$0xff] %vm1919_vm12, %v1852_v7  ;;  %v2258_v44 = vadd.f32 %v2665_v1, %v3919_v40  ;;  %v2252_v4 = vpop.f32.mrb[3].mxu1 }
 0x2bd   : > { %2388 = vst.msk [vmem:[%s3929_s9 + $0x10] sm:$0xff] %vm2321_vm14, %v2356_v2  ;;  %v2253_v9 = vadd.f32 %v3919_v40, %v2252_v4 }
 0x2be   : > { %1758 = vst.msk [vmem:[#allocation3 + $0xf8] sm:$0xff] %vm1726_vm11, %v1693_v26  ;;  %v1854_v3 = vpop.permute.xlu0 %1853  ;;  %v2373_v46 = vmax.f32 %v2258_v44, 0.0 }
 0x2bf   : > { %1935 = vst.msk [vmem:[#allocation3 + $0x78] sm:$0xff] %vm1919_vm12, %v1854_v3  ;;  %v2372_v5 = vmax.f32 %v2253_v9, 0.0  ;;  %v1884_v27 = vpop.permute.xlu1 %1883 }
 0x2c0   : > { %2341 = vst.msk [vmem:[%s3932_s10 + $0x98] sm:$0xff] %vm2321_vm14, %v2258_v44  ;;  %2340 = vst.msk [vmem:[%s3932_s10 + $0x90] sm:$0xff] %vm2321_vm14, %v2253_v9 }
 0x2c1   : > { %2405 = vst.msk [vmem:[%s3929_s9 + $0x98] sm:$0xff] %vm2321_vm14, %v2373_v46  ;;  %2404 = vst.msk [vmem:[%s3929_s9 + $0x90] sm:$0xff] %vm2321_vm14, %v2372_v5 }
 0x2c2   : > { %1950 = vst.msk [vmem:[#allocation3 + $0xf0] sm:$0xff] %vm1919_vm12, %v1884_v27 }
 0x2c3   : > { %v1966_v30 = vld [vmem:[#allocation3 + $0x70] sm:$0xff]  ;;  %v1886_v36 = vpop.permute.xlu1 %1885 }
 0x2c4   : > { %2657 = vmatprep.mubr.msk.f32.mxu0 %vm1995_vm13, %v1966_v30  ;;  %1951 = vst.msk [vmem:[#allocation3 + $0xf8] sm:$0xff] %vm1919_vm12, %v1886_v36 }
 0x2c6   : > { %v1967_v31 = vld [vmem:[#allocation3 + $0x78] sm:$0xff] }
 0x2c7   : > { %2658 = vmatmul.mubr.msk.f32.gmra.mrb[14].mxu0 %vm1995_vm13, %v1967_v31 }
 0x2c9   : > { %v1982_v50 = vld [vmem:[#allocation3 + $0xf0] sm:$0xff] }
 0x2ca   : > { %2681 = vmatprep.mubr.msk.f32.mxu1 %vm1995_vm13, %v1982_v50 }
 0x2cb   : > { %v1983_v39 = vld [vmem:[#allocation3 + $0xf8] sm:$0xff] }
 0x2cc   : > { %2682 = vmatmul.mubr.msk.f32.gmra.mrb[14].mxu1 %vm1995_vm13, %v1983_v39 }
 0x2de   : > { %v2644_v59 = vpop.f32.mrb[4].mxu0 }
 0x2df   : > { %v2188_v48 = vadd.f32 %v2644_v59, %v3919_v40  ;;  %v2182_v60 = vpop.f32.mrb[5].mxu0 }
 0x2e0   : > { %v2183_v47 = vadd.f32 %v3919_v40, %v2182_v60 }
 0x2e1   : > { %2327 = vst.msk [vmem:[%s3932_s10 + $0x28] sm:$0xff] %vm2321_vm14, %v2188_v48  ;;  %v2359_v15 = vmax.f32 %v2188_v48, 0.0 }
 0x2e2   : > { %2326 = vst.msk [vmem:[%s3932_s10 + $0x20] sm:$0xff] %vm2321_vm14, %v2183_v47  ;;  %v2358_v49 = vmax.f32 %v2183_v47, 0.0 }
 0x2e3   : > { %2391 = vst.msk [vmem:[%s3929_s9 + $0x28] sm:$0xff] %vm2321_vm14, %v2359_v15  ;;  %v2668_v17 = vpop.f32.mrb[4].mxu1 }
 0x2e4   : > { %2390 = vst.msk [vmem:[%s3929_s9 + $0x20] sm:$0xff] %vm2321_vm14, %v2358_v49  ;;  %v2268_v16 = vadd.f32 %v2668_v17, %v3919_v40  ;;  %v2262_v51 = vpop.f32.mrb[5].mxu1 }
 0x2e5   : > { %v2263_v32 = vadd.f32 %v3919_v40, %v2262_v51 }
 0x2e6   : > { %2343 = vst.msk [vmem:[%s3932_s10 + $0xa8] sm:$0xff] %vm2321_vm14, %v2268_v16  ;;  %v2375_v43 = vmax.f32 %v2268_v16, 0.0 }
 0x2e7   : > { %2342 = vst.msk [vmem:[%s3932_s10 + $0xa0] sm:$0xff] %vm2321_vm14, %v2263_v32  ;;  %v2374_v63 = vmax.f32 %v2263_v32, 0.0 }
 0x2e8   : > { %2407 = vst.msk [vmem:[%s3929_s9 + $0xa8] sm:$0xff] %vm2321_vm14, %v2375_v43 }
 0x2e9   : > { %2406 = vst.msk [vmem:[%s3929_s9 + $0xa0] sm:$0xff] %vm2321_vm14, %v2374_v63 }
 0x306   : > { %v2647_v18 = vpop.f32.mrb[6].mxu0 }
 0x307   : > { %v2198_v55 = vadd.f32 %v2647_v18, %v3919_v40  ;;  %v2192_v35 = vpop.f32.mrb[7].mxu0 }
 0x308   : > { %v2193_v56 = vadd.f32 %v3919_v40, %v2192_v35 }
 0x309   : > { %2329 = vst.msk [vmem:[%s3932_s10 + $0x38] sm:$0xff] %vm2321_vm14, %v2198_v55  ;;  %v2361_v23 = vmax.f32 %v2198_v55, 0.0 }
 0x30a   : > { %2328 = vst.msk [vmem:[%s3932_s10 + $0x30] sm:$0xff] %vm2321_vm14, %v2193_v56  ;;  %v2360_v8 = vmax.f32 %v2193_v56, 0.0 }
 0x30b   : > { %2393 = vst.msk [vmem:[%s3929_s9 + $0x38] sm:$0xff] %vm2321_vm14, %v2361_v23  ;;  %v2671_v61 = vpop.f32.mrb[6].mxu1 }
 0x30c   : > { %2392 = vst.msk [vmem:[%s3929_s9 + $0x30] sm:$0xff] %vm2321_vm14, %v2360_v8  ;;  %v2278_v10 = vadd.f32 %v2671_v61, %v3919_v40  ;;  %v2272_v22 = vpop.f32.mrb[7].mxu1 }
 0x30d   : > { %v2273_v0 = vadd.f32 %v3919_v40, %v2272_v22 }
 0x30e   : > { %2345 = vst.msk [vmem:[%s3932_s10 + $0xb8] sm:$0xff] %vm2321_vm14, %v2278_v10  ;;  %v2377_v24 = vmax.f32 %v2278_v10, 0.0 }
 0x30f   : > { %2344 = vst.msk [vmem:[%s3932_s10 + $0xb0] sm:$0xff] %vm2321_vm14, %v2273_v0  ;;  %v2376_v14 = vmax.f32 %v2273_v0, 0.0 }
 0x310   : > { %2409 = vst.msk [vmem:[%s3929_s9 + $0xb8] sm:$0xff] %vm2321_vm14, %v2377_v24 }
 0x311   : > { %2408 = vst.msk [vmem:[%s3929_s9 + $0xb0] sm:$0xff] %vm2321_vm14, %v2376_v14 }
 0x32e   : > { %v2650_v25 = vpop.f32.mrb[8].mxu0 }
 0x32f   : > { %v2208_v62 = vadd.f32 %v2650_v25, %v3919_v40  ;;  %v2202_v54 = vpop.f32.mrb[9].mxu0 }
 0x330   : > { %v2203_v28 = vadd.f32 %v3919_v40, %v2202_v54 }
 0x331   : > { %2331 = vst.msk [vmem:[%s3932_s10 + $0x48] sm:$0xff] %vm2321_vm14, %v2208_v62  ;;  %v2363_v42 = vmax.f32 %v2208_v62, 0.0 }
 0x332   : > { %2330 = vst.msk [vmem:[%s3932_s10 + $0x40] sm:$0xff] %vm2321_vm14, %v2203_v28  ;;  %v2362_v21 = vmax.f32 %v2203_v28, 0.0 }
 0x333   : > { %2395 = vst.msk [vmem:[%s3929_s9 + $0x48] sm:$0xff] %vm2321_vm14, %v2363_v42  ;;  %v2674_v38 = vpop.f32.mrb[8].mxu1 }
 0x334   : > { %2394 = vst.msk [vmem:[%s3929_s9 + $0x40] sm:$0xff] %vm2321_vm14, %v2362_v21  ;;  %v2288_v34 = vadd.f32 %v2674_v38, %v3919_v40  ;;  %v2282_v45 = vpop.f32.mrb[9].mxu1 }
 0x335   : > { %v2283_v13 = vadd.f32 %v3919_v40, %v2282_v45 }
 0x336   : > { %2347 = vst.msk [vmem:[%s3932_s10 + $0xc8] sm:$0xff] %vm2321_vm14, %v2288_v34  ;;  %v2379_v41 = vmax.f32 %v2288_v34, 0.0 }
 0x337   : > { %2346 = vst.msk [vmem:[%s3932_s10 + $0xc0] sm:$0xff] %vm2321_vm14, %v2283_v13  ;;  %v2378_v57 = vmax.f32 %v2283_v13, 0.0 }
 0x338   : > { %2411 = vst.msk [vmem:[%s3929_s9 + $0xc8] sm:$0xff] %vm2321_vm14, %v2379_v41 }
 0x339   : > { %2410 = vst.msk [vmem:[%s3929_s9 + $0xc0] sm:$0xff] %vm2321_vm14, %v2378_v57 }
 0x356   : > { %v2653_v37 = vpop.f32.mrb[10].mxu0 }
 0x357   : > { %v2218_v58 = vadd.f32 %v2653_v37, %v3919_v40  ;;  %v2212_v19 = vpop.f32.mrb[11].mxu0 }
 0x358   : > { %v2213_v29 = vadd.f32 %v3919_v40, %v2212_v19 }
 0x359   : > { %2333 = vst.msk [vmem:[%s3932_s10 + $0x58] sm:$0xff] %vm2321_vm14, %v2218_v58  ;;  %v2365_v52 = vmax.f32 %v2218_v58, 0.0 }
 0x35a   : > { %2332 = vst.msk [vmem:[%s3932_s10 + $0x50] sm:$0xff] %vm2321_vm14, %v2213_v29  ;;  %v2364_v20 = vmax.f32 %v2213_v29, 0.0 }
 0x35b   : > { %2397 = vst.msk [vmem:[%s3929_s9 + $0x58] sm:$0xff] %vm2321_vm14, %v2365_v52  ;;  %v2677_v11 = vpop.f32.mrb[10].mxu1 }
 0x35c   : > { %2396 = vst.msk [vmem:[%s3929_s9 + $0x50] sm:$0xff] %vm2321_vm14, %v2364_v20  ;;  %v2298_v33 = vadd.f32 %v2677_v11, %v3919_v40  ;;  %v2292_v12 = vpop.f32.mrb[11].mxu1 }
 0x35d   : > { %v2293_v53 = vadd.f32 %v3919_v40, %v2292_v12 }
 0x35e   : > { %2349 = vst.msk [vmem:[%s3932_s10 + $0xd8] sm:$0xff] %vm2321_vm14, %v2298_v33  ;;  %v2381_v6 = vmax.f32 %v2298_v33, 0.0 }
 0x35f   : > { %2348 = vst.msk [vmem:[%s3932_s10 + $0xd0] sm:$0xff] %vm2321_vm14, %v2293_v53  ;;  %v2380_v2 = vmax.f32 %v2293_v53, 0.0 }
 0x360   : > { %2413 = vst.msk [vmem:[%s3929_s9 + $0xd8] sm:$0xff] %vm2321_vm14, %v2381_v6 }
 0x361   : > { %2412 = vst.msk [vmem:[%s3929_s9 + $0xd0] sm:$0xff] %vm2321_vm14, %v2380_v2 }
 0x37e   : > { %v2656_v7 = vpop.f32.mrb[12].mxu0 }
 0x37f   : > { %v2228_v26 = vadd.f32 %v2656_v7, %v3919_v40  ;;  %v2222_v1 = vpop.f32.mrb[13].mxu0 }
 0x380   : > { %v2223_v44 = vadd.f32 %v3919_v40, %v2222_v1 }
 0x381   : > { %2335 = vst.msk [vmem:[%s3932_s10 + $0x68] sm:$0xff] %vm2321_vm14, %v2228_v26  ;;  %v2367_v4 = vmax.f32 %v2228_v26, 0.0 }
 0x382   : > { %2334 = vst.msk [vmem:[%s3932_s10 + $0x60] sm:$0xff] %vm2321_vm14, %v2223_v44  ;;  %v2366_v3 = vmax.f32 %v2223_v44, 0.0 }
 0x383   : > { %2399 = vst.msk [vmem:[%s3929_s9 + $0x68] sm:$0xff] %vm2321_vm14, %v2367_v4  ;;  %v2680_v9 = vpop.f32.mrb[12].mxu1 }
 0x384   : > { %2398 = vst.msk [vmem:[%s3929_s9 + $0x60] sm:$0xff] %vm2321_vm14, %v2366_v3  ;;  %v2308_v46 = vadd.f32 %v2680_v9, %v3919_v40  ;;  %v2302_v5 = vpop.f32.mrb[13].mxu1 }
 0x385   : > { %v2303_v27 = vadd.f32 %v3919_v40, %v2302_v5 }
 0x386   : > { %2351 = vst.msk [vmem:[%s3932_s10 + $0xe8] sm:$0xff] %vm2321_vm14, %v2308_v46  ;;  %v2383_v30 = vmax.f32 %v2308_v46, 0.0 }
 0x387   : > { %2350 = vst.msk [vmem:[%s3932_s10 + $0xe0] sm:$0xff] %vm2321_vm14, %v2303_v27  ;;  %v2382_v36 = vmax.f32 %v2303_v27, 0.0 }
 0x388   : > { %2415 = vst.msk [vmem:[%s3929_s9 + $0xe8] sm:$0xff] %vm2321_vm14, %v2383_v30 }
 0x389   : > { %2414 = vst.msk [vmem:[%s3929_s9 + $0xe0] sm:$0xff] %vm2321_vm14, %v2382_v36 }
 0x39a   : > { %v2659_v31 = vpop.f32.mrb[14].mxu0 }
 0x39b   : > { %v2238_v50 = vadd.f32 %v2659_v31, %v3919_v40  ;;  %v2232_v39 = vpop.f32.mrb[15].mxu0 }
 0x39c   : > { %v2233_v59 = vadd.f32 %v3919_v40, %v2232_v39 }
 0x39d   : > { %2337 = vst.msk [vmem:[%s3932_s10 + $0x78] sm:$0xff] %vm2321_vm14, %v2238_v50  ;;  %v2369_v48 = vmax.f32 %v2238_v50, 0.0 }
 0x39e   : > { %2336 = vst.msk [vmem:[%s3932_s10 + $0x70] sm:$0xff] %vm2321_vm14, %v2233_v59  ;;  %v2368_v60 = vmax.f32 %v2233_v59, 0.0 }
 0x39f   : > { %2401 = vst.msk [vmem:[%s3929_s9 + $0x78] sm:$0xff] %vm2321_vm14, %v2369_v48  ;;  %v2683_v47 = vpop.f32.mrb[14].mxu1 }
 0x3a0   : > { %2400 = vst.msk [vmem:[%s3929_s9 + $0x70] sm:$0xff] %vm2321_vm14, %v2368_v60  ;;  %v2318_v15 = vadd.f32 %v2683_v47, %v3919_v40  ;;  %v2312_v49 = vpop.f32.mrb[15].mxu1 }
 0x3a1   : > { %v2313_v17 = vadd.f32 %v3919_v40, %v2312_v49 }
 0x3a2   : > { %2353 = vst.msk [vmem:[%s3932_s10 + $0xf8] sm:$0xff] %vm2321_vm14, %v2318_v15  ;;  %v2385_v16 = vmax.f32 %v2318_v15, 0.0 }
 0x3a3   : > { %2352 = vst.msk [vmem:[%s3932_s10 + $0xf0] sm:$0xff] %vm2321_vm14, %v2313_v17  ;;  %v2384_v51 = vmax.f32 %v2313_v17, 0.0 }
 0x3a4   : > { %2417 = vst.msk [vmem:[%s3929_s9 + $0xf8] sm:$0xff] %vm2321_vm14, %v2385_v16 }
 0x3a5   : > { %2801 = shalt.err (!%p2798_p7)
}
 0x3a6   : > { %s2802_s29 = scalar_lea.hbm %s4122_s13, 4096  ;;  %s2806_s6 = scalar_lea.hbm %s4181_s3, 8192 }
 0x3a7   : > { %p2803_p8 = scmp.ne.s32.totalorder %s4122_s13, %s2802_s29  ;;  %p2807_p1 = scmp.lt.u32.totalorder %s4122_s13, %s4181_s3 }
 0x3a8   : > { %p2808_p0 = scmp.lt.u32.totalorder %s2806_s6, %s2802_s29  ;;  %p2810_p5 = scmp.lt.u32.totalorder %s2802_s29, %s4122_s13 }
 0x3a9   : > { %p2804_p11 = pnand %p2803_p8, %p4193_p9 }
 0x3aa   : > { %p2809_p6 = por %p2808_p0, %p2807_p1 }
 0x3ab   : > { %p2805_p13 = pneg %p2804_p11 }
 0x3ac   : > { %p2811_p10 = por %p2810_p5, %p2809_p6 }
 0x3ae   : > { %p2812_p12 = pnand %p2811_p10, %p2805_p13 }
 0x3b0   : > { %2815 = shalt.err (!%p2812_p12)
}
 0x3b1   : > { %s2868_s10 = smov 128   ;;  %s2869_s22 = smov 8   ;;  %2416 = vst.msk [vmem:[%s3929_s9 + $0xf0] sm:$0xff] %vm2321_vm14, %v2384_v51 }
 0x3b2   : > { %2702 = dma.vmem_to_hbm [thread:$0]  (%p4193_p9), %s4124_s23, 4096, %s4122_s13, %s4135_s19, %s2868_s10, %s2868_s10, %s2869_s22  }
 0x3b3 PF: > { %p2714_p2 = scmp.ge.s32.totalorder %s2854_s18, 2  ;;  %s2455_s11 = sand.u32 1, %s2842_s15  }
 0x3b4   : > { %p4194_p3 = scmp.ne.s32.totalorder %s4187_s26, 0  ;;  %s2456_s12 = scalar_lea.sflag [#allocation6], %s2455_s11 }
 0x3b6   : > { %p2709_p4 = pnand %p2714_p2, %p4194_p3 }
 0x3b8   : > { %2837 = dma.done.wait (!%p2709_p4), %s2456_s12, 4096  }
 0x3b9   : > { %2839 = vsyncadd (!%p2709_p4), %s2456_s12, 4294963200  ;;  %p16_p7 = scmp.ge.s32.totalorder %s2920_s21, 4   ;;  %s4195_s15 = smov %s2846_s16 }
 0x3ba   : > { %s4196_s16 = smov %s2850_s17  ;;  %s4197_s17 = smov %s2931_s24 }
 0x3bb   : > { %s4198_s18 = smov %s2920_s21  ;;  %18 = sbr.rel (!%p16_p7) target bundleno = 4 (0x4), region = 86 }
 0x3c2   :  { %2469 = vsyncpa [#allocation5], 1 }
 0x3c3   :  { %2471 = vsyncpa [#allocation5 + $0x1], 1 }
 0x3c4   :  { %2472 = vsyncpa [#allocation6], 1 }
 0x3c5   :  { %2474 = vsyncpa [#allocation6 + $0x1], 1 }

// kernel: encoder_forward.4
= control target key start
LH: loop header
LB: loop body
LE: loop exit
PB: predicated region body
PF: predicated region fallthrough
CT: control target
= control target key end

     0   :  { %10 = vsyncpa [#allocation5], 0  ;;  %s4490_s0 = inlined_call_operand.vmem [shape: f32[2,16,16,32], index: 0, kind: input, shape index: {}]   ;;  %s4491_s1 = inlined_call_operand.vmem [shape: f32[288,64], index: 1, kind: input, shape index: {}]   ;;  %s4492_s2 = inlined_call_operand.vmem [shape: f32[1,64], index: 2, kind: input, shape index: {}]   ;;  %s4493_s3 = inlined_call_operand.hbm [shape: f32[2,16,16,64], index: 3, kind: output, shape index: {0}]   ;;  %s4494_s4 = inlined_call_operand.vmem [shape: f32[2,16,16,64], index: 4, kind: output, shape index: {1}]  }
   0x1   :  { %12 = vsyncpa [#allocation5 + $0x1], 0  ;;  %s2942_s15 = smov 0   ;;  %s2944_s16 = smov 0  }
   0x2   :  { %s2946_s17 = smov 0   ;;  %s2948_s18 = smov 0  }
   0x3 LB: > { %s2963_s19 = sadd.s32 4294967295, %s2907_s18   ;;  %s2569_s20 = sadd.s32 4294967294, %s2907_s18   ;;  %s2907_s18 = sphi %s2948_s18, %s4500_s18   ;;  %s2903_s17 = sphi %s2946_s17, %s4499_s17   ;;  %s2899_s16 = sphi %s2944_s16, %s4498_s16   ;;  %s2895_s15 = sphi %s2942_s15, %s4497_s15  }
   0x4   : > { %s2967_s21 = sadd.s32 1, %s2907_s18   ;;  %s93_s22 = sadd.s32 1, %s2903_s17 }
   0x5   : > { %s90_s23 = ssub.s32 %s2907_s18, %s2967_s21  ;;  %p103_p0 = scmp.ne.s32.totalorder %s2903_s17, %s2899_s16 }
   0x6   : > { %p91_p1 = scmp.eq.s32.totalorder %s90_s23, 0  ;;  %p104_p2 = scmp.eq.s32.totalorder %s2963_s19, 1 }
   0x7   : > { %p109_p3 = scmp.ne.s32.totalorder %s2899_s16, %s2895_s15  ;;  %p110_p4 = scmp.eq.s32.totalorder %s2569_s20, 1 }
   0x8   : > { %s2978_s24 = scalar_select %p91_p1, %s2903_s17, %s93_s22  }
   0x9   : > { %p2980_p5 = por %p104_p2, %p103_p0  ;;  %p2984_p6 = por %p110_p4, %p109_p3 }
   0xa   : > { %p2572_p7 = scmp.ge.s32.totalorder %s2907_s18, 1  ;;  %p168_p8 = scmp.lt.s32.totalorder %s2907_s18, 3 }
   0xc   : > { %p169_p9 = pnand %p2572_p7, %p168_p8 }
   0xd   : > { %vm209_vm0 = vcmask (!%p169_p9), 261120   ;;  %vm212_vm1 = vcmask (!%p169_p9), 254976   ;;  %v2909_v0 = vmov (!%p169_p9), 0.0   ;;  %p199_p10 = scmp.lt.s32.totalorder (!%p169_p9), %s2963_s19, 1  ;;  %v2910_v1 = vmov (!%p169_p9), 0.0|0.0   ;;  %v1774_v2 = vld [vmem:[%s4491_s1] sm:$0xff] (!%p169_p9) }
   0xe   : > { %172 = sbr.rel (%p169_p9) target bundleno = 779 (0x30b), region = 32  ;;  %210 = vst.msk [vmem:[#allocation2] sm:$0xff] (!%p169_p9), %vm209_vm0, %v2909_v0  ;;  %211 = vst.msk [vmem:[#allocation2 + $0x8] sm:$0xff] (!%p169_p9), %vm209_vm0, %v2909_v0  ;;  %2711 = vmatprep.subr.bf16.mxu0 (!%p169_p9), %v2910_v1  ;;  %v1775_v3 = vld [vmem:[%s4491_s1 + $0x8] sm:$0xff] (!%p169_p9)  ;;  %2767 = vmatprep.subr.bf16.mxu1 (!%p169_p9), %v2910_v1  ;;  %v1776_v4 = vld [vmem:[%s4491_s1 + $0x10] sm:$0xff] (!%p169_p9)  ;;  %s2911_s5 = smov (!%p169_p9), 32  }
   0xf   : > { %214 = vst.msk [vmem:[#allocation2 + $0x18] sm:$0xff] (!%p169_p9), %vm209_vm0, %v2909_v0  ;;  %215 = vst.msk [vmem:[#allocation2 + $0x20] sm:$0xff] (!%p169_p9), %vm209_vm0, %v2909_v0  ;;  %v2712_v5 = vpack.c.bf16 (!%p169_p9), %v1775_v3, %v1774_v2  ;;  %v1777_v6 = vld [vmem:[%s4491_s1 + $0x18] sm:$0xff] (!%p169_p9)  ;;  %v1778_v8 = vld [vmem:[%s4491_s1 + $0x20] sm:$0xff] (!%p169_p9)  ;;  %s2912_s6 = smov (!%p169_p9), 64   ;;  %s2913_s13 = smov (!%p169_p9), 96  }
  0x10   : > { %217 = vst.msk [vmem:[#allocation2 + $0x30] sm:$0xff] (!%p169_p9), %vm209_vm0, %v2909_v0  ;;  %218 = vst.msk [vmem:[#allocation2 + $0x38] sm:$0xff] (!%p169_p9), %vm209_vm0, %v2909_v0  ;;  %v2715_v7 = vpack.c.bf16 (!%p169_p9), %v1777_v6, %v1776_v4  ;;  %v1779_v9 = vld [vmem:[%s4491_s1 + $0x28] sm:$0xff] (!%p169_p9)  ;;  %v1780_v13 = vld [vmem:[%s4491_s1 + $0x30] sm:$0xff] (!%p169_p9)  ;;  %vm554_vm2 = vcmask (!%p169_p9), 523520   ;;  %vm747_vm3 = vcmask (!%p169_p9), 785920  }
  0x11   : > { %220 = vst.msk [vmem:[#allocation2 + $0x48] sm:$0xff] (!%p169_p9), %vm209_vm0, %v2909_v0  ;;  %221 = vst.msk [vmem:[#allocation2 + $0x50] sm:$0xff] (!%p169_p9), %vm209_vm0, %v2909_v0  ;;  %2713 = vmatpush1.bf16.msra.mxu0 (!%p169_p9), %v2712_v5  ;;  %2783 = vmatpush1.bf16.msra.mxu1 (!%p169_p9), %v2712_v5  ;;  %v2718_v16 = vpack.c.bf16 (!%p169_p9), %v1779_v9, %v1778_v8  ;;  %v1781_v17 = vld [vmem:[%s4491_s1 + $0x38] sm:$0xff] (!%p169_p9)  ;;  %v1782_v27 = vld [vmem:[%s4491_s1 + $0x40] sm:$0xff] (!%p169_p9)  ;;  %vm940_vm4 = vcmask (!%p169_p9), 1048320   ;;  %vm2363_vm5 = vcmask (!%p169_p9), 523264  }
  0x12   : > { %223 = vst.msk [vmem:[#allocation2 + $0x60] sm:$0xff] (!%p169_p9), %vm209_vm0, %v2909_v0  ;;  %224 = vst.msk [vmem:[#allocation2 + $0x68] sm:$0xff] (!%p169_p9), %vm209_vm0, %v2909_v0  ;;  %2714 = vmatprep.subr.bf16.mxu0 (!%p169_p9), %v2910_v1  ;;  %2768 = vmatprep.subr.bf16.mxu1 (!%p169_p9), %v2910_v1  ;;  %v1783_v28 = vld [vmem:[%s4491_s1 + $0x48] sm:$0xff] (!%p169_p9)  ;;  %v2721_v32 = vpack.c.bf16 (!%p169_p9), %v1781_v17, %v1780_v13  ;;  %v1784_v44 = vld [vmem:[%s4491_s1 + $0x50] sm:$0xff] (!%p169_p9)  ;;  %s2914_s28 = smov (!%p169_p9), [#allocation4]  }
  0x13   : > { %226 = vst.msk [vmem:[#allocation2 + $0x78] sm:$0xff] (!%p169_p9), %vm209_vm0, %v2909_v0  ;;  %227 = vst.msk [vmem:[#allocation2 + $0x80] sm:$0xff] (!%p169_p9), %vm209_vm0, %v2909_v0  ;;  %v2724_v42 = vpack.c.bf16 (!%p169_p9), %v1783_v28, %v1782_v27  ;;  %v1785_v45 = vld [vmem:[%s4491_s1 + $0x58] sm:$0xff] (!%p169_p9)  ;;  %v1786_v52 = vld [vmem:[%s4491_s1 + $0x60] sm:$0xff] (!%p169_p9)  ;;  %s2849_s29 = sshll.u32 (!%p169_p9), %s2914_s28, 4  ;;  %s2850_s29 = int_to_ptr.vmem [resolvable:$false] %s2849_s29 }
  0x14   : > { %229 = vst.msk [vmem:[#allocation2 + $0x90] sm:$0xff] (!%p169_p9), %vm209_vm0, %v2909_v0  ;;  %230 = vst.msk [vmem:[#allocation2 + $0x98] sm:$0xff] (!%p169_p9), %vm209_vm0, %v2909_v0  ;;  %v2727_v51 = vpack.c.bf16 (!%p169_p9), %v1785_v45, %v1784_v44  ;;  %v1787_v55 = vld [vmem:[%s4491_s1 + $0x68] sm:$0xff] (!%p169_p9)  ;;  %v1788_v63 = vld [vmem:[%s4491_s1 + $0x70] sm:$0xff] (!%p169_p9)  ;;  %s2851_s30 = scalar_lea.vmem (!%p169_p9), %s2850_s29, 8192 }
  0x15   : > { %232 = vst.msk [vmem:[#allocation2 + $0xa8] sm:$0xff] %vm209_vm0, %v2909_v0  ;;  %233 = vst.msk [vmem:[#allocation2 + $0xb0] sm:$0xff] %vm209_vm0, %v2909_v0  ;;  %s3060_s9 = scalar_select %p199_p10, %s2963_s19, 1  ;;  %v394_v14 = vld [vmem:[#allocation2 + $0x1] sm:$0xff]  ;;  %2716 = vmatpush1.bf16.msra.mxu0 %v2715_v7  ;;  %2784 = vmatpush1.bf16.msra.mxu1 %v2715_v7  ;;  %v2730_v61 = vpack.c.bf16 %v1787_v55, %v1786_v52  ;;  %v1796_v28 = vld [vmem:[%s4491_s1 + $0xb0] sm:$0xff] }
  0x16   : > { %235 = vst.msk [vmem:[#allocation2 + $0xc0] sm:$0xff] %vm209_vm0, %v2909_v0  ;;  %236 = vst.msk [vmem:[#allocation2 + $0xc8] sm:$0xff] %vm209_vm0, %v2909_v0  ;;  %v587_v15 = vld [vmem:[#allocation2 + $0x2] sm:$0xff]  ;;  %458 = vrot.lane.b32.xlu0 %v394_v14, %s2911_s5  ;;  %2717 = vmatprep.subr.bf16.mxu0 %v2910_v1  ;;  %v1792_v14 = vld [vmem:[%s4491_s1 + $0x90] sm:$0xff] }
  0x17   : > { %238 = vst.msk [vmem:[#allocation2 + $0xd8] sm:$0xff] %vm209_vm0, %v2909_v0  ;;  %239 = vst.msk [vmem:[#allocation2 + $0xe0] sm:$0xff] %vm209_vm0, %v2909_v0  ;;  %s2616_s10 = sshll.u32 %s3060_s9, 8  ;;  %651 = vrot.lane.b32.xlu1 %v587_v15, %s2912_s6  ;;  %2769 = vmatprep.subr.bf16.mxu1 %v2910_v1  ;;  %v330_v35 = vld [vmem:[#allocation2] sm:$0xff]  ;;  %v331_v36 = vld [vmem:[#allocation2 + $0x8] sm:$0xff]  ;;  %s2618_s9 = sshll.u32 %s2963_s19, 12 }
  0x18   : > { %241 = vst.msk [vmem:[#allocation2 + $0xf0] sm:$0xff] %vm209_vm0, %v2909_v0  ;;  %242 = vst.msk [vmem:[#allocation2 + $0xf8] sm:$0xff] %vm209_vm0, %v2909_v0  ;;  %s3076_s23 = scalar_lea.vmem %s4490_s0, %s2616_s10  ;;  %v1790_v8 = vld [vmem:[%s4491_s1 + $0x80] sm:$0xff]  ;;  %v1791_v9 = vld [vmem:[%s4491_s1 + $0x88] sm:$0xff]  ;;  %s4231_s11 = scalar_lea.vmem %s4494_s4, %s2616_s10 }
  0x19   : > { %244 = vst.msk [vmem:[#allocation2 + $0x108] sm:$0xff] %vm209_vm0, %v2909_v0  ;;  %245 = vst.msk [vmem:[#allocation2 + $0x110] sm:$0xff] %vm209_vm0, %v2909_v0  ;;  %v265_v10 = vld [vmem:[%s3076_s23] sm:$0xff]  ;;  %v290_v12 = vld [vmem:[%s3076_s23 + $0xc8] sm:$0xff]  ;;  %2719 = vmatpush1.bf16.msra.mxu0 %v2718_v16  ;;  %2785 = vmatpush1.bf16.msra.mxu1 %v2718_v16  ;;  %s4438_s22 = scalar_lea.hbm %s4493_s3, %s2618_s9 }
  0x1a   : > { %247 = vst.msk [vmem:[#allocation2 + $0x120] sm:$0xff] %vm209_vm0, %v2909_v0  ;;  %248 = vst.msk [vmem:[#allocation2 + $0x128] sm:$0xff] %vm209_vm0, %v2909_v0  ;;  %v289_v11 = vld [vmem:[%s3076_s23 + $0xc0] sm:$0xff]  ;;  %v266_v19 = vld [vmem:[%s3076_s23 + $0x8] sm:$0xff]  ;;  %2720 = vmatprep.subr.bf16.mxu0 %v2910_v1  ;;  %2770 = vmatprep.subr.bf16.mxu1 %v2910_v1 }
  0x1b   : > { %250 = vst.msk [vmem:[#allocation2 + $0x138] sm:$0xff] %vm209_vm0, %v2909_v0  ;;  %251 = vst.msk [vmem:[#allocation2 + $0x140] sm:$0xff] %vm209_vm0, %v2909_v0  ;;  %v287_v20 = vld [vmem:[%s3076_s23 + $0xb0] sm:$0xff]  ;;  %v288_v23 = vld [vmem:[%s3076_s23 + $0xb8] sm:$0xff] }
  0x1c   : > { %253 = vst.msk [vmem:[#allocation2 + $0x150] sm:$0xff] %vm209_vm0, %v2909_v0  ;;  %254 = vst.msk [vmem:[#allocation2 + $0x158] sm:$0xff] %vm209_vm0, %v2909_v0  ;;  %v267_v21 = vld [vmem:[%s3076_s23 + $0x10] sm:$0xff]  ;;  %v268_v24 = vld [vmem:[%s3076_s23 + $0x18] sm:$0xff] }
  0x1d   : > { %256 = vst.msk [vmem:[#allocation2 + $0x168] sm:$0xff] %vm209_vm0, %v2909_v0  ;;  %257 = vst.msk [vmem:[#allocation2 + $0x170] sm:$0xff] %vm209_vm0, %v2909_v0  ;;  %v291_v22 = vld [vmem:[%s3076_s23 + $0xd0] sm:$0xff]  ;;  %v292_v25 = vld [vmem:[%s3076_s23 + $0xd8] sm:$0xff]  ;;  %2722 = vmatpush1.bf16.msra.mxu0 %v2721_v32  ;;  %2786 = vmatpush1.bf16.msra.mxu1 %v2721_v32 }
  0x1e   : > { %259 = vst.msk [vmem:[#allocation2 + $0x180] sm:$0xff] %vm209_vm0, %v2909_v0  ;;  %260 = vst.msk [vmem:[#allocation2 + $0x188] sm:$0xff] %vm209_vm0, %v2909_v0  ;;  %v269_v26 = vld [vmem:[%s3076_s23 + $0x20] sm:$0xff]  ;;  %v270_v30 = vld [vmem:[%s3076_s23 + $0x28] sm:$0xff]  ;;  %2723 = vmatprep.subr.bf16.mxu0 %v2910_v1  ;;  %2771 = vmatprep.subr.bf16.mxu1 %v2910_v1 }
  0x1f   : > { %262 = vst.msk [vmem:[#allocation2 + $0x198] sm:$0xff] %vm209_vm0, %v2909_v0  ;;  %263 = vst.msk [vmem:[#allocation2 + $0x1a0] sm:$0xff] %vm209_vm0, %v2909_v0  ;;  %v293_v29 = vld [vmem:[%s3076_s23 + $0xe0] sm:$0xff]  ;;  %v294_v31 = vld [vmem:[%s3076_s23 + $0xe8] sm:$0xff] }
  0x20   : > { %213 = vst.msk [vmem:[#allocation2 + $0x10] sm:$0x3] %vm212_vm1, %v2909_v0  ;;  %216 = vst.msk [vmem:[#allocation2 + $0x28] sm:$0x3] %vm212_vm1, %v2909_v0  ;;  %v271_v33 = vld [vmem:[%s3076_s23 + $0x30] sm:$0xff]  ;;  %v296_v13 = vld [vmem:[%s3076_s23 + $0xf8] sm:$0xff] }
  0x21   : > { %219 = vst.msk [vmem:[#allocation2 + $0x40] sm:$0x3] %vm212_vm1, %v2909_v0  ;;  %222 = vst.msk [vmem:[#allocation2 + $0x58] sm:$0x3] %vm212_vm1, %v2909_v0  ;;  %v295_v34 = vld [vmem:[%s3076_s23 + $0xf0] sm:$0xff]  ;;  %2725 = vmatpush1.bf16.msra.mxu0 %v2724_v42  ;;  %2787 = vmatpush1.bf16.msra.mxu1 %v2724_v42  ;;  %v1793_v15 = vld [vmem:[%s4491_s1 + $0x98] sm:$0xff] }
  0x22   : > { %225 = vst.msk [vmem:[#allocation2 + $0x70] sm:$0x3] %vm212_vm1, %v2909_v0  ;;  %228 = vst.msk [vmem:[#allocation2 + $0x88] sm:$0x3] %vm212_vm1, %v2909_v0  ;;  %2726 = vmatprep.subr.bf16.mxu0 %v2910_v1  ;;  %2772 = vmatprep.subr.bf16.mxu1 %v2910_v1  ;;  %v1801_v42 = vld [vmem:[%s4491_s1 + $0xd8] sm:$0xff]  ;;  %v1804_v55 = vld [vmem:[%s4491_s1 + $0xf0] sm:$0xff] }
  0x23   : > { %231 = vst.msk [vmem:[#allocation2 + $0xa0] sm:$0x3] %vm212_vm1, %v2909_v0  ;;  %234 = vst.msk [vmem:[#allocation2 + $0xb8] sm:$0x3] %vm212_vm1, %v2909_v0 }
  0x24   : > { %237 = vst.msk [vmem:[#allocation2 + $0xd0] sm:$0x3] %vm212_vm1, %v2909_v0  ;;  %240 = vst.msk [vmem:[#allocation2 + $0xe8] sm:$0x3] %vm212_vm1, %v2909_v0 }
  0x25   : > { %243 = vst.msk [vmem:[#allocation2 + $0x100] sm:$0x3] %vm212_vm1, %v2909_v0  ;;  %246 = vst.msk [vmem:[#allocation2 + $0x118] sm:$0x3] %vm212_vm1, %v2909_v0  ;;  %2728 = vmatpush1.bf16.msra.mxu0 %v2727_v51  ;;  %2788 = vmatpush1.bf16.msra.mxu1 %v2727_v51  ;;  %v1803_v51 = vld [vmem:[%s4491_s1 + $0xe8] sm:$0xff] }
  0x26   : > { %249 = vst.msk [vmem:[#allocation2 + $0x130] sm:$0x3] %vm212_vm1, %v2909_v0  ;;  %252 = vst.msk [vmem:[#allocation2 + $0x148] sm:$0x3] %vm212_vm1, %v2909_v0  ;;  %2729 = vmatprep.subr.bf16.mxu0 %v2910_v1  ;;  %2773 = vmatprep.subr.bf16.mxu1 %v2910_v1 }
  0x27   : > { %255 = vst.msk [vmem:[#allocation2 + $0x160] sm:$0x3] %vm212_vm1, %v2909_v0  ;;  %258 = vst.msk [vmem:[#allocation2 + $0x178] sm:$0x3] %vm212_vm1, %v2909_v0  ;;  %v395_v18 = vld [vmem:[#allocation2 + $0x9] sm:$0xff] }
  0x28   : > { %261 = vst.msk [vmem:[#allocation2 + $0x190] sm:$0x3] %vm212_vm1, %v2909_v0  ;;  %264 = vst.msk [vmem:[#allocation2 + $0x1a8] sm:$0x3] %vm212_vm1, %v2909_v0  ;;  %460 = vrot.lane.b32.xlu0 %v395_v18, %s2911_s5  ;;  %v1789_v0 = vld [vmem:[%s4491_s1 + $0x78] sm:$0xff]  ;;  %v273_v18 = vld [vmem:[%s3076_s23 + $0x40] sm:$0xff] }
  0x29   : > { %298 = vst.msk [vmem:[#allocation2 + $0x19] sm:$0xff] %vm209_vm0, %v265_v10  ;;  %322 = vst.msk [vmem:[#allocation2 + $0x139] sm:$0xff] %vm209_vm0, %v289_v11  ;;  %2731 = vmatpush1.bf16.msra.mxu0 %v2730_v61  ;;  %v2733_v5 = vpack.c.bf16 %v1789_v0, %v1788_v63  ;;  %2789 = vmatpush1.bf16.msra.mxu1 %v2730_v61  ;;  %v272_v11 = vld [vmem:[%s3076_s23 + $0x38] sm:$0xff] }
  0x2a   : > { %323 = vst.msk [vmem:[#allocation2 + $0x141] sm:$0xff] %vm209_vm0, %v290_v12  ;;  %299 = vst.msk [vmem:[#allocation2 + $0x21] sm:$0xff] %vm209_vm0, %v266_v19  ;;  %2732 = vmatprep.subr.bf16.mxu0 %v2910_v1  ;;  %2774 = vmatprep.subr.bf16.mxu1 %v2910_v1  ;;  %v2736_v12 = vpack.c.bf16 %v1791_v9, %v1790_v8  ;;  %v2739_v19 = vpack.c.bf16 %v1793_v15, %v1792_v14  ;;  %v1805_v61 = vld [vmem:[%s4491_s1 + $0xf8] sm:$0xff] }
  0x2b   : > { %320 = vst.msk [vmem:[#allocation2 + $0x121] sm:$0xff] %vm209_vm0, %v287_v20  ;;  %300 = vst.msk [vmem:[#allocation2 + $0x31] sm:$0xff] %vm209_vm0, %v267_v21  ;;  %v1794_v21 = vld [vmem:[%s4491_s1 + $0xa0] sm:$0xff]  ;;  %v276_v9 = vld [vmem:[%s3076_s23 + $0x58] sm:$0xff] }
  0x2c   : > { %324 = vst.msk [vmem:[#allocation2 + $0x151] sm:$0xff] %vm209_vm0, %v291_v22  ;;  %321 = vst.msk [vmem:[#allocation2 + $0x129] sm:$0xff] %vm209_vm0, %v288_v23  ;;  %v1795_v22 = vld [vmem:[%s4491_s1 + $0xa8] sm:$0xff] }
  0x2d   : > { %301 = vst.msk [vmem:[#allocation2 + $0x39] sm:$0xff] %vm209_vm0, %v268_v24  ;;  %325 = vst.msk [vmem:[#allocation2 + $0x159] sm:$0xff] %vm209_vm0, %v292_v25  ;;  %2734 = vmatpush1.bf16.msra.mxu0 %v2733_v5  ;;  %2790 = vmatpush1.bf16.msra.mxu1 %v2733_v5  ;;  %v2742_v25 = vpack.c.bf16 %v1795_v22, %v1794_v21  ;;  %v279_v21 = vld [vmem:[%s3076_s23 + $0x70] sm:$0xff] }
  0x2e   : > { %302 = vst.msk [vmem:[#allocation2 + $0x49] sm:$0xff] %vm209_vm0, %v269_v26  ;;  %326 = vst.msk [vmem:[#allocation2 + $0x169] sm:$0xff] %vm209_vm0, %v293_v29  ;;  %2735 = vmatprep.subr.bf16.mxu0 %v2910_v1  ;;  %2775 = vmatprep.subr.bf16.mxu1 %v2910_v1  ;;  %v1797_v29 = vld [vmem:[%s4491_s1 + $0xb8] sm:$0xff] }
  0x2f   : > { %303 = vst.msk [vmem:[#allocation2 + $0x51] sm:$0xff] %vm209_vm0, %v270_v30  ;;  %327 = vst.msk [vmem:[#allocation2 + $0x171] sm:$0xff] %vm209_vm0, %v294_v31  ;;  %v588_v30 = vld [vmem:[#allocation2 + $0xa] sm:$0xff]  ;;  %v2745_v32 = vpack.c.bf16 %v1797_v29, %v1796_v28 }
  0x30   : > { %304 = vst.msk [vmem:[#allocation2 + $0x61] sm:$0xff] %vm209_vm0, %v271_v33  ;;  %328 = vst.msk [vmem:[#allocation2 + $0x181] sm:$0xff] %vm209_vm0, %v295_v34  ;;  %v396_v37 = vld [vmem:[#allocation2 + $0x19] sm:$0xff] }
  0x31   : > { %362 = vst.msk [vmem:[#allocation3] sm:$0xff] %vm209_vm0, %v330_v35  ;;  %v3130_v38 = vld [vmem:[#allocation2 + $0x13a] sm:$0xff]  ;;  %363 = vst.msk [vmem:[#allocation3 + $0x18] sm:$0xff] %vm209_vm0, %v331_v36  ;;  %462 = vrot.lane.b32.xlu1 %v396_v37, %s2911_s5  ;;  %v3271_v16 = vld [vmem:[#allocation2 + $0x22] sm:$0xff]  ;;  %2737 = vmatpush1.bf16.msra.mxu0 %v2736_v12 }
  0x32   : > { %v3132_v39 = vld [vmem:[#allocation2 + $0x18] sm:$0xff]  ;;  %v3138_v41 = vld [vmem:[#allocation2 + $0x140] sm:$0xff]  ;;  %1005 = vst.msk [vmem:[#allocation3 + $0x8] sm:$0xff] %vm209_vm0, %v396_v37  ;;  %1149 = vrot.lane.b32.xlu0 %v3130_v38, %s2911_s5  ;;  %v3158_v47 = vld [vmem:[#allocation2 + $0x30] sm:$0xff]  ;;  %2738 = vmatprep.subr.bf16.mxu0 %v2910_v1 }
  0x33   : > { %v3136_v40 = vld [vmem:[#allocation2 + $0x138] sm:$0xff]  ;;  %364 = vst.msk [vmem:[#allocation3 + $0x30] sm:$0xff] %vm209_vm0, %v3132_v39  ;;  %389 = vst.msk [vmem:[#allocation3 + $0x288] sm:$0xff] %vm209_vm0, %v3138_v41  ;;  %v418_v46 = vld [vmem:[#allocation2 + $0x121] sm:$0xff]  ;;  %2791 = vmatpush1.bf16.msra.mxu1 %v2736_v12 }
  0x34   : > { %v3145_v43 = vld [vmem:[#allocation2 + $0x1a] sm:$0xff]  ;;  %388 = vst.msk [vmem:[#allocation3 + $0x270] sm:$0xff] %vm209_vm0, %v3136_v40  ;;  %v3160_v48 = vld [vmem:[#allocation2 + $0x31] sm:$0xff]  ;;  %366 = vst.msk [vmem:[#allocation3 + $0x60] sm:$0xff] %vm209_vm0, %v3158_v47  ;;  %2776 = vmatprep.subr.bf16.mxu1 %v2910_v1 }
  0x35   : > { %v3162_v49 = vld [vmem:[#allocation2 + $0x151] sm:$0xff]  ;;  %1007 = vst.msk [vmem:[#allocation3 + $0x38] sm:$0xff] %vm209_vm0, %v3160_v48  ;;  %1101 = vrot.lane.b32.xlu1 %v3145_v43, %s2911_s5  ;;  %v3171_v50 = vld [vmem:[#allocation2 + $0x39] sm:$0xff]  ;;  %v3197_v58 = vld [vmem:[#allocation2 + $0x49] sm:$0xff]  ;;  %2740 = vmatpush1.bf16.msra.mxu0 %v2739_v19 }
  0x36   : > { %1031 = vst.msk [vmem:[#allocation3 + $0x278] sm:$0xff] %vm209_vm0, %v3162_v49  ;;  %506 = vrot.lane.b32.xlu0 %v418_v46, %s2911_s5  ;;  %v3179_v53 = vld [vmem:[#allocation2 + $0x20] sm:$0xff]  ;;  %1008 = vst.msk [vmem:[#allocation3 + $0x50] sm:$0xff] %vm209_vm0, %v3171_v50  ;;  %v3189_v56 = vld [vmem:[#allocation2 + $0x150] sm:$0xff]  ;;  %2741 = vmatprep.subr.bf16.mxu0 %v2910_v1 }
  0x37   : > { %v3181_v54 = vld [vmem:[#allocation2 + $0x159] sm:$0xff]  ;;  %365 = vst.msk [vmem:[#allocation3 + $0x48] sm:$0xff] %vm209_vm0, %v3179_v53  ;;  %v3202_v59 = vld [vmem:[#allocation2 + $0x169] sm:$0xff]  ;;  %v3204_v60 = vld [vmem:[#allocation2 + $0x21] sm:$0xff]  ;;  %2792 = vmatpush1.bf16.msra.mxu1 %v2739_v19 }
  0x38   : > { %1032 = vst.msk [vmem:[#allocation3 + $0x290] sm:$0xff] %vm209_vm0, %v3181_v54  ;;  %v3195_v57 = vld [vmem:[#allocation2 + $0x139] sm:$0xff]  ;;  %1009 = vst.msk [vmem:[#allocation3 + $0x68] sm:$0xff] %vm209_vm0, %v3197_v58  ;;  %v3212_v62 = vld [vmem:[#allocation2 + $0x141] sm:$0xff]  ;;  %2777 = vmatprep.subr.bf16.mxu1 %v2910_v1 }
  0x39   : > { %1294 = vrot.lane.b32.xlu1 %v3158_v47, %s2912_s6  ;;  %1029 = vst.msk [vmem:[#allocation3 + $0x248] sm:$0xff] %vm209_vm0, %v3195_v57  ;;  %1006 = vst.msk [vmem:[#allocation3 + $0x20] sm:$0xff] %vm209_vm0, %v3204_v60  ;;  %v611_v2 = vld [vmem:[#allocation2 + $0x122] sm:$0xff]  ;;  %v3225_v3 = vld [vmem:[#allocation2 + $0x51] sm:$0xff]  ;;  %2743 = vmatpush1.bf16.msra.mxu0 %v2742_v25 }
  0x3a   : > { %1342 = vrot.lane.b32.xlu0 %v3189_v56, %s2912_s6  ;;  %1033 = vst.msk [vmem:[#allocation3 + $0x2a8] sm:$0xff] %vm209_vm0, %v3202_v59  ;;  %v3227_v4 = vld [vmem:[#allocation2 + $0x171] sm:$0xff]  ;;  %1030 = vst.msk [vmem:[#allocation3 + $0x260] sm:$0xff] %vm209_vm0, %v3212_v62  ;;  %v3238_v6 = vld [vmem:[#allocation2 + $0x61] sm:$0xff]  ;;  %2744 = vmatprep.subr.bf16.mxu0 %v2910_v1 }
  0x3b   : > { %1010 = vst.msk [vmem:[#allocation3 + $0x80] sm:$0xff] %vm209_vm0, %v3225_v3  ;;  %1034 = vst.msk [vmem:[#allocation3 + $0x2c0] sm:$0xff] %vm209_vm0, %v3227_v4  ;;  %v3240_v7 = vld [vmem:[#allocation2 + $0x181] sm:$0xff]  ;;  %v3290_v23 = vld [vmem:[#allocation2 + $0x38] sm:$0xff]  ;;  %2793 = vmatpush1.bf16.msra.mxu1 %v2742_v25 }
  0x3c   : > { %1011 = vst.msk [vmem:[#allocation3 + $0x98] sm:$0xff] %vm209_vm0, %v3238_v6  ;;  %1035 = vst.msk [vmem:[#allocation3 + $0x2d8] sm:$0xff] %vm209_vm0, %v3240_v7  ;;  %v354_v10 = vld [vmem:[#allocation2 + $0x120] sm:$0xff]  ;;  %v355_v17 = vld [vmem:[#allocation2 + $0x128] sm:$0xff]  ;;  %2778 = vmatprep.subr.bf16.mxu1 %v2910_v1 }
  0x3d   : > { %1486 = vrot.lane.b32.xlu1 %v3160_v48, %s2913_s13  ;;  %386 = vst.msk [vmem:[#allocation3 + $0x240] sm:$0xff] %vm209_vm0, %v354_v10  ;;  %305 = vst.msk [vmem:[#allocation2 + $0x69] sm:$0xff] %vm209_vm0, %v272_v11  ;;  %v3281_v20 = vld [vmem:[#allocation2 + $0x142] sm:$0xff]  ;;  %v3319_v33 = vld [vmem:[#allocation2 + $0x158] sm:$0xff]  ;;  %2746 = vmatpush1.bf16.msra.mxu0 %v2745_v32 }
  0x3e   : > { %699 = vrot.lane.b32.xlu0 %v611_v2, %s2912_s6  ;;  %329 = vst.msk [vmem:[#allocation2 + $0x189] sm:$0xff] %vm209_vm0, %v296_v13  ;;  %387 = vst.msk [vmem:[#allocation3 + $0x258] sm:$0xff] %vm209_vm0, %v355_v17  ;;  %v419_v27 = vld [vmem:[#allocation2 + $0x129] sm:$0xff]  ;;  %v1798_v34 = vld [vmem:[%s4491_s1 + $0xc0] sm:$0xff]  ;;  %2747 = vmatprep.subr.bf16.mxu0 %v2910_v1 }
  0x3f   : > { %306 = vst.msk [vmem:[#allocation2 + $0x79] sm:$0xff] %vm209_vm0, %v273_v18  ;;  %v1799_v35 = vld [vmem:[%s4491_s1 + $0xc8] sm:$0xff]  ;;  %2794 = vmatpush1.bf16.msra.mxu1 %v2745_v32  ;;  %v1802_v46 = vld [vmem:[%s4491_s1 + $0xe0] sm:$0xff]  ;;  %v3371_v63 = vld [vmem:[#allocation2 + $0x152] sm:$0xff] }
  0x40   : > { %v274_v36 = vld [vmem:[%s3076_s23 + $0x48] sm:$0xff]  ;;  %v2748_v37 = vpack.c.bf16 %v1799_v35, %v1798_v34  ;;  %2779 = vmatprep.subr.bf16.mxu1 %v2910_v1  ;;  %v2754_v52 = vpack.c.bf16 %v1803_v51, %v1802_v46  ;;  %309 = vst.msk [vmem:[#allocation2 + $0x99] sm:$0xff] %vm209_vm0, %v276_v9  ;;  %v3438_v10 = vld [vmem:[#allocation2 + $0x170] sm:$0xff]  ;;  %v277_v11 = vld [vmem:[%s3076_s23 + $0x60] sm:$0xff] }
  0x41   : > { %844 = vrot.lane.b32.xlu1 %v3132_v39, %s2913_s13  ;;  %307 = vst.msk [vmem:[#allocation2 + $0x81] sm:$0xff] %vm209_vm0, %v274_v36  ;;  %v612_v39 = vld [vmem:[#allocation2 + $0x12a] sm:$0xff]  ;;  %310 = vst.msk [vmem:[#allocation2 + $0xa9] sm:$0xff] %vm209_vm0, %v277_v11  ;;  %v3481_v17 = vld [vmem:[#allocation2 + $0x60] sm:$0xff] }
  0x42   : > { %1534 = vrot.lane.b32.xlu0 %v3162_v49, %s2913_s13  ;;  %2749 = vmatpush1.bf16.msra.mxu0 %v2748_v37  ;;  %v3378_v0 = vld [vmem:[#allocation2 + $0x48] sm:$0xff]  ;;  %v358_v12 = vld [vmem:[#allocation2 + $0x150] sm:$0xff]  ;;  %v3491_v19 = vld [vmem:[#allocation2 + $0x180] sm:$0xff]  ;;  %312 = vst.msk [vmem:[#allocation2 + $0xc1] sm:$0xff] %vm209_vm0, %v279_v21 }
  0x43   : > { %2750 = vmatprep.subr.bf16.mxu0 %v2910_v1  ;;  %2795 = vmatpush1.bf16.msra.mxu1 %v2748_v37  ;;  %v3390_v5 = vld [vmem:[#allocation2 + $0x168] sm:$0xff]  ;;  %390 = vst.msk [vmem:[#allocation3 + $0x2a0] sm:$0xff] %vm209_vm0, %v358_v12  ;;  %v359_v25 = vld [vmem:[#allocation2 + $0x158] sm:$0xff]  ;;  %v281_v46 = vld [vmem:[%s3076_s23 + $0x80] sm:$0xff] }
  0x44   : > { %v3293_v24 = vld [vmem:[#allocation2 + $0x69] sm:$0xff]  ;;  %2780 = vmatprep.subr.bf16.mxu1 %v2910_v1  ;;  %391 = vst.msk [vmem:[#allocation3 + $0x2b8] sm:$0xff] %vm209_vm0, %v359_v25  ;;  %314 = vst.msk [vmem:[#allocation2 + $0xd9] sm:$0xff] %vm209_vm0, %v281_v46 }
  0x45   : > { %892 = vrot.lane.b32.xlu1 %v3136_v40, %s2913_s13  ;;  %v3297_v26 = vld [vmem:[#allocation2 + $0x189] sm:$0xff]  ;;  %1012 = vst.msk [vmem:[#allocation3 + $0xb0] sm:$0xff] %vm209_vm0, %v3293_v24 }
  0x46   : > { %1103 = vrot.lane.b32.xlu0 %v3271_v16, %s2911_s5  ;;  %1036 = vst.msk [vmem:[#allocation3 + $0x2f0] sm:$0xff] %vm209_vm0, %v3297_v26  ;;  %v3313_v31 = vld [vmem:[#allocation2 + $0x79] sm:$0xff]  ;;  %v1800_v40 = vld [vmem:[%s4491_s1 + $0xd0] sm:$0xff]  ;;  %v3540_v34 = vld [vmem:[#allocation2 + $0x68] sm:$0xff] }
  0x47   : > { %1013 = vst.msk [vmem:[#allocation3 + $0xc8] sm:$0xff] %vm209_vm0, %v3313_v31  ;;  %v3342_v44 = vld [vmem:[#allocation2 + $0x6a] sm:$0xff]  ;;  %v2751_v45 = vpack.c.bf16 %v1801_v42, %v1800_v40  ;;  %v3483_v18 = vld [vmem:[#allocation2 + $0x9a] sm:$0xff] }
  0x48   : > { %1651 = vst.msk [vmem:[#allocation3 + $0x88] sm:$0xff] %vm209_vm0, %v3342_v44  ;;  %v3382_v2 = vld [vmem:[#allocation2 + $0x81] sm:$0xff]  ;;  %v3463_v13 = vld [vmem:[#allocation2 + $0x4a] sm:$0xff]  ;;  %1655 = vst.msk [vmem:[#allocation3 + $0xe8] sm:$0xff] %vm209_vm0, %v3483_v18 }
  0x49   : > { %1151 = vrot.lane.b32.xlu1 %v3281_v20, %s2911_s5  ;;  %2752 = vmatpush1.bf16.msra.mxu0 %v2751_v45  ;;  %1014 = vst.msk [vmem:[#allocation3 + $0xe0] sm:$0xff] %vm209_vm0, %v3382_v2  ;;  %v3469_v14 = vld [vmem:[#allocation2 + $0x16a] sm:$0xff]  ;;  %v3528_v32 = vld [vmem:[#allocation2 + $0xc1] sm:$0xff] }
  0x4a   : > { %1296 = vrot.lane.b32.xlu0 %v3290_v23, %s2912_s6  ;;  %2753 = vmatprep.subr.bf16.mxu0 %v2910_v1  ;;  %v3471_v15 = vld [vmem:[#allocation2 + $0xa9] sm:$0xff]  ;;  %1019 = vst.msk [vmem:[#allocation3 + $0x158] sm:$0xff] %vm209_vm0, %v3528_v32 }
  0x4b   : > { %2796 = vmatpush1.bf16.msra.mxu1 %v2751_v45  ;;  %1017 = vst.msk [vmem:[#allocation3 + $0x128] sm:$0xff] %vm209_vm0, %v3471_v15  ;;  %v336_v42 = vld [vmem:[#allocation2 + $0x48] sm:$0xff]  ;;  %v337_v25 = vld [vmem:[#allocation2 + $0x50] sm:$0xff] }
  0x4c   : > { %2781 = vmatprep.subr.bf16.mxu1 %v2910_v1  ;;  %368 = vst.msk [vmem:[#allocation3 + $0x90] sm:$0xff] %vm209_vm0, %v336_v42  ;;  %v282_v9 = vld [vmem:[%s3076_s23 + $0x88] sm:$0xff]  ;;  %369 = vst.msk [vmem:[#allocation3 + $0xa8] sm:$0xff] %vm209_vm0, %v337_v25  ;;  %v1809_v25 = vld [vmem:[%s4491_s1 + $0x118] sm:$0xff] }
  0x4d   : > { %508 = vrot.lane.b32.xlu1 %v419_v27, %s2911_s5  ;;  %2755 = vmatpush1.bf16.msra.mxu0 %v2754_v52  ;;  %v3519_v27 = vld [vmem:[#allocation2 + $0x52] sm:$0xff]  ;;  %315 = vst.msk [vmem:[#allocation2 + $0xe1] sm:$0xff] %vm209_vm0, %v282_v9  ;;  %v338_v9 = vld [vmem:[#allocation2 + $0x60] sm:$0xff] }
  0x4e   : > { %653 = vrot.lane.b32.xlu0 %v588_v30, %s2912_s6  ;;  %2756 = vmatprep.subr.bf16.mxu0 %v2910_v1  ;;  %v3526_v30 = vld [vmem:[#allocation2 + $0x172] sm:$0xff]  ;;  %370 = vst.msk [vmem:[#allocation3 + $0xc0] sm:$0xff] %vm209_vm0, %v338_v9 }
  0x4f   : > { %2797 = vmatpush1.bf16.msra.mxu1 %v2754_v52 }
  0x50   : > { %2782 = vmatprep.subr.bf16.mxu1 %v2910_v1  ;;  %v275_v1 = vld [vmem:[%s3076_s23 + $0x50] sm:$0xff] }
  0x51   : > { %1344 = vrot.lane.b32.xlu1 %v3319_v33, %s2912_s6  ;;  %308 = vst.msk [vmem:[#allocation2 + $0x91] sm:$0xff] %vm209_vm0, %v275_v1  ;;  %v1067_v1 = vld [vmem:[#allocation2 + $0x182] sm:$0xff] }
  0x52   : > { %1488 = vrot.lane.b32.xlu0 %v3171_v50, %s2913_s13 }
  0x55   : > { %701 = vrot.lane.b32.xlu1 %v612_v39, %s2912_s6  ;;  %v3552_v39 = vld [vmem:[#allocation2 + $0x188] sm:$0xff] }
  0x56   : > { %846 = vrot.lane.b32.xlu0 %v3179_v53, %s2913_s13  ;;  %v3362_v53 = vld [vmem:[#allocation2 + $0x32] sm:$0xff] }
  0x58   : > { %v3418_v8 = vld [vmem:[#allocation2 + $0x91] sm:$0xff] }
  0x59   : > { %1536 = vrot.lane.b32.xlu1 %v3181_v54, %s2913_s13  ;;  %1015 = vst.msk [vmem:[#allocation3 + $0xf8] sm:$0xff] %vm209_vm0, %v3418_v8 }
  0x5a   : > { %894 = vrot.lane.b32.xlu0 %v3138_v41, %s2913_s13  ;;  %v2757_v41 = vpack.c.bf16 %v1805_v61, %v1804_v55  ;;  %v360_v61 = vld [vmem:[#allocation2 + $0x168] sm:$0xff] }
  0x5b   : > { %392 = vst.msk [vmem:[#allocation3 + $0x2d0] sm:$0xff] %vm209_vm0, %v360_v61 }
  0x5c   : > { %2758 = vmatpush1.bf16.msra.mxu0 %v2757_v41  ;;  %2798 = vmatpush1.bf16.msra.mxu1 %v2757_v41 }
  0x5d   : > { %1105 = vrot.lane.b32.xlu1 %v3362_v53, %s2911_s5 }
  0x5e   : > { %1153 = vrot.lane.b32.xlu0 %v3371_v63, %s2911_s5 }
  0x61   : > { %1298 = vrot.lane.b32.xlu1 %v3378_v0, %s2912_s6 }
  0x62   : > { %510 = vrot.lane.b32.xlu0 %v3195_v57, %s2911_s5  ;;  %v3402_v57 = vld [vmem:[#allocation2 + $0x7a] sm:$0xff] }
  0x63   : > { %1652 = vst.msk [vmem:[#allocation3 + $0xa0] sm:$0xff] %vm209_vm0, %v3402_v57 }
  0x65   : > { %655 = vrot.lane.b32.xlu1 %v3145_v43, %s2912_s6  ;;  %v3410_v43 = vld [vmem:[#allocation2 + $0x3a] sm:$0xff] }
  0x66   : > { %1346 = vrot.lane.b32.xlu0 %v3390_v5, %s2912_s6 }
  0x69   : > { %1490 = vrot.lane.b32.xlu1 %v3197_v58, %s2913_s13 }
  0x6a   : > { %703 = vrot.lane.b32.xlu0 %v3130_v38, %s2912_s6  ;;  %v3416_v38 = vld [vmem:[#allocation2 + $0x15a] sm:$0xff] }
  0x6d   : > { %848 = vrot.lane.b32.xlu1 %v3158_v47, %s2913_s13  ;;  %v3428_v47 = vld [vmem:[#allocation2 + $0x50] sm:$0xff] }
  0x6e   : > { %1538 = vrot.lane.b32.xlu0 %v3202_v59, %s2913_s13 }
  0x71   : > { %896 = vrot.lane.b32.xlu1 %v3189_v56, %s2913_s13  ;;  %v3430_v56 = vld [vmem:[#allocation2 + $0x82] sm:$0xff] }
  0x72   : > { %1107 = vrot.lane.b32.xlu0 %v3410_v43, %s2911_s5  ;;  %1653 = vst.msk [vmem:[#allocation3 + $0xb8] sm:$0xff] %vm209_vm0, %v3430_v56 }
  0x75   : > { %464 = vrot.lane.b32.xlu1 %v3204_v60, %s2911_s5  ;;  %v3444_v60 = vld [vmem:[#allocation2 + $0x99] sm:$0xff] }
  0x76   : > { %1155 = vrot.lane.b32.xlu0 %v3416_v38, %s2911_s5  ;;  %1016 = vst.msk [vmem:[#allocation3 + $0x110] sm:$0xff] %vm209_vm0, %v3444_v60 }
  0x79   : > { %1300 = vrot.lane.b32.xlu1 %v3428_v47, %s2912_s6 }
  0x7a   : > { %512 = vrot.lane.b32.xlu0 %v3212_v62, %s2911_s5  ;;  %v3454_v62 = vld [vmem:[#allocation2 + $0x92] sm:$0xff] }
  0x7b   : > { %1654 = vst.msk [vmem:[#allocation3 + $0xd0] sm:$0xff] %vm209_vm0, %v3454_v62 }
  0x7d   : > { %657 = vrot.lane.b32.xlu1 %v3271_v16, %s2912_s6  ;;  %v278_v16 = vld [vmem:[%s3076_s23 + $0x68] sm:$0xff] }
  0x7e   : > { %1348 = vrot.lane.b32.xlu0 %v3438_v10, %s2912_s6  ;;  %311 = vst.msk [vmem:[#allocation2 + $0xb1] sm:$0xff] %vm209_vm0, %v278_v16 }
  0x81   : > { %1492 = vrot.lane.b32.xlu1 %v3225_v3, %s2913_s13 }
  0x82   : > { %705 = vrot.lane.b32.xlu0 %v3281_v20, %s2912_s6 }
  0x85   : > { %850 = vrot.lane.b32.xlu1 %v3290_v23, %s2913_s13  ;;  %v3498_v20 = vld [vmem:[#allocation2 + $0xb1] sm:$0xff] }
  0x86   : > { %1540 = vrot.lane.b32.xlu0 %v3227_v4, %s2913_s13  ;;  %1018 = vst.msk [vmem:[#allocation3 + $0x140] sm:$0xff] %vm209_vm0, %v3498_v20  ;;  %v3542_v36 = vld [vmem:[#allocation2 + $0xb2] sm:$0xff] }
  0x87   : > { %1657 = vst.msk [vmem:[#allocation3 + $0x118] sm:$0xff] %vm209_vm0, %v3542_v36 }
  0x88   : > { %v459_v22 = vpop.permute.xlu0 %458 }
  0x89   : > { %898 = vrot.lane.b32.xlu1 %v3319_v33, %s2913_s13  ;;  %v652_v23 = vpop.permute.xlu1 %651  ;;  %555 = vst.msk [vmem:[#allocation3] sm:$0xff] %vm554_vm2, %v459_v22  ;;  %v280_v33 = vld [vmem:[%s3076_s23 + $0x78] sm:$0xff] }
  0x8a   : > { %1109 = vrot.lane.b32.xlu0 %v3463_v13, %s2911_s5  ;;  %748 = vst.msk [vmem:[#allocation3] sm:$0xff] %vm747_vm3, %v652_v23  ;;  %v1260_v22 = vld [vmem:[#allocation2 + $0x198] sm:$0xff] }
  0x8b   : > { %313 = vst.msk [vmem:[#allocation2 + $0xc9] sm:$0xff] %vm209_vm0, %v280_v33  ;;  %v283_v33 = vld [vmem:[%s3076_s23 + $0x90] sm:$0xff] }
  0x8c   : > { %316 = vst.msk [vmem:[#allocation2 + $0xf1] sm:$0xff] %vm209_vm0, %v283_v33 }
  0x8d   : > { %466 = vrot.lane.b32.xlu1 %v3160_v48, %s2911_s5  ;;  %v335_v48 = vld [vmem:[#allocation2 + $0x38] sm:$0xff] }
  0x8e   : > { %1157 = vrot.lane.b32.xlu0 %v3469_v14, %s2911_s5  ;;  %367 = vst.msk [vmem:[#allocation3 + $0x78] sm:$0xff] %vm209_vm0, %v335_v48 }
  0x91   : > { %1302 = vrot.lane.b32.xlu1 %v3481_v17, %s2912_s6 }
  0x92   : > { %514 = vrot.lane.b32.xlu0 %v3162_v49, %s2911_s5  ;;  %v3508_v49 = vld [vmem:[#allocation2 + $0xaa] sm:$0xff] }
  0x93   : > { %1656 = vst.msk [vmem:[#allocation3 + $0x100] sm:$0xff] %vm209_vm0, %v3508_v49  ;;  %v3605_v48 = vld [vmem:[#allocation2 + $0xca] sm:$0xff] }
  0x94   : > { %1659 = vst.msk [vmem:[#allocation3 + $0x148] sm:$0xff] %vm209_vm0, %v3605_v48 }
  0x95   : > { %659 = vrot.lane.b32.xlu1 %v3362_v53, %s2912_s6  ;;  %v3573_v53 = vld [vmem:[#allocation2 + $0xc2] sm:$0xff] }
  0x96   : > { %1350 = vrot.lane.b32.xlu0 %v3491_v19, %s2912_s6  ;;  %1658 = vst.msk [vmem:[#allocation3 + $0x130] sm:$0xff] %vm209_vm0, %v3573_v53 }
  0x99   : > { %1494 = vrot.lane.b32.xlu1 %v3238_v6, %s2913_s13 }
  0x9a   : > { %707 = vrot.lane.b32.xlu0 %v3371_v63, %s2912_s6  ;;  %v461_v28 = vpop.permute.xlu0 %460 }
  0x9b   : > { %556 = vst.msk [vmem:[#allocation3 + $0x18] sm:$0xff] %vm554_vm2, %v461_v28 }
  0x9d   : > { %852 = vrot.lane.b32.xlu1 %v3378_v0, %s2913_s13  ;;  %v3584_v0 = vld [vmem:[#allocation2 + $0x62] sm:$0xff] }
  0x9e   : > { %1542 = vrot.lane.b32.xlu0 %v3240_v7, %s2913_s13 }
  0xa1   : > { %900 = vrot.lane.b32.xlu1 %v3390_v5, %s2913_s13 }
  0xa2   : > { %1111 = vrot.lane.b32.xlu0 %v3519_v27, %s2911_s5 }
  0xa3   : > { %v463_v29 = vpop.permute.xlu1 %462 }
  0xa4   : > { %557 = vst.msk [vmem:[#allocation3 + $0x30] sm:$0xff] %vm554_vm2, %v463_v29  ;;  %v1150_v7 = vpop.permute.xlu0 %1149  ;;  %v3621_v29 = vld [vmem:[#allocation2 + $0xe1] sm:$0xff] }
  0xa5   : > { %1221 = vst.msk [vmem:[#allocation3 + $0x248] sm:$0xff] %vm554_vm2, %v1150_v7  ;;  %468 = vrot.lane.b32.xlu1 %v3171_v50, %s2911_s5  ;;  %v1452_v7 = vld [vmem:[#allocation2 + $0x199] sm:$0xff] }
  0xa6   : > { %1159 = vrot.lane.b32.xlu0 %v3526_v30, %s2911_s5  ;;  %1022 = vst.msk [vmem:[#allocation3 + $0x1a0] sm:$0xff] %vm209_vm0, %v3621_v29 }
  0xa7   : > { %v1102_v35 = vpop.permute.xlu1 %1101 }
  0xa8   : > { %1197 = vst.msk [vmem:[#allocation3 + $0x8] sm:$0xff] %vm554_vm2, %v1102_v35  ;;  %v507_v37 = vpop.permute.xlu0 %506  ;;  %v3633_v35 = vld [vmem:[#allocation2 + $0xda] sm:$0xff] }
  0xa9   : > { %579 = vst.msk [vmem:[#allocation3 + $0x240] sm:$0xff] %vm554_vm2, %v507_v37  ;;  %1304 = vrot.lane.b32.xlu1 %v3540_v34, %s2912_s6 }
  0xaa   : > { %516 = vrot.lane.b32.xlu0 %v3181_v54, %s2911_s5  ;;  %v3561_v54 = vld [vmem:[#allocation2 + $0xc9] sm:$0xff]  ;;  %1660 = vst.msk [vmem:[#allocation3 + $0x160] sm:$0xff] %vm209_vm0, %v3633_v35 }
  0xab   : > { %v1295_v50 = vpop.permute.xlu1 %1294  ;;  %1020 = vst.msk [vmem:[#allocation3 + $0x170] sm:$0xff] %vm209_vm0, %v3561_v54 }
  0xac   : > { %1390 = vst.msk [vmem:[#allocation3 + $0x8] sm:$0xff] %vm747_vm3, %v1295_v50  ;;  %v1343_v40 = vpop.permute.xlu0 %1342 }
  0xad   : > { %1414 = vst.msk [vmem:[#allocation3 + $0x248] sm:$0xff] %vm747_vm3, %v1343_v40  ;;  %661 = vrot.lane.b32.xlu1 %v3410_v43, %s2912_s6  ;;  %v361_v40 = vld [vmem:[#allocation2 + $0x170] sm:$0xff] }
  0xae   : > { %1352 = vrot.lane.b32.xlu0 %v3552_v39, %s2912_s6  ;;  %393 = vst.msk [vmem:[#allocation3 + $0x2e8] sm:$0xff] %vm209_vm0, %v361_v40 }
  0xaf   : > { %v1487_v45 = vpop.permute.xlu1 %1486 }
  0xb0   : > { %1582 = vst.msk [vmem:[#allocation3 + $0x8] sm:$0xff] %vm940_vm4, %v1487_v45  ;;  %v700_v51 = vpop.permute.xlu0 %699 }
  0xb1   : > { %772 = vst.msk [vmem:[#allocation3 + $0x240] sm:$0xff] %vm747_vm3, %v700_v51  ;;  %1496 = vrot.lane.b32.xlu1 %v3293_v24, %s2913_s13 }
  0xb2   : > { %709 = vrot.lane.b32.xlu0 %v3416_v38, %s2912_s6  ;;  %v3592_v38 = vld [vmem:[#allocation2 + $0xd9] sm:$0xff] }
  0xb3   : > { %v845_v52 = vpop.permute.xlu1 %844  ;;  %1021 = vst.msk [vmem:[#allocation3 + $0x188] sm:$0xff] %vm209_vm0, %v3592_v38 }
  0xb4   : > { %941 = vst.msk [vmem:[#allocation3] sm:$0xff] %vm940_vm4, %v845_v52  ;;  %v1535_v55 = vpop.permute.xlu0 %1534  ;;  %v3649_v52 = vld [vmem:[#allocation2 + $0xf1] sm:$0xff] }
  0xb5   : > { %1606 = vst.msk [vmem:[#allocation3 + $0x248] sm:$0xff] %vm940_vm4, %v1535_v55  ;;  %854 = vrot.lane.b32.xlu1 %v3428_v47, %s2913_s13  ;;  %v284_v55 = vld [vmem:[%s3076_s23 + $0x98] sm:$0xff] }
  0xb6   : > { %1544 = vrot.lane.b32.xlu0 %v3297_v26, %s2913_s13  ;;  %317 = vst.msk [vmem:[#allocation2 + $0xf9] sm:$0xff] %vm209_vm0, %v284_v55  ;;  %1023 = vst.msk [vmem:[#allocation3 + $0x1b8] sm:$0xff] %vm209_vm0, %v3649_v52 }
  0xb7   : > { %v893_v63 = vpop.permute.xlu1 %892  ;;  %v1679_v41 = vld [vmem:[#allocation3 + $0x8] sm:$0xff] }
  0xb8   : > { %965 = vst.msk [vmem:[#allocation3 + $0x240] sm:$0xff] %vm940_vm4, %v893_v63  ;;  %1977 = vmatprep.mubr.f32.mxu0 %v1679_v41  ;;  %v1104_v5 = vpop.permute.xlu0 %1103 }
  0xb9   : > { %1198 = vst.msk [vmem:[#allocation3 + $0x20] sm:$0xff] %vm554_vm2, %v1104_v5  ;;  %902 = vrot.lane.b32.xlu1 %v3438_v10, %s2913_s13  ;;  %v3603_v10 = vld [vmem:[#allocation2 + $0x78] sm:$0xff]  ;;  %v3662_v5 = vld [vmem:[#allocation2 + $0xe2] sm:$0xff] }
  0xba   : > { %1113 = vrot.lane.b32.xlu0 %v3584_v0, %s2911_s5  ;;  %1661 = vst.msk [vmem:[#allocation3 + $0x178] sm:$0xff] %vm209_vm0, %v3662_v5 }
  0xbb   : > { %v1152_v26 = vpop.permute.xlu1 %1151  ;;  %v1678_v43 = vld [vmem:[#allocation3] sm:$0xff] }
  0xbc   : > { %1222 = vst.msk [vmem:[#allocation3 + $0x260] sm:$0xff] %vm554_vm2, %v1152_v26  ;;  %1978 = vmatmul.mubr.f32.vlgmr.msra.gmra.mrb[0].mxu0 %v1678_v43  ;;  %v1297_v47 = vpop.permute.xlu0 %1296  ;;  %v1751_v11 = vld [vmem:[#allocation3 + $0x248] sm:$0xff]  ;;  %v1261_v26 = vld [vmem:[#allocation2 + $0x1a0] sm:$0xff] }
  0xbd   : > { %1391 = vst.msk [vmem:[#allocation3 + $0x20] sm:$0xff] %vm747_vm3, %v1297_v47  ;;  %470 = vrot.lane.b32.xlu1 %v3197_v58, %s2911_s5  ;;  %2097 = vmatprep.mubr.f32.mxu1 %v1751_v11  ;;  %v1806_v47 = vld [vmem:[%s4491_s1 + $0x100] sm:$0xff] }
  0xbe   : > { %1161 = vrot.lane.b32.xlu0 %v1067_v1, %s2911_s5 }
  0xbf   : > { %v509_v12 = vpop.permute.xlu1 %508  ;;  %v1750_v16 = vld [vmem:[#allocation3 + $0x240] sm:$0xff] }
  0xc0   : > { %580 = vst.msk [vmem:[#allocation3 + $0x258] sm:$0xff] %vm554_vm2, %v509_v12  ;;  %2098 = vmatmul.mubr.f32.vlgmr.msra.gmra.mrb[0].mxu1 %v1750_v16  ;;  %v654_v21 = vpop.permute.xlu0 %653  ;;  %v1614_v12 = vld [vmem:[#allocation2 + $0x32] sm:$0xff] }
  0xc1   : > { %749 = vst.msk [vmem:[#allocation3 + $0x18] sm:$0xff] %vm747_vm3, %v654_v21  ;;  %1306 = vrot.lane.b32.xlu1 %v3603_v10, %s2912_s6  ;;  %v3684_v21 = vld [vmem:[#allocation2 + $0xf9] sm:$0xff] }
  0xc2   : > { %518 = vrot.lane.b32.xlu0 %v3202_v59, %s2911_s5  ;;  %1646 = vst.msk [vmem:[#allocation3 + $0x10] sm:$0xff] %vm209_vm0, %v1614_v12  ;;  %1024 = vst.msk [vmem:[#allocation3 + $0x1d0] sm:$0xff] %vm209_vm0, %v3684_v21 }
  0xc3   : > { %v1345_v58 = vpop.permute.xlu1 %1344 }
  0xc4   : > { %1415 = vst.msk [vmem:[#allocation3 + $0x260] sm:$0xff] %vm747_vm3, %v1345_v58  ;;  %v1489_v23 = vpop.permute.xlu0 %1488  ;;  %v1615_v58 = vld [vmem:[#allocation2 + $0x3a] sm:$0xff] }
  0xc5   : > { %1583 = vst.msk [vmem:[#allocation3 + $0x20] sm:$0xff] %vm940_vm4, %v1489_v23  ;;  %663 = vrot.lane.b32.xlu1 %v3463_v13, %s2912_s6  ;;  %v1808_v23 = vld [vmem:[%s4491_s1 + $0x110] sm:$0xff] }
  0xc6   : > { %1354 = vrot.lane.b32.xlu0 %v1260_v22, %s2912_s6  ;;  %1647 = vst.msk [vmem:[#allocation3 + $0x28] sm:$0xff] %vm209_vm0, %v1615_v58  ;;  %v2763_v33 = vpack.c.bf16 %v1809_v25, %v1808_v23 }
  0xc7   : > { %v702_v28 = vpop.permute.xlu1 %701 }
  0xc8   : > { %773 = vst.msk [vmem:[#allocation3 + $0x258] sm:$0xff] %vm747_vm3, %v702_v28  ;;  %v847_v59 = vpop.permute.xlu0 %846  ;;  %v1453_v28 = vld [vmem:[#allocation2 + $0x1a1] sm:$0xff] }
  0xc9   : > { %942 = vst.msk [vmem:[#allocation3 + $0x18] sm:$0xff] %vm940_vm4, %v847_v59  ;;  %1498 = vrot.lane.b32.xlu1 %v3313_v31, %s2913_s13  ;;  %v1616_v59 = vld [vmem:[#allocation2 + $0x4a] sm:$0xff] }
  0xca   : > { %711 = vrot.lane.b32.xlu0 %v3469_v14, %s2912_s6  ;;  %1648 = vst.msk [vmem:[#allocation3 + $0x40] sm:$0xff] %vm209_vm0, %v1616_v59  ;;  %v3791_v59 = vld [vmem:[#allocation2 + $0xa8] sm:$0xff] }
  0xcb   : > { %v1537_v13 = vpop.permute.xlu1 %1536 }
  0xcc   : > { %1607 = vst.msk [vmem:[#allocation3 + $0x260] sm:$0xff] %vm940_vm4, %v1537_v13  ;;  %v895_v37 = vpop.permute.xlu0 %894  ;;  %v1682_v50 = vld [vmem:[#allocation3 + $0x20] sm:$0xff] }
  0xcd   : > { %966 = vst.msk [vmem:[#allocation3 + $0x258] sm:$0xff] %vm940_vm4, %v895_v37  ;;  %856 = vrot.lane.b32.xlu1 %v3481_v17, %s2913_s13  ;;  %1982 = vmatprep.mubr.f32.mxu0 %v1682_v50  ;;  %v1068_v17 = vld [vmem:[#allocation2 + $0x18a] sm:$0xff]  ;;  %v3704_v37 = vld [vmem:[#allocation2 + $0xf2] sm:$0xff] }
  0xce   : > { %1546 = vrot.lane.b32.xlu0 %v1452_v7, %s2913_s13  ;;  %v1617_v50 = vld [vmem:[#allocation2 + $0x52] sm:$0xff]  ;;  %1662 = vst.msk [vmem:[#allocation3 + $0x190] sm:$0xff] %vm209_vm0, %v3704_v37 }
  0xcf   : > { %v1106_v14 = vpop.permute.xlu1 %1105  ;;  %1649 = vst.msk [vmem:[#allocation3 + $0x58] sm:$0xff] %vm209_vm0, %v1617_v50  ;;  %v3807_v50 = vld [vmem:[#allocation2 + $0x122] sm:$0xff] }
  0xd0   : > { %1199 = vst.msk [vmem:[#allocation3 + $0x38] sm:$0xff] %vm554_vm2, %v1106_v14  ;;  %v1154_v42 = vpop.permute.xlu0 %1153  ;;  %v1681_v45 = vld [vmem:[#allocation3 + $0x18] sm:$0xff] }
  0xd1   : > { %904 = vrot.lane.b32.xlu1 %v3491_v19, %s2913_s13  ;;  %1223 = vst.msk [vmem:[#allocation3 + $0x278] sm:$0xff] %vm554_vm2, %v1154_v42  ;;  %1983 = vmatmul.mubr.f32.gmra.mrb[2].mxu0 %v1681_v45  ;;  %v3660_v19 = vld [vmem:[#allocation2 + $0x80] sm:$0xff] }
  0xd2   : > { %1115 = vrot.lane.b32.xlu0 %v3342_v44, %s2911_s5  ;;  %1666 = vst.msk [vmem:[#allocation3 + $0x1f0] sm:$0xff] %vm209_vm0, %v3807_v50 }
  0xd3   : > { %v1299_v46 = vpop.permute.xlu1 %1298  ;;  %v1754_v51 = vld [vmem:[#allocation3 + $0x260] sm:$0xff] }
  0xd4   : > { %1392 = vst.msk [vmem:[#allocation3 + $0x38] sm:$0xff] %vm747_vm3, %v1299_v46  ;;  %2102 = vmatprep.mubr.f32.mxu1 %v1754_v51  ;;  %v511_v61 = vpop.permute.xlu0 %510  ;;  %v1753_v63 = vld [vmem:[#allocation3 + $0x258] sm:$0xff] }
  0xd5   : > { %472 = vrot.lane.b32.xlu1 %v3225_v3, %s2911_s5  ;;  %581 = vst.msk [vmem:[#allocation3 + $0x270] sm:$0xff] %vm554_vm2, %v511_v61  ;;  %2103 = vmatmul.mubr.f32.gmra.mrb[2].mxu1 %v1753_v63  ;;  %v3727_v61 = vld [vmem:[#allocation2 + $0x90] sm:$0xff] }
  0xd6   : > { %1163 = vrot.lane.b32.xlu0 %v1068_v17, %s2911_s5 }
  0xd7   : > { %v656_v41 = vpop.permute.xlu1 %655 }
  0xd8   : > { %750 = vst.msk [vmem:[#allocation3 + $0x30] sm:$0xff] %vm747_vm3, %v656_v41  ;;  %v1347_v1 = vpop.permute.xlu0 %1346 }
  0xd9   : > { %1308 = vrot.lane.b32.xlu1 %v3660_v19, %s2912_s6  ;;  %1416 = vst.msk [vmem:[#allocation3 + $0x278] sm:$0xff] %vm747_vm3, %v1347_v1 }
  0xda   : > { %520 = vrot.lane.b32.xlu0 %v3227_v4, %s2911_s5  ;;  %v1807_v4 = vld [vmem:[%s4491_s1 + $0x108] sm:$0xff] }
  0xdb   : > { %v1491_v3 = vpop.permute.xlu1 %1490  ;;  %v2759_v11 = vpack.c.bf16 %v1807_v4, %v1806_v47  ;;  %v340_v47 = vld [vmem:[#allocation2 + $0x78] sm:$0xff] }
  0xdc   : > { %1584 = vst.msk [vmem:[#allocation3 + $0x38] sm:$0xff] %vm940_vm4, %v1491_v3  ;;  %v704_v43 = vpop.permute.xlu0 %703  ;;  %v3741_v3 = vld [vmem:[#allocation2 + $0xfa] sm:$0xff] }
  0xdd   : > { %665 = vrot.lane.b32.xlu1 %v3519_v27, %s2912_s6  ;;  %774 = vst.msk [vmem:[#allocation3 + $0x270] sm:$0xff] %vm747_vm3, %v704_v43  ;;  %v285_v27 = vld [vmem:[%s3076_s23 + $0xa0] sm:$0xff]  ;;  %2760 = vmatprep.subr.bf16.mxu1 %v2759_v11  ;;  %v3762_v4 = vld [vmem:[#allocation2 + $0x98] sm:$0xff] }
  0xde   : > { %1356 = vrot.lane.b32.xlu0 %v1261_v26, %s2912_s6  ;;  %318 = vst.msk [vmem:[#allocation2 + $0x109] sm:$0xff] %vm209_vm0, %v285_v27  ;;  %2762 = vmatpush3.bf16.msra.mxu1 %v2759_v11  ;;  %1663 = vst.msk [vmem:[#allocation3 + $0x1a8] sm:$0xff] %vm209_vm0, %v3741_v3 }
  0xdf   : > { %v849_v16 = vpop.permute.xlu1 %848  ;;  %2764 = vmatprep.subr.bf16.mxu1 %v2763_v33  ;;  %372 = vst.msk [vmem:[#allocation3 + $0xf0] sm:$0xff] %vm209_vm0, %v340_v47 }
  0xe0   : > { %943 = vst.msk [vmem:[#allocation3 + $0x30] sm:$0xff] %vm940_vm4, %v849_v16  ;;  %v1539_v22 = vpop.permute.xlu0 %1538 }
  0xe1   : > { %1500 = vrot.lane.b32.xlu1 %v3382_v2, %s2913_s13  ;;  %1608 = vst.msk [vmem:[#allocation3 + $0x278] sm:$0xff] %vm940_vm4, %v1539_v22 }
  0xe2   : > { %713 = vrot.lane.b32.xlu0 %v3526_v30, %s2912_s6  ;;  %2766 = vmatpush3.bf16.msra.mxu1 %v2763_v33  ;;  %v1618_v30 = vld [vmem:[#allocation2 + $0x62] sm:$0xff] }
  0xe3   : > { %v897_v13 = vpop.permute.xlu1 %896  ;;  %v1685_v7 = vld [vmem:[#allocation3 + $0x38] sm:$0xff]  ;;  %1650 = vst.msk [vmem:[#allocation3 + $0x70] sm:$0xff] %vm209_vm0, %v1618_v30 }
  0xe4   : > { %967 = vst.msk [vmem:[#allocation3 + $0x270] sm:$0xff] %vm940_vm4, %v897_v13  ;;  %1987 = vmatprep.mubr.f32.mxu0 %v1685_v7  ;;  %v1108_v40 = vpop.permute.xlu0 %1107  ;;  %v3793_v13 = vld [vmem:[#allocation2 + $0x121] sm:$0xff]  ;;  %v3811_v30 = vld [vmem:[#allocation2 + $0x12a] sm:$0xff] }
  0xe5   : > { %858 = vrot.lane.b32.xlu1 %v3540_v34, %s2913_s13  ;;  %1200 = vst.msk [vmem:[#allocation3 + $0x50] sm:$0xff] %vm554_vm2, %v1108_v40  ;;  %v3715_v45 = vld [vmem:[#allocation2 + $0x108] sm:$0xff] }
  0xe6   : > { %1548 = vrot.lane.b32.xlu0 %v1453_v28, %s2913_s13  ;;  %384 = vst.msk [vmem:[#allocation3 + $0x210] sm:$0xff] %vm209_vm0, %v3715_v45  ;;  %v339_v34 = vld [vmem:[#allocation2 + $0x68] sm:$0xff]  ;;  %v341_v28 = vld [vmem:[#allocation2 + $0x80] sm:$0xff]  ;;  %1027 = vst.msk [vmem:[#allocation3 + $0x218] sm:$0xff] %vm209_vm0, %v3793_v13 }
  0xe7   : > { %v465_v14 = vpop.permute.xlu1 %464  ;;  %v1684_v42 = vld [vmem:[#allocation3 + $0x30] sm:$0xff]  ;;  %371 = vst.msk [vmem:[#allocation3 + $0xd8] sm:$0xff] %vm209_vm0, %v339_v34  ;;  %v3729_v63 = vld [vmem:[#allocation2 + $0x109] sm:$0xff]  ;;  %373 = vst.msk [vmem:[#allocation3 + $0x108] sm:$0xff] %vm209_vm0, %v341_v28 }
  0xe8   : > { %558 = vst.msk [vmem:[#allocation3 + $0x48] sm:$0xff] %vm554_vm2, %v465_v14  ;;  %1988 = vmatmul.mubr.f32.gmra.mrb[4].mxu0 %v1684_v42  ;;  %v1156_v17 = vpop.permute.xlu0 %1155  ;;  %v1757_v46 = vld [vmem:[#allocation3 + $0x278] sm:$0xff]  ;;  %v1638_v34 = vld [vmem:[#allocation2 + $0x152] sm:$0xff] }
  0xe9   : > { %906 = vrot.lane.b32.xlu1 %v3552_v39, %s2913_s13  ;;  %1224 = vst.msk [vmem:[#allocation3 + $0x290] sm:$0xff] %vm554_vm2, %v1156_v17  ;;  %2107 = vmatprep.mubr.f32.mxu1 %v1757_v46  ;;  %v286_v39 = vld [vmem:[%s3076_s23 + $0xa8] sm:$0xff]  ;;  %s189_s23 = sand.u32 1, %s2899_s16  }
  0xea   : > { %1117 = vrot.lane.b32.xlu0 %v3402_v57, %s2911_s5  ;;  %1025 = vst.msk [vmem:[#allocation3 + $0x1e8] sm:$0xff] %vm209_vm0, %v3729_v63  ;;  %319 = vst.msk [vmem:[#allocation2 + $0x111] sm:$0xff] %vm209_vm0, %v286_v39  ;;  %v1637_v17 = vld [vmem:[#allocation2 + $0x142] sm:$0xff]  ;;  %v1639_v39 = vld [vmem:[#allocation2 + $0x15a] sm:$0xff]  ;;  %s4447_s19 = scalar_lea.sflag [#allocation5], %s189_s23 }
  0xeb   : > { %v1301_v51 = vpop.permute.xlu1 %1300  ;;  %v1756_v55 = vld [vmem:[#allocation3 + $0x270] sm:$0xff]  ;;  %1667 = vst.msk [vmem:[#allocation3 + $0x208] sm:$0xff] %vm209_vm0, %v3811_v30  ;;  %1669 = vst.msk [vmem:[#allocation3 + $0x238] sm:$0xff] %vm209_vm0, %v1637_v17 }
  0xec   : > { %1393 = vst.msk [vmem:[#allocation3 + $0x50] sm:$0xff] %vm747_vm3, %v1301_v51  ;;  %2108 = vmatmul.mubr.f32.gmra.mrb[4].mxu1 %v1756_v55  ;;  %v513_v41 = vpop.permute.xlu0 %512  ;;  %v3829_v55 = vld [vmem:[#allocation2 + $0xb0] sm:$0xff]  ;;  %v1645_v28 = vld [vmem:[#allocation2 + $0x1a2] sm:$0xff] }
  0xed   : > { %474 = vrot.lane.b32.xlu1 %v3238_v6, %s2911_s5  ;;  %582 = vst.msk [vmem:[#allocation3 + $0x288] sm:$0xff] %vm554_vm2, %v513_v41  ;;  %v3832_v41 = vld [vmem:[#allocation2 + $0x129] sm:$0xff] }
  0xee   : > { %1310 = vrot.lane.b32.xlu0 %v3727_v61, %s2912_s6  ;;  %1670 = vst.msk [vmem:[#allocation3 + $0x250] sm:$0xff] %vm209_vm0, %v1638_v34  ;;  %1671 = vst.msk [vmem:[#allocation3 + $0x268] sm:$0xff] %vm209_vm0, %v1639_v39 }
  0xef   : > { %v658_v1 = vpop.permute.xlu1 %657  ;;  %1028 = vst.msk [vmem:[#allocation3 + $0x230] sm:$0xff] %vm209_vm0, %v3832_v41  ;;  %1677 = vst.msk [vmem:[#allocation3 + $0x2f8] sm:$0xff] %vm209_vm0, %v1645_v28 }
  0xf0   : > { %751 = vst.msk [vmem:[#allocation3 + $0x48] sm:$0xff] %vm747_vm3, %v658_v1  ;;  %v1349_v26 = vpop.permute.xlu0 %1348  ;;  %v1640_v1 = vld [vmem:[#allocation2 + $0x16a] sm:$0xff] }
  0xf1   : > { %667 = vrot.lane.b32.xlu1 %v3584_v0, %s2912_s6  ;;  %1417 = vst.msk [vmem:[#allocation3 + $0x290] sm:$0xff] %vm747_vm3, %v1349_v26  ;;  %v3752_v9 = vld [vmem:[#allocation2 + $0x110] sm:$0xff] }
  0xf2   : > { %1502 = vrot.lane.b32.xlu0 %v3418_v8, %s2913_s13  ;;  %385 = vst.msk [vmem:[#allocation3 + $0x228] sm:$0xff] %vm209_vm0, %v3752_v9  ;;  %v3764_v11 = vld [vmem:[#allocation2 + $0x111] sm:$0xff]  ;;  %1672 = vst.msk [vmem:[#allocation3 + $0x280] sm:$0xff] %vm209_vm0, %v1640_v1 }
  0xf3   : > { %v1493_v6 = vpop.permute.xlu1 %1492  ;;  %1026 = vst.msk [vmem:[#allocation3 + $0x200] sm:$0xff] %vm209_vm0, %v3764_v11  ;;  %v3774_v27 = vld [vmem:[#allocation2 + $0x10a] sm:$0xff] }
  0xf4   : > { %1585 = vst.msk [vmem:[#allocation3 + $0x50] sm:$0xff] %vm940_vm4, %v1493_v6  ;;  %v706_v43 = vpop.permute.xlu0 %705 }
  0xf5   : > { %860 = vrot.lane.b32.xlu1 %v3603_v10, %s2913_s13  ;;  %775 = vst.msk [vmem:[#allocation3 + $0x288] sm:$0xff] %vm747_vm3, %v706_v43  ;;  %v1641_v43 = vld [vmem:[#allocation2 + $0x172] sm:$0xff] }
  0xf6   : > { %1119 = vrot.lane.b32.xlu0 %v3430_v56, %s2911_s5  ;;  %1664 = vst.msk [vmem:[#allocation3 + $0x1c0] sm:$0xff] %vm209_vm0, %v3774_v27  ;;  %1673 = vst.msk [vmem:[#allocation3 + $0x298] sm:$0xff] %vm209_vm0, %v1641_v43  ;;  %v346_v43 = vld [vmem:[#allocation2 + $0xc0] sm:$0xff] }
  0xf7   : > { %v851_v0 = vpop.permute.xlu1 %850  ;;  %378 = vst.msk [vmem:[#allocation3 + $0x180] sm:$0xff] %vm209_vm0, %v346_v43 }
  0xf8   : > { %944 = vst.msk [vmem:[#allocation3 + $0x48] sm:$0xff] %vm940_vm4, %v851_v0  ;;  %v1541_v12 = vpop.permute.xlu0 %1540 }
  0xf9   : > { %476 = vrot.lane.b32.xlu1 %v3293_v24, %s2911_s5  ;;  %1609 = vst.msk [vmem:[#allocation3 + $0x290] sm:$0xff] %vm940_vm4, %v1541_v12 }
  0xfa   : > { %1312 = vrot.lane.b32.xlu0 %v3762_v4, %s2912_s6 }
  0xfb   : > { %v899_v10 = vpop.permute.xlu1 %898  ;;  %v1688_v16 = vld [vmem:[#allocation3 + $0x50] sm:$0xff] }
  0xfc   : > { %968 = vst.msk [vmem:[#allocation3 + $0x288] sm:$0xff] %vm940_vm4, %v899_v10  ;;  %1992 = vmatprep.mubr.f32.mxu0 %v1688_v16  ;;  %v1110_v58 = vpop.permute.xlu0 %1109 }
  0xfd   : > { %669 = vrot.lane.b32.xlu1 %v3342_v44, %s2912_s6  ;;  %1201 = vst.msk [vmem:[#allocation3 + $0x68] sm:$0xff] %vm554_vm2, %v1110_v58  ;;  %v1643_v58 = vld [vmem:[#allocation2 + $0x18a] sm:$0xff] }
  0xfe   : > { %1504 = vrot.lane.b32.xlu0 %v3444_v60, %s2913_s13  ;;  %1675 = vst.msk [vmem:[#allocation3 + $0x2c8] sm:$0xff] %vm209_vm0, %v1643_v58 }
  0xff   : > { %v467_v24 = vpop.permute.xlu1 %466  ;;  %v1687_v22 = vld [vmem:[#allocation3 + $0x48] sm:$0xff] }
 0x100   : > { %559 = vst.msk [vmem:[#allocation3 + $0x60] sm:$0xff] %vm554_vm2, %v467_v24  ;;  %1993 = vmatmul.mubr.f32.gmra.mrb[6].mxu0 %v1687_v22  ;;  %v1158_v23 = vpop.permute.xlu0 %1157  ;;  %v1760_v25 = vld [vmem:[#allocation3 + $0x290] sm:$0xff] }
 0x101   : > { %862 = vrot.lane.b32.xlu1 %v3660_v19, %s2913_s13  ;;  %1225 = vst.msk [vmem:[#allocation3 + $0x2a8] sm:$0xff] %vm554_vm2, %v1158_v23  ;;  %2112 = vmatprep.mubr.f32.mxu1 %v1760_v25  ;;  %v3796_v19 = vld [vmem:[#allocation2 + $0x112] sm:$0xff]  ;;  %v1644_v24 = vld [vmem:[#allocation2 + $0x19a] sm:$0xff] }
 0x102   : > { %1121 = vrot.lane.b32.xlu0 %v3454_v62, %s2911_s5  ;;  %1665 = vst.msk [vmem:[#allocation3 + $0x1d8] sm:$0xff] %vm209_vm0, %v3796_v19  ;;  %v3861_v25 = vld [vmem:[#allocation2 + $0xc0] sm:$0xff]  ;;  %1676 = vst.msk [vmem:[#allocation3 + $0x2e0] sm:$0xff] %vm209_vm0, %v1644_v24  ;;  %v347_v24 = vld [vmem:[#allocation2 + $0xc8] sm:$0xff] }
 0x103   : > { %v1303_v44 = vpop.permute.xlu1 %1302  ;;  %v1759_v33 = vld [vmem:[#allocation3 + $0x288] sm:$0xff]  ;;  %379 = vst.msk [vmem:[#allocation3 + $0x198] sm:$0xff] %vm209_vm0, %v347_v24 }
 0x104   : > { %1394 = vst.msk [vmem:[#allocation3 + $0x68] sm:$0xff] %vm747_vm3, %v1303_v44  ;;  %2113 = vmatmul.mubr.f32.gmra.mrb[6].mxu1 %v1759_v33  ;;  %v515_v7 = vpop.permute.xlu0 %514  ;;  %v351_v24 = vld [vmem:[#allocation2 + $0xf8] sm:$0xff] }
 0x105   : > { %478 = vrot.lane.b32.xlu1 %v3313_v31, %s2911_s5  ;;  %583 = vst.msk [vmem:[#allocation3 + $0x2a0] sm:$0xff] %vm554_vm2, %v515_v7  ;;  %v1636_v31 = vld [vmem:[#allocation2 + $0x13a] sm:$0xff] }
 0x106   : > { %1314 = vrot.lane.b32.xlu0 %v3791_v59, %s2912_s6  ;;  %1668 = vst.msk [vmem:[#allocation3 + $0x220] sm:$0xff] %vm209_vm0, %v1636_v31  ;;  %383 = vst.msk [vmem:[#allocation3 + $0x1f8] sm:$0xff] %vm209_vm0, %v351_v24 }
 0x107   : > { %v660_v40 = vpop.permute.xlu1 %659 }
 0x108   : > { %752 = vst.msk [vmem:[#allocation3 + $0x60] sm:$0xff] %vm747_vm3, %v660_v40  ;;  %v1351_v14 = vpop.permute.xlu0 %1350  ;;  %v344_v40 = vld [vmem:[#allocation2 + $0xa8] sm:$0xff] }
 0x109   : > { %671 = vrot.lane.b32.xlu1 %v3402_v57, %s2912_s6  ;;  %1418 = vst.msk [vmem:[#allocation3 + $0x2a8] sm:$0xff] %vm747_vm3, %v1351_v14  ;;  %v342_v57 = vld [vmem:[#allocation2 + $0x90] sm:$0xff]  ;;  %v3884_v14 = vld [vmem:[#allocation2 + $0xc8] sm:$0xff] }
 0x10a   : > { %1506 = vrot.lane.b32.xlu0 %v3471_v15, %s2913_s13  ;;  %374 = vst.msk [vmem:[#allocation3 + $0x120] sm:$0xff] %vm209_vm0, %v342_v57  ;;  %376 = vst.msk [vmem:[#allocation3 + $0x150] sm:$0xff] %vm209_vm0, %v344_v40 }
 0x10b   : > { %v1495_v42 = vpop.permute.xlu1 %1494 }
 0x10c   : > { %1586 = vst.msk [vmem:[#allocation3 + $0x68] sm:$0xff] %vm940_vm4, %v1495_v42  ;;  %v708_v46 = vpop.permute.xlu0 %707 }
 0x10d   : > { %864 = vrot.lane.b32.xlu1 %v3727_v61, %s2913_s13  ;;  %776 = vst.msk [vmem:[#allocation3 + $0x2a0] sm:$0xff] %vm747_vm3, %v708_v46 }
 0x10e   : > { %1123 = vrot.lane.b32.xlu0 %v3483_v18, %s2911_s5 }
 0x10f   : > { %v853_v51 = vpop.permute.xlu1 %852 }
 0x110   : > { %945 = vst.msk [vmem:[#allocation3 + $0x60] sm:$0xff] %vm940_vm4, %v853_v51  ;;  %v1543_v61 = vpop.permute.xlu0 %1542  ;;  %v345_v51 = vld [vmem:[#allocation2 + $0xb0] sm:$0xff] }
 0x111   : > { %480 = vrot.lane.b32.xlu1 %v3382_v2, %s2911_s5  ;;  %1610 = vst.msk [vmem:[#allocation3 + $0x2a8] sm:$0xff] %vm940_vm4, %v1543_v61  ;;  %v1642_v2 = vld [vmem:[#allocation2 + $0x182] sm:$0xff]  ;;  %v3905_v61 = vld [vmem:[#allocation2 + $0xd8] sm:$0xff] }
 0x112   : > { %1316 = vrot.lane.b32.xlu0 %v3829_v55, %s2912_s6  ;;  %1674 = vst.msk [vmem:[#allocation3 + $0x2b0] sm:$0xff] %vm209_vm0, %v1642_v2  ;;  %377 = vst.msk [vmem:[#allocation3 + $0x168] sm:$0xff] %vm209_vm0, %v345_v51  ;;  %v1686_v51 = vld [vmem:[#allocation3 + $0x40] sm:$0xff] }
 0x113   : > { %v901_v26 = vpop.permute.xlu1 %900  ;;  %v1691_v6 = vld [vmem:[#allocation3 + $0x68] sm:$0xff] }
 0x114   : > { %969 = vst.msk [vmem:[#allocation3 + $0x2a0] sm:$0xff] %vm940_vm4, %v901_v26  ;;  %1997 = vmatprep.mubr.f32.mxu0 %v1691_v6  ;;  %v1112_v47 = vpop.permute.xlu0 %1111 }
 0x115   : > { %673 = vrot.lane.b32.xlu1 %v3430_v56, %s2912_s6  ;;  %1202 = vst.msk [vmem:[#allocation3 + $0x80] sm:$0xff] %vm554_vm2, %v1112_v47  ;;  %v343_v56 = vld [vmem:[#allocation2 + $0x98] sm:$0xff] }
 0x116   : > { %1508 = vrot.lane.b32.xlu0 %v3498_v20, %s2913_s13  ;;  %375 = vst.msk [vmem:[#allocation3 + $0x138] sm:$0xff] %vm209_vm0, %v343_v56 }
 0x117   : > { %v469_v0 = vpop.permute.xlu1 %468  ;;  %v1690_v12 = vld [vmem:[#allocation3 + $0x60] sm:$0xff] }
 0x118   : > { %560 = vst.msk [vmem:[#allocation3 + $0x78] sm:$0xff] %vm554_vm2, %v469_v0  ;;  %1998 = vmatmul.mubr.f32.gmra.mrb[8].mxu0 %v1690_v12  ;;  %v1160_v10 = vpop.permute.xlu0 %1159  ;;  %v1763_v16 = vld [vmem:[#allocation3 + $0x2a8] sm:$0xff] }
 0x119   : > { %866 = vrot.lane.b32.xlu1 %v3762_v4, %s2913_s13  ;;  %1226 = vst.msk [vmem:[#allocation3 + $0x2c0] sm:$0xff] %vm554_vm2, %v1160_v10  ;;  %2117 = vmatprep.mubr.f32.mxu1 %v1763_v16 }
 0x11a   : > { %1125 = vrot.lane.b32.xlu0 %v3508_v49, %s2911_s5 }
 0x11b   : > { %v1305_v22 = vpop.permute.xlu1 %1304  ;;  %v1762_v23 = vld [vmem:[#allocation3 + $0x2a0] sm:$0xff] }
 0x11c   : > { %1395 = vst.msk [vmem:[#allocation3 + $0x80] sm:$0xff] %vm747_vm3, %v1305_v22  ;;  %2118 = vmatmul.mubr.f32.gmra.mrb[8].mxu1 %v1762_v23  ;;  %v517_v4 = vpop.permute.xlu0 %516  ;;  %v3947_v23 = vld [vmem:[#allocation2 + $0xf0] sm:$0xff] }
 0x11d   : > { %482 = vrot.lane.b32.xlu1 %v3418_v8, %s2911_s5  ;;  %584 = vst.msk [vmem:[#allocation3 + $0x2b8] sm:$0xff] %vm554_vm2, %v517_v4 }
 0x11e   : > { %1318 = vrot.lane.b32.xlu0 %v3861_v25, %s2912_s6 }
 0x11f   : > { %v662_v44 = vpop.permute.xlu1 %661 }
 0x120   : > { %753 = vst.msk [vmem:[#allocation3 + $0x78] sm:$0xff] %vm747_vm3, %v662_v44  ;;  %v1353_v33 = vpop.permute.xlu0 %1352 }
 0x121   : > { %675 = vrot.lane.b32.xlu1 %v3454_v62, %s2912_s6  ;;  %1419 = vst.msk [vmem:[#allocation3 + $0x2c0] sm:$0xff] %vm747_vm3, %v1353_v33  ;;  %v348_v33 = vld [vmem:[#allocation2 + $0xd8] sm:$0xff] }
 0x122   : > { %1510 = vrot.lane.b32.xlu0 %v3528_v32, %s2913_s13  ;;  %380 = vst.msk [vmem:[#allocation3 + $0x1b0] sm:$0xff] %vm209_vm0, %v348_v33 }
 0x123   : > { %v1497_v8 = vpop.permute.xlu1 %1496 }
 0x124   : > { %1587 = vst.msk [vmem:[#allocation3 + $0x80] sm:$0xff] %vm940_vm4, %v1497_v8  ;;  %v710_v7 = vpop.permute.xlu0 %709 }
 0x125   : > { %868 = vrot.lane.b32.xlu1 %v3791_v59, %s2913_s13  ;;  %777 = vst.msk [vmem:[#allocation3 + $0x2b8] sm:$0xff] %vm747_vm3, %v710_v7 }
 0x126   : > { %1127 = vrot.lane.b32.xlu0 %v3542_v36, %s2911_s5 }
 0x127   : > { %v855_v62 = vpop.permute.xlu1 %854 }
 0x128   : > { %946 = vst.msk [vmem:[#allocation3 + $0x78] sm:$0xff] %vm940_vm4, %v855_v62  ;;  %v1545_v31 = vpop.permute.xlu0 %1544 }
 0x129   : > { %484 = vrot.lane.b32.xlu1 %v3444_v60, %s2911_s5  ;;  %1611 = vst.msk [vmem:[#allocation3 + $0x2c0] sm:$0xff] %vm940_vm4, %v1545_v31 }
 0x12a   : > { %1320 = vrot.lane.b32.xlu0 %v3884_v14, %s2912_s6 }
 0x12b   : > { %v903_v59 = vpop.permute.xlu1 %902  ;;  %v1694_v42 = vld [vmem:[#allocation3 + $0x80] sm:$0xff] }
 0x12c   : > { %970 = vst.msk [vmem:[#allocation3 + $0x2b8] sm:$0xff] %vm940_vm4, %v903_v59  ;;  %2002 = vmatprep.mubr.f32.mxu0 %v1694_v42  ;;  %v1114_v17 = vpop.permute.xlu0 %1113 }
 0x12d   : > { %677 = vrot.lane.b32.xlu1 %v3483_v18, %s2912_s6  ;;  %1203 = vst.msk [vmem:[#allocation3 + $0x98] sm:$0xff] %vm554_vm2, %v1114_v17  ;;  %v349_v17 = vld [vmem:[#allocation2 + $0xe0] sm:$0xff] }
 0x12e   : > { %1512 = vrot.lane.b32.xlu0 %v3561_v54, %s2913_s13  ;;  %381 = vst.msk [vmem:[#allocation3 + $0x1c8] sm:$0xff] %vm209_vm0, %v349_v17 }
 0x12f   : > { %v471_v60 = vpop.permute.xlu1 %470  ;;  %v1693_v46 = vld [vmem:[#allocation3 + $0x78] sm:$0xff] }
 0x130   : > { %561 = vst.msk [vmem:[#allocation3 + $0x90] sm:$0xff] %vm554_vm2, %v471_v60  ;;  %2003 = vmatmul.mubr.f32.gmra.mrb[10].mxu0 %v1693_v46  ;;  %v1162_v57 = vpop.permute.xlu0 %1161  ;;  %v1766_v34 = vld [vmem:[#allocation3 + $0x2c0] sm:$0xff] }
 0x131   : > { %870 = vrot.lane.b32.xlu1 %v3829_v55, %s2913_s13  ;;  %1227 = vst.msk [vmem:[#allocation3 + $0x2d8] sm:$0xff] %vm554_vm2, %v1162_v57  ;;  %2122 = vmatprep.mubr.f32.mxu1 %v1766_v34  ;;  %v1683_v34 = vld [vmem:[#allocation3 + $0x28] sm:$0xff] }
 0x132   : > { %1129 = vrot.lane.b32.xlu0 %v3573_v53, %s2911_s5 }
 0x133   : > { %v1307_v18 = vpop.permute.xlu1 %1306  ;;  %v1765_v39 = vld [vmem:[#allocation3 + $0x2b8] sm:$0xff] }
 0x134   : > { %1396 = vst.msk [vmem:[#allocation3 + $0x98] sm:$0xff] %vm747_vm3, %v1307_v18  ;;  %2123 = vmatmul.mubr.f32.gmra.mrb[10].mxu1 %v1765_v39  ;;  %v519_v1 = vpop.permute.xlu0 %518 }
 0x135   : > { %486 = vrot.lane.b32.xlu1 %v3471_v15, %s2911_s5  ;;  %585 = vst.msk [vmem:[#allocation3 + $0x2d0] sm:$0xff] %vm554_vm2, %v519_v1 }
 0x136   : > { %1322 = vrot.lane.b32.xlu0 %v3905_v61, %s2912_s6 }
 0x137   : > { %v664_v55 = vpop.permute.xlu1 %663 }
 0x138   : > { %754 = vst.msk [vmem:[#allocation3 + $0x90] sm:$0xff] %vm747_vm3, %v664_v55  ;;  %v1355_v26 = vpop.permute.xlu0 %1354 }
 0x139   : > { %679 = vrot.lane.b32.xlu1 %v3508_v49, %s2912_s6  ;;  %1420 = vst.msk [vmem:[#allocation3 + $0x2d8] sm:$0xff] %vm747_vm3, %v1355_v26  ;;  %v3925_v49 = vld [vmem:[#allocation2 + $0xe0] sm:$0xff] }
 0x13a   : > { %1514 = vrot.lane.b32.xlu0 %v3592_v38, %s2913_s13 }
 0x13b   : > { %v1499_v6 = vpop.permute.xlu1 %1498 }
 0x13c   : > { %1588 = vst.msk [vmem:[#allocation3 + $0x98] sm:$0xff] %vm940_vm4, %v1499_v6  ;;  %v712_v15 = vpop.permute.xlu0 %711  ;;  %v1698_v6 = vld [vmem:[#allocation3 + $0xa0] sm:$0xff] }
 0x13d   : > { %872 = vrot.lane.b32.xlu1 %v3861_v25, %s2913_s13  ;;  %778 = vst.msk [vmem:[#allocation3 + $0x2d0] sm:$0xff] %vm747_vm3, %v712_v15  ;;  %v350_v15 = vld [vmem:[#allocation2 + $0xf0] sm:$0xff] }
 0x13e   : > { %1131 = vrot.lane.b32.xlu0 %v3605_v48, %s2911_s5  ;;  %382 = vst.msk [vmem:[#allocation3 + $0x1e0] sm:$0xff] %vm209_vm0, %v350_v15  ;;  %v1764_v15 = vld [vmem:[#allocation3 + $0x2b0] sm:$0xff] }
 0x13f   : > { %v857_v47 = vpop.permute.xlu1 %856 }
 0x140   : > { %947 = vst.msk [vmem:[#allocation3 + $0x90] sm:$0xff] %vm940_vm4, %v857_v47  ;;  %v1547_v2 = vpop.permute.xlu0 %1546 }
 0x141   : > { %488 = vrot.lane.b32.xlu1 %v3498_v20, %s2911_s5  ;;  %1612 = vst.msk [vmem:[#allocation3 + $0x2d8] sm:$0xff] %vm940_vm4, %v1547_v2  ;;  %v1701_v2 = vld [vmem:[#allocation3 + $0xb8] sm:$0xff] }
 0x142   : > { %1324 = vrot.lane.b32.xlu0 %v3925_v49, %s2912_s6 }
 0x143   : > { %v905_v0 = vpop.permute.xlu1 %904  ;;  %v1697_v12 = vld [vmem:[#allocation3 + $0x98] sm:$0xff] }
 0x144   : > { %971 = vst.msk [vmem:[#allocation3 + $0x2d0] sm:$0xff] %vm940_vm4, %v905_v0  ;;  %2007 = vmatprep.mubr.f32.mxu0 %v1697_v12  ;;  %v1116_v10 = vpop.permute.xlu0 %1115  ;;  %v1704_v0 = vld [vmem:[#allocation3 + $0xd0] sm:$0xff] }
 0x145   : > { %681 = vrot.lane.b32.xlu1 %v3542_v36, %s2912_s6  ;;  %1204 = vst.msk [vmem:[#allocation3 + $0xb0] sm:$0xff] %vm554_vm2, %v1116_v10 }
 0x146   : > { %1516 = vrot.lane.b32.xlu0 %v3621_v29, %s2913_s13 }
 0x147   : > { %v473_v20 = vpop.permute.xlu1 %472  ;;  %v1696_v16 = vld [vmem:[#allocation3 + $0x90] sm:$0xff] }
 0x148   : > { %562 = vst.msk [vmem:[#allocation3 + $0xa8] sm:$0xff] %vm554_vm2, %v473_v20  ;;  %2008 = vmatmul.mubr.f32.gmra.mrb[12].mxu0 %v1696_v16  ;;  %v1164_v58 = vpop.permute.xlu0 %1163  ;;  %v1769_v56 = vld [vmem:[#allocation3 + $0x2d8] sm:$0xff]  ;;  %v1710_v20 = vld [vmem:[#allocation3 + $0x100] sm:$0xff] }
 0x149   : > { %874 = vrot.lane.b32.xlu1 %v3884_v14, %s2913_s13  ;;  %1228 = vst.msk [vmem:[#allocation3 + $0x2f0] sm:$0xff] %vm554_vm2, %v1164_v58  ;;  %2127 = vmatprep.mubr.f32.mxu1 %v1769_v56 }
 0x14a   : > { %1133 = vrot.lane.b32.xlu0 %v3633_v35, %s2911_s5 }
 0x14b   : > { %v1309_v36 = vpop.permute.xlu1 %1308  ;;  %v1768_v22 = vld [vmem:[#allocation3 + $0x2d0] sm:$0xff] }
 0x14c   : > { %1397 = vst.msk [vmem:[#allocation3 + $0xb0] sm:$0xff] %vm747_vm3, %v1309_v36  ;;  %2128 = vmatmul.mubr.f32.gmra.mrb[12].mxu1 %v1768_v22  ;;  %v521_v25 = vpop.permute.xlu0 %520  ;;  %v1716_v36 = vld [vmem:[#allocation3 + $0x130] sm:$0xff] }
 0x14d   : > { %490 = vrot.lane.b32.xlu1 %v3528_v32, %s2911_s5  ;;  %586 = vst.msk [vmem:[#allocation3 + $0x2e8] sm:$0xff] %vm554_vm2, %v521_v25  ;;  %v4038_v25 = vld [vmem:[#allocation2 + $0x120] sm:$0xff] }
 0x14e   : > { %1326 = vrot.lane.b32.xlu0 %v3947_v23, %s2912_s6 }
 0x14f   : > { %v666_v4 = vpop.permute.xlu1 %665 }
 0x150   : > { %755 = vst.msk [vmem:[#allocation3 + $0xa8] sm:$0xff] %vm747_vm3, %v666_v4  ;;  %v1357_v28 = vpop.permute.xlu0 %1356 }
 0x151   : > { %683 = vrot.lane.b32.xlu1 %v3573_v53, %s2912_s6  ;;  %1421 = vst.msk [vmem:[#allocation3 + $0x2f0] sm:$0xff] %vm747_vm3, %v1357_v28  ;;  %v3967_v53 = vld [vmem:[#allocation2 + $0xf8] sm:$0xff] }
 0x152   : > { %1518 = vrot.lane.b32.xlu0 %v3649_v52, %s2913_s13  ;;  %v1719_v28 = vld [vmem:[#allocation3 + $0x148] sm:$0xff] }
 0x153   : > { %v1501_v44 = vpop.permute.xlu1 %1500 }
 0x154   : > { %1589 = vst.msk [vmem:[#allocation3 + $0xb0] sm:$0xff] %vm940_vm4, %v1501_v44  ;;  %v714_v32 = vpop.permute.xlu0 %713  ;;  %v1722_v44 = vld [vmem:[#allocation3 + $0x160] sm:$0xff] }
 0x155   : > { %876 = vrot.lane.b32.xlu1 %v3905_v61, %s2913_s13  ;;  %779 = vst.msk [vmem:[#allocation3 + $0x2e8] sm:$0xff] %vm747_vm3, %v714_v32  ;;  %v1692_v61 = vld [vmem:[#allocation3 + $0x70] sm:$0xff] }
 0x156   : > { %1135 = vrot.lane.b32.xlu0 %v3662_v5, %s2911_s5 }
 0x157   : > { %v859_v8 = vpop.permute.xlu1 %858 }
 0x158   : > { %948 = vst.msk [vmem:[#allocation3 + $0xa8] sm:$0xff] %vm940_vm4, %v859_v8  ;;  %v1549_v7 = vpop.permute.xlu0 %1548  ;;  %v1728_v8 = vld [vmem:[#allocation3 + $0x190] sm:$0xff] }
 0x159   : > { %492 = vrot.lane.b32.xlu1 %v3561_v54, %s2911_s5  ;;  %1613 = vst.msk [vmem:[#allocation3 + $0x2f0] sm:$0xff] %vm940_vm4, %v1549_v7 }
 0x15a   : > { %1328 = vrot.lane.b32.xlu0 %v3967_v53, %s2912_s6 }
 0x15b   : > { %v907_v40 = vpop.permute.xlu1 %906  ;;  %v1700_v62 = vld [vmem:[#allocation3 + $0xb0] sm:$0xff] }
 0x15c   : > { %972 = vst.msk [vmem:[#allocation3 + $0x2e8] sm:$0xff] %vm940_vm4, %v907_v40  ;;  %2012 = vmatprep.mubr.f32.mxu0 %v1700_v62  ;;  %v1118_v14 = vpop.permute.xlu0 %1117 }
 0x15d   : > { %685 = vrot.lane.b32.xlu1 %v3605_v48, %s2912_s6  ;;  %1205 = vst.msk [vmem:[#allocation3 + $0xc8] sm:$0xff] %vm554_vm2, %v1118_v14  ;;  %v1680_v48 = vld [vmem:[#allocation3 + $0x10] sm:$0xff] }
 0x15e   : > { %1520 = vrot.lane.b32.xlu0 %v3684_v21, %s2913_s13 }
 0x15f   : > { %v475_v54 = vpop.permute.xlu1 %474  ;;  %v1699_v31 = vld [vmem:[#allocation3 + $0xa8] sm:$0xff] }
 0x160   : > { %563 = vst.msk [vmem:[#allocation3 + $0xc0] sm:$0xff] %vm554_vm2, %v475_v54  ;;  %2013 = vmatmul.mubr.f32.gmra.mrb[14].mxu0 %v1699_v31  ;;  %v1311_v59 = vpop.permute.xlu0 %1310  ;;  %v1772_v42 = vld [vmem:[#allocation3 + $0x2f0] sm:$0xff]  ;;  %v4064_v54 = vld [vmem:[#allocation2 + $0x128] sm:$0xff] }
 0x161   : > { %878 = vrot.lane.b32.xlu1 %v3925_v49, %s2913_s13  ;;  %1398 = vst.msk [vmem:[#allocation3 + $0xc8] sm:$0xff] %vm747_vm3, %v1311_v59  ;;  %2132 = vmatprep.mubr.f32.mxu1 %v1772_v42  ;;  %v1737_v31 = vld [vmem:[#allocation3 + $0x1d8] sm:$0xff]  ;;  %v1740_v59 = vld [vmem:[#allocation3 + $0x1f0] sm:$0xff] }
 0x162   : > { %1137 = vrot.lane.b32.xlu0 %v3704_v37, %s2911_s5 }
 0x163   : > { %v668_v60 = vpop.permute.xlu1 %667  ;;  %v1771_v46 = vld [vmem:[#allocation3 + $0x2e8] sm:$0xff] }
 0x164   : > { %756 = vst.msk [vmem:[#allocation3 + $0xc0] sm:$0xff] %vm747_vm3, %v668_v60  ;;  %2133 = vmatmul.mubr.f32.gmra.mrb[14].mxu1 %v1771_v46  ;;  %v1503_v57 = vpop.permute.xlu0 %1502 }
 0x165   : > { %494 = vrot.lane.b32.xlu1 %v3592_v38, %s2911_s5  ;;  %1590 = vst.msk [vmem:[#allocation3 + $0xc8] sm:$0xff] %vm940_vm4, %v1503_v57  ;;  %2663 = vmatprep.mubr.msk.f32.mxu1 %vm209_vm0, %v1680_v48  ;;  %v1689_v38 = vld [vmem:[#allocation3 + $0x58] sm:$0xff]  ;;  %v1746_v48 = vld [vmem:[#allocation3 + $0x220] sm:$0xff] }
 0x166   : > { %1330 = vrot.lane.b32.xlu0 %v3715_v45, %s2912_s6 }
 0x167   : > { %v861_v18 = vpop.permute.xlu1 %860 }
 0x168   : > { %949 = vst.msk [vmem:[#allocation3 + $0xc0] sm:$0xff] %vm940_vm4, %v861_v18  ;;  %2664 = vmatmul.mubr.msk.f32.vlgmr.msra.gmra.mrb[16].mxu1 %vm209_vm0, %v1683_v34  ;;  %v1120_v39 = vpop.permute.xlu0 %1119 }
 0x169   : > { %687 = vrot.lane.b32.xlu1 %v3633_v35, %s2912_s6  ;;  %1206 = vst.msk [vmem:[#allocation3 + $0xe0] sm:$0xff] %vm554_vm2, %v1120_v39  ;;  %2666 = vmatprep.mubr.msk.f32.mxu1 %vm209_vm0, %v1686_v51  ;;  %v1695_v35 = vld [vmem:[#allocation3 + $0x88] sm:$0xff] }
 0x16a   : > { %1522 = vrot.lane.b32.xlu0 %v3729_v63, %s2913_s13 }
 0x16b   : > { %v477_v1 = vpop.permute.xlu1 %476 }
 0x16c   : > { %564 = vst.msk [vmem:[#allocation3 + $0xd8] sm:$0xff] %vm554_vm2, %v477_v1  ;;  %2667 = vmatmul.mubr.msk.f32.gmra.mrb[18].mxu1 %vm209_vm0, %v1689_v38  ;;  %v1313_v55 = vpop.permute.xlu0 %1312  ;;  %v1703_v26 = vld [vmem:[#allocation3 + $0xc8] sm:$0xff] }
 0x16d   : > { %880 = vrot.lane.b32.xlu1 %v3947_v23, %s2913_s13  ;;  %1399 = vst.msk [vmem:[#allocation3 + $0xe0] sm:$0xff] %vm747_vm3, %v1313_v55  ;;  %2669 = vmatprep.mubr.msk.f32.mxu1 %vm209_vm0, %v1692_v61  ;;  %v1252_v61 = vld [vmem:[#allocation2 + $0x138] sm:$0xff]  ;;  %v1758_v55 = vld [vmem:[#allocation3 + $0x280] sm:$0xff] }
 0x16e   : > { %2017 = vmatprep.mubr.f32.mxu0 %v1703_v26  ;;  %1139 = vrot.lane.b32.xlu0 %v3741_v3, %s2911_s5 }
 0x16f   : > { %v670_v43 = vpop.permute.xlu1 %669  ;;  %v1702_v47 = vld [vmem:[#allocation3 + $0xc0] sm:$0xff] }
 0x170   : > { %757 = vst.msk [vmem:[#allocation3 + $0xd8] sm:$0xff] %vm747_vm3, %v670_v43  ;;  %2018 = vmatmul.mubr.f32.gmra.mrb[16].mxu0 %v1702_v47  ;;  %2670 = vmatmul.mubr.msk.f32.gmra.mrb[20].mxu1 %vm209_vm0, %v1695_v35  ;;  %v1505_v49 = vpop.permute.xlu0 %1504  ;;  %v1444_v35 = vld [vmem:[#allocation2 + $0x139] sm:$0xff] }
 0x171   : > { %496 = vrot.lane.b32.xlu1 %v3621_v29, %s2911_s5  ;;  %1591 = vst.msk [vmem:[#allocation3 + $0xe0] sm:$0xff] %vm940_vm4, %v1505_v49  ;;  %2672 = vmatprep.mubr.msk.f32.mxu1 %vm209_vm0, %v1698_v6  ;;  %v1707_v29 = vld [vmem:[#allocation3 + $0xe8] sm:$0xff] }
 0x172   : > { %1332 = vrot.lane.b32.xlu0 %v3752_v9, %s2912_s6 }
 0x173   : > { %v863_v12 = vpop.permute.xlu1 %862 }
 0x174   : > { %950 = vst.msk [vmem:[#allocation3 + $0xd8] sm:$0xff] %vm940_vm4, %v863_v12  ;;  %2673 = vmatmul.mubr.msk.f32.gmra.mrb[22].mxu1 %vm209_vm0, %v1701_v2  ;;  %v1122_v10 = vpop.permute.xlu0 %1121  ;;  %v1770_v2 = vld [vmem:[#allocation3 + $0x2e0] sm:$0xff] }
 0x175   : > { %689 = vrot.lane.b32.xlu1 %v3662_v5, %s2912_s6  ;;  %1207 = vst.msk [vmem:[#allocation3 + $0xf8] sm:$0xff] %vm554_vm2, %v1122_v10  ;;  %2675 = vmatprep.mubr.msk.f32.mxu1 %vm209_vm0, %v1704_v0  ;;  %v1713_v5 = vld [vmem:[#allocation3 + $0x118] sm:$0xff]  ;;  %v1253_v10 = vld [vmem:[#allocation2 + $0x140] sm:$0xff] }
 0x176   : > { %1524 = vrot.lane.b32.xlu0 %v3764_v11, %s2913_s13 }
 0x177   : > { %v479_v16 = vpop.permute.xlu1 %478 }
 0x178   : > { %565 = vst.msk [vmem:[#allocation3 + $0xf0] sm:$0xff] %vm554_vm2, %v479_v16  ;;  %2676 = vmatmul.mubr.msk.f32.gmra.mrb[24].mxu1 %vm209_vm0, %v1707_v29  ;;  %v1315_v58 = vpop.permute.xlu0 %1314  ;;  %v1706_v56 = vld [vmem:[#allocation3 + $0xe0] sm:$0xff]  ;;  %v1445_v16 = vld [vmem:[#allocation2 + $0x141] sm:$0xff] }
 0x179   : > { %882 = vrot.lane.b32.xlu1 %v3967_v53, %s2913_s13  ;;  %1400 = vst.msk [vmem:[#allocation3 + $0xf8] sm:$0xff] %vm747_vm3, %v1315_v58  ;;  %2678 = vmatprep.mubr.msk.f32.mxu1 %vm209_vm0, %v1710_v20  ;;  %v1773_v20 = vld [vmem:[#allocation3 + $0x2f8] sm:$0xff] }
 0x17a   : > { %2022 = vmatprep.mubr.f32.mxu0 %v1706_v56  ;;  %1141 = vrot.lane.b32.xlu0 %v3774_v27, %s2911_s5 }
 0x17b   : > { %v672_v22 = vpop.permute.xlu1 %671  ;;  %v1705_v23 = vld [vmem:[#allocation3 + $0xd8] sm:$0xff] }
 0x17c   : > { %758 = vst.msk [vmem:[#allocation3 + $0xf0] sm:$0xff] %vm747_vm3, %v672_v22  ;;  %2023 = vmatmul.mubr.f32.gmra.mrb[18].mxu0 %v1705_v23  ;;  %2679 = vmatmul.mubr.msk.f32.gmra.mrb[26].mxu1 %vm209_vm0, %v1713_v5  ;;  %v1507_v4 = vpop.permute.xlu0 %1506 }
 0x17d   : > { %498 = vrot.lane.b32.xlu1 %v3649_v52, %s2911_s5  ;;  %1592 = vst.msk [vmem:[#allocation3 + $0xf8] sm:$0xff] %vm940_vm4, %v1507_v4  ;;  %2681 = vmatprep.mubr.msk.f32.mxu1 %vm209_vm0, %v1716_v36  ;;  %v1725_v52 = vld [vmem:[#allocation3 + $0x178] sm:$0xff] }
 0x17e   : > { %1334 = vrot.lane.b32.xlu0 %v4038_v25, %s2912_s6 }
 0x17f   : > { %v865_v32 = vpop.permute.xlu1 %864 }
 0x180   : > { %951 = vst.msk [vmem:[#allocation3 + $0xf0] sm:$0xff] %vm940_vm4, %v865_v32  ;;  %2682 = vmatmul.mubr.msk.f32.gmra.mrb[28].mxu1 %vm209_vm0, %v1719_v28  ;;  %v1124_v33 = vpop.permute.xlu0 %1123 }
 0x181   : > { %691 = vrot.lane.b32.xlu1 %v3704_v37, %s2912_s6  ;;  %1208 = vst.msk [vmem:[#allocation3 + $0x110] sm:$0xff] %vm554_vm2, %v1124_v33  ;;  %2684 = vmatprep.mubr.msk.f32.mxu1 %vm209_vm0, %v1722_v44  ;;  %v1731_v37 = vld [vmem:[#allocation3 + $0x1a8] sm:$0xff] }
 0x182   : > { %1526 = vrot.lane.b32.xlu0 %v3793_v13, %s2913_s13  ;;  %v1734_v13 = vld [vmem:[#allocation3 + $0x1c0] sm:$0xff] }
 0x183   : > { %v481_v53 = vpop.permute.xlu1 %480 }
 0x184   : > { %566 = vst.msk [vmem:[#allocation3 + $0x108] sm:$0xff] %vm554_vm2, %v481_v53  ;;  %2685 = vmatmul.mubr.msk.f32.gmra.mrb[30].mxu1 %vm209_vm0, %v1725_v52  ;;  %v1317_v7 = vpop.permute.xlu0 %1316  ;;  %v1709_v40 = vld [vmem:[#allocation3 + $0xf8] sm:$0xff] }
 0x185   : > { %884 = vrot.lane.b32.xlu1 %v3715_v45, %s2913_s13  ;;  %1401 = vst.msk [vmem:[#allocation3 + $0x110] sm:$0xff] %vm747_vm3, %v1317_v7  ;;  %2687 = vmatprep.mubr.msk.f32.mxu1 %vm209_vm0, %v1728_v8 }
 0x186   : > { %2027 = vmatprep.mubr.f32.mxu0 %v1709_v40  ;;  %1143 = vrot.lane.b32.xlu0 %v3796_v19, %s2911_s5 }
 0x187   : > { %v674_v62 = vpop.permute.xlu1 %673  ;;  %v1708_v14 = vld [vmem:[#allocation3 + $0xf0] sm:$0xff] }
 0x188   : > { %759 = vst.msk [vmem:[#allocation3 + $0x108] sm:$0xff] %vm747_vm3, %v674_v62  ;;  %2028 = vmatmul.mubr.f32.gmra.mrb[20].mxu0 %v1708_v14  ;;  %2688 = vmatmul.mubr.msk.f32.gmra.mrb[32].mxu1 %vm209_vm0, %v1731_v37  ;;  %v1509_v45 = vpop.permute.xlu0 %1508 }
 0x189   : > { %500 = vrot.lane.b32.xlu1 %v3684_v21, %s2911_s5  ;;  %1593 = vst.msk [vmem:[#allocation3 + $0x110] sm:$0xff] %vm940_vm4, %v1509_v45  ;;  %2690 = vmatprep.mubr.msk.f32.mxu1 %vm209_vm0, %v1734_v13  ;;  %v1743_v21 = vld [vmem:[#allocation3 + $0x208] sm:$0xff] }
 0x18a   : > { %1336 = vrot.lane.b32.xlu0 %v4064_v54, %s2912_s6 }
 0x18b   : > { %v867_v42 = vpop.permute.xlu1 %866 }
 0x18c   : > { %952 = vst.msk [vmem:[#allocation3 + $0x108] sm:$0xff] %vm940_vm4, %v867_v42  ;;  %2691 = vmatmul.mubr.msk.f32.gmra.mrb[34].mxu1 %vm209_vm0, %v1737_v31  ;;  %v1126_v17 = vpop.permute.xlu0 %1125 }
 0x18d   : > { %693 = vrot.lane.b32.xlu1 %v3741_v3, %s2912_s6  ;;  %1209 = vst.msk [vmem:[#allocation3 + $0x128] sm:$0xff] %vm554_vm2, %v1126_v17  ;;  %2693 = vmatprep.mubr.msk.f32.mxu1 %vm209_vm0, %v1740_v59  ;;  %v1749_v3 = vld [vmem:[#allocation3 + $0x238] sm:$0xff] }
 0x18e   : > { %1528 = vrot.lane.b32.xlu0 %v3832_v41, %s2913_s13  ;;  %v1752_v41 = vld [vmem:[#allocation3 + $0x250] sm:$0xff] }
 0x18f   : > { %v4082_v60 = vpop.f32.mrb[0].mxu0  ;;  %v483_v46 = vpop.permute.xlu1 %482 }
 0x190   : > { %567 = vst.msk [vmem:[#allocation3 + $0x120] sm:$0xff] %vm554_vm2, %v483_v46  ;;  %v1981_v57 = vpop.f32.mrb[1].mxu0  ;;  %2694 = vmatmul.mubr.msk.f32.gmra.mrb[36].mxu1 %vm209_vm0, %v1743_v21  ;;  %v1319_v34 = vpop.permute.xlu0 %1318  ;;  %v1712_v51 = vld [vmem:[#allocation3 + $0x110] sm:$0xff] }
 0x191   : > { %886 = vrot.lane.b32.xlu1 %v3752_v9, %s2913_s13  ;;  %1402 = vst.msk [vmem:[#allocation3 + $0x128] sm:$0xff] %vm747_vm3, %v1319_v34  ;;  %2696 = vmatprep.mubr.msk.f32.mxu1 %vm209_vm0, %v1746_v48 }
 0x192   : > { %2032 = vmatprep.mubr.f32.mxu0 %v1712_v51  ;;  %1145 = vrot.lane.b32.xlu0 %v3807_v50, %s2911_s5  ;;  %v1755_v50 = vld [vmem:[#allocation3 + $0x268] sm:$0xff] }
 0x193   : > { %v4092_v18 = vpop.f32.mrb[0].mxu1  ;;  %v676_v39 = vpop.permute.xlu1 %675  ;;  %v1711_v38 = vld [vmem:[#allocation3 + $0x108] sm:$0xff] }
 0x194   : > { %760 = vst.msk [vmem:[#allocation3 + $0x120] sm:$0xff] %vm747_vm3, %v676_v39  ;;  %2033 = vmatmul.mubr.f32.gmra.mrb[22].mxu0 %v1711_v38  ;;  %v2101_v1 = vpop.f32.mrb[1].mxu1  ;;  %2697 = vmatmul.mubr.msk.f32.gmra.mrb[38].mxu1 %vm209_vm0, %v1749_v3  ;;  %v1511_v9 = vpop.permute.xlu0 %1510 }
 0x195   : > { %502 = vrot.lane.b32.xlu1 %v3729_v63, %s2911_s5  ;;  %1594 = vst.msk [vmem:[#allocation3 + $0x128] sm:$0xff] %vm940_vm4, %v1511_v9  ;;  %2699 = vmatprep.mubr.msk.f32.mxu1 %vm209_vm0, %v1752_v41  ;;  %v1761_v63 = vld [vmem:[#allocation3 + $0x298] sm:$0xff] }
 0x196   : > { %1338 = vrot.lane.b32.xlu0 %v1252_v61, %s2912_s6 }
 0x197   : > { %v869_v26 = vpop.permute.xlu1 %868 }
 0x198   : > { %953 = vst.msk [vmem:[#allocation3 + $0x120] sm:$0xff] %vm940_vm4, %v869_v26  ;;  %2700 = vmatmul.mubr.msk.f32.gmra.mrb[40].mxu1 %vm209_vm0, %v1755_v50  ;;  %v1128_v6 = vpop.permute.xlu0 %1127 }
 0x199   : > { %695 = vrot.lane.b32.xlu1 %v3774_v27, %s2912_s6  ;;  %1210 = vst.msk [vmem:[#allocation3 + $0x140] sm:$0xff] %vm554_vm2, %v1128_v6  ;;  %2702 = vmatprep.mubr.msk.f32.mxu1 %vm209_vm0, %v1758_v55  ;;  %v1767_v27 = vld [vmem:[#allocation3 + $0x2c8] sm:$0xff] }
 0x19a   : > { %1530 = vrot.lane.b32.xlu0 %v1444_v35, %s2913_s13 }
 0x19b   : > { %v485_v43 = vpop.permute.xlu1 %484 }
 0x19c   : > { %568 = vst.msk [vmem:[#allocation3 + $0x138] sm:$0xff] %vm554_vm2, %v485_v43  ;;  %2703 = vmatmul.mubr.msk.f32.gmra.mrb[42].mxu1 %vm209_vm0, %v1761_v63  ;;  %v1321_v47 = vpop.permute.xlu0 %1320  ;;  %v1715_v49 = vld [vmem:[#allocation3 + $0x128] sm:$0xff] }
 0x19d   : > { %888 = vrot.lane.b32.xlu1 %v4038_v25, %s2913_s13  ;;  %1403 = vst.msk [vmem:[#allocation3 + $0x140] sm:$0xff] %vm747_vm3, %v1321_v47  ;;  %2705 = vmatprep.mubr.msk.f32.mxu1 %vm209_vm0, %v1764_v15 }
 0x19e   : > { %2037 = vmatprep.mubr.f32.mxu0 %v1715_v49  ;;  %1147 = vrot.lane.b32.xlu0 %v3811_v30, %s2911_s5 }
 0x19f   : > { %v678_v0 = vpop.permute.xlu1 %677  ;;  %v1714_v12 = vld [vmem:[#allocation3 + $0x120] sm:$0xff] }
 0x1a0   : > { %761 = vst.msk [vmem:[#allocation3 + $0x138] sm:$0xff] %vm747_vm3, %v678_v0  ;;  %2038 = vmatmul.mubr.f32.gmra.mrb[24].mxu0 %v1714_v12  ;;  %2706 = vmatmul.mubr.msk.f32.gmra.mrb[44].mxu1 %vm209_vm0, %v1767_v27  ;;  %v1513_v29 = vpop.permute.xlu0 %1512 }
 0x1a1   : > { %504 = vrot.lane.b32.xlu1 %v3764_v11, %s2911_s5  ;;  %1595 = vst.msk [vmem:[#allocation3 + $0x140] sm:$0xff] %vm940_vm4, %v1513_v29  ;;  %2708 = vmatprep.mubr.msk.f32.mxu1 %vm209_vm0, %v1770_v2 }
 0x1a2   : > { %1340 = vrot.lane.b32.xlu0 %v1253_v10, %s2912_s6 }
 0x1a3   : > { %v871_v30 = vpop.permute.xlu1 %870 }
 0x1a4   : > { %954 = vst.msk [vmem:[#allocation3 + $0x138] sm:$0xff] %vm940_vm4, %v871_v30  ;;  %2709 = vmatmul.mubr.msk.f32.gmra.mrb[46].mxu1 %vm209_vm0, %v1773_v20  ;;  %v4125_v58 = vpop.f32.mrb[2].mxu0  ;;  %v1130_v56 = vpop.permute.xlu0 %1129 }
 0x1a5   : > { %697 = vrot.lane.b32.xlu1 %v3796_v19, %s2912_s6  ;;  %1211 = vst.msk [vmem:[#allocation3 + $0x158] sm:$0xff] %vm554_vm2, %v1130_v56  ;;  %v1986_v11 = vpop.f32.mrb[3].mxu0 }
 0x1a6   : > { %1532 = vrot.lane.b32.xlu0 %v1445_v16, %s2913_s13 }
 0x1a7   : > { %v487_v5 = vpop.permute.xlu1 %486 }
 0x1a8   : > { %569 = vst.msk [vmem:[#allocation3 + $0x150] sm:$0xff] %vm554_vm2, %v487_v5  ;;  %v4132_v24 = vpop.f32.mrb[2].mxu1  ;;  %v1323_v36 = vpop.permute.xlu0 %1322  ;;  %v1718_v22 = vld [vmem:[#allocation3 + $0x140] sm:$0xff] }
 0x1a9   : > { %890 = vrot.lane.b32.xlu1 %v4064_v54, %s2913_s13  ;;  %1404 = vst.msk [vmem:[#allocation3 + $0x158] sm:$0xff] %vm747_vm3, %v1323_v36  ;;  %v2106_v23 = vpop.f32.mrb[3].mxu1  ;;  %2042 = vmatprep.mubr.f32.mxu0 %v1718_v22  ;;  %s2573_s13 = sshll.u32 %s189_s23, 8 }
 0x1aa   : > { %s4235_s12 = scalar_lea.vmem [#allocation4], %s2573_s13 }
 0x1ab   : > { %v680_v19 = vpop.permute.xlu1 %679  ;;  %v1717_v25 = vld [vmem:[#allocation3 + $0x138] sm:$0xff]  ;;  %s2479_s10 = sshll.u32 %s4235_s12, 4  ;;  %s4440_s10 = int_to_ptr.vmem [resolvable:$true] %s2479_s10 }
 0x1ac   : > { %762 = vst.msk [vmem:[#allocation3 + $0x150] sm:$0xff] %vm747_vm3, %v680_v19  ;;  %2043 = vmatmul.mubr.f32.gmra.mrb[26].mxu0 %v1717_v25  ;;  %v1515_v4 = vpop.permute.xlu0 %1514  ;;  %s2845_s27 = scalar_lea.vmem %s4440_s10, 4096  ;;  %p2852_p0 = scmp.lt.s32.totalorder %s4440_s10, %s2850_s29 }
 0x1ad   : > { %1596 = vst.msk [vmem:[#allocation3 + $0x158] sm:$0xff] %vm940_vm4, %v1515_v4  ;;  %p2846_p11 = scmp.ne.s32.totalorder %s4440_s10, %s2845_s27  ;;  %p2853_p1 = scmp.lt.s32.totalorder %s2851_s30, %s2845_s27 }
 0x1af   : > { %v873_v28 = vpop.permute.xlu1 %872  ;;  %p2847_p12 = pnand %p2846_p11, %p2980_p5  ;;  %p2854_p2 = por %p2853_p1, %p2852_p0 }
 0x1b0   : > { %955 = vst.msk [vmem:[#allocation3 + $0x150] sm:$0xff] %vm940_vm4, %v873_v28  ;;  %v1132_v44 = vpop.permute.xlu0 %1131 }
 0x1b1   : > { %1212 = vst.msk [vmem:[#allocation3 + $0x170] sm:$0xff] %vm554_vm2, %v1132_v44  ;;  %p2848_p13 = pneg %p2847_p12 }
 0x1b3   : > { %v489_v32 = vpop.permute.xlu1 %488  ;;  %p2855_p3 = pnand %p2854_p2, %p2848_p13 }
 0x1b4   : > { %570 = vst.msk [vmem:[#allocation3 + $0x168] sm:$0xff] %vm554_vm2, %v489_v32  ;;  %v1325_v33 = vpop.permute.xlu0 %1324  ;;  %v1721_v52 = vld [vmem:[#allocation3 + $0x158] sm:$0xff] }
 0x1b5   : > { %1405 = vst.msk [vmem:[#allocation3 + $0x170] sm:$0xff] %vm747_vm3, %v1325_v33  ;;  %2047 = vmatprep.mubr.f32.mxu0 %v1721_v52 }
 0x1b7   : > { %v682_v8 = vpop.permute.xlu1 %681  ;;  %v1720_v53 = vld [vmem:[#allocation3 + $0x150] sm:$0xff] }
 0x1b8   : > { %763 = vst.msk [vmem:[#allocation3 + $0x168] sm:$0xff] %vm747_vm3, %v682_v8  ;;  %2048 = vmatmul.mubr.f32.gmra.mrb[28].mxu0 %v1720_v53  ;;  %v1517_v7 = vpop.permute.xlu0 %1516 }
 0x1b9   : > { %1597 = vst.msk [vmem:[#allocation3 + $0x170] sm:$0xff] %vm940_vm4, %v1517_v7 }
 0x1bb   : > { %v875_v40 = vpop.permute.xlu1 %874  ;;  %v4145_v37 = vpop.f32.mrb[4].mxu0 }
 0x1bc   : > { %956 = vst.msk [vmem:[#allocation3 + $0x168] sm:$0xff] %vm940_vm4, %v875_v40  ;;  %v1991_v13 = vpop.f32.mrb[5].mxu0  ;;  %v1134_v62 = vpop.permute.xlu0 %1133 }
 0x1bd   : > { %1213 = vst.msk [vmem:[#allocation3 + $0x188] sm:$0xff] %vm554_vm2, %v1134_v62 }
 0x1bf   : > { %v4149_v14 = vpop.f32.mrb[4].mxu1  ;;  %v491_v54 = vpop.permute.xlu1 %490 }
 0x1c0   : > { %571 = vst.msk [vmem:[#allocation3 + $0x180] sm:$0xff] %vm554_vm2, %v491_v54  ;;  %v2111_v45 = vpop.f32.mrb[5].mxu1  ;;  %v1327_v31 = vpop.permute.xlu0 %1326  ;;  %v1724_v59 = vld [vmem:[#allocation3 + $0x170] sm:$0xff] }
 0x1c1   : > { %1406 = vst.msk [vmem:[#allocation3 + $0x188] sm:$0xff] %vm747_vm3, %v1327_v31  ;;  %2052 = vmatprep.mubr.f32.mxu0 %v1724_v59 }
 0x1c3   : > { %v684_v42 = vpop.permute.xlu1 %683  ;;  %v1723_v17 = vld [vmem:[#allocation3 + $0x168] sm:$0xff] }
 0x1c4   : > { %764 = vst.msk [vmem:[#allocation3 + $0x180] sm:$0xff] %vm747_vm3, %v684_v42  ;;  %2053 = vmatmul.mubr.f32.gmra.mrb[30].mxu0 %v1723_v17  ;;  %v1519_v21 = vpop.permute.xlu0 %1518 }
 0x1c5   : > { %1598 = vst.msk [vmem:[#allocation3 + $0x188] sm:$0xff] %vm940_vm4, %v1519_v21 }
 0x1c7   : > { %v877_v48 = vpop.permute.xlu1 %876 }
 0x1c8   : > { %957 = vst.msk [vmem:[#allocation3 + $0x180] sm:$0xff] %vm940_vm4, %v877_v48  ;;  %v1136_v46 = vpop.permute.xlu0 %1135 }
 0x1c9   : > { %1214 = vst.msk [vmem:[#allocation3 + $0x1a0] sm:$0xff] %vm554_vm2, %v1136_v46 }
 0x1cb   : > { %v493_v57 = vpop.permute.xlu1 %492 }
 0x1cc   : > { %572 = vst.msk [vmem:[#allocation3 + $0x198] sm:$0xff] %vm554_vm2, %v493_v57  ;;  %v1329_v34 = vpop.permute.xlu0 %1328  ;;  %v1727_v51 = vld [vmem:[#allocation3 + $0x188] sm:$0xff] }
 0x1cd   : > { %1407 = vst.msk [vmem:[#allocation3 + $0x1a0] sm:$0xff] %vm747_vm3, %v1329_v34  ;;  %2057 = vmatprep.mubr.f32.mxu0 %v1727_v51 }
 0x1cf   : > { %v686_v3 = vpop.permute.xlu1 %685  ;;  %v1726_v41 = vld [vmem:[#allocation3 + $0x180] sm:$0xff] }
 0x1d0   : > { %765 = vst.msk [vmem:[#allocation3 + $0x198] sm:$0xff] %vm747_vm3, %v686_v3  ;;  %2058 = vmatmul.mubr.f32.gmra.mrb[32].mxu0 %v1726_v41  ;;  %v1521_v39 = vpop.permute.xlu0 %1520 }
 0x1d1   : > { %1599 = vst.msk [vmem:[#allocation3 + $0x1a0] sm:$0xff] %vm940_vm4, %v1521_v39 }
 0x1d3   : > { %v879_v38 = vpop.permute.xlu1 %878  ;;  %v4161_v61 = vpop.f32.mrb[6].mxu0 }
 0x1d4   : > { %958 = vst.msk [vmem:[#allocation3 + $0x198] sm:$0xff] %vm940_vm4, %v879_v38  ;;  %v1996_v1 = vpop.f32.mrb[7].mxu0  ;;  %v1138_v9 = vpop.permute.xlu0 %1137 }
 0x1d5   : > { %1215 = vst.msk [vmem:[#allocation3 + $0x1b8] sm:$0xff] %vm554_vm2, %v1138_v9 }
 0x1d7   : > { %v4165_v50 = vpop.f32.mrb[6].mxu1  ;;  %v495_v55 = vpop.permute.xlu1 %494 }
 0x1d8   : > { %573 = vst.msk [vmem:[#allocation3 + $0x1b0] sm:$0xff] %vm554_vm2, %v495_v55  ;;  %v2116_v26 = vpop.f32.mrb[7].mxu1  ;;  %v1331_v35 = vpop.permute.xlu0 %1330  ;;  %v1730_v6 = vld [vmem:[#allocation3 + $0x1a0] sm:$0xff] }
 0x1d9   : > { %1408 = vst.msk [vmem:[#allocation3 + $0x1b8] sm:$0xff] %vm747_vm3, %v1331_v35  ;;  %2062 = vmatprep.mubr.f32.mxu0 %v1730_v6 }
 0x1db   : > { %v688_v63 = vpop.permute.xlu1 %687  ;;  %v1729_v15 = vld [vmem:[#allocation3 + $0x198] sm:$0xff] }
 0x1dc   : > { %766 = vst.msk [vmem:[#allocation3 + $0x1b0] sm:$0xff] %vm747_vm3, %v688_v63  ;;  %2063 = vmatmul.mubr.f32.gmra.mrb[34].mxu0 %v1729_v15  ;;  %v1523_v43 = vpop.permute.xlu0 %1522 }
 0x1dd   : > { %1600 = vst.msk [vmem:[#allocation3 + $0x1b8] sm:$0xff] %vm940_vm4, %v1523_v43 }
 0x1df   : > { %v881_v47 = vpop.permute.xlu1 %880 }
 0x1e0   : > { %959 = vst.msk [vmem:[#allocation3 + $0x1b0] sm:$0xff] %vm940_vm4, %v881_v47  ;;  %v1140_v49 = vpop.permute.xlu0 %1139 }
 0x1e1   : > { %1216 = vst.msk [vmem:[#allocation3 + $0x1d0] sm:$0xff] %vm554_vm2, %v1140_v49 }
 0x1e3   : > { %v497_v27 = vpop.permute.xlu1 %496 }
 0x1e4   : > { %574 = vst.msk [vmem:[#allocation3 + $0x1c8] sm:$0xff] %vm554_vm2, %v497_v27  ;;  %v1333_v2 = vpop.permute.xlu0 %1332  ;;  %v1733_v0 = vld [vmem:[#allocation3 + $0x1b8] sm:$0xff]  ;;  %v4218_v27 = vld [vmem:[%s4492_s2] ss:$0 sm:$0xff] }
 0x1e5   : > { %1409 = vst.msk [vmem:[#allocation3 + $0x1d0] sm:$0xff] %vm747_vm3, %v1333_v2  ;;  %2067 = vmatprep.mubr.f32.mxu0 %v1733_v0  ;;  %v1985_v0 = vadd.f32 %v4218_v27, %v4125_v58  ;;  %v1990_v58 = vadd.f32 %v4218_v27, %v4145_v37 }
 0x1e7   : > { %v690_v12 = vpop.permute.xlu1 %689  ;;  %v1732_v10 = vld [vmem:[#allocation3 + $0x1b0] sm:$0xff] }
 0x1e8   : > { %767 = vst.msk [vmem:[#allocation3 + $0x1c8] sm:$0xff] %vm747_vm3, %v690_v12  ;;  %2068 = vmatmul.mubr.f32.gmra.mrb[36].mxu0 %v1732_v10  ;;  %v1525_v29 = vpop.permute.xlu0 %1524  ;;  %v1980_v12 = vadd.f32 %v4218_v27, %v4082_v60 }
 0x1e9   : > { %1601 = vst.msk [vmem:[#allocation3 + $0x1d0] sm:$0xff] %vm940_vm4, %v1525_v29 }
 0x1eb   : > { %v883_v20 = vpop.permute.xlu1 %882  ;;  %v4177_v30 = vpop.f32.mrb[8].mxu0 }
 0x1ec   : > { %960 = vst.msk [vmem:[#allocation3 + $0x1c8] sm:$0xff] %vm940_vm4, %v883_v20  ;;  %v2001_v16 = vpop.f32.mrb[9].mxu0  ;;  %v1142_v56 = vpop.permute.xlu0 %1141 }
 0x1ed   : > { %1217 = vst.msk [vmem:[#allocation3 + $0x1e8] sm:$0xff] %vm554_vm2, %v1142_v56  ;;  %v1995_v56 = vadd.f32 %v4218_v27, %v4161_v61 }
 0x1ef   : > { %v4181_v11 = vpop.f32.mrb[8].mxu1  ;;  %v499_v5 = vpop.permute.xlu1 %498 }
 0x1f0   : > { %575 = vst.msk [vmem:[#allocation3 + $0x1e0] sm:$0xff] %vm554_vm2, %v499_v5  ;;  %v2121_v36 = vpop.f32.mrb[9].mxu1  ;;  %v1335_v22 = vpop.permute.xlu0 %1334  ;;  %v1736_v23 = vld [vmem:[#allocation3 + $0x1d0] sm:$0xff] }
 0x1f1   : > { %1410 = vst.msk [vmem:[#allocation3 + $0x1e8] sm:$0xff] %vm747_vm3, %v1335_v22  ;;  %2072 = vmatprep.mubr.f32.mxu0 %v1736_v23 }
 0x1f3   : > { %v692_v19 = vpop.permute.xlu1 %691  ;;  %v1735_v25 = vld [vmem:[#allocation3 + $0x1c8] sm:$0xff] }
 0x1f4   : > { %768 = vst.msk [vmem:[#allocation3 + $0x1e0] sm:$0xff] %vm747_vm3, %v692_v19  ;;  %2073 = vmatmul.mubr.f32.gmra.mrb[38].mxu0 %v1735_v25  ;;  %v1527_v4 = vpop.permute.xlu0 %1526  ;;  %v2000_v25 = vadd.f32 %v4218_v27, %v4177_v30 }
 0x1f5   : > { %1602 = vst.msk [vmem:[#allocation3 + $0x1e8] sm:$0xff] %vm940_vm4, %v1527_v4 }
 0x1f7   : > { %v885_v28 = vpop.permute.xlu1 %884 }
 0x1f8   : > { %961 = vst.msk [vmem:[#allocation3 + $0x1e0] sm:$0xff] %vm940_vm4, %v885_v28  ;;  %v1144_v44 = vpop.permute.xlu0 %1143 }
 0x1f9   : > { %1218 = vst.msk [vmem:[#allocation3 + $0x200] sm:$0xff] %vm554_vm2, %v1144_v44 }
 0x1fb   : > { %v501_v32 = vpop.permute.xlu1 %500 }
 0x1fc   : > { %576 = vst.msk [vmem:[#allocation3 + $0x1f8] sm:$0xff] %vm554_vm2, %v501_v32  ;;  %v1337_v33 = vpop.permute.xlu0 %1336  ;;  %v1739_v52 = vld [vmem:[#allocation3 + $0x1e8] sm:$0xff] }
 0x1fd   : > { %1411 = vst.msk [vmem:[#allocation3 + $0x200] sm:$0xff] %vm747_vm3, %v1337_v33  ;;  %2077 = vmatprep.mubr.f32.mxu0 %v1739_v52 }
 0x1ff   : > { %v694_v8 = vpop.permute.xlu1 %693  ;;  %v1738_v53 = vld [vmem:[#allocation3 + $0x1e0] sm:$0xff] }
 0x200   : > { %769 = vst.msk [vmem:[#allocation3 + $0x1f8] sm:$0xff] %vm747_vm3, %v694_v8  ;;  %2078 = vmatmul.mubr.f32.gmra.mrb[40].mxu0 %v1738_v53  ;;  %v1529_v7 = vpop.permute.xlu0 %1528 }
 0x201   : > { %1603 = vst.msk [vmem:[#allocation3 + $0x200] sm:$0xff] %vm940_vm4, %v1529_v7 }
 0x203   : > { %v887_v40 = vpop.permute.xlu1 %886  ;;  %v4193_v13 = vpop.f32.mrb[10].mxu0 }
 0x204   : > { %962 = vst.msk [vmem:[#allocation3 + $0x1f8] sm:$0xff] %vm940_vm4, %v887_v40  ;;  %v2006_v62 = vpop.f32.mrb[11].mxu0  ;;  %v1146_v54 = vpop.permute.xlu0 %1145  ;;  %v2005_v19 = vadd.f32 %v4218_v27, %v4193_v13 }
 0x205   : > { %1219 = vst.msk [vmem:[#allocation3 + $0x218] sm:$0xff] %vm554_vm2, %v1146_v54 }
 0x207   : > { %v4197_v45 = vpop.f32.mrb[10].mxu1  ;;  %v503_v31 = vpop.permute.xlu1 %502 }
 0x208   : > { %577 = vst.msk [vmem:[#allocation3 + $0x210] sm:$0xff] %vm554_vm2, %v503_v31  ;;  %v2126_v59 = vpop.f32.mrb[11].mxu1  ;;  %v1339_v42 = vpop.permute.xlu0 %1338  ;;  %v1742_v17 = vld [vmem:[#allocation3 + $0x200] sm:$0xff] }
 0x209   : > { %1412 = vst.msk [vmem:[#allocation3 + $0x218] sm:$0xff] %vm747_vm3, %v1339_v42  ;;  %2082 = vmatprep.mubr.f32.mxu0 %v1742_v17 }
 0x20b   : > { %v696_v21 = vpop.permute.xlu1 %695  ;;  %v1741_v48 = vld [vmem:[#allocation3 + $0x1f8] sm:$0xff] }
 0x20c   : > { %770 = vst.msk [vmem:[#allocation3 + $0x210] sm:$0xff] %vm747_vm3, %v696_v21  ;;  %2083 = vmatmul.mubr.f32.gmra.mrb[42].mxu0 %v1741_v48  ;;  %v1531_v46 = vpop.permute.xlu0 %1530 }
 0x20d   : > { %1604 = vst.msk [vmem:[#allocation3 + $0x218] sm:$0xff] %vm940_vm4, %v1531_v46 }
 0x20f   : > { %v889_v57 = vpop.permute.xlu1 %888 }
 0x210   : > { %963 = vst.msk [vmem:[#allocation3 + $0x210] sm:$0xff] %vm940_vm4, %v889_v57  ;;  %v1148_v34 = vpop.permute.xlu0 %1147 }
 0x211   : > { %1220 = vst.msk [vmem:[#allocation3 + $0x230] sm:$0xff] %vm554_vm2, %v1148_v34 }
 0x213   : > { %v505_v51 = vpop.permute.xlu1 %504 }
 0x214   : > { %578 = vst.msk [vmem:[#allocation3 + $0x228] sm:$0xff] %vm554_vm2, %v505_v51  ;;  %v1341_v3 = vpop.permute.xlu0 %1340  ;;  %v1745_v41 = vld [vmem:[#allocation3 + $0x218] sm:$0xff] }
 0x215   : > { %1413 = vst.msk [vmem:[#allocation3 + $0x230] sm:$0xff] %vm747_vm3, %v1341_v3  ;;  %2087 = vmatprep.mubr.f32.mxu0 %v1745_v41 }
 0x217   : > { %v698_v39 = vpop.permute.xlu1 %697  ;;  %v1744_v38 = vld [vmem:[#allocation3 + $0x210] sm:$0xff] }
 0x218   : > { %771 = vst.msk [vmem:[#allocation3 + $0x228] sm:$0xff] %vm747_vm3, %v698_v39  ;;  %2088 = vmatmul.mubr.f32.gmra.mrb[44].mxu0 %v1744_v38  ;;  %v1533_v1 = vpop.permute.xlu0 %1532 }
 0x219   : > { %1605 = vst.msk [vmem:[#allocation3 + $0x230] sm:$0xff] %vm940_vm4, %v1533_v1 }
 0x21b   : > { %v891_v9 = vpop.permute.xlu1 %890  ;;  %v2009_v55 = vpop.f32.mrb[12].mxu0 }
 0x21c   : > { %964 = vst.msk [vmem:[#allocation3 + $0x228] sm:$0xff] %vm940_vm4, %v891_v9  ;;  %v2011_v26 = vpop.f32.mrb[13].mxu0  ;;  %v2010_v7 = vadd.f32 %v4218_v27, %v2009_v55 }
 0x21f   : > { %v4210_v35 = vpop.f32.mrb[12].mxu1 }
 0x220   : > { %v2131_v6 = vpop.f32.mrb[13].mxu1  ;;  %v1748_v63 = vld [vmem:[#allocation3 + $0x230] sm:$0xff] }
 0x221   : > { %2092 = vmatprep.mubr.f32.mxu0 %v1748_v63 }
 0x223   : > { %v1747_v15 = vld [vmem:[#allocation3 + $0x228] sm:$0xff] }
 0x224   : > { %2093 = vmatmul.mubr.f32.gmra.mrb[46].mxu0 %v1747_v15 }
 0x233   : > { %v2014_v43 = vpop.f32.mrb[14].mxu0 }
 0x234   : > { %v2016_v47 = vpop.f32.mrb[15].mxu0  ;;  %v2015_v53 = vadd.f32 %v4218_v27, %v2014_v43 }
 0x237   : > { %v4213_v49 = vpop.f32.mrb[14].mxu1 }
 0x238   : > { %v2136_v2 = vpop.f32.mrb[15].mxu1 }
 0x23b   : > { %v2665_v10 = vpop.f32.mrb[16].mxu1 }
 0x23c   : > { %v2210_v29 = vadd.f32 %v2665_v10, %v1985_v0  ;;  %v2204_v20 = vpop.f32.mrb[17].mxu1 }
 0x23d   : > { %v2205_v16 = vadd.f32 %v2204_v20, %v1980_v12 }
 0x23e   : > { %2365 = vst.msk [vmem:[%s4235_s12 + $0x8] sm:$0xff] %vm2363_vm5, %v2210_v29  ;;  %v2397_v60 = vmax.f32 %v2210_v29, 0.0 }
 0x23f   : > { %2364 = vst.msk [vmem:[%s4235_s12] sm:$0xff] %vm2363_vm5, %v2205_v16  ;;  %v2396_v5 = vmax.f32 %v2205_v16, 0.0  ;;  %v2668_v36 = vpop.f32.mrb[18].mxu1 }
 0x240   : > { %2429 = vst.msk [vmem:[%s4231_s11 + $0x8] sm:$0xff] %vm2363_vm5, %v2397_v60  ;;  %v2220_v61 = vadd.f32 %v2668_v36, %v1995_v56  ;;  %v2214_v22 = vpop.f32.mrb[19].mxu1 }
 0x241   : > { %2428 = vst.msk [vmem:[%s4231_s11] sm:$0xff] %vm2363_vm5, %v2396_v5  ;;  %v2215_v23 = vadd.f32 %v2214_v22, %v1990_v58 }
 0x242   : > { %2367 = vst.msk [vmem:[%s4235_s12 + $0x18] sm:$0xff] %vm2363_vm5, %v2220_v61  ;;  %v2399_v37 = vmax.f32 %v2220_v61, 0.0  ;;  %v2105_v61 = vadd.f32 %v4218_v27, %v4132_v24 }
 0x243   : > { %2366 = vst.msk [vmem:[%s4235_s12 + $0x10] sm:$0xff] %vm2363_vm5, %v2215_v23  ;;  %v2398_v4 = vmax.f32 %v2215_v23, 0.0  ;;  %v2019_v28 = vpop.f32.mrb[16].mxu0  ;;  %v2671_v44 = vpop.f32.mrb[20].mxu1  ;;  %v2100_v23 = vadd.f32 %v4218_v27, %v4092_v18  ;;  %v2110_v18 = vadd.f32 %v4218_v27, %v4149_v14 }
 0x244   : > { %2431 = vst.msk [vmem:[%s4231_s11 + $0x18] sm:$0xff] %vm2363_vm5, %v2399_v37  ;;  %v2230_v32 = vadd.f32 %v2671_v44, %v2005_v19  ;;  %v2021_v33 = vpop.f32.mrb[17].mxu0  ;;  %v2224_v52 = vpop.f32.mrb[21].mxu1  ;;  %v2020_v42 = vadd.f32 %v4218_v27, %v2019_v28  ;;  %v2115_v44 = vadd.f32 %v4218_v27, %v4165_v50 }
 0x245   : > { %2430 = vst.msk [vmem:[%s4231_s11 + $0x10] sm:$0xff] %vm2363_vm5, %v2398_v4  ;;  %v2225_v8 = vadd.f32 %v2224_v52, %v2000_v25 }
 0x246   : > { %2369 = vst.msk [vmem:[%s4235_s12 + $0x28] sm:$0xff] %vm2363_vm5, %v2230_v32  ;;  %v2401_v30 = vmax.f32 %v2230_v32, 0.0 }
 0x247   : > { %2368 = vst.msk [vmem:[%s4235_s12 + $0x20] sm:$0xff] %vm2363_vm5, %v2225_v8  ;;  %v2400_v40 = vmax.f32 %v2225_v8, 0.0  ;;  %v2674_v13 = vpop.f32.mrb[22].mxu1 }
 0x248   : > { %2433 = vst.msk [vmem:[%s4231_s11 + $0x28] sm:$0xff] %vm2363_vm5, %v2401_v30  ;;  %v2240_v62 = vadd.f32 %v2674_v13, %v2015_v53  ;;  %v2234_v54 = vpop.f32.mrb[23].mxu1  ;;  %v2125_v53 = vadd.f32 %v4218_v27, %v4197_v45  ;;  %v2120_v30 = vadd.f32 %v4218_v27, %v4181_v11  ;;  %v2135_v11 = vadd.f32 %v4218_v27, %v4213_v49 }
 0x249   : > { %2432 = vst.msk [vmem:[%s4231_s11 + $0x20] sm:$0xff] %vm2363_vm5, %v2400_v40  ;;  %v2235_v31 = vadd.f32 %v2234_v54, %v2010_v7 }
 0x24a   : > { %2371 = vst.msk [vmem:[%s4235_s12 + $0x38] sm:$0xff] %vm2363_vm5, %v2240_v62  ;;  %v2403_v59 = vmax.f32 %v2240_v62, 0.0 }
 0x24b   : > { %2370 = vst.msk [vmem:[%s4235_s12 + $0x30] sm:$0xff] %vm2363_vm5, %v2235_v31  ;;  %v2402_v17 = vmax.f32 %v2235_v31, 0.0  ;;  %v2677_v21 = vpop.f32.mrb[24].mxu1 }
 0x24c   : > { %2435 = vst.msk [vmem:[%s4231_s11 + $0x38] sm:$0xff] %vm2363_vm5, %v2403_v59  ;;  %v2244_v48 = vpop.f32.mrb[25].mxu1 }
 0x24d   : > { %2434 = vst.msk [vmem:[%s4231_s11 + $0x30] sm:$0xff] %vm2363_vm5, %v2402_v17  ;;  %v2245_v46 = vadd.f32 %v2244_v48, %v2020_v42 }
 0x24f   : > { %2372 = vst.msk [vmem:[%s4235_s12 + $0x40] sm:$0xff] %vm2363_vm5, %v2245_v46  ;;  %v2404_v57 = vmax.f32 %v2245_v46, 0.0  ;;  %v2024_v34 = vpop.f32.mrb[18].mxu0  ;;  %v2680_v51 = vpop.f32.mrb[26].mxu1 }
 0x250   : > { %v2025_v3 = vadd.f32 %v4218_v27, %v2024_v34  ;;  %v2026_v41 = vpop.f32.mrb[19].mxu0  ;;  %v2254_v39 = vpop.f32.mrb[27].mxu1 }
 0x251   : > { %2436 = vst.msk [vmem:[%s4231_s11 + $0x40] sm:$0xff] %vm2363_vm5, %v2404_v57 }
 0x252   : > { %v2250_v38 = vadd.f32 %v2677_v21, %v2025_v3  ;;  %v2130_v21 = vadd.f32 %v4218_v27, %v4210_v35 }
 0x253   : > { %v4283_v1 = vpop.f32.mrb[28].mxu1 }
 0x254   : > { %2373 = vst.msk [vmem:[%s4235_s12 + $0x48] sm:$0xff] %vm2363_vm5, %v2250_v38  ;;  %v2405_v9 = vmax.f32 %v2250_v38, 0.0  ;;  %v2264_v55 = vpop.f32.mrb[29].mxu1 }
 0x256   : > { %2437 = vst.msk [vmem:[%s4231_s11 + $0x48] sm:$0xff] %vm2363_vm5, %v2405_v9 }
 0x257   : > { %v4289_v26 = vpop.f32.mrb[30].mxu1 }
 0x258   : > { %v4291_v6 = vpop.f32.mrb[31].mxu1 }
 0x25b   : > { %v2029_v63 = vpop.f32.mrb[20].mxu0  ;;  %v4293_v15 = vpop.f32.mrb[32].mxu1 }
 0x25c   : > { %v2030_v43 = vadd.f32 %v4218_v27, %v2029_v63  ;;  %v2031_v47 = vpop.f32.mrb[21].mxu0  ;;  %v4296_v2 = vpop.f32.mrb[33].mxu1 }
 0x25e   : > { %v2255_v0 = vadd.f32 %v2254_v39, %v2030_v43 }
 0x25f   : > { %v4298_v12 = vpop.f32.mrb[34].mxu1 }
 0x260   : > { %2374 = vst.msk [vmem:[%s4235_s12 + $0x50] sm:$0xff] %vm2363_vm5, %v2255_v0  ;;  %v2406_v10 = vmax.f32 %v2255_v0, 0.0  ;;  %v4302_v29 = vpop.f32.mrb[35].mxu1 }
 0x262   : > { %2438 = vst.msk [vmem:[%s4231_s11 + $0x50] sm:$0xff] %vm2363_vm5, %v2406_v10 }
 0x263   : > { %v4306_v20 = vpop.f32.mrb[36].mxu1 }
 0x264   : > { %v4308_v16 = vpop.f32.mrb[37].mxu1 }
 0x267   : > { %v2034_v56 = vpop.f32.mrb[22].mxu0  ;;  %v4310_v60 = vpop.f32.mrb[38].mxu1 }
 0x268   : > { %v2035_v58 = vadd.f32 %v4218_v27, %v2034_v56  ;;  %v2036_v5 = vpop.f32.mrb[23].mxu0  ;;  %v4313_v36 = vpop.f32.mrb[39].mxu1 }
 0x26a   : > { %v2260_v22 = vadd.f32 %v2680_v51, %v2035_v58 }
 0x26b   : > { %v2701_v19 = vpop.f32.mrb[40].mxu1 }
 0x26c   : > { %2375 = vst.msk [vmem:[%s4235_s12 + $0x58] sm:$0xff] %vm2363_vm5, %v2260_v22  ;;  %v2407_v37 = vmax.f32 %v2260_v22, 0.0  ;;  %v2330_v25 = vadd.f32 %v2701_v19, %v2105_v61  ;;  %v2324_v4 = vpop.f32.mrb[41].mxu1 }
 0x26d   : > { %v2325_v28 = vadd.f32 %v2324_v4, %v2100_v23 }
 0x26e   : > { %2439 = vst.msk [vmem:[%s4231_s11 + $0x58] sm:$0xff] %vm2363_vm5, %v2407_v37  ;;  %2389 = vst.msk [vmem:[%s4235_s12 + $0xc8] sm:$0xff] %vm2363_vm5, %v2330_v25  ;;  %v2421_v24 = vmax.f32 %v2330_v25, 0.0 }
 0x26f   : > { %2388 = vst.msk [vmem:[%s4235_s12 + $0xc0] sm:$0xff] %vm2363_vm5, %v2325_v28  ;;  %v2420_v32 = vmax.f32 %v2325_v28, 0.0  ;;  %v2704_v33 = vpop.f32.mrb[42].mxu1 }
 0x270   : > { %2453 = vst.msk [vmem:[%s4231_s11 + $0xc8] sm:$0xff] %vm2363_vm5, %v2421_v24  ;;  %v2340_v52 = vadd.f32 %v2704_v33, %v2115_v44  ;;  %v2334_v8 = vpop.f32.mrb[43].mxu1 }
 0x271   : > { %2452 = vst.msk [vmem:[%s4231_s11 + $0xc0] sm:$0xff] %vm2363_vm5, %v2420_v32  ;;  %v2335_v50 = vadd.f32 %v2334_v8, %v2110_v18 }
 0x272   : > { %2391 = vst.msk [vmem:[%s4235_s12 + $0xd8] sm:$0xff] %vm2363_vm5, %v2340_v52  ;;  %v2423_v14 = vmax.f32 %v2340_v52, 0.0 }
 0x273   : > { %2390 = vst.msk [vmem:[%s4235_s12 + $0xd0] sm:$0xff] %vm2363_vm5, %v2335_v50  ;;  %v2422_v7 = vmax.f32 %v2335_v50, 0.0  ;;  %v2039_v40 = vpop.f32.mrb[24].mxu0  ;;  %v2707_v13 = vpop.f32.mrb[44].mxu1 }
 0x274   : > { %2455 = vst.msk [vmem:[%s4231_s11 + $0xd8] sm:$0xff] %vm2363_vm5, %v2423_v14  ;;  %v2040_v62 = vadd.f32 %v4218_v27, %v2039_v40  ;;  %v2350_v45 = vadd.f32 %v2707_v13, %v2125_v53  ;;  %v2041_v54 = vpop.f32.mrb[25].mxu0  ;;  %v2344_v31 = vpop.f32.mrb[45].mxu1 }
 0x275   : > { %2454 = vst.msk [vmem:[%s4231_s11 + $0xd0] sm:$0xff] %vm2363_vm5, %v2422_v7  ;;  %v2345_v59 = vadd.f32 %v2344_v31, %v2120_v30 }
 0x276   : > { %v2265_v42 = vadd.f32 %v2264_v55, %v2040_v62  ;;  %2393 = vst.msk [vmem:[%s4235_s12 + $0xe8] sm:$0xff] %vm2363_vm5, %v2350_v45  ;;  %v2425_v17 = vmax.f32 %v2350_v45, 0.0 }
 0x277   : > { %2392 = vst.msk [vmem:[%s4235_s12 + $0xe0] sm:$0xff] %vm2363_vm5, %v2345_v59  ;;  %v2424_v48 = vmax.f32 %v2345_v59, 0.0  ;;  %v2710_v46 = vpop.f32.mrb[46].mxu1 }
 0x278   : > { %2376 = vst.msk [vmem:[%s4235_s12 + $0x60] sm:$0xff] %vm2363_vm5, %v2265_v42  ;;  %v2408_v57 = vmax.f32 %v2265_v42, 0.0  ;;  %2457 = vst.msk [vmem:[%s4231_s11 + $0xe8] sm:$0xff] %vm2363_vm5, %v2425_v17  ;;  %v2360_v49 = vadd.f32 %v2710_v46, %v2135_v11  ;;  %v2354_v34 = vpop.f32.mrb[47].mxu1 }
 0x279   : > { %2456 = vst.msk [vmem:[%s4231_s11 + $0xe0] sm:$0xff] %vm2363_vm5, %v2424_v48  ;;  %v2355_v51 = vadd.f32 %v2354_v34, %v2130_v21 }
 0x27a   : > { %2440 = vst.msk [vmem:[%s4231_s11 + $0x60] sm:$0xff] %vm2363_vm5, %v2408_v57  ;;  %2395 = vst.msk [vmem:[%s4235_s12 + $0xf8] sm:$0xff] %vm2363_vm5, %v2360_v49  ;;  %v2427_v35 = vmax.f32 %v2360_v49, 0.0 }
 0x27b   : > { %2394 = vst.msk [vmem:[%s4235_s12 + $0xf0] sm:$0xff] %vm2363_vm5, %v2355_v51  ;;  %v2426_v3 = vmax.f32 %v2355_v51, 0.0 }
 0x27c   : > { %2459 = vst.msk [vmem:[%s4231_s11 + $0xf8] sm:$0xff] %vm2363_vm5, %v2427_v35 }
 0x27d   : > { %2458 = vst.msk [vmem:[%s4231_s11 + $0xf0] sm:$0xff] %vm2363_vm5, %v2426_v3 }
 0x27f   : > { %v2044_v41 = vpop.f32.mrb[26].mxu0 }
 0x280   : > { %v2045_v39 = vadd.f32 %v4218_v27, %v2044_v41  ;;  %v2046_v38 = vpop.f32.mrb[27].mxu0 }
 0x282   : > { %v2270_v9 = vadd.f32 %v4283_v1, %v2045_v39 }
 0x284   : > { %2377 = vst.msk [vmem:[%s4235_s12 + $0x68] sm:$0xff] %vm2363_vm5, %v2270_v9  ;;  %v2409_v55 = vmax.f32 %v2270_v9, 0.0 }
 0x286   : > { %2441 = vst.msk [vmem:[%s4231_s11 + $0x68] sm:$0xff] %vm2363_vm5, %v2409_v55 }
 0x28b   : > { %v2049_v63 = vpop.f32.mrb[28].mxu0 }
 0x28c   : > { %v2050_v43 = vadd.f32 %v4218_v27, %v2049_v63  ;;  %v2051_v47 = vpop.f32.mrb[29].mxu0 }
 0x28e   : > { %v2275_v0 = vadd.f32 %v4291_v6, %v2050_v43 }
 0x290   : > { %2378 = vst.msk [vmem:[%s4235_s12 + $0x70] sm:$0xff] %vm2363_vm5, %v2275_v0  ;;  %v2410_v10 = vmax.f32 %v2275_v0, 0.0 }
 0x292   : > { %2442 = vst.msk [vmem:[%s4231_s11 + $0x70] sm:$0xff] %vm2363_vm5, %v2410_v10 }
 0x297   : > { %v2054_v1 = vpop.f32.mrb[30].mxu0 }
 0x298   : > { %v2055_v56 = vadd.f32 %v4218_v27, %v2054_v1  ;;  %v2056_v58 = vpop.f32.mrb[31].mxu0 }
 0x29a   : > { %v2280_v5 = vadd.f32 %v4289_v26, %v2055_v56 }
 0x29c   : > { %2379 = vst.msk [vmem:[%s4235_s12 + $0x78] sm:$0xff] %vm2363_vm5, %v2280_v5  ;;  %v2411_v61 = vmax.f32 %v2280_v5, 0.0 }
 0x29e   : > { %2443 = vst.msk [vmem:[%s4231_s11 + $0x78] sm:$0xff] %vm2363_vm5, %v2411_v61 }
 0x2a3   : > { %v2059_v6 = vpop.f32.mrb[32].mxu0 }
 0x2a4   : > { %v2060_v22 = vadd.f32 %v4218_v27, %v2059_v6  ;;  %v2061_v23 = vpop.f32.mrb[33].mxu0 }
 0x2a6   : > { %v2285_v19 = vadd.f32 %v4296_v2, %v2060_v22 }
 0x2a8   : > { %2380 = vst.msk [vmem:[%s4235_s12 + $0x80] sm:$0xff] %vm2363_vm5, %v2285_v19  ;;  %v2412_v37 = vmax.f32 %v2285_v19, 0.0 }
 0x2aa   : > { %2444 = vst.msk [vmem:[%s4231_s11 + $0x80] sm:$0xff] %vm2363_vm5, %v2412_v37 }
 0x2af   : > { %v2064_v26 = vpop.f32.mrb[34].mxu0 }
 0x2b0   : > { %v2065_v25 = vadd.f32 %v4218_v27, %v2064_v26  ;;  %v2066_v4 = vpop.f32.mrb[35].mxu0 }
 0x2b2   : > { %v2290_v28 = vadd.f32 %v4293_v15, %v2065_v25 }
 0x2b4   : > { %2381 = vst.msk [vmem:[%s4235_s12 + $0x88] sm:$0xff] %vm2363_vm5, %v2290_v28  ;;  %v2413_v44 = vmax.f32 %v2290_v28, 0.0 }
 0x2b6   : > { %2445 = vst.msk [vmem:[%s4231_s11 + $0x88] sm:$0xff] %vm2363_vm5, %v2413_v44 }
 0x2bb   : > { %v2069_v2 = vpop.f32.mrb[36].mxu0 }
 0x2bc   : > { %v2070_v24 = vadd.f32 %v4218_v27, %v2069_v2  ;;  %v2071_v18 = vpop.f32.mrb[37].mxu0 }
 0x2be   : > { %v2295_v32 = vadd.f32 %v4302_v29, %v2070_v24 }
 0x2c0   : > { %2382 = vst.msk [vmem:[%s4235_s12 + $0x90] sm:$0xff] %vm2363_vm5, %v2295_v32  ;;  %v2414_v33 = vmax.f32 %v2295_v32, 0.0 }
 0x2c2   : > { %2446 = vst.msk [vmem:[%s4231_s11 + $0x90] sm:$0xff] %vm2363_vm5, %v2414_v33 }
 0x2c7   : > { %v2074_v15 = vpop.f32.mrb[38].mxu0 }
 0x2c8   : > { %v2075_v52 = vadd.f32 %v4218_v27, %v2074_v15  ;;  %v2076_v8 = vpop.f32.mrb[39].mxu0 }
 0x2ca   : > { %v2300_v50 = vadd.f32 %v4298_v12, %v2075_v52 }
 0x2cc   : > { %2383 = vst.msk [vmem:[%s4235_s12 + $0x98] sm:$0xff] %vm2363_vm5, %v2300_v50  ;;  %v2415_v53 = vmax.f32 %v2300_v50, 0.0 }
 0x2ce   : > { %2447 = vst.msk [vmem:[%s4231_s11 + $0x98] sm:$0xff] %vm2363_vm5, %v2415_v53 }
 0x2d3   : > { %v2079_v29 = vpop.f32.mrb[40].mxu0 }
 0x2d4   : > { %v2080_v14 = vadd.f32 %v4218_v27, %v2079_v29  ;;  %v2081_v30 = vpop.f32.mrb[41].mxu0 }
 0x2d6   : > { %v2305_v7 = vadd.f32 %v4308_v16, %v2080_v14 }
 0x2d8   : > { %2384 = vst.msk [vmem:[%s4235_s12 + $0xa0] sm:$0xff] %vm2363_vm5, %v2305_v7  ;;  %v2416_v40 = vmax.f32 %v2305_v7, 0.0 }
 0x2da   : > { %2448 = vst.msk [vmem:[%s4231_s11 + $0xa0] sm:$0xff] %vm2363_vm5, %v2416_v40 }
 0x2df   : > { %v2084_v12 = vpop.f32.mrb[42].mxu0 }
 0x2e0   : > { %v2085_v13 = vadd.f32 %v4218_v27, %v2084_v12  ;;  %v2086_v62 = vpop.f32.mrb[43].mxu0 }
 0x2e2   : > { %v2310_v45 = vadd.f32 %v4306_v20, %v2085_v13 }
 0x2e4   : > { %2385 = vst.msk [vmem:[%s4235_s12 + $0xa8] sm:$0xff] %vm2363_vm5, %v2310_v45  ;;  %v2417_v54 = vmax.f32 %v2310_v45, 0.0 }
 0x2e6   : > { %2449 = vst.msk [vmem:[%s4231_s11 + $0xa8] sm:$0xff] %vm2363_vm5, %v2417_v54 }
 0x2eb   : > { %v2089_v16 = vpop.f32.mrb[44].mxu0 }
 0x2ec   : > { %v2090_v31 = vadd.f32 %v4218_v27, %v2089_v16  ;;  %v2091_v59 = vpop.f32.mrb[45].mxu0 }
 0x2ee   : > { %v2315_v11 = vadd.f32 %v4313_v36, %v2090_v31 }
 0x2f0   : > { %2386 = vst.msk [vmem:[%s4235_s12 + $0xb0] sm:$0xff] %vm2363_vm5, %v2315_v11  ;;  %v2418_v42 = vmax.f32 %v2315_v11, 0.0 }
 0x2f2   : > { %2450 = vst.msk [vmem:[%s4231_s11 + $0xb0] sm:$0xff] %vm2363_vm5, %v2418_v42 }
 0x2f7   : > { %v2094_v20 = vpop.f32.mrb[46].mxu0 }
 0x2f8   : > { %v2095_v17 = vadd.f32 %v4218_v27, %v2094_v20  ;;  %v2096_v21 = vpop.f32.mrb[47].mxu0 }
 0x2fa   : > { %v2320_v36 = vadd.f32 %v4310_v60, %v2095_v17 }
 0x2fc   : > { %2387 = vst.msk [vmem:[%s4235_s12 + $0xb8] sm:$0xff] %vm2363_vm5, %v2320_v36  ;;  %v2419_v48 = vmax.f32 %v2320_v36, 0.0 }
 0x2fd   : > { %2858 = shalt.err (!%p2855_p3)
}
 0x2fe   : > { %s2859_s23 = scalar_lea.hbm %s4438_s22, 4096  ;;  %s2863_s13 = scalar_lea.hbm %s4493_s3, 8192 }
 0x2ff   : > { %p2860_p4 = scmp.ne.s32.totalorder %s4438_s22, %s2859_s23  ;;  %p2864_p9 = scmp.lt.u32.totalorder %s4438_s22, %s4493_s3 }
 0x300   : > { %p2865_p10 = scmp.lt.u32.totalorder %s2863_s13, %s2859_s23  ;;  %p2867_p12 = scmp.lt.u32.totalorder %s2859_s23, %s4438_s22 }
 0x301   : > { %p2861_p7 = pnand %p2860_p4, %p2980_p5 }
 0x302   : > { %p2866_p11 = por %p2865_p10, %p2864_p9 }
 0x303   : > { %p2862_p8 = pneg %p2861_p7 }
 0x304   : > { %p2868_p13 = por %p2867_p12, %p2866_p11 }
 0x306   : > { %p2869_p0 = pnand %p2868_p13, %p2862_p8 }
 0x308   : > { %2872 = shalt.err (!%p2869_p0)
}
 0x309   : > { %s2915_s12 = smov 128   ;;  %s2916_s9 = smov 8   ;;  %2451 = vst.msk [vmem:[%s4231_s11 + $0xb8] sm:$0xff] %vm2363_vm5, %v2419_v48 }
 0x30a   : > { %2799 = dma.vmem_to_hbm [thread:$0]  (%p2980_p5), %s4440_s10, 4096, %s4438_s22, %s4447_s19, %s2915_s12, %s2915_s12, %s2916_s9  }
 0x30b PF: > { %p2805_p1 = scmp.ge.s32.totalorder %s2907_s18, 2  ;;  %s2497_s14 = sand.u32 1, %s2895_s15  }
 0x30c   : > { %s2498_s20 = scalar_lea.sflag [#allocation5], %s2497_s14 }
 0x30d   : > { %p2802_p2 = pnand %p2805_p1, %p2984_p6 }
 0x30f   : > { %2890 = dma.done.wait (!%p2802_p2), %s2498_s20, 4096  }
 0x310   : > { %2892 = vsyncadd (!%p2802_p2), %s2498_s20, 4294963200  ;;  %p15_p3 = scmp.ge.s32.totalorder %s2967_s21, 4   ;;  %s4497_s15 = smov %s2899_s16 }
 0x311   : > { %s4498_s16 = smov %s2903_s17  ;;  %s4499_s17 = smov %s2978_s24 }
 0x312   : > { %s4500_s18 = smov %s2967_s21  ;;  %17 = sbr.rel (!%p15_p3) target bundleno = 3 (0x3), region = 81 }
 0x319   :  { %2511 = vsyncpa [#allocation5], 1 }
 0x31a   :  { %2513 = vsyncpa [#allocation5 + $0x1], 1 }

// kernel: encoder_forward.5
= control target key start
LH: loop header
LB: loop body
LE: loop exit
PB: predicated region body
PF: predicated region fallthrough
CT: control target
= control target key end

     0   :  { %s4786_s0 = inlined_call_operand.vmem [shape: f32[2,16,16,64], index: 0, kind: input, shape index: {}]   ;;  %s4787_s1 = inlined_call_operand.vmem [shape: bf16[576,512], index: 1, kind: input, shape index: {}]   ;;  %s4788_s2 = inlined_call_operand.vmem [shape: f32[1,512], index: 2, kind: input, shape index: {}]   ;;  %s4789_s3 = inlined_call_operand.vmem [shape: f32[1,512], index: 3, kind: input, shape index: {}]   ;;  %s4790_s4 = inlined_call_operand.<no memory space> [shape: f32[1,1], index: 4, kind: input, shape index: {}]   ;;  %s4791_s5 = inlined_call_operand.hbm [shape: f32[2,16,16,512], index: 5, kind: output, shape index: {0}]   ;;  %s4792_s6 = inlined_call_operand.vmem [shape: f32[2,1,256], index: 6, kind: output, shape index: {1}]  }
   0x1   :  { %4800 = sst [smem:[#allocation18_spill]] %s4787_s1  ;;  %v12_v0 = vstv %s4790_s4 }
   0x2   :  { %13 = vst [vmem:[#allocation5] sm:$0x1] %v12_v0 }
   0x3   :  { %14 = vsyncpa [#allocation8], 0 }
   0x4   :  { %16 = vsyncpa [#allocation8 + $0x1], 0  ;;  %s3580_s23 = smov 0   ;;  %s3582_s24 = smov 0  }
   0x5   :  { %s3584_s25 = smov 0   ;;  %s3586_s26 = smov 0  }
   0x6   :  { %s3588_s27 = smov 0   ;;  %s3590_s28 = smov 0  }
   0x7   :  { %s3592_s29 = smov 0   ;;  %s3594_s30 = smov 0  }
   0x8   :  { %s3596_s4 = smov 0   ;;  %s3598_s7 = smov 0  }
   0x9 LB: > { %4801 = sst [smem:[#allocation10_spill]] %s3504_s25  ;;  %s2863_s8 = sadd.s32 4294967295, %s3532_s7   ;;  %s3532_s7 = sphi %s3598_s7, %s22_s7   ;;  %s3528_s4 = sphi %s3596_s4, %s4823_s4   ;;  %s3524_s30 = sphi %s3594_s30, %s4822_s30   ;;  %s3520_s29 = sphi %s3592_s29, %s4821_s29   ;;  %s3516_s28 = sphi %s3590_s28, %s4820_s28   ;;  %s3512_s27 = sphi %s3588_s27, %s4819_s27   ;;  %s3508_s26 = sphi %s3586_s26, %s4818_s26   ;;  %s3504_s25 = sphi %s3584_s25, %s4817_s25   ;;  %s3500_s24 = sphi %s3582_s24, %s4825_s24   ;;  %s3496_s23 = sphi %s3580_s23, %s4824_s23  }
   0xa   : > { %4802 = sst [smem:[#allocation11_spill]] %s3512_s27  ;;  %s2864_s9 = sadd.s32 4294967294, %s3532_s7  }
   0xb   : > { %4803 = sst [smem:[#allocation12_spill]] %s3524_s30  ;;  %s31_s10 = sadd.s32 1, %s3524_s30 }
   0xc   : > { %4804 = sst [smem:[#allocation13_spill]] %s3528_s4  ;;  %s34_s11 = sadd.s32 1, %s3528_s4 }
   0xd   : > { %p32_p0 = scmp.ge.s32.totalorder %s31_s10, 4  ;;  %s67_s12 = sadd.s32 1, %s3512_s27 }
   0xe   : > { %p74_p1 = scmp.ne.s32.totalorder %s3512_s27, %s3508_s26  ;;  %p75_p2 = scmp.eq.s32.totalorder %s3532_s7, 0 }
   0xf   : > { %s4827_s10 = smov (%p32_p0, %s31_s10), 0  ;;  %s4829_s11 = smov (!%p32_p0, %s34_s11), %s3528_s4 }
  0x10   : > { %4805 = sst [smem:[#allocation14_spill]] %s4827_s10  ;;  %s64_s13 = ssub.s32 %s3524_s30, %s4827_s10 }
  0x11   : > { %p3643_p3 = por %p75_p2, %p74_p1  ;;  %p36_p4 = scmp.ge.s32.totalorder %s4829_s11, 2 }
  0x12   : > { %p65_p5 = scmp.eq.s32.totalorder %s64_s13, 0  ;;  %s168_s15 = sadd.s32 1, %s3504_s25 }
  0x13   : > { %p178_p6 = scmp.ne.s32.totalorder %s3504_s25, %s3500_s24  ;;  %s4831_s11 = smov (%p36_p4, %s4829_s11), 0 }
  0x14   : > { %4807 = sst [smem:[#allocation15_spill]] %s4831_s11  ;;  %s163_s17 = ssub.s32 %s3528_s4, %s4831_s11 }
  0x15   : > { %s3653_s16 = scalar_select %p65_p5, %s3512_s27, %s67_s12  }
  0x16   : > { %p179_p7 = scmp.eq.s32.totalorder %s2863_s8, 7  ;;  %s165_s18 = sor.u32 %s163_s17, %s64_s13 }
  0x17   : > { %4808 = sst [smem:[#allocation16_spill]] %s3653_s16  ;;  %p184_p8 = scmp.ne.s32.totalorder %s3500_s24, %s3496_s23 }
  0x18   : > { %p166_p9 = scmp.eq.s32.totalorder %s165_s18, 0  ;;  %p3659_p10 = por %p179_p7, %p178_p6 }
  0x19   : > { %p185_p11 = scmp.eq.s32.totalorder %s2864_s9, 7  ;;  %p2866_p13 = scmp.ge.s32.totalorder %s3532_s7, 8 }
  0x1a   : > { %s3664_s20 = scalar_select %p166_p9, %s3504_s25, %s168_s15  }
  0x1b   : > { %p3666_p12 = por %p185_p11, %p184_p8  ;;  %230 = sbr.rel (%p2866_p13) target bundleno = 92 (0x5c), region = 20 }
  0x1c   : > { %4810 = sst [smem:[#allocation17_spill]] %s3664_s20 }
  0x22   : > { %241 = sbr.rel (!%p3643_p3) target bundleno = 92 (0x5c), region = 28  ;;  %s243_s22 = sand.u32 (%p3643_p3), 1, %s3512_s27  }
  0x23   : > { %s2867_s8 = sshll.u32 (%p3643_p3), %s3524_s30, 2  ;;  %s3285_s12 = smul.u32 (%p3643_p3), 288, %s243_s22 }
  0x24   : > { %s4812_s1 = sld [smem:[#allocation18_spill]] (%p3643_p3) }
  0x25   : > { %s3685_s14 = scalar_lea.vmem (%p3643_p3), [#allocation6], %s3285_s12 }
  0x2a   : > { %s3678_s9 = scalar_lea.vmem %s4812_s1, %s2867_s8 }
  0x2b   : > { %v263_v1 = vld [vmem:[%s3678_s9] sm:$0xf]  ;;  %v265_v2 = vld [vmem:[%s3678_s9 + $0x10] sm:$0xf] }
  0x2c   : > { %v267_v3 = vld [vmem:[%s3678_s9 + $0x20] sm:$0xf]  ;;  %v269_v4 = vld [vmem:[%s3678_s9 + $0x30] sm:$0xf]  ;;  %264 = vst [vmem:[%s3685_s14] sm:$0xf] %v263_v1 }
  0x2d   : > { %v271_v5 = vld [vmem:[%s3678_s9 + $0x40] sm:$0xf]  ;;  %266 = vst [vmem:[%s3685_s14 + $0x4] sm:$0xf] %v265_v2  ;;  %268 = vst [vmem:[%s3685_s14 + $0x8] sm:$0xf] %v267_v3 }
  0x2e   : > { %270 = vst [vmem:[%s3685_s14 + $0xc] sm:$0xf] %v269_v4  ;;  %272 = vst [vmem:[%s3685_s14 + $0x10] sm:$0xf] %v271_v5  ;;  %v273_v6 = vld [vmem:[%s3678_s9 + $0x50] sm:$0xf] }
  0x2f   : > { %v275_v7 = vld [vmem:[%s3678_s9 + $0x60] sm:$0xf]  ;;  %v277_v8 = vld [vmem:[%s3678_s9 + $0x70] sm:$0xf]  ;;  %274 = vst [vmem:[%s3685_s14 + $0x14] sm:$0xf] %v273_v6 }
  0x30   : > { %276 = vst [vmem:[%s3685_s14 + $0x18] sm:$0xf] %v275_v7  ;;  %278 = vst [vmem:[%s3685_s14 + $0x1c] sm:$0xf] %v277_v8  ;;  %v279_v9 = vld [vmem:[%s3678_s9 + $0x80] sm:$0xf] }
  0x31   : > { %v281_v10 = vld [vmem:[%s3678_s9 + $0x90] sm:$0xf]  ;;  %v283_v11 = vld [vmem:[%s3678_s9 + $0xa0] sm:$0xf]  ;;  %280 = vst [vmem:[%s3685_s14 + $0x20] sm:$0xf] %v279_v9 }
  0x32   : > { %282 = vst [vmem:[%s3685_s14 + $0x24] sm:$0xf] %v281_v10  ;;  %284 = vst [vmem:[%s3685_s14 + $0x28] sm:$0xf] %v283_v11  ;;  %v285_v12 = vld [vmem:[%s3678_s9 + $0xb0] sm:$0xf] }
  0x33   : > { %v287_v13 = vld [vmem:[%s3678_s9 + $0xc0] sm:$0xf]  ;;  %v289_v14 = vld [vmem:[%s3678_s9 + $0xd0] sm:$0xf]  ;;  %286 = vst [vmem:[%s3685_s14 + $0x2c] sm:$0xf] %v285_v12 }
  0x34   : > { %288 = vst [vmem:[%s3685_s14 + $0x30] sm:$0xf] %v287_v13  ;;  %290 = vst [vmem:[%s3685_s14 + $0x34] sm:$0xf] %v289_v14  ;;  %v291_v15 = vld [vmem:[%s3678_s9 + $0xe0] sm:$0xf] }
  0x35   : > { %v293_v16 = vld [vmem:[%s3678_s9 + $0xf0] sm:$0xf]  ;;  %v295_v17 = vld [vmem:[%s3678_s9 + $0x100] sm:$0xf]  ;;  %292 = vst [vmem:[%s3685_s14 + $0x38] sm:$0xf] %v291_v15 }
  0x36   : > { %294 = vst [vmem:[%s3685_s14 + $0x3c] sm:$0xf] %v293_v16  ;;  %296 = vst [vmem:[%s3685_s14 + $0x40] sm:$0xf] %v295_v17  ;;  %v297_v18 = vld [vmem:[%s3678_s9 + $0x110] sm:$0xf] }
  0x37   : > { %v299_v19 = vld [vmem:[%s3678_s9 + $0x120] sm:$0xf]  ;;  %v301_v20 = vld [vmem:[%s3678_s9 + $0x130] sm:$0xf]  ;;  %298 = vst [vmem:[%s3685_s14 + $0x44] sm:$0xf] %v297_v18 }
  0x38   : > { %300 = vst [vmem:[%s3685_s14 + $0x48] sm:$0xf] %v299_v19  ;;  %302 = vst [vmem:[%s3685_s14 + $0x4c] sm:$0xf] %v301_v20  ;;  %v303_v21 = vld [vmem:[%s3678_s9 + $0x140] sm:$0xf] }
  0x39   : > { %v305_v22 = vld [vmem:[%s3678_s9 + $0x150] sm:$0xf]  ;;  %v307_v23 = vld [vmem:[%s3678_s9 + $0x160] sm:$0xf]  ;;  %304 = vst [vmem:[%s3685_s14 + $0x50] sm:$0xf] %v303_v21 }
  0x3a   : > { %306 = vst [vmem:[%s3685_s14 + $0x54] sm:$0xf] %v305_v22  ;;  %308 = vst [vmem:[%s3685_s14 + $0x58] sm:$0xf] %v307_v23  ;;  %v309_v24 = vld [vmem:[%s3678_s9 + $0x170] sm:$0xf] }
  0x3b   : > { %v311_v25 = vld [vmem:[%s3678_s9 + $0x180] sm:$0xf]  ;;  %v313_v26 = vld [vmem:[%s3678_s9 + $0x190] sm:$0xf]  ;;  %310 = vst [vmem:[%s3685_s14 + $0x5c] sm:$0xf] %v309_v24 }
  0x3c   : > { %312 = vst [vmem:[%s3685_s14 + $0x60] sm:$0xf] %v311_v25  ;;  %314 = vst [vmem:[%s3685_s14 + $0x64] sm:$0xf] %v313_v26  ;;  %v315_v27 = vld [vmem:[%s3678_s9 + $0x1a0] sm:$0xf] }
  0x3d   : > { %v317_v28 = vld [vmem:[%s3678_s9 + $0x1b0] sm:$0xf]  ;;  %v319_v29 = vld [vmem:[%s3678_s9 + $0x1c0] sm:$0xf]  ;;  %316 = vst [vmem:[%s3685_s14 + $0x68] sm:$0xf] %v315_v27 }
  0x3e   : > { %318 = vst [vmem:[%s3685_s14 + $0x6c] sm:$0xf] %v317_v28  ;;  %320 = vst [vmem:[%s3685_s14 + $0x70] sm:$0xf] %v319_v29  ;;  %v321_v30 = vld [vmem:[%s3678_s9 + $0x1d0] sm:$0xf] }
  0x3f   : > { %v323_v31 = vld [vmem:[%s3678_s9 + $0x1e0] sm:$0xf]  ;;  %v325_v32 = vld [vmem:[%s3678_s9 + $0x1f0] sm:$0xf]  ;;  %322 = vst [vmem:[%s3685_s14 + $0x74] sm:$0xf] %v321_v30 }
  0x40   : > { %324 = vst [vmem:[%s3685_s14 + $0x78] sm:$0xf] %v323_v31  ;;  %326 = vst [vmem:[%s3685_s14 + $0x7c] sm:$0xf] %v325_v32  ;;  %v327_v33 = vld [vmem:[%s3678_s9 + $0x200] sm:$0xf] }
  0x41   : > { %v329_v34 = vld [vmem:[%s3678_s9 + $0x210] sm:$0xf]  ;;  %v331_v35 = vld [vmem:[%s3678_s9 + $0x220] sm:$0xf]  ;;  %328 = vst [vmem:[%s3685_s14 + $0x80] sm:$0xf] %v327_v33 }
  0x42   : > { %330 = vst [vmem:[%s3685_s14 + $0x84] sm:$0xf] %v329_v34  ;;  %332 = vst [vmem:[%s3685_s14 + $0x88] sm:$0xf] %v331_v35  ;;  %v333_v36 = vld [vmem:[%s3678_s9 + $0x230] sm:$0xf] }
  0x43   : > { %v335_v37 = vld [vmem:[%s3678_s9 + $0x240] sm:$0xf]  ;;  %v337_v38 = vld [vmem:[%s3678_s9 + $0x250] sm:$0xf]  ;;  %334 = vst [vmem:[%s3685_s14 + $0x8c] sm:$0xf] %v333_v36 }
  0x44   : > { %336 = vst [vmem:[%s3685_s14 + $0x90] sm:$0xf] %v335_v37  ;;  %338 = vst [vmem:[%s3685_s14 + $0x94] sm:$0xf] %v337_v38  ;;  %v339_v39 = vld [vmem:[%s3678_s9 + $0x260] sm:$0xf] }
  0x45   : > { %v341_v40 = vld [vmem:[%s3678_s9 + $0x270] sm:$0xf]  ;;  %v343_v41 = vld [vmem:[%s3678_s9 + $0x280] sm:$0xf]  ;;  %340 = vst [vmem:[%s3685_s14 + $0x98] sm:$0xf] %v339_v39 }
  0x46   : > { %342 = vst [vmem:[%s3685_s14 + $0x9c] sm:$0xf] %v341_v40  ;;  %344 = vst [vmem:[%s3685_s14 + $0xa0] sm:$0xf] %v343_v41  ;;  %v345_v42 = vld [vmem:[%s3678_s9 + $0x290] sm:$0xf] }
  0x47   : > { %v347_v43 = vld [vmem:[%s3678_s9 + $0x2a0] sm:$0xf]  ;;  %v349_v44 = vld [vmem:[%s3678_s9 + $0x2b0] sm:$0xf]  ;;  %346 = vst [vmem:[%s3685_s14 + $0xa4] sm:$0xf] %v345_v42 }
  0x48   : > { %348 = vst [vmem:[%s3685_s14 + $0xa8] sm:$0xf] %v347_v43  ;;  %350 = vst [vmem:[%s3685_s14 + $0xac] sm:$0xf] %v349_v44  ;;  %v351_v45 = vld [vmem:[%s3678_s9 + $0x2c0] sm:$0xf] }
  0x49   : > { %v353_v46 = vld [vmem:[%s3678_s9 + $0x2d0] sm:$0xf]  ;;  %v355_v47 = vld [vmem:[%s3678_s9 + $0x2e0] sm:$0xf]  ;;  %352 = vst [vmem:[%s3685_s14 + $0xb0] sm:$0xf] %v351_v45 }
  0x4a   : > { %354 = vst [vmem:[%s3685_s14 + $0xb4] sm:$0xf] %v353_v46  ;;  %356 = vst [vmem:[%s3685_s14 + $0xb8] sm:$0xf] %v355_v47  ;;  %v357_v48 = vld [vmem:[%s3678_s9 + $0x2f0] sm:$0xf] }
  0x4b   : > { %v359_v49 = vld [vmem:[%s3678_s9 + $0x300] sm:$0xf]  ;;  %v361_v50 = vld [vmem:[%s3678_s9 + $0x310] sm:$0xf]  ;;  %358 = vst [vmem:[%s3685_s14 + $0xbc] sm:$0xf] %v357_v48 }
  0x4c   : > { %360 = vst [vmem:[%s3685_s14 + $0xc0] sm:$0xf] %v359_v49  ;;  %362 = vst [vmem:[%s3685_s14 + $0xc4] sm:$0xf] %v361_v50  ;;  %v363_v51 = vld [vmem:[%s3678_s9 + $0x320] sm:$0xf] }
  0x4d   : > { %v365_v52 = vld [vmem:[%s3678_s9 + $0x330] sm:$0xf]  ;;  %v367_v53 = vld [vmem:[%s3678_s9 + $0x340] sm:$0xf]  ;;  %364 = vst [vmem:[%s3685_s14 + $0xc8] sm:$0xf] %v363_v51 }
  0x4e   : > { %366 = vst [vmem:[%s3685_s14 + $0xcc] sm:$0xf] %v365_v52  ;;  %368 = vst [vmem:[%s3685_s14 + $0xd0] sm:$0xf] %v367_v53  ;;  %v369_v54 = vld [vmem:[%s3678_s9 + $0x350] sm:$0xf] }
  0x4f   : > { %v371_v55 = vld [vmem:[%s3678_s9 + $0x360] sm:$0xf]  ;;  %v373_v56 = vld [vmem:[%s3678_s9 + $0x370] sm:$0xf]  ;;  %370 = vst [vmem:[%s3685_s14 + $0xd4] sm:$0xf] %v369_v54 }
  0x50   : > { %372 = vst [vmem:[%s3685_s14 + $0xd8] sm:$0xf] %v371_v55  ;;  %374 = vst [vmem:[%s3685_s14 + $0xdc] sm:$0xf] %v373_v56  ;;  %v375_v57 = vld [vmem:[%s3678_s9 + $0x380] sm:$0xf] }
  0x51   : > { %v377_v58 = vld [vmem:[%s3678_s9 + $0x390] sm:$0xf]  ;;  %v379_v59 = vld [vmem:[%s3678_s9 + $0x3a0] sm:$0xf]  ;;  %376 = vst [vmem:[%s3685_s14 + $0xe0] sm:$0xf] %v375_v57 }
  0x52   : > { %378 = vst [vmem:[%s3685_s14 + $0xe4] sm:$0xf] %v377_v58  ;;  %380 = vst [vmem:[%s3685_s14 + $0xe8] sm:$0xf] %v379_v59  ;;  %v381_v60 = vld [vmem:[%s3678_s9 + $0x3b0] sm:$0xf] }
  0x53   : > { %v383_v61 = vld [vmem:[%s3678_s9 + $0x3c0] sm:$0xf]  ;;  %v385_v62 = vld [vmem:[%s3678_s9 + $0x3d0] sm:$0xf]  ;;  %382 = vst [vmem:[%s3685_s14 + $0xec] sm:$0xf] %v381_v60 }
  0x54   : > { %384 = vst [vmem:[%s3685_s14 + $0xf0] sm:$0xf] %v383_v61  ;;  %386 = vst [vmem:[%s3685_s14 + $0xf4] sm:$0xf] %v385_v62  ;;  %v387_v63 = vld [vmem:[%s3678_s9 + $0x3e0] sm:$0xf] }
  0x55   : > { %v389_v0 = vld [vmem:[%s3678_s9 + $0x3f0] sm:$0xf]  ;;  %v391_v1 = vld [vmem:[%s3678_s9 + $0x400] sm:$0xf]  ;;  %388 = vst [vmem:[%s3685_s14 + $0xf8] sm:$0xf] %v387_v63 }
  0x56   : > { %390 = vst [vmem:[%s3685_s14 + $0xfc] sm:$0xf] %v389_v0  ;;  %392 = vst [vmem:[%s3685_s14 + $0x100] sm:$0xf] %v391_v1  ;;  %v393_v2 = vld [vmem:[%s3678_s9 + $0x410] sm:$0xf] }
  0x57   : > { %v395_v3 = vld [vmem:[%s3678_s9 + $0x420] sm:$0xf]  ;;  %v397_v4 = vld [vmem:[%s3678_s9 + $0x430] sm:$0xf]  ;;  %394 = vst [vmem:[%s3685_s14 + $0x104] sm:$0xf] %v393_v2 }
  0x58   : > { %396 = vst [vmem:[%s3685_s14 + $0x108] sm:$0xf] %v395_v3  ;;  %398 = vst [vmem:[%s3685_s14 + $0x10c] sm:$0xf] %v397_v4  ;;  %v399_v5 = vld [vmem:[%s3678_s9 + $0x440] sm:$0xf] }
  0x59   : > { %v401_v6 = vld [vmem:[%s3678_s9 + $0x450] sm:$0xf]  ;;  %v403_v7 = vld [vmem:[%s3678_s9 + $0x460] sm:$0xf]  ;;  %400 = vst [vmem:[%s3685_s14 + $0x110] sm:$0xf] %v399_v5 }
  0x5a   : > { %402 = vst [vmem:[%s3685_s14 + $0x114] sm:$0xf] %v401_v6  ;;  %404 = vst [vmem:[%s3685_s14 + $0x118] sm:$0xf] %v403_v7  ;;  %v405_v8 = vld [vmem:[%s3678_s9 + $0x470] sm:$0xf] }
  0x5b   : > { %406 = vst [vmem:[%s3685_s14 + $0x11c] sm:$0xf] %v405_v8 }
  0x5c PF: > { %p2868_p0 = scmp.ge.s32.totalorder %s3532_s7, 1  ;;  %p584_p1 = scmp.lt.s32.totalorder %s3532_s7, 9 }
  0x5e   : > { %p585_p2 = pnand %p2868_p0, %p584_p1 }
  0x5f   : > { %s591_s15 = sand.u32 (!%p585_p2), 1, %s3508_s26   ;;  %s4796_s18 = sand.u32 (!%p585_p2), 1, %s3500_s24  }
  0x60   : > { %588 = sbr.rel (%p585_p2) target bundleno = 1152 (0x480), region = 77  ;;  %s2869_s8 = sshll.u32 (!%p585_p2), %s4796_s18, 8 }
  0x61   : > { %s3286_s22 = smul.u32 (!%p585_p2), 288, %s591_s15  ;;  %p635_p3 = scmp.lt.s32.totalorder (!%p585_p2), %s3520_s29, 1 }
  0x62   : > { %p640_p4 = scmp.lt.s32.totalorder (!%p585_p2), %s3516_s28, 3  ;;  %p2873_p5 = scmp.ne.s32.totalorder (!%p585_p2), %s3516_s28, 0 }
  0x63   : > { %s3856_s25 = scalar_lea.vmem (!%p585_p2), [#allocation6], %s3286_s22 }
  0x67   : > { %s636_s12 = scalar_select %p635_p3, %s3520_s29, 1 }
  0x68   : > { %s3836_s13 = scalar_select %p640_p4, %s3516_s28, 3 }
  0x69   : > { %s2934_s17 = sshll.u32 %s636_s12, 8  ;;  %s2872_s9 = sshll.u32 %s636_s12, 1  ;;  %vm655_vm0 = vcmask (!%p2873_p5), 523264   ;;  %vm658_vm1 = vcmask (!%p2873_p5), 517120   ;;  %v3534_v11 = vmov (!%p2873_p5), 0.0   ;;  %vm952_vm3 = vcmask (!%p2873_p5), 1048064  }
  0x6a   : > { %s3841_s11 = scalar_lea.vmem %s4786_s0, %s2934_s17  ;;  %s642_s15 = scalar_lea.vmem %s4788_s2, %s3836_s13  ;;  %663 = vst.msk [vmem:[#allocation2 + $0x30] sm:$0xff] (!%p2873_p5), %vm655_vm0, %v3534_v11  ;;  %664 = vst.msk [vmem:[#allocation2 + $0x38] sm:$0xff] (!%p2873_p5), %vm655_vm0, %v3534_v11 }
  0x6b   : > { %s645_s30 = scalar_lea.vmem %s4789_s3, %s3836_s13  ;;  %s3854_s20 = scalar_lea.vmem %s4792_s6, %s2872_s9  ;;  %v713_v9 = vld [vmem:[%s3841_s11 + $0x10] sm:$0xff] (!%p2873_p5)  ;;  %v714_v10 = vld [vmem:[%s3841_s11 + $0x18] sm:$0xff] (!%p2873_p5)  ;;  %665 = vst.msk [vmem:[#allocation2 + $0x40] sm:$0x3] (!%p2873_p5), %vm658_vm1, %v3534_v11  ;;  %659 = vst.msk [vmem:[#allocation2 + $0x10] sm:$0x3] (!%p2873_p5), %vm658_vm1, %v3534_v11 }
  0x6c   : > { %s3858_s12 = scalar_lea.vmem [#allocation7], %s2869_s8  ;;  %654 = sbr.rel (%p2873_p5) target bundleno = 388 (0x184), region = 85  ;;  %656 = vst.msk [vmem:[#allocation2] sm:$0xff] (!%p2873_p5), %vm655_vm0, %v3534_v11  ;;  %657 = vst.msk [vmem:[#allocation2 + $0x8] sm:$0xff] (!%p2873_p5), %vm655_vm0, %v3534_v11  ;;  %v715_v12 = vld [vmem:[%s3841_s11 + $0x20] sm:$0xff] (!%p2873_p5)  ;;  %v716_v13 = vld [vmem:[%s3841_s11 + $0x28] sm:$0xff] (!%p2873_p5) }
  0x6d   : > { %660 = vst.msk [vmem:[#allocation2 + $0x18] sm:$0xff] (!%p2873_p5), %vm655_vm0, %v3534_v11  ;;  %661 = vst.msk [vmem:[#allocation2 + $0x20] sm:$0xff] (!%p2873_p5), %vm655_vm0, %v3534_v11  ;;  %v711_v14 = vld [vmem:[%s3841_s11] sm:$0xff] (!%p2873_p5)  ;;  %v712_v15 = vld [vmem:[%s3841_s11 + $0x8] sm:$0xff] (!%p2873_p5)  ;;  %s3535_s1 = smov (!%p2873_p5), 64  }
  0x6e   : > { %662 = vst.msk [vmem:[#allocation2 + $0x28] sm:$0x3] (!%p2873_p5), %vm658_vm1, %v3534_v11  ;;  %668 = vst.msk [vmem:[#allocation2 + $0x58] sm:$0x3] (!%p2873_p5), %vm658_vm1, %v3534_v11  ;;  %v719_v16 = vld [vmem:[%s3841_s11 + $0x40] sm:$0xff] (!%p2873_p5)  ;;  %v720_v17 = vld [vmem:[%s3841_s11 + $0x48] sm:$0xff] (!%p2873_p5) }
  0x6f   : > { %666 = vst.msk [vmem:[#allocation2 + $0x48] sm:$0xff] (!%p2873_p5), %vm655_vm0, %v3534_v11  ;;  %667 = vst.msk [vmem:[#allocation2 + $0x50] sm:$0xff] (!%p2873_p5), %vm655_vm0, %v3534_v11  ;;  %v717_v18 = vld [vmem:[%s3841_s11 + $0x30] sm:$0xff] (!%p2873_p5)  ;;  %v718_v19 = vld [vmem:[%s3841_s11 + $0x38] sm:$0xff] (!%p2873_p5) }
  0x70   : > { %669 = vst.msk [vmem:[#allocation2 + $0x60] sm:$0xff] (!%p2873_p5), %vm655_vm0, %v3534_v11  ;;  %670 = vst.msk [vmem:[#allocation2 + $0x68] sm:$0xff] (!%p2873_p5), %vm655_vm0, %v3534_v11  ;;  %v723_v20 = vld [vmem:[%s3841_s11 + $0x60] sm:$0xff] (!%p2873_p5)  ;;  %v724_v21 = vld [vmem:[%s3841_s11 + $0x68] sm:$0xff] (!%p2873_p5) }
  0x71   : > { %671 = vst.msk [vmem:[#allocation2 + $0x70] sm:$0x3] (!%p2873_p5), %vm658_vm1, %v3534_v11  ;;  %674 = vst.msk [vmem:[#allocation2 + $0x88] sm:$0x3] (!%p2873_p5), %vm658_vm1, %v3534_v11  ;;  %v721_v22 = vld [vmem:[%s3841_s11 + $0x50] sm:$0xff] (!%p2873_p5)  ;;  %v722_v23 = vld [vmem:[%s3841_s11 + $0x58] sm:$0xff] (!%p2873_p5) }
  0x72   : > { %672 = vst.msk [vmem:[#allocation2 + $0x78] sm:$0xff] (!%p2873_p5), %vm655_vm0, %v3534_v11  ;;  %673 = vst.msk [vmem:[#allocation2 + $0x80] sm:$0xff] (!%p2873_p5), %vm655_vm0, %v3534_v11  ;;  %v727_v24 = vld [vmem:[%s3841_s11 + $0x80] sm:$0xff] (!%p2873_p5)  ;;  %v728_v25 = vld [vmem:[%s3841_s11 + $0x88] sm:$0xff] (!%p2873_p5) }
  0x73   : > { %675 = vst.msk [vmem:[#allocation2 + $0x90] sm:$0xff] %vm655_vm0, %v3534_v11  ;;  %676 = vst.msk [vmem:[#allocation2 + $0x98] sm:$0xff] %vm655_vm0, %v3534_v11  ;;  %v725_v26 = vld [vmem:[%s3841_s11 + $0x70] sm:$0xff]  ;;  %v726_v27 = vld [vmem:[%s3841_s11 + $0x78] sm:$0xff] }
  0x74   : > { %677 = vst.msk [vmem:[#allocation2 + $0xa0] sm:$0x3] %vm658_vm1, %v3534_v11  ;;  %680 = vst.msk [vmem:[#allocation2 + $0xb8] sm:$0x3] %vm658_vm1, %v3534_v11  ;;  %v731_v28 = vld [vmem:[%s3841_s11 + $0xa0] sm:$0xff]  ;;  %v732_v29 = vld [vmem:[%s3841_s11 + $0xa8] sm:$0xff] }
  0x75   : > { %678 = vst.msk [vmem:[#allocation2 + $0xa8] sm:$0xff] %vm655_vm0, %v3534_v11  ;;  %679 = vst.msk [vmem:[#allocation2 + $0xb0] sm:$0xff] %vm655_vm0, %v3534_v11  ;;  %v729_v30 = vld [vmem:[%s3841_s11 + $0x90] sm:$0xff]  ;;  %v730_v31 = vld [vmem:[%s3841_s11 + $0x98] sm:$0xff] }
  0x76   : > { %681 = vst.msk [vmem:[#allocation2 + $0xc0] sm:$0xff] %vm655_vm0, %v3534_v11  ;;  %682 = vst.msk [vmem:[#allocation2 + $0xc8] sm:$0xff] %vm655_vm0, %v3534_v11  ;;  %v735_v32 = vld [vmem:[%s3841_s11 + $0xc0] sm:$0xff]  ;;  %v841_v34 = vld [vmem:[#allocation2 + $0x9] sm:$0xff] }
  0x77   : > { %683 = vst.msk [vmem:[#allocation2 + $0xd0] sm:$0x3] %vm658_vm1, %v3534_v11  ;;  %686 = vst.msk [vmem:[#allocation2 + $0xe8] sm:$0x3] %vm658_vm1, %v3534_v11  ;;  %v840_v33 = vld [vmem:[#allocation2 + $0x1] sm:$0xff] }
  0x78   : > { %684 = vst.msk [vmem:[#allocation2 + $0xd8] sm:$0xff] %vm655_vm0, %v3534_v11  ;;  %685 = vst.msk [vmem:[#allocation2 + $0xe0] sm:$0xff] %vm655_vm0, %v3534_v11  ;;  %v736_v35 = vld [vmem:[%s3841_s11 + $0xc8] sm:$0xff]  ;;  %v872_v39 = vpack.c.bf16 %v841_v34, %v840_v33 }
  0x79   : > { %687 = vst.msk [vmem:[#allocation2 + $0xf0] sm:$0xff] %vm655_vm0, %v3534_v11  ;;  %688 = vst.msk [vmem:[#allocation2 + $0xf8] sm:$0xff] %vm655_vm0, %v3534_v11 }
  0x7a   : > { %689 = vst.msk [vmem:[#allocation2 + $0x100] sm:$0x3] %vm658_vm1, %v3534_v11  ;;  %692 = vst.msk [vmem:[#allocation2 + $0x118] sm:$0x3] %vm658_vm1, %v3534_v11  ;;  %904 = vrot.lane.b32.xlu0 %v872_v39, %s3535_s1  ;;  %v734_v39 = vld [vmem:[%s3841_s11 + $0xb8] sm:$0xff] }
  0x7b   : > { %690 = vst.msk [vmem:[#allocation2 + $0x108] sm:$0xff] %vm655_vm0, %v3534_v11  ;;  %691 = vst.msk [vmem:[#allocation2 + $0x110] sm:$0xff] %vm655_vm0, %v3534_v11 }
  0x7c   : > { %693 = vst.msk [vmem:[#allocation2 + $0x120] sm:$0xff] %vm655_vm0, %v3534_v11  ;;  %694 = vst.msk [vmem:[#allocation2 + $0x128] sm:$0xff] %vm655_vm0, %v3534_v11 }
  0x7d   : > { %695 = vst.msk [vmem:[#allocation2 + $0x130] sm:$0x3] %vm658_vm1, %v3534_v11  ;;  %698 = vst.msk [vmem:[#allocation2 + $0x148] sm:$0x3] %vm658_vm1, %v3534_v11 }
  0x7e   : > { %696 = vst.msk [vmem:[#allocation2 + $0x138] sm:$0xff] %vm655_vm0, %v3534_v11  ;;  %697 = vst.msk [vmem:[#allocation2 + $0x140] sm:$0xff] %vm655_vm0, %v3534_v11 }
  0x7f   : > { %699 = vst.msk [vmem:[#allocation2 + $0x150] sm:$0xff] %vm655_vm0, %v3534_v11  ;;  %700 = vst.msk [vmem:[#allocation2 + $0x158] sm:$0xff] %vm655_vm0, %v3534_v11 }
  0x80   : > { %701 = vst.msk [vmem:[#allocation2 + $0x160] sm:$0x3] %vm658_vm1, %v3534_v11  ;;  %704 = vst.msk [vmem:[#allocation2 + $0x178] sm:$0x3] %vm658_vm1, %v3534_v11 }
  0x81   : > { %702 = vst.msk [vmem:[#allocation2 + $0x168] sm:$0xff] %vm655_vm0, %v3534_v11  ;;  %703 = vst.msk [vmem:[#allocation2 + $0x170] sm:$0xff] %vm655_vm0, %v3534_v11 }
  0x82   : > { %705 = vst.msk [vmem:[#allocation2 + $0x180] sm:$0xff] %vm655_vm0, %v3534_v11  ;;  %706 = vst.msk [vmem:[#allocation2 + $0x188] sm:$0xff] %vm655_vm0, %v3534_v11 }
  0x83   : > { %707 = vst.msk [vmem:[#allocation2 + $0x190] sm:$0x3] %vm658_vm1, %v3534_v11  ;;  %710 = vst.msk [vmem:[#allocation2 + $0x1a8] sm:$0x3] %vm658_vm1, %v3534_v11 }
  0x84   : > { %708 = vst.msk [vmem:[#allocation2 + $0x198] sm:$0xff] %vm655_vm0, %v3534_v11  ;;  %709 = vst.msk [vmem:[#allocation2 + $0x1a0] sm:$0xff] %vm655_vm0, %v3534_v11 }
  0x85   : > { %746 = vst.msk [vmem:[#allocation2 + $0x31] sm:$0xff] %vm655_vm0, %v713_v9  ;;  %747 = vst.msk [vmem:[#allocation2 + $0x39] sm:$0xff] %vm655_vm0, %v714_v10 }
  0x86   : > { %748 = vst.msk [vmem:[#allocation2 + $0x49] sm:$0xff] %vm655_vm0, %v715_v12  ;;  %749 = vst.msk [vmem:[#allocation2 + $0x51] sm:$0xff] %vm655_vm0, %v716_v13 }
  0x87   : > { %744 = vst.msk [vmem:[#allocation2 + $0x19] sm:$0xff] %vm655_vm0, %v711_v14  ;;  %745 = vst.msk [vmem:[#allocation2 + $0x21] sm:$0xff] %vm655_vm0, %v712_v15 }
  0x88   : > { %752 = vst.msk [vmem:[#allocation2 + $0x79] sm:$0xff] %vm655_vm0, %v719_v16  ;;  %753 = vst.msk [vmem:[#allocation2 + $0x81] sm:$0xff] %vm655_vm0, %v720_v17 }
  0x89   : > { %750 = vst.msk [vmem:[#allocation2 + $0x61] sm:$0xff] %vm655_vm0, %v717_v18  ;;  %751 = vst.msk [vmem:[#allocation2 + $0x69] sm:$0xff] %vm655_vm0, %v718_v19 }
  0x8a   : > { %756 = vst.msk [vmem:[#allocation2 + $0xa9] sm:$0xff] %vm655_vm0, %v723_v20  ;;  %757 = vst.msk [vmem:[#allocation2 + $0xb1] sm:$0xff] %vm655_vm0, %v724_v21 }
  0x8b   : > { %754 = vst.msk [vmem:[#allocation2 + $0x91] sm:$0xff] %vm655_vm0, %v721_v22  ;;  %755 = vst.msk [vmem:[#allocation2 + $0x99] sm:$0xff] %vm655_vm0, %v722_v23 }
  0x8c   : > { %760 = vst.msk [vmem:[#allocation2 + $0xd9] sm:$0xff] %vm655_vm0, %v727_v24  ;;  %761 = vst.msk [vmem:[#allocation2 + $0xe1] sm:$0xff] %vm655_vm0, %v728_v25  ;;  %v844_v36 = vld [vmem:[#allocation2 + $0x31] sm:$0xff]  ;;  %v845_v37 = vld [vmem:[#allocation2 + $0x39] sm:$0xff] }
  0x8d   : > { %758 = vst.msk [vmem:[#allocation2 + $0xc1] sm:$0xff] %vm655_vm0, %v725_v26  ;;  %759 = vst.msk [vmem:[#allocation2 + $0xc9] sm:$0xff] %vm655_vm0, %v726_v27  ;;  %v1546_v38 = vld [vmem:[#allocation2 + $0x32] sm:$0xff]  ;;  %v4017_v40 = vpack.c.bf16 %v845_v37, %v844_v36  ;;  %v1547_v41 = vld [vmem:[#allocation2 + $0x3a] sm:$0xff] }
  0x8e   : > { %764 = vst.msk [vmem:[#allocation2 + $0x109] sm:$0xff] %vm655_vm0, %v731_v28  ;;  %765 = vst.msk [vmem:[#allocation2 + $0x111] sm:$0xff] %vm655_vm0, %v732_v29  ;;  %v846_v42 = vld [vmem:[#allocation2 + $0x49] sm:$0xff]  ;;  %v847_v43 = vld [vmem:[#allocation2 + $0x51] sm:$0xff]  ;;  %v4019_v44 = vpack.c.bf16 %v1547_v41, %v1546_v38 }
  0x8f   : > { %762 = vst.msk [vmem:[#allocation2 + $0xf1] sm:$0xff] %vm655_vm0, %v729_v30  ;;  %763 = vst.msk [vmem:[#allocation2 + $0xf9] sm:$0xff] %vm655_vm0, %v730_v31  ;;  %v1548_v45 = vld [vmem:[#allocation2 + $0x4a] sm:$0xff]  ;;  %v1549_v46 = vld [vmem:[#allocation2 + $0x52] sm:$0xff]  ;;  %908 = vrot.lane.b32.xlu1 %v4017_v40, %s3535_s1  ;;  %v4024_v48 = vpack.c.bf16 %v847_v43, %v846_v42 }
  0x90   : > { %768 = vst.msk [vmem:[#allocation2 + $0x139] sm:$0xff] %vm655_vm0, %v735_v32  ;;  %769 = vst.msk [vmem:[#allocation2 + $0x141] sm:$0xff] %vm655_vm0, %v736_v35  ;;  %v842_v47 = vld [vmem:[#allocation2 + $0x19] sm:$0xff]  ;;  %v4026_v49 = vpack.c.bf16 %v1549_v46, %v1548_v45  ;;  %v843_v50 = vld [vmem:[#allocation2 + $0x21] sm:$0xff] }
  0x91   : > { %v850_v51 = vld [vmem:[#allocation2 + $0x79] sm:$0xff]  ;;  %v851_v52 = vld [vmem:[#allocation2 + $0x81] sm:$0xff]  ;;  %1594 = vst.msk [vmem:[#allocation3 + $0x20] sm:$0xff] %vm655_vm0, %v4019_v44  ;;  %v873_v53 = vpack.c.bf16 %v843_v50, %v842_v47  ;;  %v849_v58 = vld [vmem:[#allocation2 + $0x69] sm:$0xff] }
  0x92   : > { %v1552_v54 = vld [vmem:[#allocation2 + $0x7a] sm:$0xff]  ;;  %v1553_v55 = vld [vmem:[#allocation2 + $0x82] sm:$0xff]  ;;  %1595 = vst.msk [vmem:[#allocation3 + $0x48] sm:$0xff] %vm655_vm0, %v4026_v49  ;;  %v1551_v60 = vld [vmem:[#allocation2 + $0x6a] sm:$0xff]  ;;  %v4043_v1 = vpack.c.bf16 %v851_v52, %v850_v51 }
  0x93   : > { %v848_v56 = vld [vmem:[#allocation2 + $0x61] sm:$0xff]  ;;  %v4032_v57 = vpack.c.bf16 %v1553_v55, %v1552_v54  ;;  %1020 = vst.msk [vmem:[#allocation3 + $0x80] sm:$0xff] %vm655_vm0, %v4026_v49  ;;  %906 = vrot.lane.b32.xlu0 %v873_v53, %s3535_s1  ;;  %v854_v63 = vld [vmem:[#allocation2 + $0xa9] sm:$0xff]  ;;  %910 = vrot.lane.b32.xlu1 %v4024_v48, %s3535_s1  ;;  %v1557_v2 = vld [vmem:[#allocation2 + $0xb2] sm:$0xff] }
  0x94   : > { %v1550_v59 = vld [vmem:[#allocation2 + $0x62] sm:$0xff]  ;;  %v4037_v61 = vpack.c.bf16 %v849_v58, %v848_v56  ;;  %v1556_v0 = vld [vmem:[#allocation2 + $0xaa] sm:$0xff]  ;;  %v853_v4 = vld [vmem:[#allocation2 + $0x99] sm:$0xff]  ;;  %767 = vst.msk [vmem:[#allocation2 + $0x129] sm:$0xff] %vm655_vm0, %v734_v39 }
  0x95   : > { %v4039_v62 = vpack.c.bf16 %v1551_v60, %v1550_v59  ;;  %1597 = vst.msk [vmem:[#allocation3 + $0x98] sm:$0xff] %vm655_vm0, %v4032_v57  ;;  %v852_v3 = vld [vmem:[#allocation2 + $0x91] sm:$0xff]  ;;  %1022 = vst.msk [vmem:[#allocation3 + $0xd0] sm:$0xff] %vm655_vm0, %v4032_v57  ;;  %v4051_v6 = vpack.c.bf16 %v1557_v2, %v1556_v0  ;;  %v1555_v8 = vld [vmem:[#allocation2 + $0x9a] sm:$0xff] }
  0x96   : > { %v855_v5 = vld [vmem:[#allocation2 + $0xb1] sm:$0xff]  ;;  %v1560_v10 = vld [vmem:[#allocation2 + $0xda] sm:$0xff]  ;;  %v1561_v12 = vld [vmem:[#allocation2 + $0xe2] sm:$0xff]  ;;  %v4061_v13 = vpack.c.bf16 %v853_v4, %v852_v3 }
  0x97   : > { %1596 = vst.msk [vmem:[#allocation3 + $0x70] sm:$0xff] %vm655_vm0, %v4039_v62  ;;  %v1554_v7 = vld [vmem:[#allocation2 + $0x92] sm:$0xff]  ;;  %1021 = vst.msk [vmem:[#allocation3 + $0xa8] sm:$0xff] %vm655_vm0, %v4039_v62  ;;  %912 = vrot.lane.b32.xlu0 %v4037_v61, %s3535_s1  ;;  %v859_v15 = vld [vmem:[#allocation2 + $0xe1] sm:$0xff]  ;;  %v4063_v16 = vpack.c.bf16 %v1561_v12, %v1560_v10  ;;  %914 = vrot.lane.b32.xlu1 %v4043_v1, %s3535_s1  ;;  %v4069_v18 = vpack.c.bf16 %v855_v5, %v854_v63 }
  0x98   : > { %v4055_v9 = vpack.c.bf16 %v1555_v8, %v1554_v7  ;;  %1599 = vst.msk [vmem:[#allocation3 + $0xe8] sm:$0xff] %vm655_vm0, %v4051_v6  ;;  %v858_v14 = vld [vmem:[#allocation2 + $0xd9] sm:$0xff]  ;;  %v1558_v17 = vld [vmem:[#allocation2 + $0xc2] sm:$0xff]  ;;  %1024 = vst.msk [vmem:[#allocation3 + $0x120] sm:$0xff] %vm655_vm0, %v4051_v6 }
  0x99   : > { %v856_v19 = vld [vmem:[#allocation2 + $0xc1] sm:$0xff]  ;;  %v857_v20 = vld [vmem:[#allocation2 + $0xc9] sm:$0xff]  ;;  %1601 = vst.msk [vmem:[#allocation3 + $0x138] sm:$0xff] %vm655_vm0, %v4063_v16  ;;  %v1565_v24 = vld [vmem:[#allocation2 + $0x112] sm:$0xff]  ;;  %v4097_v36 = vpack.c.bf16 %v859_v15, %v858_v14 }
  0x9a   : > { %1598 = vst.msk [vmem:[#allocation3 + $0xc0] sm:$0xff] %vm655_vm0, %v4055_v9  ;;  %v1559_v21 = vld [vmem:[#allocation2 + $0xca] sm:$0xff]  ;;  %1023 = vst.msk [vmem:[#allocation3 + $0xf8] sm:$0xff] %vm655_vm0, %v4055_v9  ;;  %v861_v27 = vld [vmem:[#allocation2 + $0xf9] sm:$0xff]  ;;  %v4085_v30 = vpack.c.bf16 %v857_v20, %v856_v19 }
  0x9b   : > { %v4077_v22 = vpack.c.bf16 %v1559_v21, %v1558_v17  ;;  %v1564_v23 = vld [vmem:[#allocation2 + $0x10a] sm:$0xff]  ;;  %1026 = vst.msk [vmem:[#allocation3 + $0x170] sm:$0xff] %vm655_vm0, %v4063_v16  ;;  %v1562_v28 = vld [vmem:[#allocation2 + $0xf2] sm:$0xff]  ;;  %v1563_v29 = vld [vmem:[#allocation2 + $0xfa] sm:$0xff]  ;;  %916 = vrot.lane.b32.xlu0 %v4061_v13, %s3535_s1  ;;  %918 = vrot.lane.b32.xlu1 %v4069_v18, %s3535_s1 }
  0x9c   : > { %v860_v25 = vld [vmem:[#allocation2 + $0xf1] sm:$0xff]  ;;  %v4081_v26 = vpack.c.bf16 %v1565_v24, %v1564_v23  ;;  %v862_v31 = vld [vmem:[#allocation2 + $0x109] sm:$0xff]  ;;  %v4091_v34 = vpack.c.bf16 %v1563_v29, %v1562_v28  ;;  %v1568_v35 = vld [vmem:[#allocation2 + $0x13a] sm:$0xff] }
  0x9d   : > { %1600 = vst.msk [vmem:[#allocation3 + $0x110] sm:$0xff] %vm655_vm0, %v4077_v22  ;;  %v863_v32 = vld [vmem:[#allocation2 + $0x111] sm:$0xff]  ;;  %v4089_v33 = vpack.c.bf16 %v861_v27, %v860_v25  ;;  %1025 = vst.msk [vmem:[#allocation3 + $0x148] sm:$0xff] %vm655_vm0, %v4077_v22  ;;  %v1569_v37 = vld [vmem:[#allocation2 + $0x142] sm:$0xff] }
  0x9e   : > { %1603 = vst.msk [vmem:[#allocation3 + $0x188] sm:$0xff] %vm655_vm0, %v4081_v26  ;;  %v733_v38 = vld [vmem:[%s3841_s11 + $0xb0] sm:$0xff]  ;;  %1028 = vst.msk [vmem:[#allocation3 + $0x1c0] sm:$0xff] %vm655_vm0, %v4081_v26  ;;  %v4107_v41 = vpack.c.bf16 %v1569_v37, %v1568_v35  ;;  %v739_v42 = vld [vmem:[%s3841_s11 + $0xe0] sm:$0xff]  ;;  %v4133_v58 = vpack.c.bf16 %v863_v32, %v862_v31 }
  0x9f   : > { %1602 = vst.msk [vmem:[#allocation3 + $0x160] sm:$0xff] %vm655_vm0, %v4091_v34  ;;  %766 = vst.msk [vmem:[#allocation2 + $0x121] sm:$0xff] %vm655_vm0, %v733_v38  ;;  %v740_v43 = vld [vmem:[%s3841_s11 + $0xe8] sm:$0xff]  ;;  %v737_v45 = vld [vmem:[%s3841_s11 + $0xd0] sm:$0xff]  ;;  %920 = vrot.lane.b32.xlu0 %v4085_v30, %s3535_s1  ;;  %922 = vrot.lane.b32.xlu1 %v4097_v36, %s3535_s1 }
  0xa0   : > { %1027 = vst.msk [vmem:[#allocation3 + $0x198] sm:$0xff] %vm655_vm0, %v4091_v34  ;;  %1218 = vst.msk [vmem:[#allocation3 + $0x178] sm:$0xff] %vm655_vm0, %v4089_v33  ;;  %v738_v46 = vld [vmem:[%s3841_s11 + $0xd8] sm:$0xff]  ;;  %v1035_v47 = vld [vmem:[#allocation2 + $0x30] sm:$0xff] }
  0xa1   : > { %772 = vst.msk [vmem:[#allocation2 + $0x169] sm:$0xff] %vm655_vm0, %v739_v42  ;;  %773 = vst.msk [vmem:[#allocation2 + $0x171] sm:$0xff] %vm655_vm0, %v740_v43  ;;  %v1036_v50 = vld [vmem:[#allocation2 + $0x38] sm:$0xff]  ;;  %v867_v52 = vld [vmem:[#allocation2 + $0x141] sm:$0xff] }
  0xa2   : > { %770 = vst.msk [vmem:[#allocation2 + $0x151] sm:$0xff] %vm655_vm0, %v737_v45  ;;  %v866_v51 = vld [vmem:[#allocation2 + $0x139] sm:$0xff]  ;;  %1605 = vst.msk [vmem:[#allocation3 + $0x1d8] sm:$0xff] %vm655_vm0, %v4107_v41  ;;  %v4127_v53 = vpack.c.bf16 %v1036_v50, %v1035_v47  ;;  %v1040_v60 = vld [vmem:[#allocation2 + $0x68] sm:$0xff] }
  0xa3   : > { %771 = vst.msk [vmem:[#allocation2 + $0x159] sm:$0xff] %vm655_vm0, %v738_v46  ;;  %v1033_v54 = vld [vmem:[#allocation2 + $0x18] sm:$0xff]  ;;  %v1034_v55 = vld [vmem:[#allocation2 + $0x20] sm:$0xff]  ;;  %1030 = vst.msk [vmem:[#allocation3 + $0x210] sm:$0xff] %vm655_vm0, %v4107_v41  ;;  %924 = vrot.lane.b32.xlu0 %v4089_v33, %s3535_s1  ;;  %926 = vrot.lane.b32.xlu1 %v4133_v58, %s3535_s1  ;;  %v4165_v21 = vpack.c.bf16 %v867_v52, %v866_v51 }
  0xa4   : > { %v1039_v56 = vld [vmem:[#allocation2 + $0x60] sm:$0xff]  ;;  %v4135_v59 = vpack.c.bf16 %v1034_v55, %v1033_v54  ;;  %v1037_v63 = vld [vmem:[#allocation2 + $0x48] sm:$0xff]  ;;  %v1038_v0 = vld [vmem:[#allocation2 + $0x50] sm:$0xff]  ;;  %826 = vst.msk [vmem:[#allocation3 + $0x50] sm:$0xff] %vm655_vm0, %v4127_v53 }
  0xa5   : > { %v4137_v2 = vpack.c.bf16 %v1040_v60, %v1039_v56  ;;  %v4139_v3 = vpack.c.bf16 %v1038_v0, %v1037_v63  ;;  %v1043_v4 = vld [vmem:[#allocation2 + $0x90] sm:$0xff]  ;;  %v1044_v5 = vld [vmem:[#allocation2 + $0x98] sm:$0xff]  ;;  %1402 = vst.msk [vmem:[#allocation3 + $0x18] sm:$0xff] %vm655_vm0, %v4127_v53  ;;  %v1042_v10 = vld [vmem:[#allocation2 + $0x80] sm:$0xff] }
  0xa6   : > { %v1041_v7 = vld [vmem:[#allocation2 + $0x78] sm:$0xff]  ;;  %v4145_v8 = vpack.c.bf16 %v1044_v5, %v1043_v4  ;;  %v1047_v12 = vld [vmem:[#allocation2 + $0xc0] sm:$0xff]  ;;  %v1048_v14 = vld [vmem:[#allocation2 + $0xc8] sm:$0xff]  ;;  %825 = vst.msk [vmem:[#allocation3 + $0x28] sm:$0xff] %vm655_vm0, %v4135_v59 }
  0xa7   : > { %v4151_v15 = vpack.c.bf16 %v1042_v10, %v1041_v7  ;;  %v4153_v17 = vpack.c.bf16 %v1048_v14, %v1047_v12  ;;  %v1045_v19 = vld [vmem:[#allocation2 + $0xa8] sm:$0xff]  ;;  %v1046_v20 = vld [vmem:[#allocation2 + $0xb0] sm:$0xff]  ;;  %827 = vst.msk [vmem:[#allocation3 + $0x78] sm:$0xff] %vm655_vm0, %v4139_v3  ;;  %828 = vst.msk [vmem:[#allocation3 + $0xa0] sm:$0xff] %vm655_vm0, %v4137_v2  ;;  %930 = vrot.lane.b32.xlu1 %v4165_v21, %s3535_s1 }
  0xa8   : > { %1403 = vst.msk [vmem:[#allocation3 + $0x40] sm:$0xff] %vm655_vm0, %v4139_v3  ;;  %1404 = vst.msk [vmem:[#allocation3 + $0x68] sm:$0xff] %vm655_vm0, %v4137_v2  ;;  %v864_v23 = vld [vmem:[#allocation2 + $0x121] sm:$0xff]  ;;  %v865_v24 = vld [vmem:[#allocation2 + $0x129] sm:$0xff]  ;;  %v4167_v27 = vpack.c.bf16 %v1046_v20, %v1045_v19 }
  0xa9   : > { %v1566_v25 = vld [vmem:[#allocation2 + $0x122] sm:$0xff]  ;;  %v1051_v28 = vld [vmem:[#allocation2 + $0xf0] sm:$0xff]  ;;  %830 = vst.msk [vmem:[#allocation3 + $0xf0] sm:$0xff] %vm655_vm0, %v4145_v8  ;;  %1406 = vst.msk [vmem:[#allocation3 + $0xb8] sm:$0xff] %vm655_vm0, %v4145_v8  ;;  %v4173_v29 = vpack.c.bf16 %v865_v24, %v864_v23 }
  0xaa   : > { %v1567_v31 = vld [vmem:[#allocation2 + $0x12a] sm:$0xff]  ;;  %829 = vst.msk [vmem:[#allocation3 + $0xc8] sm:$0xff] %vm655_vm0, %v4151_v15  ;;  %832 = vst.msk [vmem:[#allocation3 + $0x140] sm:$0xff] %vm655_vm0, %v4153_v17  ;;  %v1573_v42 = vld [vmem:[#allocation2 + $0x172] sm:$0xff] }
  0xab   : > { %v870_v32 = vld [vmem:[#allocation2 + $0x169] sm:$0xff]  ;;  %v871_v35 = vld [vmem:[#allocation2 + $0x171] sm:$0xff]  ;;  %1405 = vst.msk [vmem:[#allocation3 + $0x90] sm:$0xff] %vm655_vm0, %v4151_v15  ;;  %1408 = vst.msk [vmem:[#allocation3 + $0x108] sm:$0xff] %vm655_vm0, %v4153_v17  ;;  %v4183_v37 = vpack.c.bf16 %v1567_v31, %v1566_v25  ;;  %928 = vrot.lane.b32.xlu0 %v4173_v29, %s3535_s1 }
  0xac   : > { %v4185_v38 = vpack.c.bf16 %v871_v35, %v870_v32  ;;  %v1572_v39 = vld [vmem:[#allocation2 + $0x16a] sm:$0xff]  ;;  %831 = vst.msk [vmem:[#allocation3 + $0x118] sm:$0xff] %vm655_vm0, %v4167_v27  ;;  %1407 = vst.msk [vmem:[#allocation3 + $0xe0] sm:$0xff] %vm655_vm0, %v4167_v27  ;;  %v869_v46 = vld [vmem:[#allocation2 + $0x159] sm:$0xff] }
  0xad   : > { %v868_v43 = vld [vmem:[#allocation2 + $0x151] sm:$0xff]  ;;  %v4193_v45 = vpack.c.bf16 %v1573_v42, %v1572_v39  ;;  %v1571_v50 = vld [vmem:[#allocation2 + $0x15a] sm:$0xff]  ;;  %1220 = vst.msk [vmem:[#allocation3 + $0x1c8] sm:$0xff] %vm655_vm0, %v4173_v29  ;;  %1604 = vst.msk [vmem:[#allocation3 + $0x1b0] sm:$0xff] %vm655_vm0, %v4183_v37 }
  0xae   : > { %v1570_v47 = vld [vmem:[#allocation2 + $0x152] sm:$0xff]  ;;  %v4201_v51 = vpack.c.bf16 %v869_v46, %v868_v43  ;;  %v1050_v56 = vld [vmem:[#allocation2 + $0xe0] sm:$0xff]  ;;  %1029 = vst.msk [vmem:[#allocation3 + $0x1e8] sm:$0xff] %vm655_vm0, %v4183_v37  ;;  %1223 = vst.msk [vmem:[#allocation3 + $0x240] sm:$0xff] %vm655_vm0, %v4185_v38  ;;  %934 = vrot.lane.b32.xlu1 %v4185_v38, %s3535_s1 }
  0xaf   : > { %v4203_v52 = vpack.c.bf16 %v1571_v50, %v1570_v47  ;;  %v1052_v54 = vld [vmem:[#allocation2 + $0xf8] sm:$0xff]  ;;  %1607 = vst.msk [vmem:[#allocation3 + $0x228] sm:$0xff] %vm655_vm0, %v4193_v45  ;;  %v1055_v0 = vld [vmem:[#allocation2 + $0x120] sm:$0xff]  ;;  %v1056_v4 = vld [vmem:[#allocation2 + $0x128] sm:$0xff] }
  0xb0   : > { %v1049_v55 = vld [vmem:[#allocation2 + $0xd8] sm:$0xff]  ;;  %v4211_v60 = vpack.c.bf16 %v1052_v54, %v1051_v28  ;;  %v1053_v5 = vld [vmem:[#allocation2 + $0x108] sm:$0xff]  ;;  %1032 = vst.msk [vmem:[#allocation3 + $0x260] sm:$0xff] %vm655_vm0, %v4193_v45  ;;  %v4219_v7 = vpack.c.bf16 %v1056_v4, %v1055_v0  ;;  %v1054_v10 = vld [vmem:[#allocation2 + $0x110] sm:$0xff]  ;;  %932 = vrot.lane.b32.xlu0 %v4201_v51, %s3535_s1 }
  0xb1   : > { %v4213_v63 = vpack.c.bf16 %v1050_v56, %v1049_v55  ;;  %1606 = vst.msk [vmem:[#allocation3 + $0x200] sm:$0xff] %vm655_vm0, %v4203_v52  ;;  %v1059_v12 = vld [vmem:[#allocation2 + $0x150] sm:$0xff]  ;;  %v1060_v14 = vld [vmem:[#allocation2 + $0x158] sm:$0xff]  ;;  %1031 = vst.msk [vmem:[#allocation3 + $0x238] sm:$0xff] %vm655_vm0, %v4203_v52  ;;  %v4227_v19 = vpack.c.bf16 %v1054_v10, %v1053_v5 }
  0xb2   : > { %1222 = vst.msk [vmem:[#allocation3 + $0x218] sm:$0xff] %vm655_vm0, %v4201_v51  ;;  %v4229_v20 = vpack.c.bf16 %v1060_v14, %v1059_v12  ;;  %v1057_v23 = vld [vmem:[#allocation2 + $0x138] sm:$0xff]  ;;  %v1058_v24 = vld [vmem:[#allocation2 + $0x140] sm:$0xff]  ;;  %v741_v25 = vld [vmem:[%s3841_s11 + $0xf0] sm:$0xff]  ;;  %1099 = vrot.lane.b32.xlu1 %v4127_v53, %s3535_s1 }
  0xb3   : > { %833 = vst.msk [vmem:[#allocation3 + $0x168] sm:$0xff] %vm655_vm0, %v4213_v63  ;;  %834 = vst.msk [vmem:[#allocation3 + $0x190] sm:$0xff] %vm655_vm0, %v4211_v60  ;;  %v4240_v28 = vpack.c.bf16 %v1058_v24, %v1057_v23  ;;  %v742_v31 = vld [vmem:[%s3841_s11 + $0xf8] sm:$0xff]  ;;  %v1061_v32 = vld [vmem:[#allocation2 + $0x168] sm:$0xff] }
  0xb4   : > { %1409 = vst.msk [vmem:[#allocation3 + $0x130] sm:$0xff] %vm655_vm0, %v4213_v63  ;;  %774 = vst.msk [vmem:[#allocation2 + $0x181] sm:$0xff] %vm655_vm0, %v741_v25  ;;  %v1062_v35 = vld [vmem:[#allocation2 + $0x170] sm:$0xff]  ;;  %v1225_v42 = vld [vmem:[#allocation2 + $0x1a] sm:$0xff]  ;;  %1097 = vrot.lane.b32.xlu0 %v4135_v59, %s3535_s1 }
  0xb5   : > { %836 = vst.msk [vmem:[#allocation3 + $0x1e0] sm:$0xff] %vm655_vm0, %v4219_v7  ;;  %775 = vst.msk [vmem:[#allocation2 + $0x189] sm:$0xff] %vm655_vm0, %v742_v31  ;;  %v4247_v39 = vpack.c.bf16 %v1062_v35, %v1061_v32  ;;  %v1226_v43 = vld [vmem:[#allocation2 + $0x22] sm:$0xff]  ;;  %v1576_v55 = vld [vmem:[#allocation2 + $0x19a] sm:$0xff] }
  0xb6   : > { %v777_v46 = vld [vmem:[#allocation2 + $0x8] sm:$0xff]  ;;  %835 = vst.msk [vmem:[#allocation3 + $0x1b8] sm:$0xff] %vm655_vm0, %v4227_v19  ;;  %838 = vst.msk [vmem:[#allocation3 + $0x230] sm:$0xff] %vm655_vm0, %v4229_v20  ;;  %v4255_v47 = vpack.c.bf16 %v1226_v43, %v1225_v42  ;;  %v776_v50 = vld [vmem:[#allocation2] sm:$0xff]  ;;  %1103 = vrot.lane.b32.xlu1 %v4137_v2, %s3535_s1 }
  0xb7   : > { %1411 = vst.msk [vmem:[#allocation3 + $0x180] sm:$0xff] %vm655_vm0, %v4227_v19  ;;  %837 = vst.msk [vmem:[#allocation3 + $0x208] sm:$0xff] %vm655_vm0, %v4240_v28  ;;  %v808_v54 = vpack.c.bf16 %v777_v46, %v776_v50  ;;  %v1577_v56 = vld [vmem:[#allocation2 + $0x1a2] sm:$0xff]  ;;  %v970_v5 = vld [vmem:[#allocation2 + $0xa] sm:$0xff] }
  0xb8   : > { %1413 = vst.msk [vmem:[#allocation3 + $0x1d0] sm:$0xff] %vm655_vm0, %v4240_v28  ;;  %839 = vst.msk [vmem:[#allocation3 + $0x258] sm:$0xff] %vm655_vm0, %v4247_v39  ;;  %v969_v0 = vld [vmem:[#allocation2 + $0x2] sm:$0xff]  ;;  %v1593_v4 = vpack.c.bf16 %v1577_v56, %v1576_v55  ;;  %v973_v10 = vld [vmem:[#allocation2 + $0x32] sm:$0xff]  ;;  %1101 = vrot.lane.b32.xlu0 %v4139_v3, %s3535_s1 }
  0xb9   : > { %1415 = vst.msk [vmem:[#allocation3 + $0x220] sm:$0xff] %vm655_vm0, %v4247_v39  ;;  %1018 = vst.msk [vmem:[#allocation3 + $0x30] sm:$0xff] %vm655_vm0, %v4255_v47  ;;  %v974_v59 = vld [vmem:[#allocation2 + $0x3a] sm:$0xff]  ;;  %v1001_v12 = vpack.c.bf16 %v970_v5, %v969_v0  ;;  %v1163_v2 = vld [vmem:[#allocation2 + $0x31] sm:$0xff] }
  0xba   : > { %824 = vst.msk [vmem:[#allocation3] sm:$0xff] %vm655_vm0, %v808_v54  ;;  %v1003_v14 = vpack.c.bf16 %v974_v59, %v973_v10  ;;  %1609 = vst.msk [vmem:[#allocation3 + $0x278] sm:$0xff] %vm655_vm0, %v1593_v4  ;;  %1107 = vrot.lane.b32.xlu1 %v4145_v8, %s3535_s1  ;;  %v1164_v3 = vld [vmem:[#allocation2 + $0x39] sm:$0xff]  ;;  %v1162_v8 = vld [vmem:[#allocation2 + $0x21] sm:$0xff] }
  0xbb   : > { %v1446_v23 = vld [vmem:[#allocation2 + $0x181] sm:$0xff]  ;;  %1017 = vst.msk [vmem:[#allocation3 + $0x8] sm:$0xff] %vm655_vm0, %v1001_v12  ;;  %v1194_v35 = vpack.c.bf16 %v1164_v3, %v1163_v2  ;;  %v1165_v43 = vld [vmem:[#allocation2 + $0x49] sm:$0xff]  ;;  %v1166_v46 = vld [vmem:[#allocation2 + $0x51] sm:$0xff] }
  0xbc   : > { %1019 = vst.msk [vmem:[#allocation3 + $0x58] sm:$0xff] %vm655_vm0, %v1003_v14  ;;  %v1574_v53 = vld [vmem:[#allocation2 + $0x182] sm:$0xff]  ;;  %v1575_v24 = vld [vmem:[#allocation2 + $0x18a] sm:$0xff]  ;;  %1105 = vrot.lane.b32.xlu0 %v4151_v15, %s3535_s1  ;;  %v1161_v15 = vld [vmem:[#allocation2 + $0x19] sm:$0xff]  ;;  %v1195_v54 = vpack.c.bf16 %v1166_v46, %v1165_v43 }
  0xbd   : > { %v4279_v25 = vpack.c.bf16 %v1575_v24, %v1574_v53  ;;  %v1447_v31 = vld [vmem:[#allocation2 + $0x189] sm:$0xff]  ;;  %v1193_v42 = vpack.c.bf16 %v1162_v8, %v1161_v15  ;;  %1210 = vst.msk [vmem:[#allocation3 + $0x38] sm:$0xff] %vm655_vm0, %v1194_v35  ;;  %v1063_v50 = vld [vmem:[#allocation2 + $0x180] sm:$0xff]  ;;  %v1174_v14 = vld [vmem:[#allocation2 + $0xb1] sm:$0xff] }
  0xbe   : > { %v4281_v32 = vpack.c.bf16 %v1447_v31, %v1446_v23  ;;  %1111 = vrot.lane.b32.xlu1 %v4153_v17, %s3535_s1  ;;  %v1167_v17 = vld [vmem:[#allocation2 + $0x61] sm:$0xff]  ;;  %1211 = vst.msk [vmem:[#allocation3 + $0x60] sm:$0xff] %vm655_vm0, %v1195_v54  ;;  %v1172_v55 = vld [vmem:[#allocation2 + $0x99] sm:$0xff]  ;;  %v1176_v10 = vld [vmem:[#allocation2 + $0xc9] sm:$0xff] }
  0xbf   : > { %1608 = vst.msk [vmem:[#allocation3 + $0x250] sm:$0xff] %vm655_vm0, %v4279_v25  ;;  %1209 = vst.msk [vmem:[#allocation3 + $0x10] sm:$0xff] %vm655_vm0, %v1193_v42  ;;  %v1169_v56 = vld [vmem:[#allocation2 + $0x79] sm:$0xff]  ;;  %v1170_v4 = vld [vmem:[#allocation2 + $0x81] sm:$0xff] }
  0xc0   : > { %1224 = vst.msk [vmem:[#allocation3 + $0x268] sm:$0xff] %vm655_vm0, %v4281_v32  ;;  %1109 = vrot.lane.b32.xlu0 %v4167_v27, %s3535_s1  ;;  %v1168_v27 = vld [vmem:[#allocation2 + $0x69] sm:$0xff]  ;;  %v1197_v5 = vpack.c.bf16 %v1170_v4, %v1169_v56  ;;  %v1178_v53 = vld [vmem:[#allocation2 + $0xe1] sm:$0xff]  ;;  %v1182_v31 = vld [vmem:[#allocation2 + $0x111] sm:$0xff] }
  0xc1   : > { %v1173_v59 = vld [vmem:[#allocation2 + $0xa9] sm:$0xff]  ;;  %v1186_v3 = vld [vmem:[#allocation2 + $0x141] sm:$0xff] }
  0xc2   : > { %1115 = vrot.lane.b32.xlu1 %v4211_v60, %s3535_s1  ;;  %v1064_v60 = vld [vmem:[#allocation2 + $0x188] sm:$0xff]  ;;  %1213 = vst.msk [vmem:[#allocation3 + $0xb0] sm:$0xff] %vm655_vm0, %v1197_v5  ;;  %v1199_v23 = vpack.c.bf16 %v1174_v14, %v1173_v59 }
  0xc3   : > { %v1080_v0 = vpack.c.bf16 %v1064_v60, %v1063_v50  ;;  %v1181_v24 = vld [vmem:[#allocation2 + $0x109] sm:$0xff] }
  0xc4   : > { %1113 = vrot.lane.b32.xlu0 %v4213_v63, %s3535_s1  ;;  %v1196_v63 = vpack.c.bf16 %v1168_v27, %v1167_v17  ;;  %1215 = vst.msk [vmem:[#allocation3 + $0x100] sm:$0xff] %vm655_vm0, %v1199_v23  ;;  %v1203_v2 = vpack.c.bf16 %v1182_v31, %v1181_v24 }
  0xc6   : > { %1119 = vrot.lane.b32.xlu1 %v4219_v7, %s3535_s1  ;;  %1212 = vst.msk [vmem:[#allocation3 + $0x88] sm:$0xff] %vm655_vm0, %v1196_v63  ;;  %1219 = vst.msk [vmem:[#allocation3 + $0x1a0] sm:$0xff] %vm655_vm0, %v1203_v2 }
  0xc8   : > { %1117 = vrot.lane.b32.xlu0 %v4227_v19, %s3535_s1  ;;  %v1171_v19 = vld [vmem:[#allocation2 + $0x91] sm:$0xff] }
  0xc9   : > { %v1198_v7 = vpack.c.bf16 %v1172_v55, %v1171_v19 }
  0xca   : > { %1123 = vrot.lane.b32.xlu1 %v4229_v20, %s3535_s1  ;;  %v1177_v20 = vld [vmem:[#allocation2 + $0xd9] sm:$0xff] }
  0xcb   : > { %1214 = vst.msk [vmem:[#allocation3 + $0xd8] sm:$0xff] %vm655_vm0, %v1198_v7 }
  0xcc   : > { %1121 = vrot.lane.b32.xlu0 %v4240_v28, %s3535_s1  ;;  %v1175_v28 = vld [vmem:[#allocation2 + $0xc1] sm:$0xff] }
  0xcd   : > { %v1200_v12 = vpack.c.bf16 %v1176_v10, %v1175_v28 }
  0xce   : > { %1127 = vrot.lane.b32.xlu1 %v1080_v0, %s3535_s1 }
  0xcf   : > { %1216 = vst.msk [vmem:[#allocation3 + $0x128] sm:$0xff] %vm655_vm0, %v1200_v12 }
  0xd0   : > { %1125 = vrot.lane.b32.xlu0 %v4247_v39, %s3535_s1  ;;  %v1201_v39 = vpack.c.bf16 %v1178_v53, %v1177_v20 }
  0xd2   : > { %1291 = vrot.lane.b32.xlu1 %v4019_v44, %s3535_s1  ;;  %1217 = vst.msk [vmem:[#allocation3 + $0x150] sm:$0xff] %vm655_vm0, %v1201_v39 }
  0xd4   : > { %1289 = vrot.lane.b32.xlu0 %v4255_v47, %s3535_s1  ;;  %v1185_v47 = vld [vmem:[#allocation2 + $0x139] sm:$0xff] }
  0xd5   : > { %v1205_v44 = vpack.c.bf16 %v1186_v3, %v1185_v47 }
  0xd6   : > { %1295 = vrot.lane.b32.xlu1 %v4039_v62, %s3535_s1 }
  0xd7   : > { %1221 = vst.msk [vmem:[#allocation3 + $0x1f0] sm:$0xff] %vm655_vm0, %v1205_v44 }
  0xd8   : > { %1293 = vrot.lane.b32.xlu0 %v4026_v49, %s3535_s1  ;;  %v1370_v49 = vld [vmem:[#allocation2 + $0xf0] sm:$0xff] }
  0xda   : > { %1299 = vrot.lane.b32.xlu1 %v4055_v9, %s3535_s1  ;;  %v1375_v9 = vld [vmem:[#allocation2 + $0x128] sm:$0xff] }
  0xdc   : > { %1297 = vrot.lane.b32.xlu0 %v4032_v57, %s3535_s1  ;;  %v1371_v57 = vld [vmem:[#allocation2 + $0xf8] sm:$0xff] }
  0xdd   : > { %v1394_v62 = vpack.c.bf16 %v1371_v57, %v1370_v49 }
  0xde   : > { %1303 = vrot.lane.b32.xlu1 %v4077_v22, %s3535_s1  ;;  %v1379_v22 = vld [vmem:[#allocation2 + $0x158] sm:$0xff] }
  0xdf   : > { %1410 = vst.msk [vmem:[#allocation3 + $0x158] sm:$0xff] %vm655_vm0, %v1394_v62 }
  0xe0   : > { %1301 = vrot.lane.b32.xlu0 %v4051_v6, %s3535_s1  ;;  %v1374_v6 = vld [vmem:[#allocation2 + $0x120] sm:$0xff] }
  0xe2   : > { %1307 = vrot.lane.b32.xlu1 %v4091_v34, %s3535_s1 }
  0xe4   : > { %1305 = vrot.lane.b32.xlu0 %v4063_v16, %s3535_s1  ;;  %v1396_v16 = vpack.c.bf16 %v1375_v9, %v1374_v6 }
  0xe6   : > { %1311 = vrot.lane.b32.xlu1 %v4183_v37, %s3535_s1  ;;  %1412 = vst.msk [vmem:[#allocation3 + $0x1a8] sm:$0xff] %vm655_vm0, %v1396_v16 }
  0xe8   : > { %1309 = vrot.lane.b32.xlu0 %v4081_v26, %s3535_s1  ;;  %v1385_v26 = vld [vmem:[#allocation2 + $0x1a0] sm:$0xff] }
  0xea   : > { %1315 = vrot.lane.b32.xlu1 %v4203_v52, %s3535_s1 }
  0xec   : > { %1313 = vrot.lane.b32.xlu0 %v4107_v41, %s3535_s1  ;;  %v1383_v41 = vld [vmem:[#allocation2 + $0x188] sm:$0xff] }
  0xee   : > { %1319 = vrot.lane.b32.xlu1 %v4279_v25, %s3535_s1 }
  0xf0   : > { %1317 = vrot.lane.b32.xlu0 %v4193_v45, %s3535_s1  ;;  %v1449_v45 = vld [vmem:[#allocation2 + $0x1a1] sm:$0xff] }
  0xf2   : > { %1484 = vrot.lane.b32.xlu1 %v4024_v48, %s3535_s1 }
  0xf4   : > { %1482 = vrot.lane.b32.xlu0 %v4017_v40, %s3535_s1  ;;  %v1378_v40 = vld [vmem:[#allocation2 + $0x150] sm:$0xff] }
  0xf5   : > { %v1398_v48 = vpack.c.bf16 %v1379_v22, %v1378_v40 }
  0xf6   : > { %1488 = vrot.lane.b32.xlu1 %v4043_v1, %s3535_s1  ;;  %v1382_v1 = vld [vmem:[#allocation2 + $0x180] sm:$0xff] }
  0xf7   : > { %1414 = vst.msk [vmem:[#allocation3 + $0x1f8] sm:$0xff] %vm655_vm0, %v1398_v48  ;;  %v1400_v37 = vpack.c.bf16 %v1383_v41, %v1382_v1 }
  0xf8   : > { %1486 = vrot.lane.b32.xlu0 %v4037_v61, %s3535_s1  ;;  %v1384_v61 = vld [vmem:[#allocation2 + $0x198] sm:$0xff] }
  0xf9   : > { %v1401_v34 = vpack.c.bf16 %v1385_v26, %v1384_v61  ;;  %1416 = vst.msk [vmem:[#allocation3 + $0x248] sm:$0xff] %vm655_vm0, %v1400_v37 }
  0xfa   : > { %1492 = vrot.lane.b32.xlu1 %v4069_v18, %s3535_s1  ;;  %v905_v18 = vpop.permute.xlu0 %904 }
  0xfb   : > { %1417 = vst.msk [vmem:[#allocation3 + $0x270] sm:$0xff] %vm655_vm0, %v1401_v34 }
  0xfc   : > { %1490 = vrot.lane.b32.xlu0 %v4061_v13, %s3535_s1  ;;  %v1610_v13 = vlaneseq  ;;  %953 = vst.msk [vmem:[#allocation3] sm:$0xff] %vm952_vm3, %v905_v18 }
  0xfe   : > { %1496 = vrot.lane.b32.xlu1 %v4097_v36, %s3535_s1  ;;  %vm1612_vm2 = vcmp.lt.s32.totalorder %v1610_v13, 256  ;;  %v1448_v36 = vld [vmem:[#allocation2 + $0x199] sm:$0xff] }
  0xff   : > { %1614 = vst.msk [vmem:[#allocation4] sm:$0x3] %vm1612_vm2, %v3534_v11  ;;  %v1465_v11 = vpack.c.bf16 %v1449_v45, %v1448_v36 }
 0x100   : > { %1494 = vrot.lane.b32.xlu0 %v4085_v30, %s3535_s1 }
 0x101   : > { %v909_v30 = vpop.permute.xlu1 %908 }
 0x102   : > { %1500 = vrot.lane.b32.xlu1 %v4133_v58, %s3535_s1  ;;  %955 = vst.msk [vmem:[#allocation3 + $0x50] sm:$0xff] %vm952_vm3, %v909_v30 }
 0x104   : > { %1498 = vrot.lane.b32.xlu0 %v4089_v33, %s3535_s1 }
 0x105   : > { %v907_v33 = vpop.permute.xlu0 %906  ;;  %v911_v52 = vpop.permute.xlu1 %910 }
 0x106   : > { %1504 = vrot.lane.b32.xlu1 %v4165_v21, %s3535_s1  ;;  %954 = vst.msk [vmem:[#allocation3 + $0x28] sm:$0xff] %vm952_vm3, %v907_v33  ;;  %956 = vst.msk [vmem:[#allocation3 + $0x78] sm:$0xff] %vm952_vm3, %v911_v52 }
 0x108   : > { %1502 = vrot.lane.b32.xlu0 %v4173_v29, %s3535_s1 }
 0x109   : > { %v913_v58 = vpop.permute.xlu0 %912  ;;  %v915_v29 = vpop.permute.xlu1 %914 }
 0x10a   : > { %1508 = vrot.lane.b32.xlu1 %v4185_v38, %s3535_s1  ;;  %957 = vst.msk [vmem:[#allocation3 + $0xa0] sm:$0xff] %vm952_vm3, %v913_v58  ;;  %958 = vst.msk [vmem:[#allocation3 + $0xc8] sm:$0xff] %vm952_vm3, %v915_v29 }
 0x10c   : > { %1506 = vrot.lane.b32.xlu0 %v4201_v51, %s3535_s1 }
 0x10d   : > { %v917_v21 = vpop.permute.xlu0 %916  ;;  %v919_v25 = vpop.permute.xlu1 %918 }
 0x10e   : > { %1512 = vrot.lane.b32.xlu1 %v1465_v11, %s3535_s1  ;;  %959 = vst.msk [vmem:[#allocation3 + $0xf0] sm:$0xff] %vm952_vm3, %v917_v21  ;;  %960 = vst.msk [vmem:[#allocation3 + $0x118] sm:$0xff] %vm952_vm3, %v919_v25 }
 0x110   : > { %1510 = vrot.lane.b32.xlu0 %v4281_v32, %s3535_s1 }
 0x111   : > { %v921_v51 = vpop.permute.xlu0 %920  ;;  %v923_v38 = vpop.permute.xlu1 %922 }
 0x112   : > { %961 = vst.msk [vmem:[#allocation3 + $0x140] sm:$0xff] %vm952_vm3, %v921_v51  ;;  %962 = vst.msk [vmem:[#allocation3 + $0x168] sm:$0xff] %vm952_vm3, %v923_v38 }
 0x115   : > { %v925_v15 = vpop.permute.xlu0 %924  ;;  %v927_v35 = vpop.permute.xlu1 %926 }
 0x116   : > { %963 = vst.msk [vmem:[#allocation3 + $0x190] sm:$0xff] %vm952_vm3, %v925_v15  ;;  %964 = vst.msk [vmem:[#allocation3 + $0x1b8] sm:$0xff] %vm952_vm3, %v927_v35 }
 0x119   : > { %v931_v8 = vpop.permute.xlu1 %930 }
 0x11a   : > { %966 = vst.msk [vmem:[#allocation3 + $0x208] sm:$0xff] %vm952_vm3, %v931_v8 }
 0x11d   : > { %v929_v32 = vpop.permute.xlu0 %928 }
 0x11e   : > { %965 = vst.msk [vmem:[#allocation3 + $0x1e0] sm:$0xff] %vm952_vm3, %v929_v32 }
 0x120   : > { %v935_v17 = vpop.permute.xlu1 %934 }
 0x121   : > { %968 = vst.msk [vmem:[#allocation3 + $0x258] sm:$0xff] %vm952_vm3, %v935_v17 }
 0x122   : > { %v933_v42 = vpop.permute.xlu0 %932 }
 0x123   : > { %967 = vst.msk [vmem:[#allocation3 + $0x230] sm:$0xff] %vm952_vm3, %v933_v42 }
 0x124   : > { %v1100_v43 = vpop.permute.xlu1 %1099 }
 0x125   : > { %1146 = vst.msk [vmem:[#allocation3 + $0x30] sm:$0xff] %vm952_vm3, %v1100_v43 }
 0x126   : > { %v1098_v27 = vpop.permute.xlu0 %1097 }
 0x127   : > { %1145 = vst.msk [vmem:[#allocation3 + $0x8] sm:$0xff] %vm952_vm3, %v1098_v27 }
 0x128   : > { %v1104_v46 = vpop.permute.xlu1 %1103 }
 0x129   : > { %1148 = vst.msk [vmem:[#allocation3 + $0x80] sm:$0xff] %vm952_vm3, %v1104_v46 }
 0x12a   : > { %v1102_v63 = vpop.permute.xlu0 %1101 }
 0x12b   : > { %1147 = vst.msk [vmem:[#allocation3 + $0x58] sm:$0xff] %vm952_vm3, %v1102_v63 }
 0x12c   : > { %v1108_v60 = vpop.permute.xlu1 %1107 }
 0x12d   : > { %1150 = vst.msk [vmem:[#allocation3 + $0xd0] sm:$0xff] %vm952_vm3, %v1108_v60 }
 0x12e   : > { %v1106_v50 = vpop.permute.xlu0 %1105 }
 0x12f   : > { %1149 = vst.msk [vmem:[#allocation3 + $0xa8] sm:$0xff] %vm952_vm3, %v1106_v50 }
 0x130   : > { %v1112_v19 = vpop.permute.xlu1 %1111 }
 0x131   : > { %1152 = vst.msk [vmem:[#allocation3 + $0x120] sm:$0xff] %vm952_vm3, %v1112_v19 }
 0x132   : > { %v1110_v54 = vpop.permute.xlu0 %1109 }
 0x133   : > { %1151 = vst.msk [vmem:[#allocation3 + $0xf8] sm:$0xff] %vm952_vm3, %v1110_v54 }
 0x134   : > { %v1116_v56 = vpop.permute.xlu1 %1115 }
 0x135   : > { %1154 = vst.msk [vmem:[#allocation3 + $0x170] sm:$0xff] %vm952_vm3, %v1116_v56 }
 0x136   : > { %v1114_v55 = vpop.permute.xlu0 %1113 }
 0x137   : > { %1153 = vst.msk [vmem:[#allocation3 + $0x148] sm:$0xff] %vm952_vm3, %v1114_v55 }
 0x138   : > { %v1120_v7 = vpop.permute.xlu1 %1119 }
 0x139   : > { %1156 = vst.msk [vmem:[#allocation3 + $0x1c0] sm:$0xff] %vm952_vm3, %v1120_v7 }
 0x13a   : > { %v1118_v0 = vpop.permute.xlu0 %1117 }
 0x13b   : > { %1155 = vst.msk [vmem:[#allocation3 + $0x198] sm:$0xff] %vm952_vm3, %v1118_v0 }
 0x13c   : > { %v1124_v5 = vpop.permute.xlu1 %1123 }
 0x13d   : > { %1158 = vst.msk [vmem:[#allocation3 + $0x210] sm:$0xff] %vm952_vm3, %v1124_v5 }
 0x13e   : > { %v1122_v4 = vpop.permute.xlu0 %1121 }
 0x13f   : > { %1157 = vst.msk [vmem:[#allocation3 + $0x1e8] sm:$0xff] %vm952_vm3, %v1122_v4 }
 0x140   : > { %v1128_v10 = vpop.permute.xlu1 %1127 }
 0x141   : > { %1160 = vst.msk [vmem:[#allocation3 + $0x260] sm:$0xff] %vm952_vm3, %v1128_v10 }
 0x142   : > { %v1126_v28 = vpop.permute.xlu0 %1125 }
 0x143   : > { %1159 = vst.msk [vmem:[#allocation3 + $0x238] sm:$0xff] %vm952_vm3, %v1126_v28 }
 0x144   : > { %v1292_v12 = vpop.permute.xlu1 %1291 }
 0x145   : > { %1338 = vst.msk [vmem:[#allocation3 + $0x38] sm:$0xff] %vm952_vm3, %v1292_v12 }
 0x146   : > { %v1290_v59 = vpop.permute.xlu0 %1289 }
 0x147   : > { %1337 = vst.msk [vmem:[#allocation3 + $0x10] sm:$0xff] %vm952_vm3, %v1290_v59 }
 0x148   : > { %v1296_v23 = vpop.permute.xlu1 %1295 }
 0x149   : > { %1340 = vst.msk [vmem:[#allocation3 + $0x88] sm:$0xff] %vm952_vm3, %v1296_v23 }
 0x14a   : > { %v1294_v14 = vpop.permute.xlu0 %1293 }
 0x14b   : > { %1339 = vst.msk [vmem:[#allocation3 + $0x60] sm:$0xff] %vm952_vm3, %v1294_v14 }
 0x14c   : > { %v1300_v53 = vpop.permute.xlu1 %1299 }
 0x14d   : > { %1342 = vst.msk [vmem:[#allocation3 + $0xd8] sm:$0xff] %vm952_vm3, %v1300_v53 }
 0x14e   : > { %v1298_v20 = vpop.permute.xlu0 %1297 }
 0x14f   : > { %1341 = vst.msk [vmem:[#allocation3 + $0xb0] sm:$0xff] %vm952_vm3, %v1298_v20 }
 0x150   : > { %v1304_v24 = vpop.permute.xlu1 %1303 }
 0x151   : > { %1344 = vst.msk [vmem:[#allocation3 + $0x128] sm:$0xff] %vm952_vm3, %v1304_v24 }
 0x152   : > { %v1302_v39 = vpop.permute.xlu0 %1301 }
 0x153   : > { %1343 = vst.msk [vmem:[#allocation3 + $0x100] sm:$0xff] %vm952_vm3, %v1302_v39 }
 0x154   : > { %v1308_v2 = vpop.permute.xlu1 %1307 }
 0x155   : > { %1346 = vst.msk [vmem:[#allocation3 + $0x178] sm:$0xff] %vm952_vm3, %v1308_v2 }
 0x156   : > { %v1306_v31 = vpop.permute.xlu0 %1305 }
 0x157   : > { %1345 = vst.msk [vmem:[#allocation3 + $0x150] sm:$0xff] %vm952_vm3, %v1306_v31 }
 0x158   : > { %v1312_v3 = vpop.permute.xlu1 %1311 }
 0x159   : > { %1348 = vst.msk [vmem:[#allocation3 + $0x1c8] sm:$0xff] %vm952_vm3, %v1312_v3 }
 0x15a   : > { %v1310_v47 = vpop.permute.xlu0 %1309 }
 0x15b   : > { %1347 = vst.msk [vmem:[#allocation3 + $0x1a0] sm:$0xff] %vm952_vm3, %v1310_v47 }
 0x15c   : > { %v1316_v49 = vpop.permute.xlu1 %1315 }
 0x15d   : > { %1350 = vst.msk [vmem:[#allocation3 + $0x218] sm:$0xff] %vm952_vm3, %v1316_v49 }
 0x15e   : > { %v1314_v44 = vpop.permute.xlu0 %1313 }
 0x15f   : > { %1349 = vst.msk [vmem:[#allocation3 + $0x1f0] sm:$0xff] %vm952_vm3, %v1314_v44 }
 0x160   : > { %v1320_v62 = vpop.permute.xlu1 %1319 }
 0x161   : > { %1352 = vst.msk [vmem:[#allocation3 + $0x268] sm:$0xff] %vm952_vm3, %v1320_v62 }
 0x162   : > { %v1318_v57 = vpop.permute.xlu0 %1317 }
 0x163   : > { %1351 = vst.msk [vmem:[#allocation3 + $0x240] sm:$0xff] %vm952_vm3, %v1318_v57 }
 0x164   : > { %v1485_v9 = vpop.permute.xlu1 %1484 }
 0x165   : > { %1531 = vst.msk [vmem:[#allocation3 + $0x40] sm:$0xff] %vm952_vm3, %v1485_v9 }
 0x166   : > { %v1483_v6 = vpop.permute.xlu0 %1482 }
 0x167   : > { %1530 = vst.msk [vmem:[#allocation3 + $0x18] sm:$0xff] %vm952_vm3, %v1483_v6 }
 0x168   : > { %v1489_v40 = vpop.permute.xlu1 %1488 }
 0x169   : > { %1533 = vst.msk [vmem:[#allocation3 + $0x90] sm:$0xff] %vm952_vm3, %v1489_v40 }
 0x16a   : > { %v1487_v16 = vpop.permute.xlu0 %1486 }
 0x16b   : > { %1532 = vst.msk [vmem:[#allocation3 + $0x68] sm:$0xff] %vm952_vm3, %v1487_v16 }
 0x16c   : > { %v1493_v48 = vpop.permute.xlu1 %1492 }
 0x16d   : > { %1535 = vst.msk [vmem:[#allocation3 + $0xe0] sm:$0xff] %vm952_vm3, %v1493_v48 }
 0x16e   : > { %v1491_v22 = vpop.permute.xlu0 %1490 }
 0x16f   : > { %1534 = vst.msk [vmem:[#allocation3 + $0xb8] sm:$0xff] %vm952_vm3, %v1491_v22 }
 0x170   : > { %v1497_v26 = vpop.permute.xlu1 %1496 }
 0x171   : > { %1537 = vst.msk [vmem:[#allocation3 + $0x130] sm:$0xff] %vm952_vm3, %v1497_v26 }
 0x172   : > { %v1495_v61 = vpop.permute.xlu0 %1494 }
 0x173   : > { %1536 = vst.msk [vmem:[#allocation3 + $0x108] sm:$0xff] %vm952_vm3, %v1495_v61 }
 0x174   : > { %v1501_v34 = vpop.permute.xlu1 %1500 }
 0x175   : > { %1539 = vst.msk [vmem:[#allocation3 + $0x180] sm:$0xff] %vm952_vm3, %v1501_v34 }
 0x176   : > { %v1499_v1 = vpop.permute.xlu0 %1498 }
 0x177   : > { %1538 = vst.msk [vmem:[#allocation3 + $0x158] sm:$0xff] %vm952_vm3, %v1499_v1 }
 0x178   : > { %v1505_v13 = vpop.permute.xlu1 %1504 }
 0x179   : > { %1541 = vst.msk [vmem:[#allocation3 + $0x1d0] sm:$0xff] %vm952_vm3, %v1505_v13 }
 0x17a   : > { %v1503_v41 = vpop.permute.xlu0 %1502 }
 0x17b   : > { %1540 = vst.msk [vmem:[#allocation3 + $0x1a8] sm:$0xff] %vm952_vm3, %v1503_v41 }
 0x17c   : > { %v1509_v18 = vpop.permute.xlu1 %1508 }
 0x17d   : > { %1543 = vst.msk [vmem:[#allocation3 + $0x220] sm:$0xff] %vm952_vm3, %v1509_v18 }
 0x17e   : > { %v1507_v37 = vpop.permute.xlu0 %1506 }
 0x17f   : > { %1542 = vst.msk [vmem:[#allocation3 + $0x1f8] sm:$0xff] %vm952_vm3, %v1507_v37 }
 0x180   : > { %v1513_v33 = vpop.permute.xlu1 %1512 }
 0x181   : > { %1545 = vst.msk [vmem:[#allocation3 + $0x270] sm:$0xff] %vm952_vm3, %v1513_v33 }
 0x182   : > { %v1511_v30 = vpop.permute.xlu0 %1510 }
 0x183   : > { %1544 = vst.msk [vmem:[#allocation3 + $0x248] sm:$0xff] %vm952_vm3, %v1511_v30 }
 0x184 PF: > { %v3381_v36 = vld [vmem:[%s3856_s25 + $0x40] sm:$0xff]   ;;  %v3385_v58 = vld [vmem:[%s3856_s25 + $0x48] sm:$0xff]   ;;  %v3389_v51 = vld [vmem:[%s3856_s25 + $0x50] sm:$0xff]   ;;  %vm1990_vm4 = vcmask 523264   ;;  %p2927_p6 = scmp.ne.s32.totalorder %s3516_s28, 3 }
 0x185   : > { %v3382_v45 = vld [vmem:[%s3856_s25] sm:$0xff]   ;;  %2935 = vmatprep.subr.bf16.mxu0 %v3381_v36  ;;  %v3386_v29 = vld [vmem:[%s3856_s25 + $0x8] sm:$0xff]   ;;  %v3390_v38 = vld [vmem:[%s3856_s25 + $0x10] sm:$0xff]  }
 0x186   : > { %v3383_v52 = vld [vmem:[%s3856_s25 + $0xc0] sm:$0xff]   ;;  %2936 = vmatpush3.bf16.msra.mxu0 %v3382_v45  ;;  %v3387_v21 = vld [vmem:[%s3856_s25 + $0xc8] sm:$0xff]   ;;  %v3391_v15 = vld [vmem:[%s3856_s25 + $0xd0] sm:$0xff]  }
 0x187   : > { %v3384_v11 = vld [vmem:[%s3856_s25 + $0x80] sm:$0xff]   ;;  %3047 = vmatprep.subr.bf16.mxu1 %v3383_v52  ;;  %2937 = vmatprep.subr.bf16.mxu0 %v3385_v58  ;;  %v3388_v25 = vld [vmem:[%s3856_s25 + $0x88] sm:$0xff]   ;;  %v3392_v35 = vld [vmem:[%s3856_s25 + $0x90] sm:$0xff]  }
 0x188   : > { %3048 = vmatpush3.bf16.msra.mxu1 %v3384_v11  ;;  %v3393_v32 = vld [vmem:[%s3856_s25 + $0x58] sm:$0xff]   ;;  %v3397_v27 = vld [vmem:[%s3856_s25 + $0x60] sm:$0xff]   ;;  %v3401_v50 = vld [vmem:[%s3856_s25 + $0x68] sm:$0xff]  }
 0x189   : > { %3049 = vmatprep.subr.bf16.mxu1 %v3387_v21  ;;  %v3394_v8 = vld [vmem:[%s3856_s25 + $0x18] sm:$0xff]   ;;  %v3398_v43 = vld [vmem:[%s3856_s25 + $0x20] sm:$0xff]   ;;  %v3402_v60 = vld [vmem:[%s3856_s25 + $0x28] sm:$0xff]  }
 0x18a   : > { %2938 = vmatpush3.bf16.msra.mxu0 %v3386_v29  ;;  %v3395_v42 = vld [vmem:[%s3856_s25 + $0xd8] sm:$0xff]   ;;  %v3399_v63 = vld [vmem:[%s3856_s25 + $0xe0] sm:$0xff]   ;;  %v3403_v54 = vld [vmem:[%s3856_s25 + $0xe8] sm:$0xff]  }
 0x18b   : > { %2939 = vmatprep.subr.bf16.mxu0 %v3389_v51  ;;  %v3396_v17 = vld [vmem:[%s3856_s25 + $0x98] sm:$0xff]   ;;  %v3400_v46 = vld [vmem:[%s3856_s25 + $0xa0] sm:$0xff]   ;;  %v3404_v19 = vld [vmem:[%s3856_s25 + $0xa8] sm:$0xff]  }
 0x18c   : > { %3050 = vmatpush3.bf16.msra.mxu1 %v3388_v25  ;;  %v3405_v55 = vld [vmem:[%s3856_s25 + $0x70] sm:$0xff]   ;;  %v3409_v4 = vld [vmem:[%s3856_s25 + $0x78] sm:$0xff]   ;;  %v1616_v10 = vld [vmem:[#allocation3 + $0x8] sm:$0xff] }
 0x18d   : > { %3051 = vmatprep.subr.bf16.mxu1 %v3391_v15  ;;  %v3406_v56 = vld [vmem:[%s3856_s25 + $0x30] sm:$0xff]   ;;  %v3410_v5 = vld [vmem:[%s3856_s25 + $0x38] sm:$0xff]   ;;  %2071 = vmatprep.mubr.bf16.mxu0 %v1616_v10  ;;  %v1620_v39 = vld [vmem:[#allocation3 + $0x28] sm:$0xff] }
 0x18e   : > { %2940 = vmatpush3.bf16.msra.mxu0 %v3390_v38  ;;  %v3407_v0 = vld [vmem:[%s3856_s25 + $0xf0] sm:$0xff]   ;;  %v3411_v28 = vld [vmem:[%s3856_s25 + $0xf8] sm:$0xff]   ;;  %v1628_v2 = vld [vmem:[#allocation3 + $0x68] sm:$0xff] }
 0x18f   : > { %2941 = vmatprep.subr.bf16.mxu0 %v3393_v32  ;;  %v3408_v7 = vld [vmem:[%s3856_s25 + $0xb0] sm:$0xff]   ;;  %v3412_v59 = vld [vmem:[%s3856_s25 + $0xb8] sm:$0xff]   ;;  %v3413_v47 = vld [vmem:[%s3856_s25 + $0x100] sm:$0xff]  }
 0x190   : > { %3052 = vmatpush3.bf16.msra.mxu1 %v3392_v35  ;;  %v1615_v12 = vld [vmem:[#allocation3] sm:$0xff]  ;;  %v1618_v14 = vld [vmem:[#allocation3 + $0x18] sm:$0xff]  ;;  %v1621_v23 = vld [vmem:[#allocation3 + $0x30] sm:$0xff] }
 0x191   : > { %3053 = vmatprep.subr.bf16.mxu1 %v3395_v42  ;;  %2232 = vmatprep.mubr.bf16.mxu1 %v1618_v14  ;;  %v1617_v20 = vld [vmem:[#allocation3 + $0x10] sm:$0xff]  ;;  %v1623_v53 = vld [vmem:[#allocation3 + $0x40] sm:$0xff]  ;;  %v1626_v24 = vld [vmem:[#allocation3 + $0x58] sm:$0xff] }
 0x192   : > { %2942 = vmatpush3.bf16.msra.mxu0 %v3394_v8  ;;  %v1622_v31 = vld [vmem:[#allocation3 + $0x38] sm:$0xff]  ;;  %v1625_v3 = vld [vmem:[#allocation3 + $0x50] sm:$0xff]  ;;  %v1631_v44 = vld [vmem:[#allocation3 + $0x80] sm:$0xff] }
 0x193   : > { %2943 = vmatprep.subr.bf16.mxu0 %v3397_v27  ;;  %v1627_v49 = vld [vmem:[#allocation3 + $0x60] sm:$0xff]  ;;  %v3414_v57 = vld [vmem:[%s3856_s25 + $0x108] sm:$0xff]   ;;  %v1630_v6 = vld [vmem:[#allocation3 + $0x78] sm:$0xff] }
 0x194   : > { %3054 = vmatpush3.bf16.msra.mxu1 %v3396_v17  ;;  %v1633_v62 = vld [vmem:[#allocation3 + $0x90] sm:$0xff]  ;;  %v1636_v16 = vld [vmem:[#allocation3 + $0xa8] sm:$0xff]  ;;  %v3416_v40 = vld [vmem:[%s3856_s25 + $0x118] sm:$0xff]  }
 0x195   : > { %3055 = vmatprep.subr.bf16.mxu1 %v3399_v63  ;;  %v3415_v9 = vld [vmem:[%s3856_s25 + $0x110] sm:$0xff]   ;;  %v1632_v22 = vld [vmem:[#allocation3 + $0x88] sm:$0xff]  ;;  %v1635_v61 = vld [vmem:[#allocation3 + $0xa0] sm:$0xff] }
 0x196   : > { %2944 = vmatpush3.bf16.msra.mxu0 %v3398_v43  ;;  %v1638_v48 = vld [vmem:[#allocation3 + $0xb8] sm:$0xff]  ;;  %v1641_v26 = vld [vmem:[#allocation3 + $0xd0] sm:$0xff]  ;;  %v1643_v34 = vld [vmem:[#allocation3 + $0xe0] sm:$0xff] }
 0x197   : > { %2945 = vmatprep.subr.bf16.mxu0 %v3401_v50  ;;  %v1637_v1 = vld [vmem:[#allocation3 + $0xb0] sm:$0xff]  ;;  %v1640_v41 = vld [vmem:[#allocation3 + $0xc8] sm:$0xff]  ;;  %v1646_v13 = vld [vmem:[#allocation3 + $0xf8] sm:$0xff] }
 0x198   : > { %3056 = vmatpush3.bf16.msra.mxu1 %v3400_v46  ;;  %v1642_v37 = vld [vmem:[#allocation3 + $0xd8] sm:$0xff]  ;;  %v1648_v18 = vld [vmem:[#allocation3 + $0x108] sm:$0xff]  ;;  %v1645_v30 = vld [vmem:[#allocation3 + $0xf0] sm:$0xff] }
 0x199   : > { %3057 = vmatprep.subr.bf16.mxu1 %v3403_v54  ;;  %v1651_v33 = vld [vmem:[#allocation3 + $0x120] sm:$0xff]  ;;  %v1653_v45 = vld [vmem:[#allocation3 + $0x130] sm:$0xff]  ;;  %v1650_v52 = vld [vmem:[#allocation3 + $0x118] sm:$0xff] }
 0x19a   : > { %2946 = vmatpush3.bf16.msra.mxu0 %v3402_v60  ;;  %v1647_v36 = vld [vmem:[#allocation3 + $0x100] sm:$0xff]  ;;  %v1656_v11 = vld [vmem:[#allocation3 + $0x148] sm:$0xff]  ;;  %v1658_v29 = vld [vmem:[#allocation3 + $0x158] sm:$0xff] }
 0x19b   : > { %2947 = vmatprep.subr.bf16.mxu0 %v3405_v55  ;;  %v1652_v58 = vld [vmem:[#allocation3 + $0x128] sm:$0xff]  ;;  %v1655_v21 = vld [vmem:[#allocation3 + $0x140] sm:$0xff]  ;;  %v1661_v25 = vld [vmem:[#allocation3 + $0x170] sm:$0xff] }
 0x19c   : > { %3058 = vmatpush3.bf16.msra.mxu1 %v3404_v19  ;;  %v1657_v51 = vld [vmem:[#allocation3 + $0x150] sm:$0xff]  ;;  %v1663_v38 = vld [vmem:[#allocation3 + $0x180] sm:$0xff]  ;;  %v1660_v15 = vld [vmem:[#allocation3 + $0x168] sm:$0xff] }
 0x19d   : > { %3059 = vmatprep.subr.bf16.mxu1 %v3407_v0  ;;  %v1666_v35 = vld [vmem:[#allocation3 + $0x198] sm:$0xff]  ;;  %v1668_v8 = vld [vmem:[#allocation3 + $0x1a8] sm:$0xff]  ;;  %v1665_v42 = vld [vmem:[#allocation3 + $0x190] sm:$0xff] }
 0x19e   : > { %2948 = vmatpush3.bf16.msra.mxu0 %v3406_v56  ;;  %v1662_v32 = vld [vmem:[#allocation3 + $0x178] sm:$0xff]  ;;  %v1671_v17 = vld [vmem:[#allocation3 + $0x1c0] sm:$0xff]  ;;  %v1673_v43 = vld [vmem:[#allocation3 + $0x1d0] sm:$0xff] }
 0x19f   : > { %2949 = vmatprep.subr.bf16.mxu0 %v3409_v4  ;;  %v1667_v27 = vld [vmem:[#allocation3 + $0x1a0] sm:$0xff]  ;;  %v1670_v63 = vld [vmem:[#allocation3 + $0x1b8] sm:$0xff]  ;;  %v1676_v46 = vld [vmem:[#allocation3 + $0x1e8] sm:$0xff] }
 0x1a0   : > { %3060 = vmatpush3.bf16.msra.mxu1 %v3408_v7  ;;  %v1672_v50 = vld [vmem:[#allocation3 + $0x1c8] sm:$0xff]  ;;  %v1678_v60 = vld [vmem:[#allocation3 + $0x1f8] sm:$0xff]  ;;  %v1675_v54 = vld [vmem:[#allocation3 + $0x1e0] sm:$0xff] }
 0x1a1   : > { %3061 = vmatprep.subr.bf16.mxu1 %v3411_v28  ;;  %v1681_v19 = vld [vmem:[#allocation3 + $0x210] sm:$0xff]  ;;  %v1683_v56 = vld [vmem:[#allocation3 + $0x220] sm:$0xff]  ;;  %v1680_v0 = vld [vmem:[#allocation3 + $0x208] sm:$0xff] }
 0x1a2   : > { %2950 = vmatpush3.bf16.msra.mxu0 %v3410_v5  ;;  %v1677_v55 = vld [vmem:[#allocation3 + $0x1f0] sm:$0xff]  ;;  %v1686_v7 = vld [vmem:[#allocation3 + $0x238] sm:$0xff]  ;;  %v1688_v5 = vld [vmem:[#allocation3 + $0x248] sm:$0xff] }
 0x1a3   : > { %3213 = vmatprep.subr.bf16.mxu0 %v3413_v47  ;;  %v1682_v4 = vld [vmem:[#allocation3 + $0x218] sm:$0xff]  ;;  %v1685_v28 = vld [vmem:[#allocation3 + $0x230] sm:$0xff]  ;;  %v1691_v10 = vld [vmem:[#allocation3 + $0x260] sm:$0xff] }
 0x1a4   : > { %3062 = vmatpush3.bf16.msra.mxu1 %v3412_v59  ;;  %v1687_v59 = vld [vmem:[#allocation3 + $0x240] sm:$0xff]  ;;  %v1690_v14 = vld [vmem:[#allocation3 + $0x258] sm:$0xff] }
 0x1a5   : > { %2072 = vmatmul.mubr.bf16.vlgmr.msra.gmra.mrb[0].mxu0 %v1615_v12  ;;  %v1693_v12 = vld [vmem:[#allocation3 + $0x270] sm:$0xff] }
 0x1a6   : > { %2079 = vmatprep.mubr.bf16.mxu0 %v1621_v23  ;;  %3214 = vmatpush3.bf16.msra.mxu0 %v3413_v47  ;;  %v1619_v23 = vld [vmem:[#allocation3 + $0x20] sm:$0xff]  ;;  %v1649_v47 = vld [vmem:[#allocation3 + $0x110] sm:$0xff] }
 0x1a7   : > { %2233 = vmatmul.mubr.bf16.vlgmr.msra.gmra.mrb[0].mxu1 %v1617_v20  ;;  %3215 = vmatprep.subr.bf16.mxu0 %v3414_v57  ;;  %v1692_v20 = vld [vmem:[#allocation3 + $0x268] sm:$0xff] }
 0x1a8   : > { %2240 = vmatprep.mubr.bf16.mxu1 %v1623_v53  ;;  %v1624_v53 = vld [vmem:[#allocation3 + $0x48] sm:$0xff] }
 0x1aa   : > { %3216 = vmatpush3.bf16.msra.mxu0 %v3414_v57  ;;  %v1669_v57 = vld [vmem:[#allocation3 + $0x1b0] sm:$0xff] }
 0x1ab   : > { %3217 = vmatprep.subr.bf16.mxu0 %v3415_v9 }
 0x1ad   : > { %2080 = vmatmul.mubr.bf16.gmra.mrb[4].mxu0 %v1620_v39  ;;  %v1629_v39 = vld [vmem:[#allocation3 + $0x70] sm:$0xff] }
 0x1ae   : > { %2087 = vmatprep.mubr.bf16.mxu0 %v1626_v24  ;;  %3218 = vmatpush3.bf16.msra.mxu0 %v3415_v9  ;;  %v1634_v24 = vld [vmem:[#allocation3 + $0x98] sm:$0xff]  ;;  %v1684_v9 = vld [vmem:[#allocation3 + $0x228] sm:$0xff] }
 0x1af   : > { %2241 = vmatmul.mubr.bf16.gmra.mrb[4].mxu1 %v1622_v31  ;;  %3219 = vmatprep.subr.bf16.mxu0 %v3416_v40  ;;  %v1639_v31 = vld [vmem:[#allocation3 + $0xc0] sm:$0xff] }
 0x1b0   : > { %2248 = vmatprep.mubr.bf16.mxu1 %v1628_v2  ;;  %v1644_v2 = vld [vmem:[#allocation3 + $0xe8] sm:$0xff] }
 0x1b2   : > { %3220 = vmatpush3.bf16.msra.mxu0 %v3416_v40  ;;  %v1694_v40 = vld [vmem:[#allocation3 + $0x278] sm:$0xff] }
 0x1b5   : > { %2088 = vmatmul.mubr.bf16.gmra.mrb[8].mxu0 %v1625_v3  ;;  %v1654_v3 = vld [vmem:[#allocation3 + $0x138] sm:$0xff] }
 0x1b6   : > { %2095 = vmatprep.mubr.bf16.mxu0 %v1631_v44  ;;  %v1659_v44 = vld [vmem:[#allocation3 + $0x160] sm:$0xff] }
 0x1b7   : > { %2249 = vmatmul.mubr.bf16.gmra.mrb[8].mxu1 %v1627_v49  ;;  %v1664_v49 = vld [vmem:[#allocation3 + $0x188] sm:$0xff] }
 0x1b8   : > { %2256 = vmatprep.mubr.bf16.mxu1 %v1633_v62  ;;  %v1674_v62 = vld [vmem:[#allocation3 + $0x1d8] sm:$0xff] }
 0x1bd   : > { %2096 = vmatmul.mubr.bf16.gmra.mrb[12].mxu0 %v1630_v6  ;;  %v1679_v6 = vld [vmem:[#allocation3 + $0x200] sm:$0xff] }
 0x1be   : > { %2103 = vmatprep.mubr.bf16.mxu0 %v1636_v16  ;;  %v1689_v16 = vld [vmem:[#allocation3 + $0x250] sm:$0xff] }
 0x1bf   : > { %2257 = vmatmul.mubr.bf16.gmra.mrb[12].mxu1 %v1632_v22 }
 0x1c0   : > { %2264 = vmatprep.mubr.bf16.mxu1 %v1638_v48  ;;  %v4511_v48 = vld [vmem:[%s642_s15] ss:$0 sm:$0xff] }
 0x1c5   : > { %2104 = vmatmul.mubr.bf16.gmra.mrb[16].mxu0 %v1635_v61 }
 0x1c6   : > { %2111 = vmatprep.mubr.bf16.mxu0 %v1641_v26 }
 0x1c7   : > { %2265 = vmatmul.mubr.bf16.gmra.mrb[16].mxu1 %v1637_v1 }
 0x1c8   : > { %2272 = vmatprep.mubr.bf16.mxu1 %v1643_v34 }
 0x1cd   : > { %2112 = vmatmul.mubr.bf16.gmra.mrb[20].mxu0 %v1640_v41 }
 0x1ce   : > { %2119 = vmatprep.mubr.bf16.mxu0 %v1646_v13 }
 0x1cf   : > { %2273 = vmatmul.mubr.bf16.gmra.mrb[20].mxu1 %v1642_v37 }
 0x1d0   : > { %2280 = vmatprep.mubr.bf16.mxu1 %v1648_v18 }
 0x1d5   : > { %2120 = vmatmul.mubr.bf16.gmra.mrb[24].mxu0 %v1645_v30 }
 0x1d6   : > { %2127 = vmatprep.mubr.bf16.mxu0 %v1651_v33 }
 0x1d7   : > { %2281 = vmatmul.mubr.bf16.gmra.mrb[24].mxu1 %v1647_v36 }
 0x1d8   : > { %2288 = vmatprep.mubr.bf16.mxu1 %v1653_v45 }
 0x1dd   : > { %2128 = vmatmul.mubr.bf16.gmra.mrb[28].mxu0 %v1650_v52 }
 0x1de   : > { %2135 = vmatprep.mubr.bf16.mxu0 %v1656_v11 }
 0x1df   : > { %2289 = vmatmul.mubr.bf16.gmra.mrb[28].mxu1 %v1652_v58 }
 0x1e0   : > { %2296 = vmatprep.mubr.bf16.mxu1 %v1658_v29 }
 0x1e5   : > { %2136 = vmatmul.mubr.bf16.gmra.mrb[32].mxu0 %v1655_v21 }
 0x1e6   : > { %2143 = vmatprep.mubr.bf16.mxu0 %v1661_v25 }
 0x1e7   : > { %2297 = vmatmul.mubr.bf16.gmra.mrb[32].mxu1 %v1657_v51 }
 0x1e8   : > { %2304 = vmatprep.mubr.bf16.mxu1 %v1663_v38 }
 0x1ed   : > { %2144 = vmatmul.mubr.bf16.gmra.mrb[36].mxu0 %v1660_v15 }
 0x1ee   : > { %2151 = vmatprep.mubr.bf16.mxu0 %v1666_v35 }
 0x1ef   : > { %2305 = vmatmul.mubr.bf16.gmra.mrb[36].mxu1 %v1662_v32 }
 0x1f0   : > { %2312 = vmatprep.mubr.bf16.mxu1 %v1668_v8 }
 0x1f5   : > { %2152 = vmatmul.mubr.bf16.gmra.mrb[40].mxu0 %v1665_v42 }
 0x1f6   : > { %2159 = vmatprep.mubr.bf16.mxu0 %v1671_v17 }
 0x1f7   : > { %2313 = vmatmul.mubr.bf16.gmra.mrb[40].mxu1 %v1667_v27 }
 0x1f8   : > { %2320 = vmatprep.mubr.bf16.mxu1 %v1673_v43 }
 0x1fd   : > { %2160 = vmatmul.mubr.bf16.gmra.mrb[44].mxu0 %v1670_v63 }
 0x1fe   : > { %2167 = vmatprep.mubr.bf16.mxu0 %v1676_v46 }
 0x1ff   : > { %2321 = vmatmul.mubr.bf16.gmra.mrb[44].mxu1 %v1672_v50 }
 0x200   : > { %2328 = vmatprep.mubr.bf16.mxu1 %v1678_v60 }
 0x205   : > { %2168 = vmatmul.mubr.bf16.gmra.mrb[48].mxu0 %v1675_v54 }
 0x206   : > { %2175 = vmatprep.mubr.bf16.mxu0 %v1681_v19 }
 0x207   : > { %2329 = vmatmul.mubr.bf16.gmra.mrb[48].mxu1 %v1677_v55 }
 0x208   : > { %2336 = vmatprep.mubr.bf16.mxu1 %v1683_v56 }
 0x20d   : > { %2176 = vmatmul.mubr.bf16.gmra.mrb[52].mxu0 %v1680_v0 }
 0x20e   : > { %2183 = vmatprep.mubr.bf16.mxu0 %v1686_v7 }
 0x20f   : > { %2337 = vmatmul.mubr.bf16.gmra.mrb[52].mxu1 %v1682_v4 }
 0x210   : > { %2344 = vmatprep.mubr.bf16.mxu1 %v1688_v5 }
 0x215   : > { %2184 = vmatmul.mubr.bf16.gmra.mrb[56].mxu0 %v1685_v28 }
 0x216   : > { %2191 = vmatprep.mubr.bf16.mxu0 %v1691_v10 }
 0x217   : > { %2345 = vmatmul.mubr.bf16.gmra.mrb[56].mxu1 %v1687_v59 }
 0x218   : > { %2352 = vmatprep.mubr.bf16.mxu1 %v1693_v12 }
 0x21d   : > { %2192 = vmatmul.mubr.bf16.gmra.mrb[60].mxu0 %v1690_v14 }
 0x21e   : > { %3221 = vmatprep.mubr.msk.bf16.mxu0 %vm1990_vm4, %v1619_v23 }
 0x21f   : > { %2353 = vmatmul.mubr.bf16.gmra.mrb[60].mxu1 %v1692_v20 }
 0x225   : > { %3222 = vmatmul.mubr.msk.bf16.vlgmr.msra.gmra.mrb[64].mxu0 %vm1990_vm4, %v1624_v53 }
 0x226   : > { %3225 = vmatprep.mubr.msk.bf16.mxu0 %vm1990_vm4, %v1629_v39 }
 0x22d   : > { %3226 = vmatmul.mubr.msk.bf16.gmra.mrb[68].mxu0 %vm1990_vm4, %v1634_v24 }
 0x22e   : > { %3229 = vmatprep.mubr.msk.bf16.mxu0 %vm1990_vm4, %v1639_v31 }
 0x235   : > { %3230 = vmatmul.mubr.msk.bf16.gmra.mrb[72].mxu0 %vm1990_vm4, %v1644_v2 }
 0x236   : > { %3233 = vmatprep.mubr.msk.bf16.mxu0 %vm1990_vm4, %v1649_v47 }
 0x23d   : > { %3234 = vmatmul.mubr.msk.bf16.gmra.mrb[76].mxu0 %vm1990_vm4, %v1654_v3 }
 0x23e   : > { %3237 = vmatprep.mubr.msk.bf16.mxu0 %vm1990_vm4, %v1659_v44 }
 0x245   : > { %3238 = vmatmul.mubr.msk.bf16.gmra.mrb[80].mxu0 %vm1990_vm4, %v1664_v49 }
 0x246   : > { %3241 = vmatprep.mubr.msk.bf16.mxu0 %vm1990_vm4, %v1669_v57 }
 0x24d   : > { %3242 = vmatmul.mubr.msk.bf16.gmra.mrb[84].mxu0 %vm1990_vm4, %v1674_v62 }
 0x24e   : > { %3245 = vmatprep.mubr.msk.bf16.mxu0 %vm1990_vm4, %v1679_v6 }
 0x255   : > { %3246 = vmatmul.mubr.msk.bf16.gmra.mrb[88].mxu0 %vm1990_vm4, %v1684_v9 }
 0x256   : > { %3249 = vmatprep.mubr.msk.bf16.mxu0 %vm1990_vm4, %v1689_v16 }
 0x25d   : > { %3250 = vmatmul.mubr.msk.bf16.gmra.mrb[92].mxu0 %vm1990_vm4, %v1694_v40 }
 0x278   : > { %v2951_v22 = vpop.f32.mrb[0].mxu0 }
 0x279   : > { %v2952_v61 = vpop.f32.mrb[1].mxu0 }
 0x27a   : > { %v2953_v26 = vadd.f32 %v2952_v61, %v2951_v22  ;;  %v2954_v1 = vpop.f32.mrb[2].mxu0  ;;  %v3063_v34 = vpop.f32.mrb[0].mxu1 }
 0x27b   : > { %v2955_v41 = vpop.f32.mrb[3].mxu0  ;;  %v3064_v18 = vpop.f32.mrb[1].mxu1 }
 0x27c   : > { %v2074_v13 = vadd.f32 %v2953_v26, %v4511_v48  ;;  %v2956_v37 = vadd.f32 %v2955_v41, %v2954_v1  ;;  %v3065_v30 = vadd.f32 %v3064_v18, %v3063_v34  ;;  %v3066_v33 = vpop.f32.mrb[2].mxu1 }
 0x27d   : > { %v3067_v45 = vpop.f32.mrb[3].mxu1 }
 0x27e   : > { %v2077_v36 = vadd.f32 %v2956_v37, %v4511_v48  ;;  %v3068_v52 = vadd.f32 %v3067_v45, %v3066_v33  ;;  %v4515_v11 = vadd.f32 %v3065_v30, %v2074_v13 }
 0x280   : > { %v2957_v58 = vpop.f32.mrb[4].mxu0  ;;  %v4517_v21 = vadd.f32 %v3068_v52, %v2077_v36 }
 0x281   : > { %v2958_v29 = vpop.f32.mrb[5].mxu0 }
 0x282   : > { %v2959_v25 = vadd.f32 %v2958_v29, %v2957_v58  ;;  %v2960_v51 = vpop.f32.mrb[6].mxu0  ;;  %v3069_v38 = vpop.f32.mrb[4].mxu1 }
 0x283   : > { %v2961_v15 = vpop.f32.mrb[7].mxu0  ;;  %v3070_v8 = vpop.f32.mrb[5].mxu1 }
 0x284   : > { %v2082_v35 = vadd.f32 %v2959_v25, %v4511_v48  ;;  %v2962_v32 = vadd.f32 %v2961_v15, %v2960_v51  ;;  %v3071_v42 = vadd.f32 %v3070_v8, %v3069_v38  ;;  %v3072_v17 = vpop.f32.mrb[6].mxu1 }
 0x285   : > { %v3073_v43 = vpop.f32.mrb[7].mxu1 }
 0x286   : > { %v2085_v27 = vadd.f32 %v2962_v32, %v4511_v48  ;;  %v3074_v63 = vadd.f32 %v3073_v43, %v3072_v17  ;;  %v4521_v46 = vadd.f32 %v3071_v42, %v2082_v35 }
 0x288   : > { %v2963_v50 = vpop.f32.mrb[8].mxu0  ;;  %v4523_v54 = vadd.f32 %v3074_v63, %v2085_v27 }
 0x289   : > { %v2964_v60 = vpop.f32.mrb[9].mxu0 }
 0x28a   : > { %v2965_v19 = vadd.f32 %v2964_v60, %v2963_v50  ;;  %v2966_v55 = vpop.f32.mrb[10].mxu0  ;;  %v3075_v56 = vpop.f32.mrb[8].mxu1 }
 0x28b   : > { %v2967_v0 = vpop.f32.mrb[11].mxu0  ;;  %v3076_v5 = vpop.f32.mrb[9].mxu1 }
 0x28c   : > { %v2090_v7 = vadd.f32 %v2965_v19, %v4511_v48  ;;  %v2968_v4 = vadd.f32 %v2967_v0, %v2966_v55  ;;  %v3077_v28 = vadd.f32 %v3076_v5, %v3075_v56  ;;  %v3078_v10 = vpop.f32.mrb[10].mxu1 }
 0x28d   : > { %v3079_v12 = vpop.f32.mrb[11].mxu1 }
 0x28e   : > { %v2093_v59 = vadd.f32 %v2968_v4, %v4511_v48  ;;  %v3080_v14 = vadd.f32 %v3079_v12, %v3078_v10  ;;  %v4527_v23 = vadd.f32 %v3077_v28, %v2090_v7 }
 0x290   : > { %v2969_v20 = vpop.f32.mrb[12].mxu0  ;;  %v4529_v39 = vadd.f32 %v3080_v14, %v2093_v59 }
 0x291   : > { %v2970_v53 = vpop.f32.mrb[13].mxu0 }
 0x292   : > { %v2971_v24 = vadd.f32 %v2970_v53, %v2969_v20  ;;  %v2972_v31 = vpop.f32.mrb[14].mxu0  ;;  %v3081_v2 = vpop.f32.mrb[12].mxu1 }
 0x293   : > { %v2973_v47 = vpop.f32.mrb[15].mxu0  ;;  %v3082_v49 = vpop.f32.mrb[13].mxu1 }
 0x294   : > { %v2098_v3 = vadd.f32 %v2971_v24, %v4511_v48  ;;  %v2974_v44 = vadd.f32 %v2973_v47, %v2972_v31  ;;  %v3083_v57 = vadd.f32 %v3082_v49, %v3081_v2  ;;  %v3084_v62 = vpop.f32.mrb[14].mxu1 }
 0x295   : > { %v3085_v9 = vpop.f32.mrb[15].mxu1 }
 0x296   : > { %v2101_v6 = vadd.f32 %v2974_v44, %v4511_v48  ;;  %v3086_v16 = vadd.f32 %v3085_v9, %v3084_v62  ;;  %v4533_v40 = vadd.f32 %v3083_v57, %v2098_v3 }
 0x298   : > { %v2975_v22 = vpop.f32.mrb[16].mxu0  ;;  %v4535_v26 = vadd.f32 %v3086_v16, %v2101_v6 }
 0x299   : > { %v2976_v61 = vpop.f32.mrb[17].mxu0 }
 0x29a   : > { %v2977_v1 = vadd.f32 %v2976_v61, %v2975_v22  ;;  %v2978_v34 = vpop.f32.mrb[18].mxu0  ;;  %v3087_v41 = vpop.f32.mrb[16].mxu1 }
 0x29b   : > { %v2979_v13 = vpop.f32.mrb[19].mxu0  ;;  %v3088_v30 = vpop.f32.mrb[17].mxu1 }
 0x29c   : > { %v2106_v37 = vadd.f32 %v2977_v1, %v4511_v48  ;;  %v2980_v18 = vadd.f32 %v2979_v13, %v2978_v34  ;;  %v3089_v33 = vadd.f32 %v3088_v30, %v3087_v41  ;;  %v3090_v36 = vpop.f32.mrb[18].mxu1 }
 0x29d   : > { %v3091_v52 = vpop.f32.mrb[19].mxu1 }
 0x29e   : > { %v2109_v45 = vadd.f32 %v2980_v18, %v4511_v48  ;;  %v3092_v58 = vadd.f32 %v3091_v52, %v3090_v36  ;;  %v4539_v29 = vadd.f32 %v3089_v33, %v2106_v37 }
 0x2a0   : > { %v2981_v25 = vpop.f32.mrb[20].mxu0  ;;  %v4541_v38 = vadd.f32 %v3092_v58, %v2109_v45 }
 0x2a1   : > { %v2982_v51 = vpop.f32.mrb[21].mxu0 }
 0x2a2   : > { %v2983_v15 = vadd.f32 %v2982_v51, %v2981_v25  ;;  %v2984_v35 = vpop.f32.mrb[22].mxu0  ;;  %v3093_v32 = vpop.f32.mrb[20].mxu1 }
 0x2a3   : > { %v2985_v8 = vpop.f32.mrb[23].mxu0  ;;  %v3094_v27 = vpop.f32.mrb[21].mxu1 }
 0x2a4   : > { %v2114_v42 = vadd.f32 %v2983_v15, %v4511_v48  ;;  %v2986_v17 = vadd.f32 %v2985_v8, %v2984_v35  ;;  %v3095_v43 = vadd.f32 %v3094_v27, %v3093_v32  ;;  %v3096_v63 = vpop.f32.mrb[22].mxu1 }
 0x2a5   : > { %v3097_v60 = vpop.f32.mrb[23].mxu1 }
 0x2a6   : > { %v2117_v50 = vadd.f32 %v2986_v17, %v4511_v48  ;;  %v3098_v19 = vadd.f32 %v3097_v60, %v3096_v63  ;;  %v4545_v55 = vadd.f32 %v3095_v43, %v2114_v42 }
 0x2a8   : > { %v2987_v56 = vpop.f32.mrb[24].mxu0  ;;  %v4547_v7 = vadd.f32 %v3098_v19, %v2117_v50 }
 0x2a9   : > { %v2988_v0 = vpop.f32.mrb[25].mxu0 }
 0x2aa   : > { %v2989_v4 = vadd.f32 %v2988_v0, %v2987_v56  ;;  %v2990_v5 = vpop.f32.mrb[26].mxu0  ;;  %v3099_v28 = vpop.f32.mrb[24].mxu1 }
 0x2ab   : > { %v2991_v10 = vpop.f32.mrb[27].mxu0  ;;  %v3100_v14 = vpop.f32.mrb[25].mxu1 }
 0x2ac   : > { %v2122_v59 = vadd.f32 %v2989_v4, %v4511_v48  ;;  %v2992_v12 = vadd.f32 %v2991_v10, %v2990_v5  ;;  %v3101_v20 = vadd.f32 %v3100_v14, %v3099_v28  ;;  %v3102_v53 = vpop.f32.mrb[26].mxu1 }
 0x2ad   : > { %v3103_v31 = vpop.f32.mrb[27].mxu1 }
 0x2ae   : > { %v2125_v24 = vadd.f32 %v2992_v12, %v4511_v48  ;;  %v3104_v2 = vadd.f32 %v3103_v31, %v3102_v53  ;;  %v4551_v47 = vadd.f32 %v3101_v20, %v2122_v59 }
 0x2b0   : > { %v2993_v3 = vpop.f32.mrb[28].mxu0  ;;  %v4553_v49 = vadd.f32 %v3104_v2, %v2125_v24 }
 0x2b1   : > { %v2994_v44 = vpop.f32.mrb[29].mxu0 }
 0x2b2   : > { %v2995_v57 = vadd.f32 %v2994_v44, %v2993_v3  ;;  %v2996_v62 = vpop.f32.mrb[30].mxu0  ;;  %v3105_v6 = vpop.f32.mrb[28].mxu1 }
 0x2b3   : > { %v2997_v9 = vpop.f32.mrb[31].mxu0  ;;  %v3106_v61 = vpop.f32.mrb[29].mxu1 }
 0x2b4   : > { %v2130_v16 = vadd.f32 %v2995_v57, %v4511_v48  ;;  %v2998_v22 = vadd.f32 %v2997_v9, %v2996_v62  ;;  %v3107_v1 = vadd.f32 %v3106_v61, %v3105_v6  ;;  %v3108_v34 = vpop.f32.mrb[30].mxu1 }
 0x2b5   : > { %v3109_v13 = vpop.f32.mrb[31].mxu1 }
 0x2b6   : > { %v2133_v41 = vadd.f32 %v2998_v22, %v4511_v48  ;;  %v3110_v37 = vadd.f32 %v3109_v13, %v3108_v34  ;;  %v4557_v18 = vadd.f32 %v3107_v1, %v2130_v16 }
 0x2b8   : > { %v2999_v30 = vpop.f32.mrb[32].mxu0  ;;  %v4559_v36 = vadd.f32 %v3110_v37, %v2133_v41 }
 0x2b9   : > { %v3000_v33 = vpop.f32.mrb[33].mxu0 }
 0x2ba   : > { %v3001_v45 = vadd.f32 %v3000_v33, %v2999_v30  ;;  %v3002_v52 = vpop.f32.mrb[34].mxu0  ;;  %v3111_v58 = vpop.f32.mrb[32].mxu1 }
 0x2bb   : > { %v3003_v25 = vpop.f32.mrb[35].mxu0  ;;  %v3112_v35 = vpop.f32.mrb[33].mxu1 }
 0x2bc   : > { %v2138_v51 = vadd.f32 %v3001_v45, %v4511_v48  ;;  %v3004_v15 = vadd.f32 %v3003_v25, %v3002_v52  ;;  %v3113_v32 = vadd.f32 %v3112_v35, %v3111_v58  ;;  %v3114_v8 = vpop.f32.mrb[34].mxu1 }
 0x2bd   : > { %v3115_v17 = vpop.f32.mrb[35].mxu1 }
 0x2be   : > { %v2141_v42 = vadd.f32 %v3004_v15, %v4511_v48  ;;  %v3116_v27 = vadd.f32 %v3115_v17, %v3114_v8  ;;  %v4563_v43 = vadd.f32 %v3113_v32, %v2138_v51 }
 0x2c0   : > { %v3005_v63 = vpop.f32.mrb[36].mxu0  ;;  %v4565_v60 = vadd.f32 %v3116_v27, %v2141_v42 }
 0x2c1   : > { %v3006_v50 = vpop.f32.mrb[37].mxu0 }
 0x2c2   : > { %v3007_v19 = vadd.f32 %v3006_v50, %v3005_v63  ;;  %v3008_v56 = vpop.f32.mrb[38].mxu0  ;;  %v3117_v0 = vpop.f32.mrb[36].mxu1 }
 0x2c3   : > { %v3009_v4 = vpop.f32.mrb[39].mxu0  ;;  %v3118_v10 = vpop.f32.mrb[37].mxu1 }
 0x2c4   : > { %v2146_v5 = vadd.f32 %v3007_v19, %v4511_v48  ;;  %v3010_v28 = vadd.f32 %v3009_v4, %v3008_v56  ;;  %v3119_v59 = vadd.f32 %v3118_v10, %v3117_v0  ;;  %v3120_v12 = vpop.f32.mrb[38].mxu1 }
 0x2c5   : > { %v3121_v20 = vpop.f32.mrb[39].mxu1 }
 0x2c6   : > { %v2149_v14 = vadd.f32 %v3010_v28, %v4511_v48  ;;  %v3122_v53 = vadd.f32 %v3121_v20, %v3120_v12  ;;  %v4569_v24 = vadd.f32 %v3119_v59, %v2146_v5  ;;  %v4590_v59 = vld [vmem:[%s645_s30] sm:$0x1] }
 0x2c7   : > { %3211 = vmatprep.mubr.f32.mxu1 %v4590_v59 }
 0x2c8   : > { %v3011_v31 = vpop.f32.mrb[40].mxu0  ;;  %v4571_v3 = vadd.f32 %v3122_v53, %v2149_v14 }
 0x2c9   : > { %v3012_v2 = vpop.f32.mrb[41].mxu0 }
 0x2ca   : > { %v3013_v44 = vadd.f32 %v3012_v2, %v3011_v31  ;;  %v3014_v57 = vpop.f32.mrb[42].mxu0  ;;  %v3123_v62 = vpop.f32.mrb[40].mxu1 }
 0x2cb   : > { %v3015_v6 = vpop.f32.mrb[43].mxu0  ;;  %v3124_v22 = vpop.f32.mrb[41].mxu1 }
 0x2cc   : > { %v2154_v9 = vadd.f32 %v3013_v44, %v4511_v48  ;;  %v3016_v16 = vadd.f32 %v3015_v6, %v3014_v57  ;;  %v3125_v61 = vadd.f32 %v3124_v22, %v3123_v62  ;;  %v3126_v1 = vpop.f32.mrb[42].mxu1 }
 0x2cd   : > { %v3127_v41 = vpop.f32.mrb[43].mxu1 }
 0x2ce   : > { %v2157_v34 = vadd.f32 %v3016_v16, %v4511_v48  ;;  %v3128_v13 = vadd.f32 %v3127_v41, %v3126_v1  ;;  %v4575_v37 = vadd.f32 %v3125_v61, %v2154_v9 }
 0x2d0   : > { %v3017_v30 = vpop.f32.mrb[44].mxu0  ;;  %v4577_v45 = vadd.f32 %v3128_v13, %v2157_v34 }
 0x2d1   : > { %v3018_v33 = vpop.f32.mrb[45].mxu0 }
 0x2d2   : > { %v3019_v52 = vadd.f32 %v3018_v33, %v3017_v30  ;;  %v3020_v58 = vpop.f32.mrb[46].mxu0  ;;  %v3129_v25 = vpop.f32.mrb[44].mxu1 }
 0x2d3   : > { %v3021_v51 = vpop.f32.mrb[47].mxu0  ;;  %v3130_v32 = vpop.f32.mrb[45].mxu1 }
 0x2d4   : > { %v2162_v15 = vadd.f32 %v3019_v52, %v4511_v48  ;;  %v3022_v35 = vadd.f32 %v3021_v51, %v3020_v58  ;;  %v3131_v8 = vadd.f32 %v3130_v32, %v3129_v25  ;;  %v3132_v42 = vpop.f32.mrb[46].mxu1 }
 0x2d5   : > { %v3133_v27 = vpop.f32.mrb[47].mxu1 }
 0x2d6   : > { %v2165_v17 = vadd.f32 %v3022_v35, %v4511_v48  ;;  %v3134_v63 = vadd.f32 %v3133_v27, %v3132_v42  ;;  %v4581_v50 = vadd.f32 %v3131_v8, %v2162_v15 }
 0x2d8   : > { %v3023_v19 = vpop.f32.mrb[48].mxu0  ;;  %v4583_v0 = vadd.f32 %v3134_v63, %v2165_v17 }
 0x2d9   : > { %v3024_v56 = vpop.f32.mrb[49].mxu0 }
 0x2da   : > { %v3025_v4 = vadd.f32 %v3024_v56, %v3023_v19  ;;  %v3026_v5 = vpop.f32.mrb[50].mxu0  ;;  %v3135_v28 = vpop.f32.mrb[48].mxu1 }
 0x2db   : > { %v3027_v10 = vpop.f32.mrb[51].mxu0  ;;  %v3136_v20 = vpop.f32.mrb[49].mxu1 }
 0x2dc   : > { %v2170_v12 = vadd.f32 %v3025_v4, %v4511_v48  ;;  %v3028_v14 = vadd.f32 %v3027_v10, %v3026_v5  ;;  %v3137_v53 = vadd.f32 %v3136_v20, %v3135_v28  ;;  %v3138_v31 = vpop.f32.mrb[50].mxu1 }
 0x2dd   : > { %v3139_v44 = vpop.f32.mrb[51].mxu1 }
 0x2de   : > { %v2173_v2 = vadd.f32 %v3028_v14, %v4511_v48  ;;  %v3140_v57 = vadd.f32 %v3139_v44, %v3138_v31  ;;  %v4595_v62 = vadd.f32 %v3137_v53, %v2170_v12 }
 0x2e0   : > { %v3029_v6 = vpop.f32.mrb[52].mxu0  ;;  %v4597_v16 = vadd.f32 %v3140_v57, %v2173_v2 }
 0x2e1   : > { %v3030_v9 = vpop.f32.mrb[53].mxu0 }
 0x2e2   : > { %v3031_v22 = vadd.f32 %v3030_v9, %v3029_v6  ;;  %v3032_v61 = vpop.f32.mrb[54].mxu0  ;;  %v3141_v1 = vpop.f32.mrb[52].mxu1 }
 0x2e3   : > { %v3033_v34 = vpop.f32.mrb[55].mxu0  ;;  %v3142_v30 = vpop.f32.mrb[53].mxu1 }
 0x2e4   : > { %v2178_v41 = vadd.f32 %v3031_v22, %v4511_v48  ;;  %v3034_v13 = vadd.f32 %v3033_v34, %v3032_v61  ;;  %v3143_v33 = vadd.f32 %v3142_v30, %v3141_v1  ;;  %v3144_v52 = vpop.f32.mrb[54].mxu1 }
 0x2e5   : > { %v3145_v25 = vpop.f32.mrb[55].mxu1 }
 0x2e6   : > { %v2181_v58 = vadd.f32 %v3034_v13, %v4511_v48  ;;  %v3146_v51 = vadd.f32 %v3145_v25, %v3144_v52  ;;  %v4601_v15 = vadd.f32 %v3143_v33, %v2178_v41 }
 0x2e8   : > { %v3035_v35 = vpop.f32.mrb[56].mxu0  ;;  %v4603_v8 = vadd.f32 %v3146_v51, %v2181_v58 }
 0x2e9   : > { %v3036_v32 = vpop.f32.mrb[57].mxu0 }
 0x2ea   : > { %v3037_v42 = vadd.f32 %v3036_v32, %v3035_v35  ;;  %v3038_v17 = vpop.f32.mrb[58].mxu0  ;;  %v3147_v27 = vpop.f32.mrb[56].mxu1 }
 0x2eb   : > { %v3039_v63 = vpop.f32.mrb[59].mxu0  ;;  %v3148_v4 = vpop.f32.mrb[57].mxu1 }
 0x2ec   : > { %v2186_v19 = vadd.f32 %v3037_v42, %v4511_v48  ;;  %v3040_v56 = vadd.f32 %v3039_v63, %v3038_v17  ;;  %v3149_v5 = vadd.f32 %v3148_v4, %v3147_v27  ;;  %v3150_v28 = vpop.f32.mrb[58].mxu1 }
 0x2ed   : > { %v3151_v12 = vpop.f32.mrb[59].mxu1 }
 0x2ee   : > { %v2189_v10 = vadd.f32 %v3040_v56, %v4511_v48  ;;  %v3152_v14 = vadd.f32 %v3151_v12, %v3150_v28  ;;  %v4607_v20 = vadd.f32 %v3149_v5, %v2186_v19 }
 0x2f0   : > { %v3041_v53 = vpop.f32.mrb[60].mxu0  ;;  %v4609_v2 = vadd.f32 %v3152_v14, %v2189_v10 }
 0x2f1   : > { %v3042_v31 = vpop.f32.mrb[61].mxu0 }
 0x2f2   : > { %v3043_v44 = vadd.f32 %v3042_v31, %v3041_v53  ;;  %v3044_v57 = vpop.f32.mrb[62].mxu0  ;;  %v3153_v6 = vpop.f32.mrb[60].mxu1 }
 0x2f3   : > { %v3045_v9 = vpop.f32.mrb[63].mxu0  ;;  %v3154_v1 = vpop.f32.mrb[61].mxu1 }
 0x2f4   : > { %v2194_v22 = vadd.f32 %v3043_v44, %v4511_v48  ;;  %v3046_v61 = vadd.f32 %v3045_v9, %v3044_v57  ;;  %v3155_v34 = vadd.f32 %v3154_v1, %v3153_v6  ;;  %v3156_v41 = vpop.f32.mrb[62].mxu1 }
 0x2f5   : > { %v3157_v30 = vpop.f32.mrb[63].mxu1 }
 0x2f6   : > { %v2197_v13 = vadd.f32 %v3046_v61, %v4511_v48  ;;  %v3158_v33 = vadd.f32 %v3157_v30, %v3156_v41  ;;  %v4613_v52 = vadd.f32 %v3155_v34, %v2194_v22 }
 0x2f8   : > { %v3223_v58 = vpop.f32.mrb[64].mxu0  ;;  %v4616_v35 = vadd.f32 %v3158_v33, %v2197_v13 }
 0x2f9   : > { %v2404_v25 = vadd.f32 %v3223_v58, %v4521_v46  ;;  %v2395_v51 = vpop.f32.mrb[65].mxu0 }
 0x2fa   : > { %v2396_v32 = vadd.f32 %v2395_v51, %v4515_v11  ;;  %v3224_v42 = vpop.f32.mrb[66].mxu0 }
 0x2fb   : > { %2524 = vst [vmem:[%s3858_s12 + $0x10] sm:$0xff] %v2404_v25  ;;  %v2407_v17 = vadd.f32 %v3224_v42, %v4523_v54  ;;  %v2398_v27 = vpop.f32.mrb[67].mxu0  ;;  %v2556_v63 = vmax.f32 %v2404_v25, 0.0 }
 0x2fc   : > { %2522 = vst [vmem:[%s3858_s12] sm:$0xff] %v2396_v32  ;;  %v2399_v48 = vadd.f32 %v2398_v27, %v4517_v21  ;;  %v2554_v56 = vmax.f32 %v2396_v32, 0.0 }
 0x2fd   : > { %2525 = vst [vmem:[%s3858_s12 + $0x18] sm:$0xff] %v2407_v17  ;;  %v2557_v19 = vmax.f32 %v2407_v17, 0.0 }
 0x2fe   : > { %2523 = vst [vmem:[%s3858_s12 + $0x8] sm:$0xff] %v2399_v48  ;;  %v2555_v46 = vmax.f32 %v2399_v48, 0.0 }
 0x2ff   : > { %v4625_v4 = vpack.c.bf16 %v2557_v19, %v2556_v63 }
 0x300   : > { %v4627_v11 = vpack.c.bf16 %v2555_v46, %v2554_v56  ;;  %v3227_v5 = vpop.f32.mrb[68].mxu0 }
 0x301   : > { %v2420_v54 = vadd.f32 %v3227_v5, %v4533_v40  ;;  %v2411_v28 = vpop.f32.mrb[69].mxu0 }
 0x302   : > { %v2412_v10 = vadd.f32 %v2411_v28, %v4527_v23  ;;  %v3228_v21 = vpop.f32.mrb[70].mxu0 }
 0x303   : > { %2528 = vst [vmem:[%s3858_s12 + $0x30] sm:$0xff] %v2420_v54  ;;  %v2423_v12 = vadd.f32 %v3228_v21, %v4535_v26  ;;  %v2414_v14 = vpop.f32.mrb[71].mxu0  ;;  %v2560_v31 = vmax.f32 %v2420_v54, 0.0 }
 0x304   : > { %2526 = vst [vmem:[%s3858_s12 + $0x20] sm:$0xff] %v2412_v10  ;;  %v2415_v53 = vadd.f32 %v2414_v14, %v4529_v39  ;;  %v2558_v57 = vmax.f32 %v2412_v10, 0.0 }
 0x305   : > { %2529 = vst [vmem:[%s3858_s12 + $0x38] sm:$0xff] %v2423_v12  ;;  %v2561_v44 = vmax.f32 %v2423_v12, 0.0 }
 0x306   : > { %2527 = vst [vmem:[%s3858_s12 + $0x28] sm:$0xff] %v2415_v53  ;;  %v2559_v40 = vmax.f32 %v2415_v53, 0.0 }
 0x307   : > { %v4637_v6 = vpack.c.bf16 %v2561_v44, %v2560_v31 }
 0x308   : > { %v4639_v23 = vpack.c.bf16 %v2559_v40, %v2558_v57  ;;  %v3231_v9 = vpop.f32.mrb[72].mxu0 }
 0x309   : > { %v2436_v26 = vadd.f32 %v3231_v9, %v4545_v55  ;;  %v2427_v22 = vpop.f32.mrb[73].mxu0 }
 0x30a   : > { %v2428_v61 = vadd.f32 %v2427_v22, %v4539_v29  ;;  %v3232_v39 = vpop.f32.mrb[74].mxu0 }
 0x30b   : > { %2532 = vst [vmem:[%s3858_s12 + $0x50] sm:$0xff] %v2436_v26  ;;  %v2439_v1 = vadd.f32 %v3232_v39, %v4547_v7  ;;  %v2430_v34 = vpop.f32.mrb[75].mxu0  ;;  %v2564_v13 = vmax.f32 %v2436_v26, 0.0 }
 0x30c   : > { %2530 = vst [vmem:[%s3858_s12 + $0x40] sm:$0xff] %v2428_v61  ;;  %v2431_v41 = vadd.f32 %v2430_v34, %v4541_v38  ;;  %v2562_v33 = vmax.f32 %v2428_v61, 0.0 }
 0x30d   : > { %2533 = vst [vmem:[%s3858_s12 + $0x58] sm:$0xff] %v2439_v1  ;;  %v2565_v30 = vmax.f32 %v2439_v1, 0.0 }
 0x30e   : > { %2531 = vst [vmem:[%s3858_s12 + $0x48] sm:$0xff] %v2431_v41  ;;  %v2563_v55 = vmax.f32 %v2431_v41, 0.0 }
 0x30f   : > { %v4649_v58 = vpack.c.bf16 %v2565_v30, %v2564_v13 }
 0x310   : > { %v4651_v29 = vpack.c.bf16 %v2563_v55, %v2562_v33  ;;  %v3235_v25 = vpop.f32.mrb[76].mxu0 }
 0x311   : > { %v2452_v7 = vadd.f32 %v3235_v25, %v4557_v18  ;;  %v2443_v51 = vpop.f32.mrb[77].mxu0 }
 0x312   : > { %v2444_v32 = vadd.f32 %v2443_v51, %v4551_v47  ;;  %v3236_v38 = vpop.f32.mrb[78].mxu0 }
 0x313   : > { %2536 = vst [vmem:[%s3858_s12 + $0x70] sm:$0xff] %v2452_v7  ;;  %v2455_v42 = vadd.f32 %v3236_v38, %v4559_v36  ;;  %v2446_v17 = vpop.f32.mrb[79].mxu0  ;;  %v2568_v48 = vmax.f32 %v2452_v7, 0.0 }
 0x314   : > { %2534 = vst [vmem:[%s3858_s12 + $0x60] sm:$0xff] %v2444_v32  ;;  %v2447_v27 = vadd.f32 %v2446_v17, %v4553_v49  ;;  %v2566_v19 = vmax.f32 %v2444_v32, 0.0 }
 0x315   : > { %2537 = vst [vmem:[%s3858_s12 + $0x78] sm:$0xff] %v2455_v42  ;;  %v2569_v63 = vmax.f32 %v2455_v42, 0.0 }
 0x316   : > { %2535 = vst [vmem:[%s3858_s12 + $0x68] sm:$0xff] %v2447_v27  ;;  %v2567_v18 = vmax.f32 %v2447_v27, 0.0 }
 0x317   : > { %v4661_v56 = vpack.c.bf16 %v2569_v63, %v2568_v48 }
 0x318   : > { %v4663_v47 = vpack.c.bf16 %v2567_v18, %v2566_v19  ;;  %v3239_v46 = vpop.f32.mrb[80].mxu0 }
 0x319   : > { %v2468_v36 = vadd.f32 %v3239_v46, %v4569_v24  ;;  %v2459_v5 = vpop.f32.mrb[81].mxu0 }
 0x31a   : > { %v2460_v54 = vadd.f32 %v2459_v5, %v4563_v43  ;;  %v3240_v49 = vpop.f32.mrb[82].mxu0 }
 0x31b   : > { %2540 = vst [vmem:[%s3858_s12 + $0x90] sm:$0xff] %v2468_v36  ;;  %v2471_v28 = vadd.f32 %v3240_v49, %v4571_v3  ;;  %v2462_v10 = vpop.f32.mrb[83].mxu0  ;;  %v2572_v12 = vmax.f32 %v2468_v36, 0.0 }
 0x31c   : > { %2538 = vst [vmem:[%s3858_s12 + $0x80] sm:$0xff] %v2460_v54  ;;  %v2463_v21 = vadd.f32 %v2462_v10, %v4565_v60  ;;  %v2570_v53 = vmax.f32 %v2460_v54, 0.0  ;;  %v2586_v10 = vld [vmem:[#allocation4] sm:$0x3] }
 0x31d   : > { %2541 = vst [vmem:[%s3858_s12 + $0x98] sm:$0xff] %v2471_v28  ;;  %v2573_v14 = vmax.f32 %v2471_v28, 0.0 }
 0x31e   : > { %2539 = vst [vmem:[%s3858_s12 + $0x88] sm:$0xff] %v2463_v21  ;;  %v2571_v31 = vmax.f32 %v2463_v21, 0.0 }
 0x31f   : > { %v3257_v24 = vpack.c.bf16 %v2573_v14, %v2572_v12 }
 0x320   : > { %v3243_v44 = vpop.f32.mrb[84].mxu0  ;;  %v3253_v43 = vpack.c.bf16 %v2571_v31, %v2570_v53 }
 0x321   : > { %v2484_v57 = vadd.f32 %v3243_v44, %v4581_v50  ;;  %v2475_v3 = vpop.f32.mrb[85].mxu0 }
 0x322   : > { %v2476_v40 = vadd.f32 %v2475_v3, %v4575_v37  ;;  %v3244_v9 = vpop.f32.mrb[86].mxu0  ;;  %3254 = vmatprep.subr.bf16.mxu1 %v3253_v43 }
 0x323   : > { %2544 = vst [vmem:[%s3858_s12 + $0xb0] sm:$0xff] %v2484_v57  ;;  %v2487_v60 = vadd.f32 %v3244_v9, %v4583_v0  ;;  %v2478_v26 = vpop.f32.mrb[87].mxu0  ;;  %3256 = vmatpush3.bf16.xpose.msra.mxu1 %v4627_v11  ;;  %v2576_v61 = vmax.f32 %v2484_v57, 0.0 }
 0x324   : > { %2542 = vst [vmem:[%s3858_s12 + $0xa0] sm:$0xff] %v2476_v40  ;;  %v2479_v22 = vadd.f32 %v2478_v26, %v4577_v45  ;;  %3258 = vmatprep.subr.bf16.mxu1 %v3257_v24  ;;  %v2574_v39 = vmax.f32 %v2476_v40, 0.0 }
 0x325   : > { %2545 = vst [vmem:[%s3858_s12 + $0xb8] sm:$0xff] %v2487_v60  ;;  %v2577_v50 = vmax.f32 %v2487_v60, 0.0 }
 0x326   : > { %2543 = vst [vmem:[%s3858_s12 + $0xa8] sm:$0xff] %v2479_v22  ;;  %v2575_v37 = vmax.f32 %v2479_v22, 0.0 }
 0x327   : > { %v3265_v1 = vpack.c.bf16 %v2577_v50, %v2576_v61 }
 0x328   : > { %v3247_v34 = vpop.f32.mrb[88].mxu0  ;;  %v3261_v41 = vpack.c.bf16 %v2575_v37, %v2574_v39 }
 0x329   : > { %v2500_v0 = vadd.f32 %v3247_v34, %v4601_v15  ;;  %v2491_v11 = vpop.f32.mrb[89].mxu0 }
 0x32a   : > { %v2492_v13 = vadd.f32 %v2491_v11, %v4595_v62  ;;  %v3248_v30 = vpop.f32.mrb[90].mxu0 }
 0x32b   : > { %2548 = vst [vmem:[%s3858_s12 + $0xd0] sm:$0xff] %v2500_v0  ;;  %v2503_v45 = vadd.f32 %v3248_v30, %v4603_v8  ;;  %v2494_v33 = vpop.f32.mrb[91].mxu0  ;;  %3260 = vmatpush3.bf16.xpose.msra.mxu1 %v4625_v4  ;;  %v2580_v25 = vmax.f32 %v2500_v0, 0.0 }
 0x32c   : > { %2546 = vst [vmem:[%s3858_s12 + $0xc0] sm:$0xff] %v2492_v13  ;;  %v2495_v55 = vadd.f32 %v2494_v33, %v4597_v16  ;;  %3262 = vmatprep.subr.bf16.mxu1 %v3261_v41  ;;  %v2578_v15 = vmax.f32 %v2492_v13, 0.0 }
 0x32d   : > { %2549 = vst [vmem:[%s3858_s12 + $0xd8] sm:$0xff] %v2503_v45  ;;  %v2581_v7 = vmax.f32 %v2503_v45, 0.0 }
 0x32e   : > { %2547 = vst [vmem:[%s3858_s12 + $0xc8] sm:$0xff] %v2495_v55  ;;  %v2579_v51 = vmax.f32 %v2495_v55, 0.0 }
 0x32f   : > { %v3273_v62 = vpack.c.bf16 %v2581_v7, %v2580_v25 }
 0x330   : > { %v3251_v32 = vpop.f32.mrb[92].mxu0  ;;  %v3269_v38 = vpack.c.bf16 %v2579_v51, %v2578_v15 }
 0x331   : > { %v2516_v8 = vadd.f32 %v3251_v32, %v4613_v52  ;;  %v2507_v4 = vpop.f32.mrb[93].mxu0 }
 0x332   : > { %v2508_v42 = vadd.f32 %v2507_v4, %v4607_v20  ;;  %v3252_v17 = vpop.f32.mrb[94].mxu0  ;;  %v3536_v20 = vmov 1966171168  }
 0x333   : > { %2552 = vst [vmem:[%s3858_s12 + $0xf0] sm:$0xff] %v2516_v8  ;;  %v2519_v16 = vadd.f32 %v3252_v17, %v4616_v35  ;;  %v2510_v27 = vpop.f32.mrb[95].mxu0  ;;  %3264 = vmatpush3.bf16.xpose.msra.mxu1 %v4639_v23  ;;  %v2584_v63 = vmax.f32 %v2516_v8, 0.0  ;;  %v2665_v35 = vlaneseq }
 0x334   : > { %2550 = vst [vmem:[%s3858_s12 + $0xe0] sm:$0xff] %v2508_v42  ;;  %v2511_v48 = vadd.f32 %v2510_v27, %v4609_v2  ;;  %3266 = vmatprep.subr.bf16.mxu1 %v3265_v1  ;;  %v2582_v18 = vmax.f32 %v2508_v42, 0.0  ;;  %v2663_v2 = vunpack.c.l.s4 %v3536_v20 }
 0x335   : > { %2553 = vst [vmem:[%s3858_s12 + $0xf8] sm:$0xff] %v2519_v16  ;;  %v2585_v19 = vmax.f32 %v2519_v16, 0.0  ;;  %v2666_v5 = vshrl.u32 %v2665_v35, 7  ;;  %vm4706_vm5 = vcmp.lt.s32.totalorder %v2665_v35, 256 }
 0x336   : > { %2551 = vst [vmem:[%s3858_s12 + $0xe8] sm:$0xff] %v2511_v48  ;;  %v2583_v52 = vmax.f32 %v2511_v48, 0.0  ;;  %v2664_v23 = vunpack.c.0.s8 %v2663_v2 }
 0x337   : > { %v3281_v46 = vpack.c.bf16 %v2585_v19, %v2584_v63  ;;  %v2696_v12 = vsub.s32 (!%p2927_p6), 0, %v2666_v5 }
 0x338   : > { %v3277_v36 = vpack.c.bf16 %v2583_v52, %v2582_v18  ;;  %v2667_v54 = vsub.s32 %v2664_v23, %v2666_v5 }
 0x33b   : > { %3268 = vmatpush3.bf16.xpose.msra.mxu1 %v4637_v6 }
 0x33c   : > { %3270 = vmatprep.subr.bf16.mxu1 %v3269_v38 }
 0x343   : > { %3272 = vmatpush3.bf16.xpose.msra.mxu1 %v4651_v29 }
 0x344   : > { %3274 = vmatprep.subr.bf16.mxu1 %v3273_v62 }
 0x34b   : > { %3276 = vmatpush3.bf16.xpose.msra.mxu1 %v4649_v58 }
 0x34c   : > { %3278 = vmatprep.subr.bf16.mxu1 %v3277_v36 }
 0x353   : > { %3280 = vmatpush3.bf16.xpose.msra.mxu1 %v4663_v47 }
 0x354   : > { %3282 = vmatprep.subr.bf16.mxu1 %v3281_v46 }
 0x35b   : > { %3284 = vmatpush3.bf16.xpose.msra.mxu1 %v4661_v56  ;;  %v3537_v56 = vmov (!%p2927_p6), 0  }
 0x35c   : > { %3417 = vset.pattern.permute.xlu0 (!%p2927_p6), %v3537_v56 }
 0x362   : > { %3212 = vmatmul.mubr.f32.vlgmr.msra.gmra.mrb[64].mxu1 %v4590_v59  ;;  %v2688_v59 = vld [vmem:[#allocation5] sm:$0x1] (!%p2927_p6) }
 0x363   : > { %2691 = vperm.xlu0 (!%p2927_p6), %3417, %v2688_v59  }
 0x3e2   : > { %v2692_v14 = vpop.permute.xlu0 (!%p2927_p6), %2691 }
 0x3e3   : > { %v2697_v31 = vrot.slane (!%p2927_p6), %v2692_v14, %v2696_v12 }
 0x435   : > { %v2654_v6 = vpop.f32.mrb[64].mxu1 }
 0x436   : > { %v2656_v49 = vpop.f32.mrb[65].mxu1 }
 0x437   : > { %v2661_v29 = vcombine.low %v2654_v6, %v2656_v49 }
 0x439   : > { %v2668_v28 = vrot.slane %v2661_v29, %v2667_v54  ;;  %2686 = sbr.rel (%p2927_p6) target bundleno = 1124 (0x464), region = 89 }
 0x43b   : > { %v2675_v58 = vrot.slane %v2668_v28, %v2667_v54 }
 0x43d   : > { %v2677_v47 = vadd.f32 %v2675_v58, %v2586_v10 }
 0x43f   : > { %2682 = vst.msk [vmem:[#allocation4] sm:$0x3] %vm4706_vm5, %v2677_v47 }
 0x446   : > { %v2687_v53 = vld [vmem:[#allocation4] sm:$0x3] }
 0x447   : > { %v2698_v24 = vadd.f32 %v2697_v31, %v2687_v53 }
 0x449   : > { %v2928_v44 = vmul.f32 -1.442695, %v2698_v24 }
 0x44b   : > { %3418 = vpow2.f32 %v2928_v44 }
 0x455   : > { %v3419_v43 = vpop.eup %3418 }
 0x456   : > { %v2702_v57 = vadd.f32 1.0, %v3419_v43 }
 0x458   : > { %3420 = vrcp.f32 %v2702_v57 }
 0x462   : > { %v3421_v3 = vpop.eup %3420 }
 0x463   : > { %2705 = vst.msk [vmem:[%s3854_s20] sm:$0x3] %vm4706_vm5, %v3421_v3 }
 0x464 PF: > { %s2930_s30 = sshll.u32 %s3520_s29, 7  ;;  %s2725_s16 = sshll.u32 %s3858_s12, 4  ;;  %s4719_s16 = int_to_ptr.vmem [resolvable:$true] %s2725_s16 }
 0x465   : > { %s2722_s11 = sadd.s32 %s3516_s28, %s2930_s30  ;;  %s4815_s20 = sand.u32 1, %s3500_s24  }
 0x466   : > { %s2931_s18 = sshll.u32 %s2722_s11, 7  ;;  %s4728_s17 = scalar_lea.sflag [#allocation8], %s4815_s20 }
 0x467   : > { %s4724_s13 = scalar_lea.hbm %s4791_s5, %s2931_s18  ;;  %s3422_s9 = scalar_lea.vmem %s4719_s16, 4096 }
 0x468   : > { %p3423_p7 = scmp.ne.s32.totalorder %s4719_s16, %s3422_s9  ;;  %s3538_s28 = smov [#allocation7]  }
 0x469   : > { %s3426_s29 = sshll.u32 %s3538_s28, 4  ;;  %s3427_s29 = int_to_ptr.vmem [resolvable:$false] %s3426_s29 }
 0x46a   : > { %p3424_p8 = pnand %p3423_p7, %p3659_p10  ;;  %s3428_s14 = scalar_lea.vmem %s3427_s29, 8192 }
 0x46b   : > { %p3429_p11 = scmp.lt.s32.totalorder %s4719_s16, %s3427_s29  ;;  %p3430_p13 = scmp.lt.s32.totalorder %s3428_s14, %s3422_s9 }
 0x46c   : > { %p3425_p9 = pneg %p3424_p8 }
 0x46d   : > { %p3431_p0 = por %p3430_p13, %p3429_p11 }
 0x46f   : > { %p3432_p1 = pnand %p3431_p0, %p3425_p9 }
 0x471   : > { %3435 = shalt.err (!%p3432_p1)
}
 0x472   : > { %s3436_s26 = scalar_lea.hbm %s4724_s13, 4096  ;;  %s3440_s1 = scalar_lea.hbm %s4791_s5, 32768 }
 0x473   : > { %p3437_p2 = scmp.ne.s32.totalorder %s4724_s13, %s3436_s26  ;;  %p3441_p5 = scmp.lt.u32.totalorder %s4724_s13, %s4791_s5 }
 0x474   : > { %p3442_p6 = scmp.lt.u32.totalorder %s3440_s1, %s3436_s26  ;;  %p3444_p8 = scmp.lt.u32.totalorder %s3436_s26, %s4724_s13 }
 0x475   : > { %p3438_p3 = pnand %p3437_p2, %p3659_p10 }
 0x476   : > { %p3443_p7 = por %p3442_p6, %p3441_p5 }
 0x477   : > { %p3439_p4 = pneg %p3438_p3 }
 0x478   : > { %p3445_p9 = por %p3444_p8, %p3443_p7 }
 0x47a   : > { %p3446_p11 = pnand %p3445_p9, %p3439_p4 }
 0x47c   : > { %3449 = shalt.err (!%p3446_p11)
}
 0x47d   : > { %s3539_s4 = smov 128   ;;  %s3540_s10 = smov 512  }
 0x47e   : > { %s3541_s30 = smov 8  }
 0x47f   : > { %3287 = dma.vmem_to_hbm [thread:$0]  (%p3659_p10), %s4719_s16, 4096, %s4724_s13, %s4728_s17, %s3539_s4, %s3540_s10, %s3541_s30  }
 0x480 PF: > { %p3293_p13 = scmp.ge.s32.totalorder %s3532_s7, 2  ;;  %s2743_s11 = sand.u32 1, %s3496_s23  }
 0x481   : > { %s2744_s18 = scalar_lea.sflag [#allocation8], %s2743_s11 }
 0x482   : > { %p3290_p0 = pnand %p3293_p13, %p3666_p12 }
 0x484   : > { %3491 = dma.done.wait (!%p3290_p0), %s2744_s18, 4096  }
 0x485   : > { %3493 = vsyncadd (!%p3290_p0), %s2744_s18, 4294963200  ;;  %s22_s7 = sadd.s32 1, %s3532_s7   ;;  %s4816_s22 = sld [smem:[#allocation10_spill]] }
 0x486   : > { %p19_p1 = scmp.ge.s32.totalorder %s22_s7, 10   ;;  %s4817_s25 = sld [smem:[#allocation17_spill]] }
 0x487   : > { %s4818_s26 = sld [smem:[#allocation11_spill]]  ;;  %s4819_s27 = sld [smem:[#allocation16_spill]] }
 0x488   : > { %s4820_s28 = sld [smem:[#allocation12_spill]]  ;;  %s4821_s29 = sld [smem:[#allocation13_spill]] }
 0x489   : > { %s4822_s30 = sld [smem:[#allocation14_spill]]  ;;  %s4823_s4 = sld [smem:[#allocation15_spill]] }
 0x48a   : > { %s4824_s23 = smov %s3500_s24  ;;  %21 = sbr.rel (!%p19_p1) target bundleno = 9 (0x9), region = 152 }
 0x48b   : > { %s4825_s24 = smov %s4816_s22 }
 0x491   :  { %2756 = vsyncpa [#allocation8], 1 }
 0x492   :  { %2758 = vsyncpa [#allocation8 + $0x1], 1 }

</bundles_post_ra>
